<compile_context>
chip_gen: v5e
topology: v5e:2x2
jax: 0.10.0
libtpu: 0.0.40
codegen_flags: <defaults>
</compile_context>

<pallas_src>
import functools

import jax
import jax.numpy as jnp
from jax.experimental import pallas as pl
from jax.experimental.pallas import tpu as pltpu

WAV_DIM = 768                    # WavLM latent feature dim (wav5)
SPEC_DIM = 512                   # ResNet latent feature dim (spec5)
FINAL_DIM = WAV_DIM + SPEC_DIM   # 1280
HID = 512                        # hidden dim of cls1D / cls2D
LOGIT_LANES = 128                # lane-padded logit slab width
EPS = 1e-9


def _round_up(x, m):
    return (x + m - 1) // m * m


def _head_kernel(wav_ref, spec_ref,
                 w1a_ref, b1a_ref, w1b_ref,          # cls1D
                 w2a_ref, b2a_ref, w2b_ref,          # cls2D
                 wfaw_ref, wfas_ref, bfa_ref, wfb_ref,  # cls_final (wfa split)
                 bsc_ref,                            # SMEM: [b1b, b2b, bfb]
                 f1d_ref, f2d_ref, f_ref, lg_ref):
    wav = wav_ref[...]      # (TB, 768) f32
    spec = spec_ref[...]    # (TB, 512) f32

    # norm_feat: feat / (1e-9 + ||feat||_2)   (torch.norm p=2, dim=-1, keepdim)
    wav_sq = jnp.sum(wav * wav, axis=-1, keepdims=True)
    spec_sq = jnp.sum(spec * spec, axis=-1, keepdims=True)
    inv1 = pl.reciprocal(EPS + jnp.sqrt(wav_sq), approx=True)            # EUP
    inv2 = pl.reciprocal(EPS + jnp.sqrt(spec_sq), approx=True)
    invc = pl.reciprocal(EPS + jnp.sqrt(wav_sq + spec_sq), approx=True)

    f1 = wav * inv1                 # feature1D
    f2 = spec * inv2                # feature2D
    f_wav = wav * invc              # first 768 cols of 'feature'
    f_spec = spec * invc            # last 512 cols of 'feature'

    f1d_ref[...] = f1
    f2d_ref[...] = f2
    f_ref[:, :WAV_DIM] = f_wav      # lane offsets are multiples of 128
    f_ref[:, WAV_DIM:] = f_spec

    # First (wide) layers on the MXU: bf16 weights, f32 accumulation.
    h1 = jnp.dot(f1.astype(jnp.bfloat16), w1a_ref[...],
                 preferred_element_type=jnp.float32) + b1a_ref[...]
    h1 = jnp.maximum(h1, 0.0)
    h2 = jnp.dot(f2.astype(jnp.bfloat16), w2a_ref[...],
                 preferred_element_type=jnp.float32) + b2a_ref[...]
    h2 = jnp.maximum(h2, 0.0)
    hf = (jnp.dot(f_wav.astype(jnp.bfloat16), wfaw_ref[...],
                  preferred_element_type=jnp.float32)
          + jnp.dot(f_spec.astype(jnp.bfloat16), wfas_ref[...],
                    preferred_element_type=jnp.float32)
          + bfa_ref[...])
    hf = jnp.maximum(hf, 0.0)
    # Dropout(0.1) is identity in eval (stage='test').

    # Second layers (out_features == 1): VPU multiply + lane reduction instead
    # of an N=1 MXU matmul; scalar biases come from SMEM.
    l1 = jnp.sum(h1 * w1b_ref[...], axis=-1, keepdims=True) + bsc_ref[0]
    l2 = jnp.sum(h2 * w2b_ref[...], axis=-1, keepdims=True) + bsc_ref[1]
    lf = jnp.sum(hf * wfb_ref[...], axis=-1, keepdims=True) + bsc_ref[2]

    # Pack the three logits into one lane-dense slab (cols 0,1,2; rest zero).
    lane = jax.lax.broadcasted_iota(jnp.int32, lg_ref.shape, 1)
    slab = jnp.where(lane == 0, l1, 0.0)
    slab = jnp.where(lane == 1, l2, slab)
    lg_ref[...] = jnp.where(lane == 2, lf, slab)


def multiview_head(wav5, spec5, params):
    """Pallas-fused head of MultiViewModel.forward (everything post-backbone)."""
    B = wav5.shape[0]
    TB = min(256, _round_up(B, 8))          # batch tile (multiple of 8 sublanes)
    Bp = _round_up(B, TB)
    if Bp != B:
        pad = Bp - B
        wav5 = jnp.pad(wav5, ((0, pad), (0, 0)))
        spec5 = jnp.pad(spec5, ((0, pad), (0, 0)))
    grid = (Bp // TB,)

    # Kernel-ready parameter layout (casts are no-ops if init_params was used).
    w1a = params["w1a"].astype(jnp.bfloat16)          # (768, 512)
    w2a = params["w2a"].astype(jnp.bfloat16)          # (512, 512)
    wfa_w = params["wfa_w"].astype(jnp.bfloat16)      # (768, 1280)
    wfa_s = params["wfa_s"].astype(jnp.bfloat16)      # (512, 1280)
    b1a = params["b1a"].astype(jnp.float32)           # (1, 512)
    b2a = params["b2a"].astype(jnp.float32)           # (1, 512)
    bfa = params["bfa"].astype(jnp.float32)           # (1, 1280)
    w1b = params["w1b"].astype(jnp.float32)           # (1, 512) row
    w2b = params["w2b"].astype(jnp.float32)           # (1, 512) row
    wfb = params["wfb"].astype(jnp.float32)           # (1, 1280) row
    b_out = params["b_out"].astype(jnp.float32)       # (3,)  [b1b, b2b, bfb]

    def act_spec(d):
        return pl.BlockSpec((TB, d), lambda i: (i, 0))

    def w_spec(shape):
        return pl.BlockSpec(shape, lambda i: (0, 0))   # resident across tiles

    in_specs = [
        act_spec(WAV_DIM), act_spec(SPEC_DIM),
        w_spec(w1a.shape), w_spec(b1a.shape), w_spec(w1b.shape),
        w_spec(w2a.shape), w_spec(b2a.shape), w_spec(w2b.shape),
        w_spec(wfa_w.shape), w_spec(wfa_s.shape), w_spec(bfa.shape),
        w_spec(wfb.shape),
        pl.BlockSpec(memory_space=pltpu.SMEM),         # scalar biases
    ]
    out_shapes = (
        jax.ShapeDtypeStruct((Bp, WAV_DIM), jnp.float32),     # feature1D
        jax.ShapeDtypeStruct((Bp, SPEC_DIM), jnp.float32),    # feature2D
        jax.ShapeDtypeStruct((Bp, FINAL_DIM), jnp.float32),   # feature
        jax.ShapeDtypeStruct((Bp, LOGIT_LANES), jnp.float32), # packed logits
    )
    out_specs = (
        act_spec(WAV_DIM), act_spec(SPEC_DIM), act_spec(FINAL_DIM),
        act_spec(LOGIT_LANES),
    )

    mm_flops = WAV_DIM * HID + SPEC_DIM * HID + FINAL_DIM * FINAL_DIM
    w_bytes = 2 * mm_flops + 4 * (2 * HID + FINAL_DIM) * 2 + 4 * 3
    act_bytes = 4 * Bp * (WAV_DIM + SPEC_DIM) \
        + 4 * Bp * (WAV_DIM + SPEC_DIM + FINAL_DIM + LOGIT_LANES)
    cost = pl.CostEstimate(
        flops=int(2 * Bp * mm_flops + 2 * Bp * (2 * HID + FINAL_DIM)),
        transcendentals=int(6 * Bp),
        bytes_accessed=int(w_bytes + act_bytes),
    )

    f1d, f2d, feat, lg = pl.pallas_call(
        _head_kernel,
        out_shape=out_shapes,
        grid=grid,
        in_specs=in_specs,
        out_specs=out_specs,
        compiler_params=pltpu.CompilerParams(
            dimension_semantics=("parallel",),
            vmem_limit_bytes=32 << 20,
        ),
        cost_estimate=cost,
    )(wav5, spec5,
      w1a, b1a, w1b,
      w2a, b2a, w2b,
      wfa_w, wfa_s, bfa, wfb,
      b_out)

    return {
        "feature1D": f1d[:B],
        "feature2D": f2d[:B],
        "feature": feat[:B],
        "logit1D": lg[:B, 0],      # .squeeze(-1) as in the torch forward
        "logit2D": lg[:B, 1],
        "logit": lg[:B, 2],
    }


def _linear_params(key, fan_in, fan_out):
    # deterministic stand-in for torch.nn.Linear init (kaiming-uniform-like)
    kw, kb = jax.random.split(key)
    bound = 1.0 / jnp.sqrt(jnp.float32(fan_in))
    w = jax.random.uniform(kw, (fan_in, fan_out), jnp.float32, -bound, bound)
    b = jax.random.uniform(kb, (1, fan_out), jnp.float32, -bound, bound)
    return w, b


def init_params(key):
    """Kernel-ready parameters (big matrices pre-cast to bf16, wfa pre-split,
    second-layer weights as lane rows, scalar biases packed for SMEM)."""
    ks = jax.random.split(key, 6)
    # cls1D: Linear(768,512) -> ReLU -> Dropout -> Linear(512,1)
    w1a, b1a = _linear_params(ks[0], WAV_DIM, HID)
    w1b, b1b = _linear_params(ks[1], HID, 1)
    # cls2D: Linear(512,512) -> ReLU -> Dropout -> Linear(512,1)
    w2a, b2a = _linear_params(ks[2], SPEC_DIM, HID)
    w2b, b2b = _linear_params(ks[3], HID, 1)
    # cls_final: Linear(1280,1280) -> ReLU -> Dropout -> Linear(1280,1)
    wfa, bfa = _linear_params(ks[4], FINAL_DIM, FINAL_DIM)
    wfb, bfb = _linear_params(ks[5], FINAL_DIM, 1)
    return {
        "w1a": w1a.astype(jnp.bfloat16), "b1a": b1a,
        "w1b": w1b.reshape(1, HID),
        "w2a": w2a.astype(jnp.bfloat16), "b2a": b2a,
        "w2b": w2b.reshape(1, HID),
        "wfa_w": wfa[:WAV_DIM].astype(jnp.bfloat16),
        "wfa_s": wfa[WAV_DIM:].astype(jnp.bfloat16),
        "bfa": bfa,
        "wfb": wfb.reshape(1, FINAL_DIM),
        "b_out": jnp.concatenate([b1b[0], b2b[0], bfb[0]]),   # (3,)
    }


@functools.partial(jax.jit, static_argnames=())
def multiview_forward(x, params, backbone):
    # TODO(synk): ResNet / WavLM_1D / Squeeze / Expand backbones are external
    # modules not defined in the reference file; replaced with deterministic
    # stand-in projections producing wav5 (B,768) and spec5 (B,512).
    wav5 = jnp.tanh(x @ backbone["proj_wav"])      # stand-in for WavLM pipeline
    spec5 = jnp.tanh(x @ backbone["proj_spec"])    # stand-in for ResNet pipeline
    return multiview_head(wav5, spec5, params)


if __name__ == "__main__":
    key = jax.random.PRNGKey(0)
    k_x, k_p, k_bw, k_bs = jax.random.split(key, 4)

    B, SAMPLES = 2, 4096                      # small synthetic waveform batch
    x = jax.random.normal(k_x, (B, SAMPLES), jnp.float32)

    params = init_params(k_p)
    backbone = {
        "proj_wav": jax.random.normal(k_bw, (SAMPLES, WAV_DIM), jnp.float32) * 0.02,
        "proj_spec": jax.random.normal(k_bs, (SAMPLES, SPEC_DIM), jnp.float32) * 0.02,
    }

    res = multiview_forward(x, params, backbone)
    jax.block_until_ready(res)

    # light sanity checks (shapes, finiteness, L2-normalisation)
    assert res["feature1D"].shape == (B, WAV_DIM)
    assert res["feature2D"].shape == (B, SPEC_DIM)
    assert res["feature"].shape == (B, FINAL_DIM)
    assert res["logit1D"].shape == (B,)
    assert res["logit2D"].shape == (B,)
    assert res["logit"].shape == (B,)
    assert bool(jnp.all(jnp.isfinite(res["logit"])))
    norms = jnp.linalg.norm(res["feature"], axis=-1)
    assert bool(jnp.all(jnp.abs(norms - 1.0) < 1e-2))
    print("KERNEL_OK")
</pallas_src>

<mosaic_0001>
module attributes {stable_mosaic.version = 11 : i64} {
  func.func @_head_kernel(%arg0: i32, %arg1: memref<8x768xf32, #tpu.memory_space<vmem>>, %arg2: memref<8x512xf32, #tpu.memory_space<vmem>>, %arg3: memref<768x512xbf16, #tpu.memory_space<vmem>>, %arg4: memref<1x512xf32, #tpu.memory_space<vmem>>, %arg5: memref<1x512xf32, #tpu.memory_space<vmem>>, %arg6: memref<512x512xbf16, #tpu.memory_space<vmem>>, %arg7: memref<1x512xf32, #tpu.memory_space<vmem>>, %arg8: memref<1x512xf32, #tpu.memory_space<vmem>>, %arg9: memref<768x1280xbf16, #tpu.memory_space<vmem>>, %arg10: memref<512x1280xbf16, #tpu.memory_space<vmem>>, %arg11: memref<1x1280xf32, #tpu.memory_space<vmem>>, %arg12: memref<1x1280xf32, #tpu.memory_space<vmem>>, %arg13: memref<3xf32, #tpu.memory_space<smem>>, %arg14: memref<8x768xf32, #tpu.memory_space<vmem>>, %arg15: memref<8x512xf32, #tpu.memory_space<vmem>>, %arg16: memref<8x1280xf32, #tpu.memory_space<vmem>>, %arg17: memref<8x128xf32, #tpu.memory_space<vmem>>) attributes {dimension_semantics = [#tpu.dimension_semantics<parallel>], iteration_bounds = array<i64: 1>, scalar_prefetch = 0 : i64, scratch_operands = 0 : i64, tpu.core_type = #tpu.core_type<tc>, window_params = [{transform_indices = @transform_0, window_bounds = array<i64: 8, 768>}, {transform_indices = @transform_1, window_bounds = array<i64: 8, 512>}, {pipeline_mode = #tpu.pipeline_mode<synchronous>, transform_indices = @transform_2, window_bounds = array<i64: 768, 512>}, {pipeline_mode = #tpu.pipeline_mode<synchronous>, transform_indices = @transform_3, window_bounds = array<i64: 1, 512>}, {pipeline_mode = #tpu.pipeline_mode<synchronous>, transform_indices = @transform_4, window_bounds = array<i64: 1, 512>}, {pipeline_mode = #tpu.pipeline_mode<synchronous>, transform_indices = @transform_5, window_bounds = array<i64: 512, 512>}, {pipeline_mode = #tpu.pipeline_mode<synchronous>, transform_indices = @transform_6, window_bounds = array<i64: 1, 512>}, {pipeline_mode = #tpu.pipeline_mode<synchronous>, transform_indices = @transform_7, window_bounds = array<i64: 1, 512>}, {pipeline_mode = #tpu.pipeline_mode<synchronous>, transform_indices = @transform_8, window_bounds = array<i64: 768, 1280>}, {pipeline_mode = #tpu.pipeline_mode<synchronous>, transform_indices = @transform_9, window_bounds = array<i64: 512, 1280>}, {pipeline_mode = #tpu.pipeline_mode<synchronous>, transform_indices = @transform_10, window_bounds = array<i64: 1, 1280>}, {pipeline_mode = #tpu.pipeline_mode<synchronous>, transform_indices = @transform_11, window_bounds = array<i64: 1, 1280>}, {transform_indices = @transform_12, window_bounds = array<i64: 3>}, {transform_indices = @transform_13, window_bounds = array<i64: 8, 768>}, {transform_indices = @transform_14, window_bounds = array<i64: 8, 512>}, {transform_indices = @transform_15, window_bounds = array<i64: 8, 1280>}, {transform_indices = @transform_16, window_bounds = array<i64: 8, 128>}]} {
    %c0 = arith.constant 0 : index
    %c0_0 = arith.constant 0 : index
    %0 = vector.load %arg1[%c0, %c0_0] : memref<8x768xf32, #tpu.memory_space<vmem>>, vector<8x768xf32>
    %c0_1 = arith.constant 0 : index
    %c0_2 = arith.constant 0 : index
    %1 = vector.load %arg2[%c0_1, %c0_2] : memref<8x512xf32, #tpu.memory_space<vmem>>, vector<8x512xf32>
    %2 = arith.mulf %0, %0 : vector<8x768xf32>
    %cst = arith.constant dense<0.000000e+00> : vector<8xf32>
    %3 = vector.multi_reduction <add>, %2, %cst [1] : vector<8x768xf32> to vector<8xf32>
    %4 = vector.shape_cast %3 : vector<8xf32> to vector<8x1xf32>
    %5 = arith.mulf %1, %1 : vector<8x512xf32>
    %cst_3 = arith.constant dense<0.000000e+00> : vector<8xf32>
    %6 = vector.multi_reduction <add>, %5, %cst_3 [1] : vector<8x512xf32> to vector<8xf32>
    %7 = vector.shape_cast %6 : vector<8xf32> to vector<8x1xf32>
    %8 = math.sqrt %4 : vector<8x1xf32>
    %cst_4 = arith.constant 9.99999971E-10 : f32
    %9 = vector.broadcast %cst_4 : f32 to vector<8x1xf32>
    %10 = arith.addf %9, %8 : vector<8x1xf32>
    %11 = tpu.reciprocal %10 {approx = true} : vector<8x1xf32> -> vector<8x1xf32>
    %12 = math.sqrt %7 : vector<8x1xf32>
    %cst_5 = arith.constant 9.99999971E-10 : f32
    %13 = vector.broadcast %cst_5 : f32 to vector<8x1xf32>
    %14 = arith.addf %13, %12 : vector<8x1xf32>
    %15 = tpu.reciprocal %14 {approx = true} : vector<8x1xf32> -> vector<8x1xf32>
    %16 = arith.addf %4, %7 : vector<8x1xf32>
    %17 = math.sqrt %16 : vector<8x1xf32>
    %cst_6 = arith.constant 9.99999971E-10 : f32
    %18 = vector.broadcast %cst_6 : f32 to vector<8x1xf32>
    %19 = arith.addf %18, %17 : vector<8x1xf32>
    %20 = tpu.reciprocal %19 {approx = true} : vector<8x1xf32> -> vector<8x1xf32>
    %21 = vector.broadcast %11 : vector<8x1xf32> to vector<8x768xf32>
    %22 = arith.mulf %0, %21 : vector<8x768xf32>
    %23 = vector.broadcast %15 : vector<8x1xf32> to vector<8x512xf32>
    %24 = arith.mulf %1, %23 : vector<8x512xf32>
    %25 = vector.broadcast %20 : vector<8x1xf32> to vector<8x768xf32>
    %26 = arith.mulf %0, %25 : vector<8x768xf32>
    %27 = vector.broadcast %20 : vector<8x1xf32> to vector<8x512xf32>
    %28 = arith.mulf %1, %27 : vector<8x512xf32>
    %c0_7 = arith.constant 0 : index
    %c0_8 = arith.constant 0 : index
    %29 = vector.load %arg14[%c0_7, %c0_8] : memref<8x768xf32, #tpu.memory_space<vmem>>, vector<8x768xf32>
    tpu.vector_store %arg14[%c0_7, %c0_8], %22 {strides = array<i32>} : memref<8x768xf32, #tpu.memory_space<vmem>>, vector<8x768xf32>,
    %c0_9 = arith.constant 0 : index
    %c0_10 = arith.constant 0 : index
    %30 = vector.load %arg15[%c0_9, %c0_10] : memref<8x512xf32, #tpu.memory_space<vmem>>, vector<8x512xf32>
    tpu.vector_store %arg15[%c0_9, %c0_10], %24 {strides = array<i32>} : memref<8x512xf32, #tpu.memory_space<vmem>>, vector<8x512xf32>,
    %c0_11 = arith.constant 0 : index
    %c0_12 = arith.constant 0 : index
    %31 = vector.load %arg16[%c0_11, %c0_12] : memref<8x1280xf32, #tpu.memory_space<vmem>>, vector<8x768xf32>
    tpu.vector_store %arg16[%c0_11, %c0_12], %26 {strides = array<i32>} : memref<8x1280xf32, #tpu.memory_space<vmem>>, vector<8x768xf32>,
    %c0_13 = arith.constant 0 : index
    %c768 = arith.constant 768 : index
    %32 = vector.load %arg16[%c0_13, %c768] : memref<8x1280xf32, #tpu.memory_space<vmem>>, vector<8x512xf32>
    tpu.vector_store %arg16[%c0_13, %c768], %28 {strides = array<i32>} : memref<8x1280xf32, #tpu.memory_space<vmem>>, vector<8x512xf32>,
    %33 = arith.truncf %22 : vector<8x768xf32> to vector<8x768xbf16>
    %c0_14 = arith.constant 0 : index
    %c0_15 = arith.constant 0 : index
    %34 = vector.load %arg3[%c0_14, %c0_15] : memref<768x512xbf16, #tpu.memory_space<vmem>>, vector<768x512xbf16>
    %cst_16 = arith.constant dense<0.000000e+00> : vector<8x512xf32>
    %35 = tpu.matmul %33, %34, %cst_16 {dimension_numbers = #tpu.dot_dimension_numbers<[1], [0], [0], [1], [0, 0, 1, 1], [], []>} : vector<8x768xbf16>, vector<768x512xbf16>, vector<8x512xf32> -> vector<8x512xf32>
    %c0_17 = arith.constant 0 : index
    %c0_18 = arith.constant 0 : index
    %36 = vector.load %arg4[%c0_17, %c0_18] : memref<1x512xf32, #tpu.memory_space<vmem>>, vector<1x512xf32>
    %37 = vector.broadcast %36 : vector<1x512xf32> to vector<8x512xf32>
    %38 = arith.addf %35, %37 : vector<8x512xf32>
    %cst_19 = arith.constant 0.000000e+00 : f32
    %39 = vector.broadcast %cst_19 : f32 to vector<8x512xf32>
    %40 = arith.maximumf %38, %39 : vector<8x512xf32>
    %41 = arith.truncf %24 : vector<8x512xf32> to vector<8x512xbf16>
    %c0_20 = arith.constant 0 : index
    %c0_21 = arith.constant 0 : index
    %42 = vector.load %arg6[%c0_20, %c0_21] : memref<512x512xbf16, #tpu.memory_space<vmem>>, vector<512x512xbf16>
    %cst_22 = arith.constant dense<0.000000e+00> : vector<8x512xf32>
    %43 = tpu.matmul %41, %42, %cst_22 {dimension_numbers = #tpu.dot_dimension_numbers<[1], [0], [0], [1], [0, 0, 1, 1], [], []>} : vector<8x512xbf16>, vector<512x512xbf16>, vector<8x512xf32> -> vector<8x512xf32>
    %c0_23 = arith.constant 0 : index
    %c0_24 = arith.constant 0 : index
    %44 = vector.load %arg7[%c0_23, %c0_24] : memref<1x512xf32, #tpu.memory_space<vmem>>, vector<1x512xf32>
    %45 = vector.broadcast %44 : vector<1x512xf32> to vector<8x512xf32>
    %46 = arith.addf %43, %45 : vector<8x512xf32>
    %cst_25 = arith.constant 0.000000e+00 : f32
    %47 = vector.broadcast %cst_25 : f32 to vector<8x512xf32>
    %48 = arith.maximumf %46, %47 : vector<8x512xf32>
    %49 = arith.truncf %26 : vector<8x768xf32> to vector<8x768xbf16>
    %c0_26 = arith.constant 0 : index
    %c0_27 = arith.constant 0 : index
    %50 = vector.load %arg9[%c0_26, %c0_27] : memref<768x1280xbf16, #tpu.memory_space<vmem>>, vector<768x1280xbf16>
    %cst_28 = arith.constant dense<0.000000e+00> : vector<8x1280xf32>
    %51 = tpu.matmul %49, %50, %cst_28 {dimension_numbers = #tpu.dot_dimension_numbers<[1], [0], [0], [1], [0, 0, 1, 1], [], []>} : vector<8x768xbf16>, vector<768x1280xbf16>, vector<8x1280xf32> -> vector<8x1280xf32>
    %52 = arith.truncf %28 : vector<8x512xf32> to vector<8x512xbf16>
    %c0_29 = arith.constant 0 : index
    %c0_30 = arith.constant 0 : index
    %53 = vector.load %arg10[%c0_29, %c0_30] : memref<512x1280xbf16, #tpu.memory_space<vmem>>, vector<512x1280xbf16>
    %cst_31 = arith.constant dense<0.000000e+00> : vector<8x1280xf32>
    %54 = tpu.matmul %52, %53, %cst_31 {dimension_numbers = #tpu.dot_dimension_numbers<[1], [0], [0], [1], [0, 0, 1, 1], [], []>} : vector<8x512xbf16>, vector<512x1280xbf16>, vector<8x1280xf32> -> vector<8x1280xf32>
    %55 = arith.addf %51, %54 : vector<8x1280xf32>
    %c0_32 = arith.constant 0 : index
    %c0_33 = arith.constant 0 : index
    %56 = vector.load %arg11[%c0_32, %c0_33] : memref<1x1280xf32, #tpu.memory_space<vmem>>, vector<1x1280xf32>
    %57 = vector.broadcast %56 : vector<1x1280xf32> to vector<8x1280xf32>
    %58 = arith.addf %55, %57 : vector<8x1280xf32>
    %cst_34 = arith.constant 0.000000e+00 : f32
    %59 = vector.broadcast %cst_34 : f32 to vector<8x1280xf32>
    %60 = arith.maximumf %58, %59 : vector<8x1280xf32>
    %c0_35 = arith.constant 0 : index
    %c0_36 = arith.constant 0 : index
    %61 = vector.load %arg5[%c0_35, %c0_36] : memref<1x512xf32, #tpu.memory_space<vmem>>, vector<1x512xf32>
    %62 = vector.broadcast %61 : vector<1x512xf32> to vector<8x512xf32>
    %63 = arith.mulf %40, %62 : vector<8x512xf32>
    %cst_37 = arith.constant dense<0.000000e+00> : vector<8xf32>
    %64 = vector.multi_reduction <add>, %63, %cst_37 [1] : vector<8x512xf32> to vector<8xf32>
    %65 = vector.shape_cast %64 : vector<8xf32> to vector<8x1xf32>
    %c0_38 = arith.constant 0 : index
    %66 = memref.load %arg13[%c0_38] : memref<3xf32, #tpu.memory_space<smem>>
    %67 = vector.broadcast %66 : f32 to vector<8x1xf32>
    %68 = arith.addf %65, %67 : vector<8x1xf32>
    %c0_39 = arith.constant 0 : index
    %c0_40 = arith.constant 0 : index
    %69 = vector.load %arg8[%c0_39, %c0_40] : memref<1x512xf32, #tpu.memory_space<vmem>>, vector<1x512xf32>
    %70 = vector.broadcast %69 : vector<1x512xf32> to vector<8x512xf32>
    %71 = arith.mulf %48, %70 : vector<8x512xf32>
    %cst_41 = arith.constant dense<0.000000e+00> : vector<8xf32>
    %72 = vector.multi_reduction <add>, %71, %cst_41 [1] : vector<8x512xf32> to vector<8xf32>
    %73 = vector.shape_cast %72 : vector<8xf32> to vector<8x1xf32>
    %c1 = arith.constant 1 : index
    %74 = memref.load %arg13[%c1] : memref<3xf32, #tpu.memory_space<smem>>
    %75 = vector.broadcast %74 : f32 to vector<8x1xf32>
    %76 = arith.addf %73, %75 : vector<8x1xf32>
    %c0_42 = arith.constant 0 : index
    %c0_43 = arith.constant 0 : index
    %77 = vector.load %arg12[%c0_42, %c0_43] : memref<1x1280xf32, #tpu.memory_space<vmem>>, vector<1x1280xf32>
    %78 = vector.broadcast %77 : vector<1x1280xf32> to vector<8x1280xf32>
    %79 = arith.mulf %60, %78 : vector<8x1280xf32>
    %cst_44 = arith.constant dense<0.000000e+00> : vector<8xf32>
    %80 = vector.multi_reduction <add>, %79, %cst_44 [1] : vector<8x1280xf32> to vector<8xf32>
    %81 = vector.shape_cast %80 : vector<8xf32> to vector<8x1xf32>
    %c2 = arith.constant 2 : index
    %82 = memref.load %arg13[%c2] : memref<3xf32, #tpu.memory_space<smem>>
    %83 = vector.broadcast %82 : f32 to vector<8x1xf32>
    %84 = arith.addf %81, %83 : vector<8x1xf32>
    %85 = tpu.iota {dimensions = array<i32: 1>} : vector<8x128xi32>
    %c0_i32 = arith.constant 0 : i32
    %86 = vector.broadcast %c0_i32 : i32 to vector<8x128xi32>
    %87 = arith.cmpi eq, %85, %86 : vector<8x128xi32>
    %cst_45 = arith.constant 0.000000e+00 : f32
    %88 = vector.shape_cast %68 : vector<8x1xf32> to vector<8x1xf32>
    %89 = vector.broadcast %88 : vector<8x1xf32> to vector<8x128xf32>
    %90 = vector.broadcast %cst_45 : f32 to vector<8x128xf32>
    %91 = arith.select %87, %89, %90 : vector<8x128xi1>, vector<8x128xf32>
    %c1_i32 = arith.constant 1 : i32
    %92 = vector.broadcast %c1_i32 : i32 to vector<8x128xi32>
    %93 = arith.cmpi eq, %85, %92 : vector<8x128xi32>
    %94 = vector.shape_cast %76 : vector<8x1xf32> to vector<8x1xf32>
    %95 = vector.broadcast %94 : vector<8x1xf32> to vector<8x128xf32>
    %96 = arith.select %93, %95, %91 : vector<8x128xi1>, vector<8x128xf32>
    %c2_i32 = arith.constant 2 : i32
    %97 = vector.broadcast %c2_i32 : i32 to vector<8x128xi32>
    %98 = arith.cmpi eq, %85, %97 : vector<8x128xi32>
    %99 = vector.shape_cast %84 : vector<8x1xf32> to vector<8x1xf32>
    %100 = vector.broadcast %99 : vector<8x1xf32> to vector<8x128xf32>
    %101 = arith.select %98, %100, %96 : vector<8x128xi1>, vector<8x128xf32>
    %c0_46 = arith.constant 0 : index
    %c0_47 = arith.constant 0 : index
    %102 = vector.load %arg17[%c0_46, %c0_47] : memref<8x128xf32, #tpu.memory_space<vmem>>, vector<8x128xf32>
    tpu.vector_store %arg17[%c0_46, %c0_47], %101 {strides = array<i32>} : memref<8x128xf32, #tpu.memory_space<vmem>>, vector<8x128xf32>,
    return
  }
  func.func @transform_0(%arg0: i32) -> (i32, i32) {
    %c0_i32 = arith.constant 0 : i32
    %c0_i32_0 = arith.constant 0 : i32
    return %arg0, %c0_i32 : i32, i32
  }
  func.func @transform_1(%arg0: i32) -> (i32, i32) {
    %c0_i32 = arith.constant 0 : i32
    %c0_i32_0 = arith.constant 0 : i32
    return %arg0, %c0_i32 : i32, i32
  }
  func.func @transform_2(%arg0: i32) -> (i32, i32) {
    %c0_i32 = arith.constant 0 : i32
    %c0_i32_0 = arith.constant 0 : i32
    %c0_i32_1 = arith.constant 0 : i32
    return %c0_i32, %c0_i32_0 : i32, i32
  }
  func.func @transform_3(%arg0: i32) -> (i32, i32) {
    %c0_i32 = arith.constant 0 : i32
    %c0_i32_0 = arith.constant 0 : i32
    %c0_i32_1 = arith.constant 0 : i32
    return %c0_i32, %c0_i32_0 : i32, i32
  }
  func.func @transform_4(%arg0: i32) -> (i32, i32) {
    %c0_i32 = arith.constant 0 : i32
    %c0_i32_0 = arith.constant 0 : i32
    %c0_i32_1 = arith.constant 0 : i32
    return %c0_i32, %c0_i32_0 : i32, i32
  }
  func.func @transform_5(%arg0: i32) -> (i32, i32) {
    %c0_i32 = arith.constant 0 : i32
    %c0_i32_0 = arith.constant 0 : i32
    %c0_i32_1 = arith.constant 0 : i32
    return %c0_i32, %c0_i32_0 : i32, i32
  }
  func.func @transform_6(%arg0: i32) -> (i32, i32) {
    %c0_i32 = arith.constant 0 : i32
    %c0_i32_0 = arith.constant 0 : i32
    %c0_i32_1 = arith.constant 0 : i32
    return %c0_i32, %c0_i32_0 : i32, i32
  }
  func.func @transform_7(%arg0: i32) -> (i32, i32) {
    %c0_i32 = arith.constant 0 : i32
    %c0_i32_0 = arith.constant 0 : i32
    %c0_i32_1 = arith.constant 0 : i32
    return %c0_i32, %c0_i32_0 : i32, i32
  }
  func.func @transform_8(%arg0: i32) -> (i32, i32) {
    %c0_i32 = arith.constant 0 : i32
    %c0_i32_0 = arith.constant 0 : i32
    %c0_i32_1 = arith.constant 0 : i32
    return %c0_i32, %c0_i32_0 : i32, i32
  }
  func.func @transform_9(%arg0: i32) -> (i32, i32) {
    %c0_i32 = arith.constant 0 : i32
    %c0_i32_0 = arith.constant 0 : i32
    %c0_i32_1 = arith.constant 0 : i32
    return %c0_i32, %c0_i32_0 : i32, i32
  }
  func.func @transform_10(%arg0: i32) -> (i32, i32) {
    %c0_i32 = arith.constant 0 : i32
    %c0_i32_0 = arith.constant 0 : i32
    %c0_i32_1 = arith.constant 0 : i32
    return %c0_i32, %c0_i32_0 : i32, i32
  }
  func.func @transform_11(%arg0: i32) -> (i32, i32) {
    %c0_i32 = arith.constant 0 : i32
    %c0_i32_0 = arith.constant 0 : i32
    %c0_i32_1 = arith.constant 0 : i32
    return %c0_i32, %c0_i32_0 : i32, i32
  }
  func.func @transform_12(%arg0: i32) -> i32 {
    %c0_i32 = arith.constant 0 : i32
    %c0_i32_0 = arith.constant 0 : i32
    return %c0_i32 : i32
  }
  func.func @transform_13(%arg0: i32) -> (i32, i32) {
    %c0_i32 = arith.constant 0 : i32
    %c0_i32_0 = arith.constant 0 : i32
    return %arg0, %c0_i32 : i32, i32
  }
  func.func @transform_14(%arg0: i32) -> (i32, i32) {
    %c0_i32 = arith.constant 0 : i32
    %c0_i32_0 = arith.constant 0 : i32
    return %arg0, %c0_i32 : i32, i32
  }
  func.func @transform_15(%arg0: i32) -> (i32, i32) {
    %c0_i32 = arith.constant 0 : i32
    %c0_i32_0 = arith.constant 0 : i32
    return %arg0, %c0_i32 : i32, i32
  }
  func.func @transform_16(%arg0: i32) -> (i32, i32) {
    %c0_i32 = arith.constant 0 : i32
    %c0_i32_0 = arith.constant 0 : i32
    return %arg0, %c0_i32 : i32, i32
  }
}

</mosaic_0001>

<bundles_post_ra>
// kernel: multiview_forward.1
= control target key start
LH: loop header
LB: loop body
LE: loop exit
PB: predicated region body
PF: predicated region fallthrough
CT: control target
= control target key end

     0   :  { %s22019_s0 = inlined_call_operand.vmem [shape: f32[8,768], index: 0, kind: input, shape index: {}]   ;;  %s22020_s1 = inlined_call_operand.vmem [shape: f32[8,512], index: 1, kind: input, shape index: {}]   ;;  %s22021_s2 = inlined_call_operand.vmem [shape: bf16[768,512], index: 2, kind: input, shape index: {}]   ;;  %s22022_s3 = inlined_call_operand.vmem [shape: f32[1,512], index: 3, kind: input, shape index: {}]   ;;  %s22023_s4 = inlined_call_operand.vmem [shape: f32[1,512], index: 4, kind: input, shape index: {}]   ;;  %s22024_s5 = inlined_call_operand.vmem [shape: bf16[512,512], index: 5, kind: input, shape index: {}]   ;;  %s22025_s6 = inlined_call_operand.vmem [shape: f32[1,512], index: 6, kind: input, shape index: {}]   ;;  %s22026_s7 = inlined_call_operand.vmem [shape: f32[1,512], index: 7, kind: input, shape index: {}]   ;;  %s22027_s8 = inlined_call_operand.vmem [shape: bf16[768,1280], index: 8, kind: input, shape index: {}]   ;;  %s22028_s9 = inlined_call_operand.vmem [shape: bf16[512,1280], index: 9, kind: input, shape index: {}]   ;;  %s22029_s10 = inlined_call_operand.vmem [shape: f32[1,1280], index: 10, kind: input, shape index: {}]   ;;  %s22030_s11 = inlined_call_operand.vmem [shape: f32[1,1280], index: 11, kind: input, shape index: {}]   ;;  %s22031_s12 = inlined_call_operand.vmem [shape: f32[3], index: 12, kind: input, shape index: {}]   ;;  %s22032_s13 = inlined_call_operand.vmem [shape: f32[8,768], index: 13, kind: output, shape index: {0}]   ;;  %s22033_s14 = inlined_call_operand.vmem [shape: f32[8,512], index: 14, kind: output, shape index: {1}]   ;;  %s22034_s15 = inlined_call_operand.vmem [shape: f32[8,1280], index: 15, kind: output, shape index: {2}]   ;;  %s22035_s16 = inlined_call_operand.vmem [shape: f32[8,128], index: 16, kind: output, shape index: {3}]  }
   0x1   :  { %22037 = sst [smem:[#allocation5_spill]] %s22019_s0 }
   0x2   :  { %22 = vsyncpa [#allocation3], 0  ;;  %s52_s23 = sshll.u32 %s22031_s12, 4  ;;  %s14572_s24 = smov [#allocation2]   ;;  %s53_s23 = int_to_ptr.vmem [resolvable:$true] %s52_s23 }
   0x3   :  { %55 = dma.vmem_to_smem %s53_s23, 16, %s14572_s24, [#allocation3]  }
   0x4   :  { %14570 = dma.done.wait [#allocation3], 16  }
   0x5   :  { %14571 = vsyncadd [#allocation3], 4294967280 }
   0x6   :  { %60 = sfence }
   0x7   :  { %s22038_s27 = sld [smem:[#allocation5_spill]]  ;;  %v14695_v8 = vld [vmem:[%s22020_s1] sm:$0xff]  ;;  %v14700_v9 = vld [vmem:[%s22020_s1 + $0x8] sm:$0xff]  ;;  %v13438_v14 = vld [vmem:[%s22021_s2 + $0xec] sm:$0xf0] }
   0x8   :  { %v9040_v13 = vld [vmem:[%s22021_s2 + $0xe0] sm:$0xf]  ;;  %v14720_v16 = vld [vmem:[%s22020_s1 + $0x10] sm:$0xff]  ;;  %v84_v22 = vmul.f32 %v14695_v8, %v14695_v8  ;;  %v85_v23 = vmul.f32 %v14700_v9, %v14700_v9  ;;  %v14767_v39 = vld [vmem:[%s22020_s1 + $0x18] sm:$0xff] }
   0x9   :  { %v9041_v17 = vor.u32 %v13438_v14, %v9040_v13  ;;  %v9168_v18 = vld [vmem:[%s22021_s2 + $0x1e0] sm:$0xf]  ;;  %v13470_v19 = vld [vmem:[%s22021_s2 + $0x1ec] sm:$0xf0]  ;;  %v86_v46 = vmul.f32 %v14720_v16, %v14720_v16 }
   0xa   :  { %v9296_v20 = vld [vmem:[%s22021_s2 + $0x2e0] sm:$0xf]  ;;  %v9169_v24 = vor.u32 %v13470_v19, %v9168_v18  ;;  %v13502_v25 = vld [vmem:[%s22021_s2 + $0x2ec] sm:$0xf0]  ;;  %v88_v47 = vadd.f32 %v85_v23, %v84_v22 }
   0xb   :  { %v9424_v26 = vld [vmem:[%s22021_s2 + $0x3e0] sm:$0xf]  ;;  %v13534_v27 = vld [vmem:[%s22021_s2 + $0x3ec] sm:$0xf0]  ;;  %1344 = vmatpush.bf16.msra.mxu0 %v9041_v17  ;;  %v9297_v28 = vor.u32 %v13502_v25, %v9296_v20 }
   0xc   :  { %v9425_v29 = vor.u32 %v13534_v27, %v9424_v26  ;;  %v9024_v30 = vld [vmem:[%s22021_s2 + $0xc0] sm:$0xf]  ;;  %v13434_v31 = vld [vmem:[%s22021_s2 + $0xcc] sm:$0xf0]  ;;  %1357 = vmatpush.bf16.msra.mxu1 %v9169_v24 }
   0xd   :  { %v14664_v0 = vld [vmem:[%s22038_s27] sm:$0xff]  ;;  %v14669_v1 = vld [vmem:[%s22038_s27 + $0x8] sm:$0xff]  ;;  %v14674_v2 = vld [vmem:[%s22038_s27 + $0x10] sm:$0xff]  ;;  %v9025_v35 = vor.u32 %v13434_v31, %v9024_v30  ;;  %1370 = vmatpush.bf16.msra.mxu2 %v9297_v28 }
   0xe   :  { %v14679_v3 = vld [vmem:[%s22038_s27 + $0x18] sm:$0xff]  ;;  %v14684_v4 = vld [vmem:[%s22038_s27 + $0x20] sm:$0xff]  ;;  %v71_v5 = vmul.f32 %v14664_v0, %v14664_v0  ;;  %v72_v6 = vmul.f32 %v14669_v1, %v14669_v1  ;;  %v73_v7 = vmul.f32 %v14674_v2, %v14674_v2  ;;  %v14705_v10 = vld [vmem:[%s22038_s27 + $0x28] sm:$0xff]  ;;  %1383 = vmatpush.bf16.msra.mxu3 %v9425_v29 }
   0xf   :  { %v74_v11 = vmul.f32 %v14679_v3, %v14679_v3  ;;  %v75_v15 = vmul.f32 %v14684_v4, %v14684_v4  ;;  %v9152_v32 = vld [vmem:[%s22021_s2 + $0x1c0] sm:$0xf]  ;;  %v76_v33 = vmul.f32 %v14705_v10, %v14705_v10  ;;  %v13466_v36 = vld [vmem:[%s22021_s2 + $0x1cc] sm:$0xf0]  ;;  %1345 = vmatpush.bf16.msra.mxu0 %v9025_v35 }
  0x10   :  { %v77_v12 = vadd.f32 %v72_v6, %v71_v5  ;;  %v9280_v37 = vld [vmem:[%s22021_s2 + $0x2c0] sm:$0xf]  ;;  %v13498_v38 = vld [vmem:[%s22021_s2 + $0x2cc] sm:$0xf0]  ;;  %v9153_v40 = vor.u32 %v13466_v36, %v9152_v32 }
  0x11   :  { %v9281_v41 = vor.u32 %v13498_v38, %v9280_v37  ;;  %v9408_v42 = vld [vmem:[%s22021_s2 + $0x3c0] sm:$0xf]  ;;  %v13530_v43 = vld [vmem:[%s22021_s2 + $0x3cc] sm:$0xf0] }
  0x12   :  { %v78_v21 = vadd.f32 %v77_v12, %v73_v7  ;;  %v9008_v44 = vld [vmem:[%s22021_s2 + $0xa0] sm:$0xf]  ;;  %v9409_v48 = vor.u32 %v13530_v43, %v9408_v42  ;;  %v13430_v49 = vld [vmem:[%s22021_s2 + $0xac] sm:$0xf0]  ;;  %1358 = vmatpush.bf16.msra.mxu1 %v9153_v40  ;;  %v87_v7 = vmul.f32 %v14767_v39, %v14767_v39 }
  0x13   :  { %v9136_v50 = vld [vmem:[%s22021_s2 + $0x1a0] sm:$0xf]  ;;  %v13462_v51 = vld [vmem:[%s22021_s2 + $0x1ac] sm:$0xf0]  ;;  %v9009_v52 = vor.u32 %v13430_v49, %v9008_v44  ;;  %1371 = vmatpush.bf16.msra.mxu2 %v9281_v41 }
  0x14   :  { %v79_v34 = vadd.f32 %v78_v21, %v74_v11  ;;  %v9264_v53 = vld [vmem:[%s22021_s2 + $0x2a0] sm:$0xf]  ;;  %v13494_v54 = vld [vmem:[%s22021_s2 + $0x2ac] sm:$0xf0]  ;;  %v9137_v57 = vor.u32 %v13462_v51, %v9136_v50  ;;  %1384 = vmatpush.bf16.msra.mxu3 %v9409_v48  ;;  %v89_v11 = vadd.f32 %v88_v47, %v86_v46 }
  0x15   :  { %v9392_v55 = vld [vmem:[%s22021_s2 + $0x3a0] sm:$0xf]  ;;  %v13526_v58 = vld [vmem:[%s22021_s2 + $0x3ac] sm:$0xf0]  ;;  %v9265_v61 = vor.u32 %v13494_v54, %v9264_v53  ;;  %1346 = vmatpush.bf16.msra.mxu0 %v9009_v52 }
  0x16   :  { %v80_v45 = vadd.f32 %v79_v34, %v75_v15  ;;  %v8992_v59 = vld [vmem:[%s22021_s2 + $0x80] sm:$0xf]  ;;  %v13426_v60 = vld [vmem:[%s22021_s2 + $0x8c] sm:$0xf0]  ;;  %v9393_v62 = vor.u32 %v13526_v58, %v9392_v55  ;;  %1359 = vmatpush.bf16.msra.mxu1 %v9137_v57  ;;  %v90_v25 = vadd.f32 %v89_v11, %v87_v7 }
  0x17   :  { %v9120_v63 = vld [vmem:[%s22021_s2 + $0x180] sm:$0xf]  ;;  %v13458_v5 = vld [vmem:[%s22021_s2 + $0x18c] sm:$0xf0]  ;;  %v8993_v15 = vor.u32 %v13426_v60, %v8992_v59  ;;  %1372 = vmatpush.bf16.msra.mxu2 %v9265_v61 }
  0x18   :  { %v81_v56 = vadd.f32 %v80_v45, %v76_v33  ;;  %v9248_v6 = vld [vmem:[%s22021_s2 + $0x280] sm:$0xf]  ;;  %v13490_v12 = vld [vmem:[%s22021_s2 + $0x28c] sm:$0xf0]  ;;  %v9121_v17 = vor.u32 %v13458_v5, %v9120_v63  ;;  %1385 = vmatpush.bf16.msra.mxu3 %v9393_v62 }
  0x19   :  { %v9376_v13 = vld [vmem:[%s22021_s2 + $0x380] sm:$0xf]  ;;  %v13522_v14 = vld [vmem:[%s22021_s2 + $0x38c] sm:$0xf0]  ;;  %v9249_v20 = vor.u32 %v13490_v12, %v9248_v6  ;;  %1347 = vmatpush.bf16.msra.mxu0 %v8993_v15 }
  0x1a   :  { %82 = vadd.xlane.f32.xlu0 %v81_v56  ;;  %v8976_v18 = vld [vmem:[%s22021_s2 + $0x60] sm:$0xf]  ;;  %v13422_v19 = vld [vmem:[%s22021_s2 + $0x6c] sm:$0xf0]  ;;  %v9377_v21 = vor.u32 %v13522_v14, %v9376_v13  ;;  %1360 = vmatpush.bf16.msra.mxu1 %v9121_v17 }
  0x1b   :  { %v9104_v22 = vld [vmem:[%s22021_s2 + $0x160] sm:$0xf]  ;;  %v13454_v23 = vld [vmem:[%s22021_s2 + $0x16c] sm:$0xf0]  ;;  %v8977_v29 = vor.u32 %v13422_v19, %v8976_v18  ;;  %1373 = vmatpush.bf16.msra.mxu2 %v9249_v20 }
  0x1c   :  { %v9232_v24 = vld [vmem:[%s22021_s2 + $0x260] sm:$0xf]  ;;  %v13486_v26 = vld [vmem:[%s22021_s2 + $0x26c] sm:$0xf0]  ;;  %v9105_v30 = vor.u32 %v13454_v23, %v9104_v22  ;;  %1386 = vmatpush.bf16.msra.mxu3 %v9377_v21  ;;  %v13436_v21 = vld [vmem:[%s22021_s2 + $0xe4] sm:$0xf] }
  0x1d   :  { %v9360_v27 = vld [vmem:[%s22021_s2 + $0x360] sm:$0xf]  ;;  %v13518_v28 = vld [vmem:[%s22021_s2 + $0x36c] sm:$0xf0]  ;;  %v9233_v33 = vor.u32 %v13486_v26, %v9232_v24  ;;  %1348 = vmatpush.bf16.msra.mxu0 %v8977_v29  ;;  %v9042_v22 = vld [vmem:[%s22021_s2 + $0xf0] sm:$0xf0] }
  0x1e   :  { %v8960_v31 = vld [vmem:[%s22021_s2 + $0x40] sm:$0xf]  ;;  %v13418_v32 = vld [vmem:[%s22021_s2 + $0x4c] sm:$0xf0]  ;;  %v9361_v34 = vor.u32 %v13518_v28, %v9360_v27  ;;  %1361 = vmatpush.bf16.msra.mxu1 %v9105_v30  ;;  %v13468_v23 = vld [vmem:[%s22021_s2 + $0x1e4] sm:$0xf]  ;;  %v9045_v24 = vor.u32 %v13436_v21, %v9042_v22 }
  0x1f   :  { %v9088_v35 = vld [vmem:[%s22021_s2 + $0x140] sm:$0xf]  ;;  %v13450_v36 = vld [vmem:[%s22021_s2 + $0x14c] sm:$0xf0]  ;;  %v8961_v42 = vor.u32 %v13418_v32, %v8960_v31  ;;  %1374 = vmatpush.bf16.msra.mxu2 %v9233_v33  ;;  %v13432_v32 = vld [vmem:[%s22021_s2 + $0xc4] sm:$0xf] }
  0x20   :  { %v9216_v37 = vld [vmem:[%s22021_s2 + $0x240] sm:$0xf]  ;;  %v13482_v38 = vld [vmem:[%s22021_s2 + $0x24c] sm:$0xf0]  ;;  %v9089_v43 = vor.u32 %v13450_v36, %v9088_v35  ;;  %1387 = vmatpush.bf16.msra.mxu3 %v9361_v34  ;;  %v9026_v33 = vld [vmem:[%s22021_s2 + $0xd0] sm:$0xf0] }
  0x21   :  { %v9344_v40 = vld [vmem:[%s22021_s2 + $0x340] sm:$0xf]  ;;  %v13514_v41 = vld [vmem:[%s22021_s2 + $0x34c] sm:$0xf0]  ;;  %v9217_v44 = vor.u32 %v13482_v38, %v9216_v37  ;;  %1349 = vmatpush.bf16.msra.mxu0 %v8961_v42  ;;  %v9029_v35 = vor.u32 %v13432_v32, %v9026_v33  ;;  %v13464_v36 = vld [vmem:[%s22021_s2 + $0x1c4] sm:$0xf] }
  0x22   :  { %91 = vadd.xlane.f32.xlu0 %v90_v25  ;;  %v9345_v45 = vor.u32 %v13514_v41, %v9344_v40  ;;  %1362 = vmatpush.bf16.msra.mxu1 %v9089_v43  ;;  %v8944_v46 = vld [vmem:[%s22021_s2 + $0x20] sm:$0xf]  ;;  %v13414_v47 = vld [vmem:[%s22021_s2 + $0x2c] sm:$0xf0]  ;;  %v9170_v25 = vld [vmem:[%s22021_s2 + $0x1f0] sm:$0xf0] }
  0x23   :  { %1375 = vmatpush.bf16.msra.mxu2 %v9217_v44  ;;  %v9072_v48 = vld [vmem:[%s22021_s2 + $0x120] sm:$0xf]  ;;  %v8945_v49 = vor.u32 %v13414_v47, %v8944_v46  ;;  %v13446_v50 = vld [vmem:[%s22021_s2 + $0x12c] sm:$0xf0]  ;;  %v9173_v26 = vor.u32 %v13468_v23, %v9170_v25  ;;  %v9154_v37 = vld [vmem:[%s22021_s2 + $0x1d0] sm:$0xf0] }
  0x24   :  { %1388 = vmatpush.bf16.msra.mxu3 %v9345_v45  ;;  %v9200_v51 = vld [vmem:[%s22021_s2 + $0x220] sm:$0xf]  ;;  %v13478_v52 = vld [vmem:[%s22021_s2 + $0x22c] sm:$0xf0]  ;;  %v9073_v53 = vor.u32 %v13446_v50, %v9072_v48  ;;  %v9157_v38 = vor.u32 %v13464_v36, %v9154_v37  ;;  %v13428_v45 = vld [vmem:[%s22021_s2 + $0xa4] sm:$0xf] }
  0x25   :  { %v9201_v54 = vor.u32 %v13478_v52, %v9200_v51  ;;  %v9328_v55 = vld [vmem:[%s22021_s2 + $0x320] sm:$0xf]  ;;  %v13510_v56 = vld [vmem:[%s22021_s2 + $0x32c] sm:$0xf0]  ;;  %1350 = vmatpush.bf16.msra.mxu0 %v8945_v49  ;;  %v9010_v46 = vld [vmem:[%s22021_s2 + $0xb0] sm:$0xf0] }
  0x26   :  { %v9329_v57 = vor.u32 %v13510_v56, %v9328_v55  ;;  %1363 = vmatpush.bf16.msra.mxu1 %v9073_v53  ;;  %v8928_v58 = vld [vmem:[%s22021_s2] sm:$0xf]  ;;  %v13410_v59 = vld [vmem:[%s22021_s2 + $0xc] sm:$0xf0]  ;;  %v9013_v48 = vor.u32 %v13428_v45, %v9010_v46  ;;  %v13460_v49 = vld [vmem:[%s22021_s2 + $0x1a4] sm:$0xf] }
  0x27   :  { %1376 = vmatpush.bf16.msra.mxu2 %v9201_v54  ;;  %v9056_v60 = vld [vmem:[%s22021_s2 + $0x100] sm:$0xf]  ;;  %v8929_v61 = vor.u32 %v13410_v59, %v8928_v58  ;;  %v13442_v62 = vld [vmem:[%s22021_s2 + $0x10c] sm:$0xf0]  ;;  %v9138_v50 = vld [vmem:[%s22021_s2 + $0x1b0] sm:$0xf0] }
  0x28   :  { %1389 = vmatpush.bf16.msra.mxu3 %v9329_v57  ;;  %v9184_v63 = vld [vmem:[%s22021_s2 + $0x200] sm:$0xf]  ;;  %v13474_v5 = vld [vmem:[%s22021_s2 + $0x20c] sm:$0xf0]  ;;  %v9057_v6 = vor.u32 %v13442_v62, %v9056_v60  ;;  %v9141_v51 = vor.u32 %v13460_v49, %v9138_v50  ;;  %v13424_v57 = vld [vmem:[%s22021_s2 + $0x84] sm:$0xf] }
  0x29   :  { %v9185_v7 = vor.u32 %v13474_v5, %v9184_v63  ;;  %v9312_v11 = vld [vmem:[%s22021_s2 + $0x300] sm:$0xf]  ;;  %v13506_v12 = vld [vmem:[%s22021_s2 + $0x30c] sm:$0xf0]  ;;  %1351 = vmatpush.bf16.msra.mxu0 %v8929_v61  ;;  %v8994_v58 = vld [vmem:[%s22021_s2 + $0x90] sm:$0xf0] }
  0x2a   :  { %v9552_v13 = vld [vmem:[%s22021_s2 + $0x4e0] sm:$0xf]  ;;  %v9313_v14 = vor.u32 %v13506_v12, %v9312_v11  ;;  %v13566_v15 = vld [vmem:[%s22021_s2 + $0x4ec] sm:$0xf0]  ;;  %1364 = vmatpush.bf16.msra.mxu1 %v9057_v6  ;;  %v8997_v60 = vor.u32 %v13424_v57, %v8994_v58  ;;  %v13456_v61 = vld [vmem:[%s22021_s2 + $0x184] sm:$0xf] }
  0x2b   :  { %v9680_v17 = vld [vmem:[%s22021_s2 + $0x5e0] sm:$0xf]  ;;  %v13598_v18 = vld [vmem:[%s22021_s2 + $0x5ec] sm:$0xf0]  ;;  %1377 = vmatpush.bf16.msra.mxu2 %v9185_v7  ;;  %v9553_v19 = vor.u32 %v13566_v15, %v9552_v13  ;;  %v9122_v62 = vld [vmem:[%s22021_s2 + $0x190] sm:$0xf0] }
  0x2c   :  { %v9681_v20 = vor.u32 %v13598_v18, %v9680_v17  ;;  %1390 = vmatpush.bf16.msra.mxu3 %v9313_v14  ;;  %v9536_v27 = vld [vmem:[%s22021_s2 + $0x4c0] sm:$0xf]  ;;  %v13562_v28 = vld [vmem:[%s22021_s2 + $0x4cc] sm:$0xf0]  ;;  %v9125_v63 = vor.u32 %v13456_v61, %v9122_v62  ;;  %v13420_v13 = vld [vmem:[%s22021_s2 + $0x64] sm:$0xf] }
  0x2d   :  { %1396 = vmatpush.bf16.msrb.mxu0 %v9553_v19  ;;  %v9664_v29 = vld [vmem:[%s22021_s2 + $0x5c0] sm:$0xf]  ;;  %v9537_v30 = vor.u32 %v13562_v28, %v9536_v27  ;;  %v13594_v31 = vld [vmem:[%s22021_s2 + $0x5cc] sm:$0xf0]  ;;  %v8978_v14 = vld [vmem:[%s22021_s2 + $0x70] sm:$0xf0] }
  0x2e   :  { %1409 = vmatpush.bf16.msrb.mxu1 %v9681_v20  ;;  %v9665_v34 = vor.u32 %v13594_v31, %v9664_v29  ;;  %v9520_v40 = vld [vmem:[%s22021_s2 + $0x4a0] sm:$0xf]  ;;  %v13558_v41 = vld [vmem:[%s22021_s2 + $0x4ac] sm:$0xf0]  ;;  %v8981_v17 = vor.u32 %v13420_v13, %v8978_v14  ;;  %v13452_v18 = vld [vmem:[%s22021_s2 + $0x164] sm:$0xf] }
  0x2f   :  { %1422 = vmatpush.bf16.msrb.mxu2 %v9045_v24  ;;  %v9648_v42 = vld [vmem:[%s22021_s2 + $0x5a0] sm:$0xf]  ;;  %v9521_v43 = vor.u32 %v13558_v41, %v9520_v40  ;;  %v13590_v44 = vld [vmem:[%s22021_s2 + $0x5ac] sm:$0xf0]  ;;  %v9106_v19 = vld [vmem:[%s22021_s2 + $0x170] sm:$0xf0] }
  0x30   :  { %1435 = vmatpush.bf16.msrb.mxu3 %v9173_v26  ;;  %v9649_v47 = vor.u32 %v13590_v44, %v9648_v42  ;;  %v9504_v52 = vld [vmem:[%s22021_s2 + $0x480] sm:$0xf]  ;;  %v13554_v53 = vld [vmem:[%s22021_s2 + $0x48c] sm:$0xf0]  ;;  %v9109_v20 = vor.u32 %v13452_v18, %v9106_v19  ;;  %v13416_v26 = vld [vmem:[%s22021_s2 + $0x44] sm:$0xf] }
  0x31   :  { %1397 = vmatpush.bf16.msrb.mxu0 %v9537_v30  ;;  %v9632_v54 = vld [vmem:[%s22021_s2 + $0x580] sm:$0xf]  ;;  %v9505_v55 = vor.u32 %v13554_v53, %v9504_v52  ;;  %v13586_v56 = vld [vmem:[%s22021_s2 + $0x58c] sm:$0xf0]  ;;  %v8962_v27 = vld [vmem:[%s22021_s2 + $0x50] sm:$0xf0] }
  0x32   :  { %1410 = vmatpush.bf16.msrb.mxu1 %v9665_v34  ;;  %v9633_v59 = vor.u32 %v13586_v56, %v9632_v54  ;;  %v9488_v5 = vld [vmem:[%s22021_s2 + $0x460] sm:$0xf]  ;;  %v13550_v6 = vld [vmem:[%s22021_s2 + $0x46c] sm:$0xf0]  ;;  %v8965_v29 = vor.u32 %v13416_v26, %v8962_v27  ;;  %v13448_v30 = vld [vmem:[%s22021_s2 + $0x144] sm:$0xf] }
  0x33   :  { %1423 = vmatpush.bf16.msrb.mxu2 %v9029_v35  ;;  %v9616_v7 = vld [vmem:[%s22021_s2 + $0x560] sm:$0xf]  ;;  %v9489_v11 = vor.u32 %v13550_v6, %v9488_v5  ;;  %v13582_v12 = vld [vmem:[%s22021_s2 + $0x56c] sm:$0xf0]  ;;  %v9090_v31 = vld [vmem:[%s22021_s2 + $0x150] sm:$0xf0] }
  0x34   :  { %1436 = vmatpush.bf16.msrb.mxu3 %v9157_v38  ;;  %v9617_v15 = vor.u32 %v13582_v12, %v9616_v7  ;;  %v9472_v21 = vld [vmem:[%s22021_s2 + $0x440] sm:$0xf]  ;;  %v13546_v22 = vld [vmem:[%s22021_s2 + $0x44c] sm:$0xf0]  ;;  %v9093_v32 = vor.u32 %v13448_v30, %v9090_v31  ;;  %v13412_v38 = vld [vmem:[%s22021_s2 + $0x24] sm:$0xf] }
  0x35   :  { %1398 = vmatpush.bf16.msrb.mxu0 %v9521_v43  ;;  %v9600_v23 = vld [vmem:[%s22021_s2 + $0x540] sm:$0xf]  ;;  %v9473_v24 = vor.u32 %v13546_v22, %v9472_v21  ;;  %v13578_v25 = vld [vmem:[%s22021_s2 + $0x54c] sm:$0xf0]  ;;  %v8946_v40 = vld [vmem:[%s22021_s2 + $0x30] sm:$0xf0] }
  0x36   :  { %1411 = vmatpush.bf16.msrb.mxu1 %v9649_v47  ;;  %v9601_v28 = vor.u32 %v13578_v25, %v9600_v23  ;;  %v9456_v33 = vld [vmem:[%s22021_s2 + $0x420] sm:$0xf]  ;;  %v13542_v34 = vld [vmem:[%s22021_s2 + $0x42c] sm:$0xf0]  ;;  %v8949_v42 = vor.u32 %v13412_v38, %v8946_v40  ;;  %v13444_v43 = vld [vmem:[%s22021_s2 + $0x124] sm:$0xf] }
  0x37   :  { %1424 = vmatpush.bf16.msrb.mxu2 %v9013_v48  ;;  %v9584_v35 = vld [vmem:[%s22021_s2 + $0x520] sm:$0xf]  ;;  %v9457_v36 = vor.u32 %v13542_v34, %v9456_v33  ;;  %v13574_v37 = vld [vmem:[%s22021_s2 + $0x52c] sm:$0xf0]  ;;  %v9074_v44 = vld [vmem:[%s22021_s2 + $0x130] sm:$0xf0] }
  0x38   :  { %1437 = vmatpush.bf16.msrb.mxu3 %v9141_v51  ;;  %v9585_v41 = vor.u32 %v13574_v37, %v9584_v35  ;;  %v9077_v46 = vor.u32 %v13444_v43, %v9074_v44  ;;  %v9440_v47 = vld [vmem:[%s22021_s2 + $0x400] sm:$0xf]  ;;  %v13538_v48 = vld [vmem:[%s22021_s2 + $0x40c] sm:$0xf0]  ;;  %v13408_v53 = vld [vmem:[%s22021_s2 + $0x4] sm:$0xf] }
  0x39   :  { %1399 = vmatpush.bf16.msrb.mxu0 %v9505_v55  ;;  %v9568_v49 = vld [vmem:[%s22021_s2 + $0x500] sm:$0xf]  ;;  %v13570_v50 = vld [vmem:[%s22021_s2 + $0x50c] sm:$0xf0]  ;;  %v9441_v51 = vor.u32 %v13538_v48, %v9440_v47  ;;  %v8930_v54 = vld [vmem:[%s22021_s2 + $0x10] sm:$0xf0] }
  0x3a   :  { %1412 = vmatpush.bf16.msrb.mxu1 %v9633_v59  ;;  %v9569_v52 = vor.u32 %v13570_v50, %v9568_v49  ;;  %v13440_v55 = vld [vmem:[%s22021_s2 + $0x104] sm:$0xf]  ;;  %v8933_v56 = vor.u32 %v13408_v53, %v8930_v54  ;;  %v9058_v57 = vld [vmem:[%s22021_s2 + $0x110] sm:$0xf0] }
  0x3b   :  { %1425 = vmatpush.bf16.msrb.mxu2 %v8997_v60  ;;  %v9061_v58 = vor.u32 %v13440_v55, %v9058_v57  ;;  %v13500_v23 = vld [vmem:[%s22021_s2 + $0x2e4] sm:$0xf]  ;;  %v9426_v27 = vld [vmem:[%s22021_s2 + $0x3f0] sm:$0xf0] }
  0x3c   :  { %1438 = vmatpush.bf16.msrb.mxu3 %v9125_v63  ;;  %v13532_v26 = vld [vmem:[%s22021_s2 + $0x3e4] sm:$0xf]  ;;  %v9682_v38 = vld [vmem:[%s22021_s2 + $0x5f0] sm:$0xf0] }
  0x3d   :  { %1400 = vmatpush.bf16.msrb.mxu0 %v9489_v11  ;;  %v13564_v31 = vld [vmem:[%s22021_s2 + $0x4e4] sm:$0xf]  ;;  %v9282_v44 = vld [vmem:[%s22021_s2 + $0x2d0] sm:$0xf0] }
  0x3e   :  { %1413 = vmatpush.bf16.msrb.mxu1 %v9617_v15  ;;  %v13596_v37 = vld [vmem:[%s22021_s2 + $0x5e4] sm:$0xf] }
  0x3f   :  { %1426 = vmatpush.bf16.msrb.mxu2 %v8981_v17  ;;  %v13496_v43 = vld [vmem:[%s22021_s2 + $0x2c4] sm:$0xf]  ;;  %v9685_v54 = vor.u32 %v13596_v37, %v9682_v38  ;;  %v9362_v38 = vld [vmem:[%s22021_s2 + $0x370] sm:$0xf0] }
  0x40   :  { %1439 = vmatpush.bf16.msrb.mxu3 %v9109_v20  ;;  %v13528_v50 = vld [vmem:[%s22021_s2 + $0x3c4] sm:$0xf] }
  0x41   :  { %1401 = vmatpush.bf16.msrb.mxu0 %v9473_v24  ;;  %v9298_v24 = vld [vmem:[%s22021_s2 + $0x2f0] sm:$0xf0]  ;;  %v13560_v55 = vld [vmem:[%s22021_s2 + $0x4c4] sm:$0xf] }
  0x42   :  { %1414 = vmatpush.bf16.msrb.mxu1 %v9601_v28  ;;  %v9301_v30 = vor.u32 %v13500_v23, %v9298_v24  ;;  %v13516_v37 = vld [vmem:[%s22021_s2 + $0x364] sm:$0xf] }
  0x43   :  { %1427 = vmatpush.bf16.msrb.mxu2 %v8965_v29 }
  0x44   :  { %1440 = vmatpush.bf16.msrb.mxu3 %v9093_v32 }
  0x45   :  { %1402 = vmatpush.bf16.msrb.mxu0 %v9457_v36  ;;  %v9554_v36 = vld [vmem:[%s22021_s2 + $0x4f0] sm:$0xf0] }
  0x46   :  { %1415 = vmatpush.bf16.msrb.mxu1 %v9585_v41  ;;  %v9557_v53 = vor.u32 %v13564_v31, %v9554_v36  ;;  %v9634_v31 = vld [vmem:[%s22021_s2 + $0x590] sm:$0xf0] }
  0x47   :  { %1428 = vmatpush.bf16.msrb.mxu2 %v8949_v42  ;;  %v9429_v42 = vor.u32 %v13532_v26, %v9426_v27  ;;  %v9378_v26 = vld [vmem:[%s22021_s2 + $0x390] sm:$0xf0]  ;;  %v13552_v27 = vld [vmem:[%s22021_s2 + $0x484] sm:$0xf] }
  0x48   :  { %1441 = vmatpush.bf16.msrb.mxu3 %v9077_v46 }
  0x49   :  { %1403 = vmatpush.bf16.msrb.mxu0 %v9441_v51  ;;  %v9410_v51 = vld [vmem:[%s22021_s2 + $0x3d0] sm:$0xf0] }
  0x4a   :  { %1416 = vmatpush.bf16.msrb.mxu1 %v9569_v52 }
  0x4b   :  { %1429 = vmatpush.bf16.msrb.mxu2 %v8933_v56  ;;  %v9538_v56 = vld [vmem:[%s22021_s2 + $0x4d0] sm:$0xf0] }
  0x4c   :  { %1442 = vmatpush.bf16.msrb.mxu3 %v9061_v58  ;;  %v13592_v58 = vld [vmem:[%s22021_s2 + $0x5c4] sm:$0xf] }
  0x8d   :  { %v83_v45 = vpop.xlane.xlu0 %82 }
  0x8e   :  { %14529 = vrsqrt.f32 %v83_v45  ;;  %vm100_vm0 = vcmp.eq.f32.partialorder %v83_v45, inf  ;;  %v103_v13 = vand.u32 2147483648, %v83_v45  ;;  %vm102_vm1 = vcmp.eq.f32.partialorder %v83_v45, 0.0 }
  0x94   :  { %v14530_v59 = vpop.eup %14529 }
  0x95   :  { %v94_v60 = vmul.f32 %v14530_v59, %v83_v45  ;;  %v15115_v61 = vpop.xlane.xlu0 %91 }
  0x96   :  { %v121_v63 = vadd.f32 %v15115_v61, %v83_v45  ;;  %vm114_vm4 = vcmp.eq.f32.partialorder %v15115_v61, inf  ;;  %vm116_vm5 = vcmp.eq.f32.partialorder %v15115_v61, 0.0 }
  0x97   :  { %v95_v62 = vmul.f32 %v14530_v59, %v94_v60  ;;  %v13492_v60 = vld [vmem:[%s22021_s2 + $0x2a4] sm:$0xf] }
  0x98   :  { %14531 = vrsqrt.f32 %v121_v63  ;;  %vm129_vm2 = vcmp.eq.f32.partialorder %v121_v63, inf  ;;  %vm131_vm3 = vcmp.eq.f32.partialorder %v121_v63, 0.0  ;;  %v132_v29 = vand.u32 2147483648, %v121_v63 }
  0x99   :  { %v96_v5 = vmul.f32 0.5, %v95_v62  ;;  %v9285_v62 = vor.u32 %v13496_v43, %v9282_v44  ;;  %v9618_v43 = vld [vmem:[%s22021_s2 + $0x570] sm:$0xf0] }
  0x9b   :  { %v97_v6 = vsub.f32 1.5, %v96_v5  ;;  %v9266_v5 = vld [vmem:[%s22021_s2 + $0x2b0] sm:$0xf0] }
  0x9d   :  { %v98_v7 = vmul.f32 %v14530_v59, %v97_v6  ;;  %v9666_v59 = vld [vmem:[%s22021_s2 + $0x5d0] sm:$0xf0]  ;;  %v13524_v6 = vld [vmem:[%s22021_s2 + $0x3a4] sm:$0xf] }
  0x9e   :  { %v14532_v11 = vpop.eup %14531 }
  0x9f   :  { %v99_v12 = vmul.f32 %v98_v7, %v83_v45  ;;  %v123_v14 = vmul.f32 %v14532_v11, %v121_v63  ;;  %v9541_v7 = vor.u32 %v13560_v55, %v9538_v56  ;;  %v9218_v55 = vld [vmem:[%s22021_s2 + $0x250] sm:$0xf0] }
  0xa1   :  { %v101_v15 = vsel %vm100_vm0, %v83_v45, %v99_v12  ;;  %v124_v18 = vmul.f32 %v14532_v11, %v123_v14  ;;  %v9394_v12 = vld [vmem:[%s22021_s2 + $0x3b0] sm:$0xf0] }
  0xa2   :  { %v104_v17 = vsel %vm102_vm1, %v103_v13, %v101_v15  ;;  %v13556_v13 = vld [vmem:[%s22021_s2 + $0x4a4] sm:$0xf]  ;;  %v9522_v14 = vld [vmem:[%s22021_s2 + $0x4b0] sm:$0xf0] }
  0xa3   :  { %v105_v19 = vadd.f32 1e-09, %v104_v17  ;;  %v125_v20 = vmul.f32 0.5, %v124_v18  ;;  %v13588_v15 = vld [vmem:[%s22021_s2 + $0x5a4] sm:$0xf]  ;;  %v9525_v23 = vor.u32 %v13556_v13, %v9522_v14 }
  0xa4   :  { %v9650_v17 = vld [vmem:[%s22021_s2 + $0x5b0] sm:$0xf0]  ;;  %v13508_v14 = vld [vmem:[%s22021_s2 + $0x324] sm:$0xf] }
  0xa5   :  { %14533 = vrcp.f32 %v105_v19  ;;  %v126_v21 = vsub.f32 1.5, %v125_v20  ;;  %v9269_v19 = vor.u32 %v13492_v60, %v9266_v5  ;;  %v9397_v20 = vor.u32 %v13524_v6, %v9394_v12  ;;  %v13576_v60 = vld [vmem:[%s22021_s2 + $0x544] sm:$0xf] }
  0xa6   :  { %v9653_v24 = vor.u32 %v13588_v15, %v9650_v17  ;;  %v9330_v15 = vld [vmem:[%s22021_s2 + $0x330] sm:$0xf0]  ;;  %v13540_v17 = vld [vmem:[%s22021_s2 + $0x424] sm:$0xf] }
  0xa7   :  { %v127_v22 = vmul.f32 %v14532_v11, %v126_v21  ;;  %v9669_v11 = vor.u32 %v13592_v58, %v9666_v59  ;;  %v13488_v21 = vld [vmem:[%s22021_s2 + $0x284] sm:$0xf]  ;;  %v9346_v58 = vld [vmem:[%s22021_s2 + $0x350] sm:$0xf0] }
  0xa8   :  { %v13544_v59 = vld [vmem:[%s22021_s2 + $0x444] sm:$0xf] }
  0xa9   :  { %v128_v25 = vmul.f32 %v127_v22, %v121_v63  ;;  %v9250_v22 = vld [vmem:[%s22021_s2 + $0x290] sm:$0xf0] }
  0xab   :  { %v14534_v28 = vpop.eup %14533  ;;  %v130_v32 = vsel %vm129_vm2, %v121_v63, %v128_v25  ;;  %v9413_v63 = vor.u32 %v13528_v50, %v9410_v51  ;;  %v13520_v25 = vld [vmem:[%s22021_s2 + $0x384] sm:$0xf] }
  0xac   :  { %v136_v33 = vmul.f32 %v14534_v28, %v14664_v0  ;;  %v137_v34 = vmul.f32 %v14534_v28, %v14669_v1  ;;  %v138_v35 = vmul.f32 %v14534_v28, %v14674_v2  ;;  %v133_v40 = vsel %vm131_vm3, %v132_v29, %v130_v32  ;;  %v9506_v29 = vld [vmem:[%s22021_s2 + $0x490] sm:$0xf0]  ;;  %v13484_v32 = vld [vmem:[%s22021_s2 + $0x264] sm:$0xf] }
  0xad   :  { %v139_v41 = vmul.f32 %v14534_v28, %v14679_v3  ;;  %v15153_v45 = vmul.f32 %v14534_v28, %v14684_v4  ;;  %v134_v46 = vadd.f32 1e-09, %v133_v40  ;;  %v15182_v57 = vmul.f32 %v14534_v28, %v14705_v10 }
  0xae   :  { %156 = vst [vmem:[%s22032_s13] sm:$0xff] %v136_v33  ;;  %v15158_v47 = vpack.c.bf16 %v136_v33, %v136_v33  ;;  %v15160_v48 = vpack.c.bf16 %v137_v34, %v137_v34  ;;  %v15162_v49 = vpack.c.bf16 %v138_v35, %v138_v35  ;;  %v9381_v36 = vor.u32 %v13520_v25, %v9378_v26 }
  0xaf   :  { %157 = vst [vmem:[%s22032_s13 + $0x8] sm:$0xff] %v137_v34  ;;  %v15173_v52 = vpack.c.bf16 %v139_v41, %v139_v41  ;;  %14535 = vrcp.f32 %v134_v46  ;;  %v9365_v46 = vor.u32 %v13516_v37, %v9362_v38  ;;  %v15303_v51 = vpack.c.bf16 %v15153_v45, %v15153_v45 }
  0xb0   :  { %1352 = vmatmul.bf16.vlgmr.msra.gmra.mxu0 %v15158_v47  ;;  %1365 = vmatmul.bf16.vlgmr.msra.gmra.mxu1 %v15160_v48  ;;  %158 = vst [vmem:[%s22032_s13 + $0x10] sm:$0xff] %v138_v35  ;;  %v9253_v35 = vor.u32 %v13488_v21, %v9250_v22  ;;  %v13472_v21 = vld [vmem:[%s22021_s2 + $0x204] sm:$0xf]  ;;  %v9186_v22 = vld [vmem:[%s22021_s2 + $0x210] sm:$0xf0]  ;;  %14537 = vrsqrt.f32 %v15115_v61 }
  0xb1   :  { %1378 = vmatmul.bf16.vlgmr.msra.gmra.mxu2 %v15162_v49  ;;  %159 = vst [vmem:[%s22032_s13 + $0x18] sm:$0xff] %v139_v41  ;;  %1391 = vmatmul.bf16.vlgmr.msra.gmra.mxu3 %v15173_v52  ;;  %v13548_v41 = vld [vmem:[%s22021_s2 + $0x464] sm:$0xf]  ;;  %v9189_v37 = vor.u32 %v13472_v21, %v9186_v22  ;;  %v13459_v21 = vld [vmem:[%s22021_s2 + $0x194] sm:$0xf0] }
  0xb2   :  { %1448 = vmatpush.bf16.msra.mxu0 %v9301_v30  ;;  %1461 = vmatpush.bf16.msra.mxu1 %v9429_v42  ;;  %160 = vst [vmem:[%s22032_s13 + $0x20] sm:$0xff] %v15153_v45  ;;  %v13584_v30 = vld [vmem:[%s22021_s2 + $0x584] sm:$0xf]  ;;  %v9490_v42 = vld [vmem:[%s22021_s2 + $0x470] sm:$0xf0] }
  0xb3   :  { %1474 = vmatpush.bf16.msra.mxu2 %v9557_v53  ;;  %1487 = vmatpush.bf16.msra.mxu3 %v9685_v54  ;;  %161 = vst [vmem:[%s22032_s13 + $0x28] sm:$0xff] %v15182_v57  ;;  %v9637_v40 = vor.u32 %v13584_v30, %v9634_v31  ;;  %v15307_v53 = vpack.c.bf16 %v15182_v57, %v15182_v57  ;;  %v13480_v54 = vld [vmem:[%s22021_s2 + $0x244] sm:$0xf]  ;;  %v9256_v22 = vld [vmem:[%s22021_s2 + $0x288] sm:$0xf] }
  0xb4   :  { %v9493_v45 = vor.u32 %v13548_v41, %v9490_v42  ;;  %v13512_v57 = vld [vmem:[%s22021_s2 + $0x344] sm:$0xf]  ;;  %v9221_v5 = vor.u32 %v13480_v54, %v9218_v55  ;;  %v9160_v54 = vld [vmem:[%s22021_s2 + $0x1c8] sm:$0xf]  ;;  %v13467_v55 = vld [vmem:[%s22021_s2 + $0x1d4] sm:$0xf0] }
  0xb5   :  { %v15232_v18 = vpop.eup %14535  ;;  %v9349_v6 = vor.u32 %v13512_v57, %v9346_v58  ;;  %v13531_v57 = vld [vmem:[%s22021_s2 + $0x3d4] sm:$0xf0] }
  0xb6   :  { %1449 = vmatpush.bf16.msra.mxu0 %v9285_v62  ;;  %1462 = vmatpush.bf16.msra.mxu1 %v9413_v63  ;;  %v152_v28 = vmul.f32 %v15232_v18, %v14695_v8  ;;  %v9234_v8 = vld [vmem:[%s22021_s2 + $0x270] sm:$0xf0]  ;;  %v153_v33 = vmul.f32 %v15232_v18, %v14700_v9  ;;  %v146_v34 = vmul.f32 %v15232_v18, %v14664_v0 }
  0xb7   :  { %1475 = vmatpush.bf16.msra.mxu2 %v9541_v7  ;;  %1488 = vmatpush.bf16.msra.mxu3 %v9669_v11  ;;  %v154_v9 = vmul.f32 %v15232_v18, %v14720_v16  ;;  %v9509_v0 = vor.u32 %v13552_v27, %v9506_v29  ;;  %v13580_v16 = vld [vmem:[%s22021_s2 + $0x564] sm:$0xf]  ;;  %v9237_v44 = vor.u32 %v13484_v32, %v9234_v8  ;;  %v9602_v62 = vld [vmem:[%s22021_s2 + $0x550] sm:$0xf0] }
  0xb8   :  { %172 = vst [vmem:[%s22034_s15 + $0x30] sm:$0xff] %v152_v28  ;;  %v155_v50 = vmul.f32 %v15232_v18, %v14767_v39  ;;  %v147_v39 = vmul.f32 %v15232_v18, %v14669_v1  ;;  %v9621_v56 = vor.u32 %v13580_v16, %v9618_v43  ;;  %v9474_v1 = vld [vmem:[%s22021_s2 + $0x450] sm:$0xf0]  ;;  %v148_v63 = vmul.f32 %v15232_v18, %v14674_v2  ;;  %v13476_v7 = vld [vmem:[%s22021_s2 + $0x224] sm:$0xf] }
  0xb9   :  { %166 = vst [vmem:[%s22034_s15] sm:$0xff] %v146_v34  ;;  %v9202_v11 = vld [vmem:[%s22021_s2 + $0x230] sm:$0xf0]  ;;  %v149_v12 = vmul.f32 %v15232_v18, %v14679_v3  ;;  %v9477_v2 = vor.u32 %v13544_v59, %v9474_v1  ;;  %v9605_v13 = vor.u32 %v13576_v60, %v9602_v62  ;;  %v150_v25 = vmul.f32 %v15232_v18, %v14684_v4  ;;  %v13536_v28 = vld [vmem:[%s22021_s2 + $0x404] sm:$0xf]  ;;  %v13471_v34 = vld [vmem:[%s22021_s2 + $0x1f4] sm:$0xf0] }
  0xba   :  { %1450 = vmatpush.bf16.msra.mxu0 %v9269_v19  ;;  %1463 = vmatpush.bf16.msra.mxu1 %v9397_v20  ;;  %173 = vst [vmem:[%s22034_s15 + $0x38] sm:$0xff] %v153_v33  ;;  %v9458_v3 = vld [vmem:[%s22021_s2 + $0x430] sm:$0xf0]  ;;  %v13572_v19 = vld [vmem:[%s22021_s2 + $0x524] sm:$0xf]  ;;  %v9205_v26 = vor.u32 %v13476_v7, %v9202_v11  ;;  %v9333_v27 = vor.u32 %v13508_v14, %v9330_v15 }
  0xbb   :  { %1476 = vmatpush.bf16.msra.mxu2 %v9525_v23  ;;  %1489 = vmatpush.bf16.msra.mxu3 %v9653_v24  ;;  %174 = vst [vmem:[%s22034_s15 + $0x40] sm:$0xff] %v154_v9  ;;  %v9586_v20 = vld [vmem:[%s22021_s2 + $0x530] sm:$0xf0]  ;;  %v13504_v23 = vld [vmem:[%s22021_s2 + $0x304] sm:$0xf]  ;;  %v151_v30 = vmul.f32 %v15232_v18, %v14705_v10  ;;  %v9461_v4 = vor.u32 %v13540_v17, %v9458_v3 }
  0xbc   :  { %175 = vst [vmem:[%s22034_s15 + $0x48] sm:$0xff] %v155_v50  ;;  %v9314_v24 = vld [vmem:[%s22021_s2 + $0x310] sm:$0xf0]  ;;  %v9589_v31 = vor.u32 %v13572_v19, %v9586_v20  ;;  %v13568_v32 = vld [vmem:[%s22021_s2 + $0x504] sm:$0xf]  ;;  %v9161_v59 = vor.u32 %v13467_v55, %v9160_v54 }
  0xbd   :  { %167 = vst [vmem:[%s22034_s15 + $0x8] sm:$0xff] %v147_v39  ;;  %v9442_v29 = vld [vmem:[%s22021_s2 + $0x410] sm:$0xf0]  ;;  %v9048_v33 = vld [vmem:[%s22021_s2 + $0xe8] sm:$0xf]  ;;  %v9317_v38 = vor.u32 %v13504_v23, %v9314_v24 }
  0xbe   :  { %1451 = vmatpush.bf16.msra.mxu0 %v9253_v35  ;;  %1464 = vmatpush.bf16.msra.mxu1 %v9381_v36  ;;  %168 = vst [vmem:[%s22034_s15 + $0x10] sm:$0xff] %v148_v63  ;;  %v9570_v8 = vld [vmem:[%s22021_s2 + $0x510] sm:$0xf0]  ;;  %v13439_v10 = vld [vmem:[%s22021_s2 + $0xf4] sm:$0xf0] }
  0xbf   :  { %1477 = vmatpush.bf16.msra.mxu2 %v9509_v0  ;;  %1490 = vmatpush.bf16.msra.mxu3 %v9637_v40  ;;  %169 = vst [vmem:[%s22034_s15 + $0x18] sm:$0xff] %v149_v12  ;;  %v9176_v18 = vld [vmem:[%s22021_s2 + $0x1e8] sm:$0xf]  ;;  %v13503_v36 = vld [vmem:[%s22021_s2 + $0x2f4] sm:$0xf0]  ;;  %v9445_v40 = vor.u32 %v13536_v28, %v9442_v29  ;;  %v9573_v41 = vor.u32 %v13568_v32, %v9570_v8 }
  0xc0   :  { %1404 = vmatmul.bf16.vlgmr.msrb.gmra.mxu0 %v15303_v51  ;;  %1417 = vmatmul.bf16.vlgmr.msrb.gmra.mxu1 %v15307_v53  ;;  %v9304_v35 = vld [vmem:[%s22021_s2 + $0x2e8] sm:$0xf]  ;;  %170 = vst [vmem:[%s22034_s15 + $0x20] sm:$0xff] %v150_v25  ;;  %v13535_v0 = vld [vmem:[%s22021_s2 + $0x3f4] sm:$0xf0]  ;;  %v9049_v42 = vor.u32 %v13439_v10, %v9048_v33  ;;  %v9177_v16 = vor.u32 %v13471_v34, %v9176_v18 }
  0xc1   :  { %1430 = vmatmul.bf16.vlgmr.msrb.gmra.mxu2 %v15158_v47  ;;  %1443 = vmatmul.bf16.vlgmr.msrb.gmra.mxu3 %v15160_v48  ;;  %v9432_v9 = vld [vmem:[%s22021_s2 + $0x3e8] sm:$0xf]  ;;  %171 = vst [vmem:[%s22034_s15 + $0x28] sm:$0xff] %v151_v30  ;;  %v13431_v60 = vld [vmem:[%s22021_s2 + $0xb4] sm:$0xf0] }
  0xc2   :  { %1452 = vmatpush.bf16.msra.mxu0 %v9237_v44  ;;  %1465 = vmatpush.bf16.msra.mxu1 %v9365_v46  ;;  %v9032_v43 = vld [vmem:[%s22021_s2 + $0xc8] sm:$0xf]  ;;  %v13435_v44 = vld [vmem:[%s22021_s2 + $0xd4] sm:$0xf0]  ;;  %v9305_v46 = vor.u32 %v13503_v36, %v9304_v35  ;;  %v9433_v50 = vor.u32 %v13535_v0, %v9432_v9 }
  0xc3   :  { %1478 = vmatpush.bf16.msra.mxu2 %v9493_v45  ;;  %1491 = vmatpush.bf16.msra.mxu3 %v9621_v56  ;;  %v9288_v39 = vld [vmem:[%s22021_s2 + $0x2c8] sm:$0xf]  ;;  %v13499_v45 = vld [vmem:[%s22021_s2 + $0x2d4] sm:$0xf0]  ;;  %v9033_v58 = vor.u32 %v13435_v44, %v9032_v43 }
  0xc4   :  { %v9416_v56 = vld [vmem:[%s22021_s2 + $0x3c8] sm:$0xf]  ;;  %v9289_v62 = vor.u32 %v13499_v45, %v9288_v39  ;;  %v13495_v11 = vld [vmem:[%s22021_s2 + $0x2b4] sm:$0xf0] }
  0xc5   :  { %v9016_v1 = vld [vmem:[%s22021_s2 + $0xa8] sm:$0xf]  ;;  %v9417_v63 = vor.u32 %v13531_v57, %v9416_v56  ;;  %v13427_v17 = vld [vmem:[%s22021_s2 + $0x94] sm:$0xf0] }
  0xc6   :  { %1453 = vmatpush.bf16.msra.mxu0 %v9221_v5  ;;  %1466 = vmatpush.bf16.msra.mxu1 %v9349_v6  ;;  %v9144_v5 = vld [vmem:[%s22021_s2 + $0x1a8] sm:$0xf]  ;;  %v13463_v6 = vld [vmem:[%s22021_s2 + $0x1b4] sm:$0xf0] }
  0xc7   :  { %1479 = vmatpush.bf16.msra.mxu2 %v9477_v2  ;;  %1492 = vmatpush.bf16.msra.mxu3 %v9605_v13  ;;  %v9272_v7 = vld [vmem:[%s22021_s2 + $0x2a8] sm:$0xf]  ;;  %v13527_v2 = vld [vmem:[%s22021_s2 + $0x3b4] sm:$0xf0]  ;;  %v9017_v13 = vor.u32 %v13431_v60, %v9016_v1  ;;  %v9145_v14 = vor.u32 %v13463_v6, %v9144_v5 }
  0xc8   :  { %v9400_v12 = vld [vmem:[%s22021_s2 + $0x3a8] sm:$0xf]  ;;  %v9273_v3 = vor.u32 %v13495_v11, %v9272_v7  ;;  %v13491_v23 = vld [vmem:[%s22021_s2 + $0x294] sm:$0xf0] }
  0xc9   :  { %v9000_v15 = vld [vmem:[%s22021_s2 + $0x88] sm:$0xf]  ;;  %v9401_v19 = vor.u32 %v13527_v2, %v9400_v12  ;;  %v13523_v25 = vld [vmem:[%s22021_s2 + $0x394] sm:$0xf0]  ;;  %v9257_v30 = vor.u32 %v13491_v23, %v9256_v22 }
  0xca   :  { %1454 = vmatpush.bf16.msra.mxu0 %v9205_v26  ;;  %1467 = vmatpush.bf16.msra.mxu1 %v9333_v27  ;;  %v9128_v20 = vld [vmem:[%s22021_s2 + $0x188] sm:$0xf]  ;;  %v9001_v26 = vor.u32 %v13427_v17, %v9000_v15  ;;  %v13423_v29 = vld [vmem:[%s22021_s2 + $0x74] sm:$0xf0] }
  0xcb   :  { %1480 = vmatpush.bf16.msra.mxu2 %v9461_v4  ;;  %1493 = vmatpush.bf16.msra.mxu3 %v9589_v31  ;;  %v9384_v24 = vld [vmem:[%s22021_s2 + $0x388] sm:$0xf]  ;;  %v9129_v27 = vor.u32 %v13459_v21, %v9128_v20  ;;  %v13455_v32 = vld [vmem:[%s22021_s2 + $0x174] sm:$0xf0]  ;;  %v13437_v21 = vld [vmem:[%s22021_s2 + $0xec] sm:$0xf] }
  0xcc   :  { %v8984_v28 = vld [vmem:[%s22021_s2 + $0x68] sm:$0xf]  ;;  %v9385_v4 = vor.u32 %v13523_v25, %v9384_v24  ;;  %v13487_v33 = vld [vmem:[%s22021_s2 + $0x274] sm:$0xf0]  ;;  %v9050_v24 = vld [vmem:[%s22021_s2 + $0xf8] sm:$0xf0] }
  0xcd   :  { %v9112_v31 = vld [vmem:[%s22021_s2 + $0x168] sm:$0xf]  ;;  %v13519_v18 = vld [vmem:[%s22021_s2 + $0x374] sm:$0xf0]  ;;  %v8985_v34 = vor.u32 %v13423_v29, %v8984_v28  ;;  %v13469_v25 = vld [vmem:[%s22021_s2 + $0x1ec] sm:$0xf] }
  0xce   :  { %1455 = vmatpush.bf16.msra.mxu0 %v9189_v37  ;;  %1468 = vmatpush.bf16.msra.mxu1 %v9317_v38  ;;  %v9240_v8 = vld [vmem:[%s22021_s2 + $0x268] sm:$0xf]  ;;  %v9113_v35 = vor.u32 %v13455_v32, %v9112_v31  ;;  %v13419_v37 = vld [vmem:[%s22021_s2 + $0x54] sm:$0xf0]  ;;  %v9053_v32 = vor.u32 %v13437_v21, %v9050_v24  ;;  %v9114_v21 = vld [vmem:[%s22021_s2 + $0x178] sm:$0xf0] }
  0xcf   :  { %1481 = vmatpush.bf16.msra.mxu2 %v9445_v40  ;;  %1494 = vmatpush.bf16.msra.mxu3 %v9573_v41  ;;  %v9368_v10 = vld [vmem:[%s22021_s2 + $0x368] sm:$0xf]  ;;  %v9241_v38 = vor.u32 %v13487_v33, %v9240_v8  ;;  %v13451_v40 = vld [vmem:[%s22021_s2 + $0x154] sm:$0xf0] }
  0xd0   :  { %v8968_v36 = vld [vmem:[%s22021_s2 + $0x48] sm:$0xf]  ;;  %v9369_v9 = vor.u32 %v13519_v18, %v9368_v10  ;;  %v13515_v43 = vld [vmem:[%s22021_s2 + $0x354] sm:$0xf0]  ;;  %v13433_v18 = vld [vmem:[%s22021_s2 + $0xcc] sm:$0xf] }
  0xd1   :  { %1456 = vmatmul.bf16.vlgmr.msra.gmra.mxu0 %v15162_v49  ;;  %1469 = vmatmul.bf16.vlgmr.msra.gmra.mxu1 %v15173_v52  ;;  %v9096_v0 = vld [vmem:[%s22021_s2 + $0x148] sm:$0xf]  ;;  %v8969_v44 = vor.u32 %v13419_v37, %v8968_v36  ;;  %v13415_v54 = vld [vmem:[%s22021_s2 + $0x34] sm:$0xf0]  ;;  %v9162_v36 = vld [vmem:[%s22021_s2 + $0x1d8] sm:$0xf0] }
  0xd2   :  { %1500 = vmatpush.bf16.msrb.mxu0 %v9049_v42  ;;  %1513 = vmatpush.bf16.msrb.mxu1 %v9177_v16  ;;  %v9224_v41 = vld [vmem:[%s22021_s2 + $0x248] sm:$0xf]  ;;  %v13483_v42 = vld [vmem:[%s22021_s2 + $0x254] sm:$0xf0] }
  0xd3   :  { %1526 = vmatpush.bf16.msrb.mxu2 %v9305_v46  ;;  %1539 = vmatpush.bf16.msrb.mxu3 %v9433_v50  ;;  %v9352_v16 = vld [vmem:[%s22021_s2 + $0x348] sm:$0xf]  ;;  %v9097_v46 = vor.u32 %v13451_v40, %v9096_v0  ;;  %v9225_v55 = vor.u32 %v13483_v42, %v9224_v41  ;;  %v13447_v56 = vld [vmem:[%s22021_s2 + $0x134] sm:$0xf0] }
  0xd4   :  { %1482 = vmatmul.bf16.vlgmr.msra.gmra.mxu2 %v15303_v51  ;;  %1495 = vmatmul.bf16.vlgmr.msra.gmra.mxu3 %v15307_v53  ;;  %v8952_v50 = vld [vmem:[%s22021_s2 + $0x28] sm:$0xf]  ;;  %v9353_v39 = vor.u32 %v13515_v43, %v9352_v16  ;;  %v13511_v1 = vld [vmem:[%s22021_s2 + $0x334] sm:$0xf0]  ;;  %v13429_v43 = vld [vmem:[%s22021_s2 + $0xac] sm:$0xf] }
  0xd5   :  { %v9080_v45 = vld [vmem:[%s22021_s2 + $0x128] sm:$0xf]  ;;  %v13411_v5 = vld [vmem:[%s22021_s2 + $0x14] sm:$0xf0] }
  0xd6   :  { %1501 = vmatpush.bf16.msrb.mxu0 %v9033_v58  ;;  %1514 = vmatpush.bf16.msrb.mxu1 %v9161_v59  ;;  %v9208_v57 = vld [vmem:[%s22021_s2 + $0x228] sm:$0xf]  ;;  %v13479_v58 = vld [vmem:[%s22021_s2 + $0x234] sm:$0xf0] }
  0xd7   :  { %1527 = vmatpush.bf16.msrb.mxu2 %v9289_v62  ;;  %1540 = vmatpush.bf16.msrb.mxu3 %v9417_v63  ;;  %v9336_v59 = vld [vmem:[%s22021_s2 + $0x328] sm:$0xf]  ;;  %v8953_v62 = vor.u32 %v13415_v54, %v8952_v50  ;;  %v9081_v63 = vor.u32 %v13447_v56, %v9080_v45  ;;  %v13443_v7 = vld [vmem:[%s22021_s2 + $0x114] sm:$0xf0]  ;;  %v9209_v11 = vor.u32 %v13479_v58, %v9208_v57  ;;  %v9146_v50 = vld [vmem:[%s22021_s2 + $0x1b8] sm:$0xf0]  ;;  %v15689_v54 = vpop.eup %14537 }
  0xd8   :  { %v8936_v60 = vld [vmem:[%s22021_s2 + $0x8] sm:$0xf]  ;;  %v9337_v12 = vor.u32 %v13511_v1, %v9336_v59  ;;  %v13507_v15 = vld [vmem:[%s22021_s2 + $0x314] sm:$0xf0] }
  0xd9   :  { %v9064_v6 = vld [vmem:[%s22021_s2 + $0x108] sm:$0xf]  ;;  %v13599_v20 = vld [vmem:[%s22021_s2 + $0x5f4] sm:$0xf0]  ;;  %v8937_v22 = vor.u32 %v13411_v5, %v8936_v60  ;;  %v13425_v60 = vld [vmem:[%s22021_s2 + $0x8c] sm:$0xf] }
  0xda   :  { %1502 = vmatpush.bf16.msrb.mxu0 %v9017_v13  ;;  %1515 = vmatpush.bf16.msrb.mxu1 %v9145_v14  ;;  %v9192_v2 = vld [vmem:[%s22021_s2 + $0x208] sm:$0xf]  ;;  %v13475_v13 = vld [vmem:[%s22021_s2 + $0x214] sm:$0xf0]  ;;  %v9065_v23 = vor.u32 %v13443_v7, %v9064_v6  ;;  %v9130_v5 = vld [vmem:[%s22021_s2 + $0x198] sm:$0xf0]  ;;  %v108_v6 = vmul.f32 %v15689_v54, %v15115_v61 }
  0xdb   :  { %1528 = vmatpush.bf16.msrb.mxu2 %v9273_v3  ;;  %1541 = vmatpush.bf16.msrb.mxu3 %v9401_v19  ;;  %v9320_v14 = vld [vmem:[%s22021_s2 + $0x308] sm:$0xf]  ;;  %v13567_v3 = vld [vmem:[%s22021_s2 + $0x4f4] sm:$0xf0] }
  0xdc   :  { %v9560_v17 = vld [vmem:[%s22021_s2 + $0x4e8] sm:$0xf]  ;;  %v9321_v28 = vor.u32 %v13507_v15, %v9320_v14  ;;  %v13563_v31 = vld [vmem:[%s22021_s2 + $0x4d4] sm:$0xf0] }
  0xdd   :  { %v9688_v19 = vld [vmem:[%s22021_s2 + $0x5e8] sm:$0xf]  ;;  %v9561_v29 = vor.u32 %v13567_v3, %v9560_v17  ;;  %v13595_v10 = vld [vmem:[%s22021_s2 + $0x5d4] sm:$0xf0]  ;;  %v13421_v3 = vld [vmem:[%s22021_s2 + $0x6c] sm:$0xf] }
  0xde   :  { %1503 = vmatpush.bf16.msrb.mxu0 %v9001_v26  ;;  %1516 = vmatpush.bf16.msrb.mxu1 %v9129_v27  ;;  %v9178_v26 = vld [vmem:[%s22021_s2 + $0x1f8] sm:$0xf0]  ;;  %v9193_v27 = vor.u32 %v13475_v13, %v9192_v2  ;;  %v9672_v33 = vld [vmem:[%s22021_s2 + $0x5c8] sm:$0xf]  ;;  %v13559_v0 = vld [vmem:[%s22021_s2 + $0x4b4] sm:$0xf0] }
  0xdf   :  { %1529 = vmatpush.bf16.msrb.mxu2 %v9257_v30  ;;  %1542 = vmatpush.bf16.msrb.mxu3 %v9385_v4  ;;  %v9689_v30 = vor.u32 %v13599_v20, %v9688_v19  ;;  %v9544_v4 = vld [vmem:[%s22021_s2 + $0x4c8] sm:$0xf]  ;;  %v9181_v8 = vor.u32 %v13469_v25, %v9178_v26  ;;  %v13591_v16 = vld [vmem:[%s22021_s2 + $0x5b4] sm:$0xf0]  ;;  %v8986_v19 = vld [vmem:[%s22021_s2 + $0x78] sm:$0xf0] }
  0xe0   :  { %v9545_v37 = vor.u32 %v13563_v31, %v9544_v4  ;;  %v9656_v42 = vld [vmem:[%s22021_s2 + $0x5a8] sm:$0xf]  ;;  %v13555_v56 = vld [vmem:[%s22021_s2 + $0x494] sm:$0xf0]  ;;  %v13453_v20 = vld [vmem:[%s22021_s2 + $0x16c] sm:$0xf] }
  0xe1   :  { %v9512_v45 = vld [vmem:[%s22021_s2 + $0x488] sm:$0xf]  ;;  %v13587_v1 = vld [vmem:[%s22021_s2 + $0x594] sm:$0xf0]  ;;  %v13417_v4 = vld [vmem:[%s22021_s2 + $0x4c] sm:$0xf] }
  0xe2   :  { %1504 = vmatpush.bf16.msrb.mxu0 %v8985_v34  ;;  %1517 = vmatpush.bf16.msrb.mxu1 %v9113_v35  ;;  %v9034_v34 = vld [vmem:[%s22021_s2 + $0xd8] sm:$0xf0]  ;;  %v13465_v35 = vld [vmem:[%s22021_s2 + $0x1cc] sm:$0xf]  ;;  %v9640_v59 = vld [vmem:[%s22021_s2 + $0x588] sm:$0xf]  ;;  %v9513_v7 = vor.u32 %v13555_v56, %v9512_v45 }
  0xe3   :  { %1530 = vmatpush.bf16.msrb.mxu2 %v9241_v38  ;;  %1543 = vmatpush.bf16.msrb.mxu3 %v9369_v9  ;;  %v9673_v38 = vor.u32 %v13595_v10, %v9672_v33  ;;  %v9528_v9 = vld [vmem:[%s22021_s2 + $0x4a8] sm:$0xf]  ;;  %v9037_v40 = vor.u32 %v13433_v18, %v9034_v34  ;;  %v9165_v41 = vor.u32 %v13465_v35, %v9162_v36  ;;  %v13551_v2 = vld [vmem:[%s22021_s2 + $0x474] sm:$0xf0]  ;;  %v8970_v31 = vld [vmem:[%s22021_s2 + $0x58] sm:$0xf0] }
  0xe4   :  { %v9624_v15 = vld [vmem:[%s22021_s2 + $0x568] sm:$0xf]  ;;  %v13583_v17 = vld [vmem:[%s22021_s2 + $0x574] sm:$0xf0]  ;;  %v8973_v36 = vor.u32 %v13417_v4, %v8970_v31  ;;  %v13493_v4 = vld [vmem:[%s22021_s2 + $0x2ac] sm:$0xf] }
  0xe5   :  { %v9625_v24 = vor.u32 %v13583_v17, %v9624_v15  ;;  %v9480_v25 = vld [vmem:[%s22021_s2 + $0x448] sm:$0xf]  ;;  %v13547_v26 = vld [vmem:[%s22021_s2 + $0x454] sm:$0xf0]  ;;  %v9274_v31 = vld [vmem:[%s22021_s2 + $0x2b8] sm:$0xf0] }
  0xe6   :  { %1505 = vmatpush.bf16.msrb.mxu0 %v8969_v44  ;;  %1518 = vmatpush.bf16.msrb.mxu1 %v9097_v46  ;;  %v9018_v44 = vld [vmem:[%s22021_s2 + $0xb8] sm:$0xf0]  ;;  %v13461_v46 = vld [vmem:[%s22021_s2 + $0x1ac] sm:$0xf]  ;;  %v9481_v10 = vor.u32 %v13547_v26, %v9480_v25  ;;  %v9464_v34 = vld [vmem:[%s22021_s2 + $0x428] sm:$0xf] }
  0xe7   :  { %1531 = vmatpush.bf16.msrb.mxu2 %v9225_v55  ;;  %1544 = vmatpush.bf16.msrb.mxu3 %v9353_v39  ;;  %v9529_v55 = vor.u32 %v13559_v0, %v9528_v9  ;;  %v9657_v39 = vor.u32 %v13591_v16, %v9656_v42  ;;  %v9021_v57 = vor.u32 %v13429_v43, %v9018_v44  ;;  %v13543_v35 = vld [vmem:[%s22021_s2 + $0x434] sm:$0xf0]  ;;  %v13413_v0 = vld [vmem:[%s22021_s2 + $0x2c] sm:$0xf]  ;;  %v9082_v42 = vld [vmem:[%s22021_s2 + $0x138] sm:$0xf0] }
  0xe8   :  { %v9149_v58 = vor.u32 %v13461_v46, %v9146_v50  ;;  %v13575_v9 = vld [vmem:[%s22021_s2 + $0x534] sm:$0xf0]  ;;  %v9448_v43 = vld [vmem:[%s22021_s2 + $0x408] sm:$0xf]  ;;  %v9465_v44 = vor.u32 %v13543_v35, %v9464_v34  ;;  %v13561_v25 = vld [vmem:[%s22021_s2 + $0x4cc] sm:$0xf] }
  0xe9   :  { %v13539_v50 = vld [vmem:[%s22021_s2 + $0x414] sm:$0xf0]  ;;  %v9530_v35 = vld [vmem:[%s22021_s2 + $0x4b8] sm:$0xf0] }
  0xea   :  { %1506 = vmatpush.bf16.msrb.mxu0 %v8953_v62  ;;  %1519 = vmatpush.bf16.msrb.mxu1 %v9081_v63  ;;  %v9002_v62 = vld [vmem:[%s22021_s2 + $0x98] sm:$0xf0]  ;;  %v13457_v63 = vld [vmem:[%s22021_s2 + $0x18c] sm:$0xf] }
  0xeb   :  { %1532 = vmatpush.bf16.msrb.mxu2 %v9209_v11  ;;  %1545 = vmatpush.bf16.msrb.mxu3 %v9337_v12  ;;  %v9641_v11 = vor.u32 %v13587_v1, %v9640_v59  ;;  %v9496_v12 = vld [vmem:[%s22021_s2 + $0x468] sm:$0xf]  ;;  %v9005_v13 = vor.u32 %v13425_v60, %v9002_v62  ;;  %v9133_v14 = vor.u32 %v13457_v63, %v9130_v5  ;;  %v13441_v59 = vld [vmem:[%s22021_s2 + $0x10c] sm:$0xf]  ;;  %v9066_v1 = vld [vmem:[%s22021_s2 + $0x118] sm:$0xf0] }
  0xec   :  { %v13501_v60 = vld [vmem:[%s22021_s2 + $0x2ec] sm:$0xf]  ;;  %v9306_v62 = vld [vmem:[%s22021_s2 + $0x2f8] sm:$0xf0]  ;;  %v9069_v15 = vor.u32 %v13441_v59, %v9066_v1 }
  0xed   :  { %v13533_v63 = vld [vmem:[%s22021_s2 + $0x3ec] sm:$0xf]  ;;  %v9434_v5 = vld [vmem:[%s22021_s2 + $0x3f8] sm:$0xf0]  ;;  %v9309_v17 = vor.u32 %v13501_v60, %v9306_v62 }
  0xee   :  { %1507 = vmatpush.bf16.msrb.mxu0 %v8937_v22  ;;  %1520 = vmatpush.bf16.msrb.mxu1 %v9065_v23  ;;  %v109_v22 = vmul.f32 %v15689_v54, %v108_v6  ;;  %v9497_v23 = vor.u32 %v13551_v2, %v9496_v12  ;;  %v13565_v6 = vld [vmem:[%s22021_s2 + $0x4ec] sm:$0xf]  ;;  %v9562_v12 = vld [vmem:[%s22021_s2 + $0x4f8] sm:$0xf0] }
  0xef   :  { %1533 = vmatpush.bf16.msrb.mxu2 %v9193_v27  ;;  %1546 = vmatpush.bf16.msrb.mxu3 %v9321_v28  ;;  %v8989_v27 = vor.u32 %v13421_v3, %v8986_v19  ;;  %v9117_v28 = vor.u32 %v13453_v20, %v9114_v21  ;;  %v13597_v2 = vld [vmem:[%s22021_s2 + $0x5ec] sm:$0xf]  ;;  %v9437_v3 = vor.u32 %v13533_v63, %v9434_v5  ;;  %v9290_v20 = vld [vmem:[%s22021_s2 + $0x2d8] sm:$0xf0] }
  0xf0   :  { %v110_v33 = vmul.f32 0.5, %v109_v22  ;;  %v13497_v19 = vld [vmem:[%s22021_s2 + $0x2cc] sm:$0xf]  ;;  %v9565_v21 = vor.u32 %v13565_v6, %v9562_v12  ;;  %v9370_v62 = vld [vmem:[%s22021_s2 + $0x378] sm:$0xf0] }
  0xf1   :  { %1508 = vmatmul.bf16.vlgmr.msrb.gmra.mxu0 %v15158_v47  ;;  %1521 = vmatmul.bf16.vlgmr.msrb.gmra.mxu1 %v15160_v48  ;;  %v13517_v60 = vld [vmem:[%s22021_s2 + $0x36c] sm:$0xf]  ;;  %v9626_v6 = vld [vmem:[%s22021_s2 + $0x578] sm:$0xf0] }
  0xf2   :  { %1552 = vmatpush.bf16.msra.mxu0 %v9561_v29  ;;  %1565 = vmatpush.bf16.msra.mxu1 %v9689_v30  ;;  %v9608_v29 = vld [vmem:[%s22021_s2 + $0x548] sm:$0xf]  ;;  %v13579_v30 = vld [vmem:[%s22021_s2 + $0x554] sm:$0xf0]  ;;  %v111_v16 = vsub.f32 1.5, %v110_v33  ;;  %v9373_v12 = vor.u32 %v13517_v60, %v9370_v62 }
  0xf3   :  { %1578 = vmatpush.bf16.msra.mxu2 %v9053_v32  ;;  %1591 = vmatpush.bf16.msra.mxu3 %v9181_v8  ;;  %v13449_v32 = vld [vmem:[%s22021_s2 + $0x14c] sm:$0xf]  ;;  %v9098_v8 = vld [vmem:[%s22021_s2 + $0x158] sm:$0xf0]  ;;  %v9609_v18 = vor.u32 %v13579_v30, %v9608_v29  ;;  %v9293_v30 = vor.u32 %v13497_v19, %v9290_v20  ;;  %v9920_v60 = vld [vmem:[%s22024_s5 + $0x1c0] sm:$0xf] }
  0xf4   :  { %1534 = vmatmul.bf16.vlgmr.msrb.gmra.mxu2 %v15162_v49  ;;  %1547 = vmatmul.bf16.vlgmr.msrb.gmra.mxu3 %v15173_v52  ;;  %v112_v26 = vmul.f32 %v15689_v54, %v111_v16  ;;  %v9674_v29 = vld [vmem:[%s22021_s2 + $0x5d8] sm:$0xf0]  ;;  %v13525_v33 = vld [vmem:[%s22021_s2 + $0x3ac] sm:$0xf] }
  0xf5   :  { %v9386_v16 = vld [vmem:[%s22021_s2 + $0x398] sm:$0xf0]  ;;  %v13549_v63 = vld [vmem:[%s22021_s2 + $0x46c] sm:$0xf] }
  0xf6   :  { %1553 = vmatpush.bf16.msra.mxu0 %v9545_v37  ;;  %1566 = vmatpush.bf16.msra.mxu1 %v9673_v38  ;;  %v9101_v37 = vor.u32 %v13449_v32, %v9098_v8  ;;  %v9592_v38 = vld [vmem:[%s22021_s2 + $0x528] sm:$0xf]  ;;  %v113_v34 = vmul.f32 %v112_v26, %v15115_v61  ;;  %v13581_v5 = vld [vmem:[%s22021_s2 + $0x56c] sm:$0xf]  ;;  %v9482_v20 = vld [vmem:[%s22021_s2 + $0x458] sm:$0xf0] }
  0xf7   :  { %1579 = vmatpush.bf16.msra.mxu2 %v9037_v40  ;;  %1592 = vmatpush.bf16.msra.mxu3 %v9165_v41  ;;  %v8954_v40 = vld [vmem:[%s22021_s2 + $0x38] sm:$0xf0]  ;;  %v13445_v41 = vld [vmem:[%s22021_s2 + $0x12c] sm:$0xf]  ;;  %v9593_v46 = vor.u32 %v13575_v9, %v9592_v38  ;;  %v117_v38 = vand.u32 2147483648, %v15115_v61  ;;  %v9277_v9 = vor.u32 %v13493_v4, %v9274_v31 }
  0xf8   :  { %v8957_v45 = vor.u32 %v13413_v0, %v8954_v40  ;;  %v9085_v56 = vor.u32 %v13445_v41, %v9082_v42  ;;  %v13489_v40 = vld [vmem:[%s22021_s2 + $0x28c] sm:$0xf]  ;;  %v9258_v41 = vld [vmem:[%s22021_s2 + $0x298] sm:$0xf0] }
  0xf9   :  { %v13521_v42 = vld [vmem:[%s22021_s2 + $0x38c] sm:$0xf]  ;;  %v9210_v26 = vld [vmem:[%s22021_s2 + $0x238] sm:$0xf0] }
  0xfa   :  { %1554 = vmatpush.bf16.msra.mxu0 %v9529_v55  ;;  %1567 = vmatpush.bf16.msra.mxu1 %v9657_v39  ;;  %v9576_v55 = vld [vmem:[%s22021_s2 + $0x508] sm:$0xf]  ;;  %v13571_v39 = vld [vmem:[%s22021_s2 + $0x514] sm:$0xf0]  ;;  %v13545_v19 = vld [vmem:[%s22021_s2 + $0x44c] sm:$0xf] }
  0xfb   :  { %1580 = vmatpush.bf16.msra.mxu2 %v9021_v57  ;;  %1593 = vmatpush.bf16.msra.mxu3 %v9149_v58  ;;  %v13409_v57 = vld [vmem:[%s22021_s2 + $0xc] sm:$0xf]  ;;  %v8938_v58 = vld [vmem:[%s22021_s2 + $0x18] sm:$0xf0] }
  0xfc   :  { %v9466_v4 = vld [vmem:[%s22021_s2 + $0x438] sm:$0xf0]  ;;  %v13573_v31 = vld [vmem:[%s22021_s2 + $0x52c] sm:$0xf] }
  0xfe   :  { %1555 = vmatpush.bf16.msra.mxu0 %v9513_v7  ;;  %1568 = vmatpush.bf16.msra.mxu1 %v9641_v11  ;;  %v9449_v7 = vor.u32 %v13539_v50, %v9448_v43  ;;  %v9577_v11 = vor.u32 %v13571_v39, %v9576_v55  ;;  %v13553_v43 = vld [vmem:[%s22021_s2 + $0x48c] sm:$0xf]  ;;  %v9642_v55 = vld [vmem:[%s22021_s2 + $0x598] sm:$0xf0]  ;;  %v9261_v39 = vor.u32 %v13489_v40, %v9258_v41  ;;  %v9808_v41 = vld [vmem:[%s22024_s5 + $0xe0] sm:$0xf] }
  0xff   :  { %1581 = vmatpush.bf16.msra.mxu2 %v9005_v13  ;;  %1594 = vmatpush.bf16.msra.mxu3 %v9133_v14  ;;  %v9690_v13 = vld [vmem:[%s22021_s2 + $0x5f8] sm:$0xf0]  ;;  %v8941_v14 = vor.u32 %v13409_v57, %v8938_v58  ;;  %v13585_v50 = vld [vmem:[%s22021_s2 + $0x58c] sm:$0xf] }
 0x100   :  { %v9693_v22 = vor.u32 %v13597_v2, %v9690_v13  ;;  %v9242_v57 = vld [vmem:[%s22021_s2 + $0x278] sm:$0xf0]  ;;  %v9645_v1 = vor.u32 %v13585_v50, %v9642_v55  ;;  %v13481_v2 = vld [vmem:[%s22021_s2 + $0x24c] sm:$0xf]  ;;  %v13694_v50 = vld [vmem:[%s22024_s5 + $0x2ec] sm:$0xf0] }
 0x101   :  { %v9226_v13 = vld [vmem:[%s22021_s2 + $0x258] sm:$0xf0]  ;;  %v10192_v55 = vld [vmem:[%s22024_s5 + $0x3e0] sm:$0xf] }
 0x102   :  { %1556 = vmatpush.bf16.msra.mxu0 %v9497_v23  ;;  %1569 = vmatpush.bf16.msra.mxu1 %v9625_v24  ;;  %v13529_v23 = vld [vmem:[%s22021_s2 + $0x3cc] sm:$0xf]  ;;  %v9418_v24 = vld [vmem:[%s22021_s2 + $0x3d8] sm:$0xf0] }
 0x103   :  { %1582 = vmatpush.bf16.msra.mxu2 %v8989_v27  ;;  %1595 = vmatpush.bf16.msra.mxu3 %v9117_v28  ;;  %v9546_v27 = vld [vmem:[%s22021_s2 + $0x4d8] sm:$0xf0]  ;;  %v13593_v28 = vld [vmem:[%s22021_s2 + $0x5cc] sm:$0xf]  ;;  %v9421_v54 = vor.u32 %v13529_v23, %v9418_v24  ;;  %v9229_v23 = vor.u32 %v13481_v2, %v9226_v13  ;;  %v10176_v2 = vld [vmem:[%s22024_s5 + $0x3c0] sm:$0xf] }
 0x104   :  { %v9549_v32 = vor.u32 %v13561_v25, %v9546_v27  ;;  %v9677_v8 = vor.u32 %v13593_v28, %v9674_v29  ;;  %v13477_v25 = vld [vmem:[%s22021_s2 + $0x22c] sm:$0xf]  ;;  %v9485_v27 = vor.u32 %v13545_v19, %v9482_v20  ;;  %v9578_v40 = vld [vmem:[%s22021_s2 + $0x518] sm:$0xf0]  ;;  %v13722_v13 = vld [vmem:[%s22024_s5 + $0x3cc] sm:$0xf0] }
 0x105   :  { %v13509_v29 = vld [vmem:[%s22021_s2 + $0x32c] sm:$0xf]  ;;  %v13622_v19 = vld [vmem:[%s22024_s5 + $0xac] sm:$0xf0] }
 0x106   :  { %1557 = vmatpush.bf16.msra.mxu0 %v9481_v10  ;;  %1570 = vmatpush.bf16.msra.mxu1 %v9609_v18  ;;  %v9402_v10 = vld [vmem:[%s22021_s2 + $0x3b8] sm:$0xf0]  ;;  %v13557_v18 = vld [vmem:[%s22021_s2 + $0x4ac] sm:$0xf]  ;;  %v14543_v20 = vld [vmem:[%s22020_s1 + $0x10] sm:$0xff] }
 0x107   :  { %1583 = vmatpush.bf16.msra.mxu2 %v8973_v36  ;;  %1596 = vmatpush.bf16.msra.mxu3 %v9101_v37  ;;  %v13589_v36 = vld [vmem:[%s22021_s2 + $0x5ac] sm:$0xf]  ;;  %v9658_v37 = vld [vmem:[%s22021_s2 + $0x5b8] sm:$0xf0]  ;;  %v9405_v0 = vor.u32 %v13525_v33, %v9402_v10  ;;  %v9213_v33 = vor.u32 %v13477_v25, %v9210_v26 }
 0x108   :  { %v14544_v26 = vld [vmem:[%s22020_s1 + $0x18] sm:$0xff] }
 0x10a   :  { %1558 = vmatpush.bf16.msra.mxu0 %v9465_v44  ;;  %1571 = vmatpush.bf16.msra.mxu1 %v9593_v46  ;;  %v115_v44 = vsel %vm114_vm4, %v15115_v61, %v113_v34  ;;  %v9514_v46 = vld [vmem:[%s22021_s2 + $0x498] sm:$0xf0]  ;;  %v13505_v34 = vld [vmem:[%s22021_s2 + $0x30c] sm:$0xf] }
 0x10b   :  { %1584 = vmatpush.bf16.msra.mxu2 %v8957_v45  ;;  %1597 = vmatpush.bf16.msra.mxu3 %v9085_v56  ;;  %v9389_v45 = vor.u32 %v13521_v42, %v9386_v16  ;;  %v13485_v56 = vld [vmem:[%s22021_s2 + $0x26c] sm:$0xf]  ;;  %v118_v58 = vsel %vm116_vm5, %v117_v38, %v115_v44  ;;  %v9517_v59 = vor.u32 %v13553_v43, %v9514_v46  ;;  %v9498_v61 = vld [vmem:[%s22021_s2 + $0x478] sm:$0xf0]  ;;  %v13662_v42 = vld [vmem:[%s22024_s5 + $0x1ec] sm:$0xf0] }
 0x10c   :  { %v13537_v38 = vld [vmem:[%s22021_s2 + $0x40c] sm:$0xf]  ;;  %v10064_v16 = vld [vmem:[%s22024_s5 + $0x2e0] sm:$0xf] }
 0x10d   :  { %v10065_v62 = vor.u32 %v13694_v50, %v10064_v16 }
 0x10e   :  { %1559 = vmatpush.bf16.msra.mxu0 %v9449_v7  ;;  %1572 = vmatpush.bf16.msra.mxu1 %v9577_v11  ;;  %v119_v7 = vadd.f32 1e-09, %v118_v58  ;;  %v9245_v11 = vor.u32 %v13485_v56, %v9242_v57 }
 0x10f   :  { %1585 = vmatpush.bf16.msra.mxu2 %v8941_v14  ;;  %1598 = vmatpush.bf16.msra.mxu3 %v9069_v15  ;;  %v9501_v14 = vor.u32 %v13549_v63, %v9498_v61  ;;  %v9629_v15 = vor.u32 %v13581_v5, %v9626_v6  ;;  %v13658_v61 = vld [vmem:[%s22024_s5 + $0x1cc] sm:$0xf0]  ;;  %v10048_v5 = vld [vmem:[%s22024_s5 + $0x2c0] sm:$0xf] }
 0x110   :  { %14539 = vrcp.f32 %v119_v7  ;;  %v16062_v6 = vld [vmem:[%s22022_s3] sm:$0xf] }
 0x111   :  { %1560 = vmatmul.bf16.vlgmr.msra.gmra.mxu0 %v15303_v51  ;;  %1573 = vmatmul.bf16.vlgmr.msra.gmra.mxu1 %v15307_v53  ;;  %v14541_v7 = vld [vmem:[%s22020_s1] sm:$0xff]  ;;  %v376_v25 = vperm.slane %v16062_v6, 0 }
 0x112   :  { %1604 = vmatpush.bf16.msrb.mxu0 %v9309_v17  ;;  %1617 = vmatpush.bf16.msrb.mxu1 %v9437_v3  ;;  %v13513_v17 = vld [vmem:[%s22021_s2 + $0x34c] sm:$0xf]  ;;  %v9354_v3 = vld [vmem:[%s22021_s2 + $0x358] sm:$0xf0] }
 0x113   :  { %1630 = vmatpush.bf16.msrb.mxu2 %v9565_v21  ;;  %1643 = vmatpush.bf16.msrb.mxu3 %v9693_v22  ;;  %v13577_v21 = vld [vmem:[%s22021_s2 + $0x54c] sm:$0xf]  ;;  %v9610_v22 = vld [vmem:[%s22021_s2 + $0x558] sm:$0xf0]  ;;  %v9357_v24 = vor.u32 %v13513_v17, %v9354_v3  ;;  %v9776_v3 = vld [vmem:[%s22024_s5 + $0xa0] sm:$0xf] }
 0x114   :  { %1586 = vmatmul.bf16.vlgmr.msra.gmra.mxu2 %v15158_v47  ;;  %1599 = vmatmul.bf16.vlgmr.msra.gmra.mxu3 %v15160_v48  ;;  %v9533_v47 = vor.u32 %v13557_v18, %v9530_v35  ;;  %v9661_v48 = vor.u32 %v13589_v36, %v9658_v37  ;;  %v9613_v28 = vor.u32 %v13577_v21, %v9610_v22  ;;  %v9194_v18 = vld [vmem:[%s22021_s2 + $0x218] sm:$0xf0] }
 0x115   :  { %v9322_v35 = vld [vmem:[%s22021_s2 + $0x318] sm:$0xf0]  ;;  %v9921_v22 = vor.u32 %v13658_v61, %v9920_v60 }
 0x116   :  { %1605 = vmatpush.bf16.msrb.mxu0 %v9293_v30  ;;  %1618 = vmatpush.bf16.msrb.mxu1 %v9421_v54  ;;  %v9338_v30 = vld [vmem:[%s22021_s2 + $0x338] sm:$0xf0]  ;;  %v13541_v54 = vld [vmem:[%s22021_s2 + $0x42c] sm:$0xf]  ;;  %v14540_v43 = vpop.eup %14539  ;;  %v9325_v46 = vor.u32 %v13505_v34, %v9322_v35  ;;  %v13650_v35 = vld [vmem:[%s22024_s5 + $0x18c] sm:$0xf0] }
 0x117   :  { %1631 = vmatpush.bf16.msrb.mxu2 %v9549_v32  ;;  %1644 = vmatpush.bf16.msrb.mxu3 %v9677_v8  ;;  %v9594_v32 = vld [vmem:[%s22021_s2 + $0x538] sm:$0xf0]  ;;  %v13473_v8 = vld [vmem:[%s22021_s2 + $0x20c] sm:$0xf]  ;;  %v9341_v10 = vor.u32 %v13509_v29, %v9338_v30  ;;  %v9469_v36 = vor.u32 %v13541_v54, %v9466_v4  ;;  %v16096_v21 = vmul.f32 %v14543_v20, %v14540_v43  ;;  %v10032_v30 = vld [vmem:[%s22024_s5 + $0x2a0] sm:$0xf] }
 0x118   :  { %v9597_v37 = vor.u32 %v13573_v31, %v9594_v32  ;;  %v9197_v44 = vor.u32 %v13473_v8, %v9194_v18  ;;  %v10177_v29 = vor.u32 %v13722_v13, %v10176_v2  ;;  %v13686_v54 = vld [vmem:[%s22024_s5 + $0x2ac] sm:$0xf0]  ;;  %v10160_v4 = vld [vmem:[%s22024_s5 + $0x3a0] sm:$0xf] }
 0x119   :  { %164 = vst [vmem:[%s22033_s14 + $0x10] sm:$0xff] %v16096_v21  ;;  %v13718_v31 = vld [vmem:[%s22024_s5 + $0x3ac] sm:$0xf0]  ;;  %v9984_v13 = vld [vmem:[%s22024_s5 + $0x240] sm:$0xf] }
 0x11a   :  { %1606 = vmatpush.bf16.msrb.mxu0 %v9277_v9  ;;  %1619 = vmatpush.bf16.msrb.mxu1 %v9405_v0  ;;  %v9450_v9 = vld [vmem:[%s22021_s2 + $0x418] sm:$0xf0]  ;;  %v13569_v0 = vld [vmem:[%s22021_s2 + $0x50c] sm:$0xf]  ;;  %v13618_v18 = vld [vmem:[%s22024_s5 + $0x8c] sm:$0xf0]  ;;  %v10161_v34 = vor.u32 %v13718_v31, %v10160_v4 }
 0x11b   :  { %1632 = vmatpush.bf16.msrb.mxu2 %v9533_v47  ;;  %1645 = vmatpush.bf16.msrb.mxu3 %v9661_v48  ;;  %v13630_v47 = vld [vmem:[%s22024_s5 + $0xec] sm:$0xf0]  ;;  %v9936_v48 = vld [vmem:[%s22024_s5 + $0x1e0] sm:$0xf]  ;;  %v9581_v56 = vor.u32 %v13569_v0, %v9578_v40 }
 0x11c   :  { %v9809_v57 = vor.u32 %v13630_v47, %v9808_v41  ;;  %v9937_v58 = vor.u32 %v13662_v42, %v9936_v48  ;;  %v13714_v0 = vld [vmem:[%s22024_s5 + $0x38c] sm:$0xf0]  ;;  %v9744_v47 = vld [vmem:[%s22024_s5 + $0x60] sm:$0xf] }
 0x11d   :  { %v13614_v48 = vld [vmem:[%s22024_s5 + $0x6c] sm:$0xf0]  ;;  %v10096_v31 = vld [vmem:[%s22024_s5 + $0x320] sm:$0xf] }
 0x11e   :  { %1607 = vmatpush.bf16.msrb.mxu0 %v9261_v39  ;;  %1620 = vmatpush.bf16.msrb.mxu1 %v9389_v45  ;;  %v13726_v39 = vld [vmem:[%s22024_s5 + $0x3ec] sm:$0xf0]  ;;  %v9453_v45 = vor.u32 %v13537_v38, %v9450_v9  ;;  %v10144_v9 = vld [vmem:[%s22024_s5 + $0x380] sm:$0xf] }
 0x11f   :  { %1633 = vmatpush.bf16.msrb.mxu2 %v9517_v59  ;;  %1646 = vmatpush.bf16.msrb.mxu3 %v9645_v1  ;;  %v9792_v59 = vld [vmem:[%s22024_s5 + $0xc0] sm:$0xf]  ;;  %v13626_v1 = vld [vmem:[%s22024_s5 + $0xcc] sm:$0xf0]  ;;  %v10193_v63 = vor.u32 %v13726_v39, %v10192_v55  ;;  %v10145_v16 = vor.u32 %v13714_v0, %v10144_v9 }
 0x120   :  { %v9793_v17 = vor.u32 %v13626_v1, %v9792_v59  ;;  %v13682_v38 = vld [vmem:[%s22024_s5 + $0x28c] sm:$0xf0]  ;;  %v9745_v1 = vor.u32 %v13614_v48, %v9744_v47  ;;  %v10080_v9 = vld [vmem:[%s22024_s5 + $0x300] sm:$0xf]  ;;  %v9810_v47 = vld [vmem:[%s22024_s5 + $0xf0] sm:$0xf0] }
 0x121   :  { %v13678_v39 = vld [vmem:[%s22024_s5 + $0x26c] sm:$0xf0]  ;;  %v13660_v48 = vld [vmem:[%s22024_s5 + $0x1e4] sm:$0xf] }
 0x122   :  { %1608 = vmatpush.bf16.msrb.mxu0 %v9245_v11  ;;  %1621 = vmatpush.bf16.msrb.mxu1 %v9373_v12  ;;  %v16067_v11 = vmul.f32 %v14541_v7, %v14540_v43  ;;  %v13690_v12 = vld [vmem:[%s22024_s5 + $0x2cc] sm:$0xf0] }
 0x123   :  { %1634 = vmatpush.bf16.msrb.mxu2 %v9501_v14  ;;  %1647 = vmatpush.bf16.msrb.mxu3 %v9629_v15  ;;  %v14542_v14 = vld [vmem:[%s22020_s1 + $0x8] sm:$0xff]  ;;  %v13642_v2 = vld [vmem:[%s22024_s5 + $0x14c] sm:$0xf0] }
 0x124   :  { %v16081_v15 = vmul.f32 %v14542_v14, %v14540_v43  ;;  %162 = vst [vmem:[%s22033_s14] sm:$0xff] %v16067_v11  ;;  %v13674_v14 = vld [vmem:[%s22024_s5 + $0x24c] sm:$0xf0] }
 0x125   :  { %v13670_v4 = vld [vmem:[%s22024_s5 + $0x22c] sm:$0xf0] }
 0x126   :  { %1609 = vmatpush.bf16.msrb.mxu0 %v9229_v23  ;;  %1622 = vmatpush.bf16.msrb.mxu1 %v9357_v24  ;;  %v9904_v23 = vld [vmem:[%s22024_s5 + $0x1a0] sm:$0xf]  ;;  %v13654_v24 = vld [vmem:[%s22024_s5 + $0x1ac] sm:$0xf0]  ;;  %163 = vst [vmem:[%s22033_s14 + $0x8] sm:$0xff] %v16081_v15 }
 0x127   :  { %1635 = vmatpush.bf16.msrb.mxu2 %v9485_v27  ;;  %1648 = vmatpush.bf16.msrb.mxu3 %v9613_v28  ;;  %v16112_v27 = vmul.f32 %v14544_v26, %v14540_v43  ;;  %v10049_v28 = vor.u32 %v13690_v12, %v10048_v5  ;;  %v9905_v8 = vor.u32 %v13654_v24, %v9904_v23  ;;  %v9872_v43 = vld [vmem:[%s22024_s5 + $0x160] sm:$0xf]  ;;  %v13606_v23 = vld [vmem:[%s22024_s5 + $0x2c] sm:$0xf0] }
 0x128   :  { %v9856_v12 = vld [vmem:[%s22024_s5 + $0x140] sm:$0xf]  ;;  %v9985_v24 = vor.u32 %v13674_v14, %v9984_v13  ;;  %v13698_v0 = vld [vmem:[%s22024_s5 + $0x30c] sm:$0xf0]  ;;  %v13688_v13 = vld [vmem:[%s22024_s5 + $0x2c4] sm:$0xf]  ;;  %v16302_v14 = vpack.c.bf16 %v16067_v11, %v16067_v11 }
 0x129   :  { %165 = vst [vmem:[%s22033_s14 + $0x18] sm:$0xff] %v16112_v27  ;;  %v9857_v20 = vor.u32 %v13642_v2, %v9856_v12  ;;  %v9840_v26 = vld [vmem:[%s22024_s5 + $0x120] sm:$0xf]  ;;  %v13656_v12 = vld [vmem:[%s22024_s5 + $0x1c4] sm:$0xf] }
 0x12a   :  { %1610 = vmatpush.bf16.msrb.mxu0 %v9213_v33  ;;  %1623 = vmatpush.bf16.msrb.mxu1 %v9341_v10  ;;  %v9760_v10 = vld [vmem:[%s22024_s5 + $0x80] sm:$0xf]  ;;  %v9922_v2 = vld [vmem:[%s22024_s5 + $0x1d0] sm:$0xf0] }
 0x12b   :  { %1636 = vmatpush.bf16.msrb.mxu2 %v9469_v36  ;;  %1649 = vmatpush.bf16.msrb.mxu3 %v9597_v37  ;;  %v10016_v36 = vld [vmem:[%s22024_s5 + $0x280] sm:$0xf]  ;;  %v9761_v40 = vor.u32 %v13618_v18, %v9760_v10 }
 0x12c   :  { %v10017_v42 = vor.u32 %v13682_v38, %v10016_v36  ;;  %v13666_v38 = vld [vmem:[%s22024_s5 + $0x20c] sm:$0xf0] }
 0x12d   :  { %v1366_v32 = vpop.f32.mrf.mxu1 }
 0x12e   :  { %1611 = vmatpush.bf16.msrb.mxu0 %v9197_v44  ;;  %1624 = vmatpush.bf16.msrb.mxu1 %v9325_v46  ;;  %v13646_v44 = vld [vmem:[%s22024_s5 + $0x16c] sm:$0xf0]  ;;  %v10000_v46 = vld [vmem:[%s22024_s5 + $0x260] sm:$0xf] }
 0x12f   :  { %1637 = vmatpush.bf16.msrb.mxu2 %v9453_v45  ;;  %1650 = vmatpush.bf16.msrb.mxu3 %v9581_v56  ;;  %v10128_v45 = vld [vmem:[%s22024_s5 + $0x360] sm:$0xf]  ;;  %v13710_v56 = vld [vmem:[%s22024_s5 + $0x36c] sm:$0xf0]  ;;  %v9873_v60 = vor.u32 %v13646_v44, %v9872_v43  ;;  %v10001_v5 = vor.u32 %v13678_v39, %v10000_v46  ;;  %v377_v43 = vperm.slane %v16062_v6, 1  ;;  %v10081_v6 = vor.u32 %v13698_v0, %v10080_v9 }
 0x130   :  { %v10129_v7 = vor.u32 %v13710_v56, %v10128_v45  ;;  %v10194_v39 = vld [vmem:[%s22024_s5 + $0x3f0] sm:$0xf0] }
 0x131   :  { %1612 = vmatmul.bf16.vlgmr.msrb.gmra.mxu0 %v15162_v49  ;;  %1625 = vmatmul.bf16.vlgmr.msrb.gmra.mxu1 %v15173_v52  ;;  %v1353_v49 = vpop.f32.mrf.mxu0  ;;  %v9777_v52 = vor.u32 %v13622_v19, %v9776_v3  ;;  %v13706_v3 = vld [vmem:[%s22024_s5 + $0x34c] sm:$0xf0] }
 0x132   :  { %2442 = vmatpush.bf16.msra.mxu0 %v9809_v57  ;;  %2455 = vmatpush.bf16.msra.mxu1 %v9937_v58  ;;  %v1354_v33 = vadd.f32 %v1353_v49, %v376_v25  ;;  %v13702_v49 = vld [vmem:[%s22024_s5 + $0x32c] sm:$0xf0] }
 0x133   :  { %2468 = vmatpush.bf16.msra.mxu2 %v10065_v62  ;;  %2481 = vmatpush.bf16.msra.mxu3 %v10193_v63  ;;  %v9728_v62 = vld [vmem:[%s22024_s5 + $0x40] sm:$0xf]  ;;  %v13610_v63 = vld [vmem:[%s22024_s5 + $0x4c] sm:$0xf0] }
 0x134   :  { %1638 = vmatmul.bf16.vlgmr.msrb.gmra.mxu2 %v15303_v51  ;;  %1651 = vmatmul.bf16.vlgmr.msrb.gmra.mxu3 %v15307_v53  ;;  %v10033_v51 = vor.u32 %v13686_v54, %v10032_v30  ;;  %v9888_v53 = vld [vmem:[%s22024_s5 + $0x180] sm:$0xf]  ;;  %v1367_v37 = vadd.f32 %v1366_v32, %v1354_v33  ;;  %v1379_v50 = vpop.f32.mrf.mxu2  ;;  %v1392_v55 = vpop.f32.mrf.mxu3  ;;  %v9729_v19 = vor.u32 %v13610_v63, %v9728_v62  ;;  %v13602_v33 = vld [vmem:[%s22024_s5 + $0xc] sm:$0xf0] }
 0x135   :  { %v9889_v41 = vor.u32 %v13650_v35, %v9888_v53  ;;  %v1368_v59 = vpop.f32.mrf.mxu1  ;;  %v13634_v53 = vld [vmem:[%s22024_s5 + $0x10c] sm:$0xf0]  ;;  %v9952_v35 = vld [vmem:[%s22024_s5 + $0x200] sm:$0xf] }
 0x136   :  { %2443 = vmatpush.bf16.msra.mxu0 %v9793_v17  ;;  %2456 = vmatpush.bf16.msra.mxu1 %v9921_v22  ;;  %v1380_v57 = vadd.f32 %v1379_v50, %v1367_v37  ;;  %v10112_v17 = vld [vmem:[%s22024_s5 + $0x340] sm:$0xf]  ;;  %v10097_v37 = vor.u32 %v13702_v49, %v10096_v31  ;;  %v10066_v50 = vld [vmem:[%s22024_s5 + $0x2f0] sm:$0xf0]  ;;  %v9953_v45 = vor.u32 %v13666_v38, %v9952_v35  ;;  %v13680_v35 = vld [vmem:[%s22024_s5 + $0x284] sm:$0xf] }
 0x137   :  { %2469 = vmatpush.bf16.msra.mxu2 %v10049_v28  ;;  %2482 = vmatpush.bf16.msra.mxu3 %v10177_v29  ;;  %v9712_v22 = vld [vmem:[%s22024_s5 + $0x20] sm:$0xf]  ;;  %v10113_v25 = vor.u32 %v13706_v3, %v10112_v17  ;;  %v13638_v28 = vld [vmem:[%s22024_s5 + $0x12c] sm:$0xf0]  ;;  %v16306_v17 = vpack.c.bf16 %v16081_v15, %v16081_v15  ;;  %v10050_v3 = vld [vmem:[%s22024_s5 + $0x2d0] sm:$0xf0]  ;;  %v16323_v15 = vpack.c.bf16 %v16112_v27, %v16112_v27 }
 0x138   :  { %v1393_v61 = vadd.f32 %v1392_v55, %v1380_v57  ;;  %v9968_v29 = vld [vmem:[%s22024_s5 + $0x220] sm:$0xf]  ;;  %v9713_v10 = vor.u32 %v13606_v23, %v9712_v22  ;;  %v9841_v18 = vor.u32 %v13638_v28, %v9840_v26  ;;  %v13724_v55 = vld [vmem:[%s22024_s5 + $0x3e4] sm:$0xf]  ;;  %v16319_v22 = vpack.c.bf16 %v16096_v21, %v16096_v21  ;;  %v9778_v26 = vld [vmem:[%s22024_s5 + $0xb0] sm:$0xf0] }
 0x139   :  { %v1355_v58 = vpop.f32.mrf.mxu0  ;;  %v9969_v36 = vor.u32 %v13670_v4, %v9968_v29  ;;  %v10197_v63 = vor.u32 %v13724_v55, %v10194_v39  ;;  %v10053_v21 = vor.u32 %v13688_v13, %v10050_v3  ;;  %v13652_v27 = vld [vmem:[%s22024_s5 + $0x1a4] sm:$0xf]  ;;  %v9906_v29 = vld [vmem:[%s22024_s5 + $0x1b0] sm:$0xf0] }
 0x13a   :  { %2444 = vmatpush.bf16.msra.mxu0 %v9777_v52  ;;  %2457 = vmatpush.bf16.msra.mxu1 %v9905_v8  ;;  %v9696_v8 = vld [vmem:[%s22024_s5] sm:$0xf]  ;;  %v13716_v4 = vld [vmem:[%s22024_s5 + $0x3a4] sm:$0xf]  ;;  %v10162_v31 = vld [vmem:[%s22024_s5 + $0x3b0] sm:$0xf0] }
 0x13b   :  { %2470 = vmatpush.bf16.msra.mxu2 %v10033_v51  ;;  %2483 = vmatpush.bf16.msra.mxu3 %v10161_v34  ;;  %v9824_v34 = vld [vmem:[%s22024_s5 + $0x100] sm:$0xf]  ;;  %v9697_v44 = vor.u32 %v13602_v33, %v9696_v8  ;;  %v13616_v33 = vld [vmem:[%s22024_s5 + $0x84] sm:$0xf]  ;;  %v10146_v38 = vld [vmem:[%s22024_s5 + $0x390] sm:$0xf0] }
 0x13c   :  { %v1381_v30 = vpop.f32.mrf.mxu2  ;;  %v1394_v54 = vpop.f32.mrf.mxu3  ;;  %v9825_v46 = vor.u32 %v13634_v53, %v9824_v34  ;;  %v13648_v34 = vld [vmem:[%s22024_s5 + $0x184] sm:$0xf]  ;;  %v9890_v53 = vld [vmem:[%s22024_s5 + $0x190] sm:$0xf0] }
 0x13d   :  { %v1418_v52 = vpop.f32.mrf.mxu1  ;;  %v13684_v30 = vld [vmem:[%s22024_s5 + $0x2a4] sm:$0xf]  ;;  %v10034_v54 = vld [vmem:[%s22024_s5 + $0x2b0] sm:$0xf0] }
 0x13e   :  { %2445 = vmatpush.bf16.msra.mxu0 %v9761_v40  ;;  %2458 = vmatpush.bf16.msra.mxu1 %v9889_v41  ;;  %v13628_v41 = vld [vmem:[%s22024_s5 + $0xe4] sm:$0xf]  ;;  %v9986_v13 = vld [vmem:[%s22024_s5 + $0x250] sm:$0xf0] }
 0x13f   :  { %2471 = vmatpush.bf16.msra.mxu2 %v10017_v42  ;;  %2484 = vmatpush.bf16.msra.mxu3 %v10145_v16  ;;  %v9938_v42 = vld [vmem:[%s22024_s5 + $0x1f0] sm:$0xf0]  ;;  %v13692_v16 = vld [vmem:[%s22024_s5 + $0x2e4] sm:$0xf]  ;;  %v9813_v56 = vor.u32 %v13628_v41, %v9810_v47 }
 0x140   :  { %v9941_v57 = vor.u32 %v13660_v48, %v9938_v42  ;;  %v10069_v62 = vor.u32 %v13692_v16, %v10066_v50  ;;  %v9893_v48 = vor.u32 %v13648_v34, %v9890_v53  ;;  %v13612_v42 = vld [vmem:[%s22024_s5 + $0x64] sm:$0xf]  ;;  %v9746_v16 = vld [vmem:[%s22024_s5 + $0x70] sm:$0xf0] }
 0x141   :  { %v1405_v32 = vpop.f32.mrf.mxu0  ;;  %v9874_v50 = vld [vmem:[%s22024_s5 + $0x170] sm:$0xf0]  ;;  %v13676_v55 = vld [vmem:[%s22024_s5 + $0x264] sm:$0xf] }
 0x142   :  { %2446 = vmatpush.bf16.msra.mxu0 %v9745_v1  ;;  %2459 = vmatpush.bf16.msra.mxu1 %v9873_v60  ;;  %v1406_v51 = vadd.f32 %v1405_v32, %v1393_v61  ;;  %v13624_v1 = vld [vmem:[%s22024_s5 + $0xc4] sm:$0xf]  ;;  %v9794_v60 = vld [vmem:[%s22024_s5 + $0xd0] sm:$0xf0]  ;;  %v9909_v32 = vor.u32 %v13652_v27, %v9906_v29 }
 0x143   :  { %2472 = vmatpush.bf16.msra.mxu2 %v10001_v5  ;;  %2485 = vmatpush.bf16.msra.mxu3 %v10129_v7  ;;  %v9797_v23 = vor.u32 %v13624_v1, %v9794_v60  ;;  %v13608_v1 = vld [vmem:[%s22024_s5 + $0x44] sm:$0xf]  ;;  %v9730_v60 = vld [vmem:[%s22024_s5 + $0x50] sm:$0xf0] }
 0x144   :  { %v16258_v40 = vadd.f32 %v1418_v52, %v1406_v51  ;;  %v1431_v58 = vpop.f32.mrf.mxu2  ;;  %v1444_v59 = vpop.f32.mrf.mxu3  ;;  %v10165_v51 = vor.u32 %v13716_v4, %v10162_v31  ;;  %v13704_v3 = vld [vmem:[%s22024_s5 + $0x344] sm:$0xf]  ;;  %v9714_v27 = vld [vmem:[%s22024_s5 + $0x30] sm:$0xf0] }
 0x145   :  { %v1432_v61 = vadd.f32 %v1431_v58, %v377_v43  ;;  %v1420_v7 = vpop.f32.mrf.mxu1  ;;  %v9749_v58 = vor.u32 %v13612_v42, %v9746_v16  ;;  %v13636_v29 = vld [vmem:[%s22024_s5 + $0x124] sm:$0xf]  ;;  %v9698_v53 = vld [vmem:[%s22024_s5 + $0x10] sm:$0xf0] }
 0x146   :  { %2447 = vmatpush.bf16.msra.mxu0 %v9729_v19  ;;  %2460 = vmatpush.bf16.msra.mxu1 %v9857_v20  ;;  %v13720_v19 = vld [vmem:[%s22024_s5 + $0x3c4] sm:$0xf]  ;;  %v10178_v20 = vld [vmem:[%s22024_s5 + $0x3d0] sm:$0xf0] }
 0x147   :  { %2473 = vmatpush.bf16.msra.mxu2 %v9985_v24  ;;  %2486 = vmatpush.bf16.msra.mxu3 %v10113_v25  ;;  %v1445_v11 = vadd.f32 %v1444_v59, %v1432_v61  ;;  %v9925_v24 = vor.u32 %v13656_v12, %v9922_v2  ;;  %v13620_v25 = vld [vmem:[%s22024_s5 + $0xa4] sm:$0xf]  ;;  %v10181_v28 = vor.u32 %v13720_v19, %v10178_v20  ;;  %v10114_v19 = vld [vmem:[%s22024_s5 + $0x350] sm:$0xf0] }
 0x148   :  { %v9781_v49 = vor.u32 %v13620_v25, %v9778_v26  ;;  %v13640_v61 = vld [vmem:[%s22024_s5 + $0x144] sm:$0xf]  ;;  %v10082_v16 = vld [vmem:[%s22024_s5 + $0x310] sm:$0xf0] }
 0x149   :  { %v1407_v5 = vpop.f32.mrf.mxu0  ;;  %v13672_v7 = vld [vmem:[%s22024_s5 + $0x244] sm:$0xf] }
 0x14a   :  { %2448 = vmatpush.bf16.msra.mxu0 %v9713_v10  ;;  %2461 = vmatpush.bf16.msra.mxu1 %v9841_v18  ;;  %v9762_v10 = vld [vmem:[%s22024_s5 + $0x90] sm:$0xf0]  ;;  %v10037_v18 = vor.u32 %v13684_v30, %v10034_v54  ;;  %v13604_v26 = vld [vmem:[%s22024_s5 + $0x24] sm:$0xf]  ;;  %v1656_v54 = vmax.f32 %v16258_v40, 0.0  ;;  %v9989_v31 = vor.u32 %v13672_v7, %v9986_v13 }
 0x14b   :  { %2474 = vmatpush.bf16.msra.mxu2 %v9969_v36  ;;  %2487 = vmatpush.bf16.msra.mxu3 %v10097_v37  ;;  %v10018_v36 = vld [vmem:[%s22024_s5 + $0x290] sm:$0xf0]  ;;  %v13712_v37 = vld [vmem:[%s22024_s5 + $0x384] sm:$0xf]  ;;  %v9765_v47 = vor.u32 %v13616_v33, %v9762_v10  ;;  %v13659_v13 = vld [vmem:[%s22024_s5 + $0x1d4] sm:$0xf0] }
 0x14c   :  { %v1433_v52 = vpop.f32.mrf.mxu2  ;;  %v1446_v8 = vpop.f32.mrf.mxu3  ;;  %v10021_v43 = vor.u32 %v13680_v35, %v10018_v36  ;;  %v9858_v5 = vld [vmem:[%s22024_s5 + $0x150] sm:$0xf0]  ;;  %v13600_v10 = vld [vmem:[%s22024_s5 + $0x4] sm:$0xf] }
 0x14d   :  { %v9842_v30 = vld [vmem:[%s22024_s5 + $0x130] sm:$0xf0]  ;;  %v13700_v8 = vld [vmem:[%s22024_s5 + $0x324] sm:$0xf] }
 0x14e   :  { %2449 = vmatpush.bf16.msra.mxu0 %v9697_v44  ;;  %2462 = vmatpush.bf16.msra.mxu1 %v9825_v46  ;;  %v1470_v0 = vpop.f32.mrf.mxu1  ;;  %v10149_v44 = vor.u32 %v13712_v37, %v10146_v38  ;;  %v13644_v46 = vld [vmem:[%s22024_s5 + $0x164] sm:$0xf]  ;;  %v9970_v52 = vld [vmem:[%s22024_s5 + $0x230] sm:$0xf0] }
 0x14f   :  { %2475 = vmatpush.bf16.msra.mxu2 %v9953_v45  ;;  %2488 = vmatpush.bf16.msra.mxu3 %v10081_v6  ;;  %v10002_v45 = vld [vmem:[%s22024_s5 + $0x270] sm:$0xf0]  ;;  %v13708_v6 = vld [vmem:[%s22024_s5 + $0x364] sm:$0xf]  ;;  %v9877_v59 = vor.u32 %v13644_v46, %v9874_v50  ;;  %v9944_v46 = vld [vmem:[%s22024_s5 + $0x1e8] sm:$0xf] }
 0x150   :  { %v10098_v40 = vld [vmem:[%s22024_s5 + $0x330] sm:$0xf0]  ;;  %v13632_v35 = vld [vmem:[%s22024_s5 + $0x104] sm:$0xf]  ;;  %v13663_v50 = vld [vmem:[%s22024_s5 + $0x1f4] sm:$0xf0] }
 0x151   :  { %2450 = vmatmul.bf16.vlgmr.msra.gmra.mxu0 %v16302_v14  ;;  %2463 = vmatmul.bf16.vlgmr.msra.gmra.mxu1 %v16306_v17  ;;  %v1457_v9 = vpop.f32.mrf.mxu0  ;;  %v9826_v36 = vld [vmem:[%s22024_s5 + $0x110] sm:$0xf0] }
 0x152   :  { %2494 = vmatpush.bf16.msrb.mxu0 %v9813_v56  ;;  %2507 = vmatpush.bf16.msrb.mxu1 %v9941_v57  ;;  %v1458_v41 = vadd.f32 %v1457_v9, %v1445_v11  ;;  %v10130_v56 = vld [vmem:[%s22024_s5 + $0x370] sm:$0xf0]  ;;  %v16404_v57 = vld [vmem:[%s22023_s4] sm:$0xf]  ;;  %v10101_v9 = vor.u32 %v13700_v8, %v10098_v40  ;;  %v13619_v8 = vld [vmem:[%s22024_s5 + $0x94] sm:$0xf0] }
 0x153   :  { %2520 = vmatpush.bf16.msrb.mxu2 %v10069_v62  ;;  %2533 = vmatpush.bf16.msrb.mxu3 %v10197_v63  ;;  %v10005_v62 = vor.u32 %v13676_v55, %v10002_v45  ;;  %v10133_v63 = vor.u32 %v13708_v6, %v10130_v56  ;;  %v8810_v20 = vperm.slane %v16404_v57, 0  ;;  %v10072_v55 = vld [vmem:[%s22024_s5 + $0x2e8] sm:$0xf]  ;;  %v9701_v45 = vor.u32 %v13600_v10, %v9698_v53  ;;  %v13695_v56 = vld [vmem:[%s22024_s5 + $0x2f4] sm:$0xf0] }
 0x154   :  { %2476 = vmatmul.bf16.vlgmr.msra.gmra.mxu2 %v16319_v22  ;;  %2489 = vmatmul.bf16.vlgmr.msra.gmra.mxu3 %v16323_v15  ;;  %v1471_v39 = vadd.f32 %v1470_v0, %v1458_v41  ;;  %v13664_v0 = vld [vmem:[%s22024_s5 + $0x204] sm:$0xf]  ;;  %v9954_v41 = vld [vmem:[%s22024_s5 + $0x210] sm:$0xf0]  ;;  %v9829_v6 = vor.u32 %v13632_v35, %v9826_v36  ;;  %v10073_v7 = vor.u32 %v13695_v56, %v10072_v55  ;;  %v9896_v10 = vld [vmem:[%s22024_s5 + $0x188] sm:$0xf] }
 0x155   :  { %v8818_v37 = vmul.f32 %v8810_v20, %v1656_v54  ;;  %v10184_v20 = vld [vmem:[%s22024_s5 + $0x3c8] sm:$0xf]  ;;  %v13687_v54 = vld [vmem:[%s22024_s5 + $0x2b4] sm:$0xf0] }
 0x156   :  { %2495 = vmatpush.bf16.msrb.mxu0 %v9797_v23  ;;  %2508 = vmatpush.bf16.msrb.mxu1 %v9925_v24  ;;  %v8811_v23 = vperm.slane %v16404_v57, 1  ;;  %v1472_v25 = vpop.f32.mrf.mxu1  ;;  %v10152_v53 = vld [vmem:[%s22024_s5 + $0x388] sm:$0xf]  ;;  %v13715_v35 = vld [vmem:[%s22024_s5 + $0x394] sm:$0xf0] }
 0x157   :  { %2521 = vmatpush.bf16.msrb.mxu2 %v10053_v21  ;;  %2534 = vmatpush.bf16.msrb.mxu3 %v10181_v28  ;;  %v1483_v12 = vpop.f32.mrf.mxu2  ;;  %v1496_v2 = vpop.f32.mrf.mxu3  ;;  %v9733_v21 = vor.u32 %v13608_v1, %v9730_v60  ;;  %v9861_v28 = vor.u32 %v13640_v61, %v9858_v5  ;;  %v9957_v1 = vor.u32 %v13664_v0, %v9954_v41  ;;  %v9800_v61 = vld [vmem:[%s22024_s5 + $0xc8] sm:$0xf]  ;;  %v13627_v5 = vld [vmem:[%s22024_s5 + $0xd4] sm:$0xf0] }
 0x158   :  { %v1484_v11 = vadd.f32 %v1483_v12, %v1471_v39  ;;  %v9784_v25 = vld [vmem:[%s22024_s5 + $0xa8] sm:$0xf]  ;;  %v13615_v41 = vld [vmem:[%s22024_s5 + $0x74] sm:$0xf0] }
 0x159   :  { %v1459_v24 = vpop.f32.mrf.mxu0  ;;  %v9752_v0 = vld [vmem:[%s22024_s5 + $0x68] sm:$0xf]  ;;  %v13611_v56 = vld [vmem:[%s22024_s5 + $0x54] sm:$0xf0] }
 0x15a   :  { %2496 = vmatpush.bf16.msrb.mxu0 %v9781_v49  ;;  %2509 = vmatpush.bf16.msrb.mxu1 %v9909_v32  ;;  %v1497_v4 = vadd.f32 %v1496_v2, %v1484_v11  ;;  %v10117_v49 = vor.u32 %v13704_v3, %v10114_v19  ;;  %v13668_v32 = vld [vmem:[%s22024_s5 + $0x224] sm:$0xf]  ;;  %v9928_v2 = vld [vmem:[%s22024_s5 + $0x1c8] sm:$0xf]  ;;  %v13691_v19 = vld [vmem:[%s22024_s5 + $0x2d4] sm:$0xf0]  ;;  %v9753_v55 = vor.u32 %v13615_v41, %v9752_v0 }
 0x15b   :  { %2522 = vmatpush.bf16.msrb.mxu2 %v10037_v18  ;;  %2535 = vmatpush.bf16.msrb.mxu3 %v10165_v51  ;;  %v9717_v18 = vor.u32 %v13604_v26, %v9714_v27  ;;  %v9845_v51 = vor.u32 %v13636_v29, %v9842_v30  ;;  %v9973_v34 = vor.u32 %v13668_v32, %v9970_v52  ;;  %v10056_v3 = vld [vmem:[%s22024_s5 + $0x2c8] sm:$0xf]  ;;  %v13723_v11 = vld [vmem:[%s22024_s5 + $0x3d4] sm:$0xf0]  ;;  %v13693_v0 = vld [vmem:[%s22024_s5 + $0x2ec] sm:$0xf] }
 0x15c   :  { %v1657_v33 = vmax.f32 %v1497_v4, 0.0  ;;  %v9929_v24 = vor.u32 %v13659_v13, %v9928_v2  ;;  %v13623_v26 = vld [vmem:[%s22024_s5 + $0xb4] sm:$0xf0]  ;;  %v9912_v27 = vld [vmem:[%s22024_s5 + $0x1a8] sm:$0xf] }
 0x15d   :  { %v13655_v29 = vld [vmem:[%s22024_s5 + $0x1b4] sm:$0xf0]  ;;  %v10040_v30 = vld [vmem:[%s22024_s5 + $0x2a8] sm:$0xf] }
 0x15e   :  { %2497 = vmatpush.bf16.msrb.mxu0 %v9765_v47  ;;  %2510 = vmatpush.bf16.msrb.mxu1 %v9893_v48  ;;  %v8819_v38 = vmul.f32 %v8811_v23, %v1657_v33  ;;  %v13696_v47 = vld [vmem:[%s22024_s5 + $0x304] sm:$0xf]  ;;  %v9801_v23 = vor.u32 %v13627_v5, %v9800_v61  ;;  %v10168_v4 = vld [vmem:[%s22024_s5 + $0x3a8] sm:$0xf]  ;;  %v9913_v32 = vor.u32 %v13655_v29, %v9912_v27  ;;  %v13675_v5 = vld [vmem:[%s22024_s5 + $0x254] sm:$0xf0] }
 0x15f   :  { %2523 = vmatpush.bf16.msrb.mxu2 %v10021_v43  ;;  %2536 = vmatpush.bf16.msrb.mxu3 %v10149_v44  ;;  %v1485_v48 = vpop.f32.mrf.mxu2  ;;  %v1498_v42 = vpop.f32.mrf.mxu3  ;;  %v9816_v43 = vld [vmem:[%s22024_s5 + $0xe8] sm:$0xf]  ;;  %v13631_v44 = vld [vmem:[%s22024_s5 + $0xf4] sm:$0xf0]  ;;  %v10085_v60 = vor.u32 %v13696_v47, %v10082_v16  ;;  %v10041_v40 = vor.u32 %v13687_v54, %v10040_v30 }
 0x160   :  { %v16496_v39 = vadd.f32 %v8819_v38, %v8818_v37  ;;  %v9768_v52 = vld [vmem:[%s22024_s5 + $0x88] sm:$0xf]  ;;  %v10153_v48 = vor.u32 %v13715_v35, %v10152_v53  ;;  %v13647_v16 = vld [vmem:[%s22024_s5 + $0x174] sm:$0xf0]  ;;  %v13629_v53 = vld [vmem:[%s22024_s5 + $0xec] sm:$0xf] }
 0x161   :  { %v9769_v38 = vor.u32 %v13619_v8, %v9768_v52  ;;  %v9880_v42 = vld [vmem:[%s22024_s5 + $0x168] sm:$0xf]  ;;  %v13703_v29 = vld [vmem:[%s22024_s5 + $0x334] sm:$0xf0]  ;;  %v9818_v35 = vld [vmem:[%s22024_s5 + $0xf8] sm:$0xf0] }
 0x162   :  { %2498 = vmatpush.bf16.msrb.mxu0 %v9749_v58  ;;  %2511 = vmatpush.bf16.msrb.mxu1 %v9877_v59  ;;  %v10200_v58 = vld [vmem:[%s22024_s5 + $0x3e8] sm:$0xf]  ;;  %v13727_v59 = vld [vmem:[%s22024_s5 + $0x3f4] sm:$0xf0] }
 0x163   :  { %2524 = vmatpush.bf16.msrb.mxu2 %v10005_v62  ;;  %2537 = vmatpush.bf16.msrb.mxu3 %v10133_v63  ;;  %v9817_v62 = vor.u32 %v13631_v44, %v9816_v43  ;;  %v9945_v63 = vor.u32 %v13663_v50, %v9944_v46  ;;  %v10201_v12 = vor.u32 %v13727_v59, %v10200_v58  ;;  %v10008_v43 = vld [vmem:[%s22024_s5 + $0x268] sm:$0xf]  ;;  %v13679_v44 = vld [vmem:[%s22024_s5 + $0x274] sm:$0xf0] }
 0x164   :  { %v10136_v46 = vld [vmem:[%s22024_s5 + $0x368] sm:$0xf]  ;;  %v13711_v50 = vld [vmem:[%s22024_s5 + $0x374] sm:$0xf0]  ;;  %v10009_v58 = vor.u32 %v13679_v44, %v10008_v43 }
 0x165   :  { %v10137_v59 = vor.u32 %v13711_v50, %v10136_v46  ;;  %v10104_v27 = vld [vmem:[%s22024_s5 + $0x328] sm:$0xf]  ;;  %v9821_v46 = vor.u32 %v13629_v53, %v9818_v35 }
 0x166   :  { %2499 = vmatpush.bf16.msrb.mxu0 %v9733_v21  ;;  %2512 = vmatpush.bf16.msrb.mxu1 %v9861_v28  ;;  %v10057_v21 = vor.u32 %v13691_v19, %v10056_v3  ;;  %v10185_v28 = vor.u32 %v13723_v11, %v10184_v20  ;;  %v9720_v20 = vld [vmem:[%s22024_s5 + $0x28] sm:$0xf]  ;;  %v13607_v11 = vld [vmem:[%s22024_s5 + $0x34] sm:$0xf0]  ;;  %v10105_v8 = vor.u32 %v13703_v29, %v10104_v27  ;;  %v13617_v27 = vld [vmem:[%s22024_s5 + $0x8c] sm:$0xf] }
 0x167   :  { %2525 = vmatpush.bf16.msrb.mxu2 %v9989_v31  ;;  %2538 = vmatpush.bf16.msrb.mxu3 %v10117_v49  ;;  %v13719_v31 = vld [vmem:[%s22024_s5 + $0x3b4] sm:$0xf0]  ;;  %v9785_v49 = vor.u32 %v13623_v26, %v9784_v25  ;;  %v9848_v25 = vld [vmem:[%s22024_s5 + $0x128] sm:$0xf]  ;;  %v9721_v54 = vor.u32 %v13607_v11, %v9720_v20  ;;  %v13653_v20 = vld [vmem:[%s22024_s5 + $0x1ac] sm:$0xf] }
 0x168   :  { %v10169_v33 = vor.u32 %v13719_v31, %v10168_v4  ;;  %v13639_v26 = vld [vmem:[%s22024_s5 + $0x134] sm:$0xf0]  ;;  %v9704_v30 = vld [vmem:[%s22024_s5 + $0x8] sm:$0xf]  ;;  %v9914_v11 = vld [vmem:[%s22024_s5 + $0x1b8] sm:$0xf0] }
 0x169   :  { %v9849_v4 = vor.u32 %v13639_v26, %v9848_v25  ;;  %v13603_v31 = vld [vmem:[%s22024_s5 + $0x14] sm:$0xf0]  ;;  %v13717_v25 = vld [vmem:[%s22024_s5 + $0x3ac] sm:$0xf]  ;;  %v10170_v26 = vld [vmem:[%s22024_s5 + $0x3b8] sm:$0xf0] }
 0x16a   :  { %2500 = vmatpush.bf16.msrb.mxu0 %v9717_v18  ;;  %2513 = vmatpush.bf16.msrb.mxu1 %v9845_v51  ;;  %v13651_v18 = vld [vmem:[%s22024_s5 + $0x194] sm:$0xf0]  ;;  %v10024_v51 = vld [vmem:[%s22024_s5 + $0x288] sm:$0xf]  ;;  %v9705_v41 = vor.u32 %v13603_v31, %v9704_v30  ;;  %v9770_v29 = vld [vmem:[%s22024_s5 + $0x98] sm:$0xf0] }
 0x16b   :  { %2526 = vmatpush.bf16.msrb.mxu2 %v9973_v34  ;;  %2539 = vmatpush.bf16.msrb.mxu3 %v10101_v9  ;;  %v13683_v34 = vld [vmem:[%s22024_s5 + $0x294] sm:$0xf0]  ;;  %v9897_v9 = vor.u32 %v13651_v18, %v9896_v10  ;;  %v10088_v10 = vld [vmem:[%s22024_s5 + $0x308] sm:$0xf]  ;;  %v9898_v31 = vld [vmem:[%s22024_s5 + $0x198] sm:$0xf0] }
 0x16c   :  { %v10025_v47 = vor.u32 %v13683_v34, %v10024_v51  ;;  %v13699_v34 = vld [vmem:[%s22024_s5 + $0x314] sm:$0xf0] }
 0x16d   :  { %v10089_v44 = vor.u32 %v13699_v34, %v10088_v10  ;;  %v9773_v10 = vor.u32 %v13617_v27, %v9770_v29  ;;  %v9754_v34 = vld [vmem:[%s22024_s5 + $0x78] sm:$0xf0]  ;;  %v13601_v27 = vld [vmem:[%s22024_s5 + $0xc] sm:$0xf] }
 0x16e   :  { %2501 = vmatpush.bf16.msrb.mxu0 %v9701_v45  ;;  %2514 = vmatpush.bf16.msrb.mxu1 %v9829_v6  ;;  %v16583_v36 = vpop.f32.mrf.mxu0  ;;  %v16585_v37 = vpop.f32.mrf.mxu1  ;;  %v9881_v45 = vor.u32 %v13647_v16, %v9880_v42  ;;  %v9736_v6 = vld [vmem:[%s22024_s5 + $0x48] sm:$0xf]  ;;  %v13725_v42 = vld [vmem:[%s22024_s5 + $0x3ec] sm:$0xf]  ;;  %v10202_v16 = vld [vmem:[%s22024_s5 + $0x3f8] sm:$0xf0] }
 0x16f   :  { %2527 = vmatpush.bf16.msrb.mxu2 %v9957_v1  ;;  %2540 = vmatpush.bf16.msrb.mxu3 %v10085_v60  ;;  %v9864_v1 = vld [vmem:[%s22024_s5 + $0x148] sm:$0xf]  ;;  %v13643_v60 = vld [vmem:[%s22024_s5 + $0x154] sm:$0xf0]  ;;  %v9737_v3 = vor.u32 %v13611_v56, %v9736_v6  ;;  %v10205_v56 = vor.u32 %v13725_v42, %v10202_v16 }
 0x170   :  { %v9865_v19 = vor.u32 %v13643_v60, %v9864_v1  ;;  %v13689_v1 = vld [vmem:[%s22024_s5 + $0x2cc] sm:$0xf]  ;;  %v10058_v60 = vld [vmem:[%s22024_s5 + $0x2d8] sm:$0xf0] }
 0x171   :  { %2502 = vmatmul.bf16.vlgmr.msrb.gmra.mxu0 %v16302_v14  ;;  %2515 = vmatmul.bf16.vlgmr.msrb.gmra.mxu1 %v16306_v17 }
 0x172   :  { %2546 = vmatpush.bf16.msra.mxu0 %v9817_v62  ;;  %2559 = vmatpush.bf16.msra.mxu1 %v9945_v63  ;;  %v9992_v62 = vld [vmem:[%s22024_s5 + $0x248] sm:$0xf] }
 0x173   :  { %2572 = vmatpush.bf16.msra.mxu2 %v10073_v7  ;;  %2585 = vmatpush.bf16.msra.mxu3 %v10201_v12  ;;  %v10120_v7 = vld [vmem:[%s22024_s5 + $0x348] sm:$0xf]  ;;  %v13707_v12 = vld [vmem:[%s22024_s5 + $0x354] sm:$0xf0] }
 0x174   :  { %2528 = vmatmul.bf16.vlgmr.msrb.gmra.mxu2 %v16319_v22  ;;  %2541 = vmatmul.bf16.vlgmr.msrb.gmra.mxu3 %v16323_v15 }
 0x176   :  { %2547 = vmatpush.bf16.msra.mxu0 %v9801_v23  ;;  %2560 = vmatpush.bf16.msra.mxu1 %v9929_v24  ;;  %v1511_v2 = vpop.f32.mrf.mxu0  ;;  %v1524_v13 = vpop.f32.mrf.mxu1  ;;  %v9993_v23 = vor.u32 %v13675_v5, %v9992_v62  ;;  %v10121_v24 = vor.u32 %v13707_v12, %v10120_v7  ;;  %v13721_v62 = vld [vmem:[%s22024_s5 + $0x3cc] sm:$0xf]  ;;  %v10186_v5 = vld [vmem:[%s22024_s5 + $0x3d8] sm:$0xf0] }
 0x177   :  { %2573 = vmatpush.bf16.msra.mxu2 %v10057_v21  ;;  %2586 = vmatpush.bf16.msra.mxu3 %v10185_v28  ;;  %v16626_v63 = vpop.f32.mrf.mxu2  ;;  %v16628_v61 = vpop.f32.mrf.mxu3  ;;  %v9976_v21 = vld [vmem:[%s22024_s5 + $0x228] sm:$0xf]  ;;  %v13671_v28 = vld [vmem:[%s22024_s5 + $0x234] sm:$0xf0]  ;;  %v13621_v2 = vld [vmem:[%s22024_s5 + $0xac] sm:$0xf] }
 0x178   :  { %v9977_v52 = vor.u32 %v13671_v28, %v9976_v21  ;;  %v9786_v13 = vld [vmem:[%s22024_s5 + $0xb8] sm:$0xf0]  ;;  %v9917_v28 = vor.u32 %v13653_v20, %v9914_v11 }
 0x179   :  { %v9789_v21 = vor.u32 %v13621_v2, %v9786_v13 }
 0x17a   :  { %2548 = vmatpush.bf16.msra.mxu0 %v9785_v49  ;;  %2561 = vmatpush.bf16.msra.mxu1 %v9913_v32  ;;  %v9832_v49 = vld [vmem:[%s22024_s5 + $0x108] sm:$0xf]  ;;  %v13635_v32 = vld [vmem:[%s22024_s5 + $0x114] sm:$0xf0] }
 0x17b   :  { %2574 = vmatpush.bf16.msra.mxu2 %v10041_v40  ;;  %2587 = vmatpush.bf16.msra.mxu3 %v10169_v33  ;;  %v9960_v40 = vld [vmem:[%s22024_s5 + $0x208] sm:$0xf]  ;;  %v13667_v33 = vld [vmem:[%s22024_s5 + $0x214] sm:$0xf0] }
 0x17c   :  { %v9961_v43 = vor.u32 %v13667_v33, %v9960_v40 }
 0x17e   :  { %2549 = vmatpush.bf16.msra.mxu0 %v9769_v38  ;;  %2562 = vmatpush.bf16.msra.mxu1 %v9897_v9  ;;  %v13661_v38 = vld [vmem:[%s22024_s5 + $0x1ec] sm:$0xf]  ;;  %v9946_v9 = vld [vmem:[%s22024_s5 + $0x1f8] sm:$0xf0] }
 0x17f   :  { %2575 = vmatpush.bf16.msra.mxu2 %v10025_v47  ;;  %2588 = vmatpush.bf16.msra.mxu3 %v10153_v48  ;;  %v1537_v18 = vpop.f32.mrf.mxu2  ;;  %v1550_v51 = vpop.f32.mrf.mxu3  ;;  %v9833_v47 = vor.u32 %v13635_v32, %v9832_v49  ;;  %v10074_v48 = vld [vmem:[%s22024_s5 + $0x2f8] sm:$0xf0]  ;;  %v9949_v50 = vor.u32 %v13661_v38, %v9946_v9  ;;  %v13681_v49 = vld [vmem:[%s22024_s5 + $0x28c] sm:$0xf] }
 0x180   :  { %v10077_v6 = vor.u32 %v13693_v0, %v10074_v48  ;;  %v10026_v32 = vld [vmem:[%s22024_s5 + $0x298] sm:$0xf0]  ;;  %v13613_v51 = vld [vmem:[%s22024_s5 + $0x6c] sm:$0xf] }
 0x181   :  { %v10029_v53 = vor.u32 %v13681_v49, %v10026_v32  ;;  %v13645_v38 = vld [vmem:[%s22024_s5 + $0x16c] sm:$0xf]  ;;  %v9882_v9 = vld [vmem:[%s22024_s5 + $0x178] sm:$0xf0]  ;;  %v9757_v42 = vor.u32 %v13613_v51, %v9754_v34 }
 0x182   :  { %2550 = vmatpush.bf16.msra.mxu0 %v9753_v55  ;;  %2563 = vmatpush.bf16.msra.mxu1 %v9881_v45  ;;  %v13625_v55 = vld [vmem:[%s22024_s5 + $0xcc] sm:$0xf]  ;;  %v9802_v45 = vld [vmem:[%s22024_s5 + $0xd8] sm:$0xf0]  ;;  %v9885_v16 = vor.u32 %v13645_v38, %v9882_v9  ;;  %v14283_v38 = vld [vmem:[%s22028_s9 + $0x254] sm:$0xf0] }
 0x183   :  { %2576 = vmatpush.bf16.msra.mxu2 %v10009_v58  ;;  %2589 = vmatpush.bf16.msra.mxu3 %v10137_v59  ;;  %v13657_v58 = vld [vmem:[%s22024_s5 + $0x1cc] sm:$0xf]  ;;  %v9930_v59 = vld [vmem:[%s22024_s5 + $0x1d8] sm:$0xf0]  ;;  %v9805_v7 = vor.u32 %v13625_v55, %v9802_v45  ;;  %v10808_v9 = vld [vmem:[%s22028_s9 + $0x4b0] sm:$0xf] }
 0x184   :  { %v9933_v12 = vor.u32 %v13657_v58, %v9930_v59  ;;  %v13677_v0 = vld [vmem:[%s22024_s5 + $0x26c] sm:$0xf]  ;;  %v10138_v48 = vld [vmem:[%s22024_s5 + $0x378] sm:$0xf0] }
 0x185   :  { %v13641_v55 = vld [vmem:[%s22024_s5 + $0x14c] sm:$0xf]  ;;  %v9866_v45 = vld [vmem:[%s22024_s5 + $0x158] sm:$0xf0] }
 0x186   :  { %2551 = vmatpush.bf16.msra.mxu0 %v9737_v3  ;;  %2564 = vmatpush.bf16.msra.mxu1 %v9865_v19  ;;  %v10061_v3 = vor.u32 %v13689_v1, %v10058_v60  ;;  %v10189_v19 = vor.u32 %v13721_v62, %v10186_v5  ;;  %v9994_v59 = vld [vmem:[%s22024_s5 + $0x258] sm:$0xf0]  ;;  %v13705_v1 = vld [vmem:[%s22024_s5 + $0x34c] sm:$0xf]  ;;  %v9869_v13 = vor.u32 %v13641_v55, %v9866_v45  ;;  %v10448_v45 = vld [vmem:[%s22028_s9 + $0x1e0] sm:$0xf] }
 0x187   :  { %2577 = vmatpush.bf16.msra.mxu2 %v9993_v23  ;;  %2590 = vmatpush.bf16.msra.mxu3 %v10121_v24  ;;  %v13685_v23 = vld [vmem:[%s22024_s5 + $0x2ac] sm:$0xf]  ;;  %v10042_v24 = vld [vmem:[%s22024_s5 + $0x2b8] sm:$0xf0] }
 0x188   :  { %v10045_v30 = vor.u32 %v13685_v23, %v10042_v24  ;;  %v10122_v60 = vld [vmem:[%s22024_s5 + $0x358] sm:$0xf0]  ;;  %v13637_v23 = vld [vmem:[%s22024_s5 + $0x12c] sm:$0xf] }
 0x189   :  { %v10125_v11 = vor.u32 %v13705_v1, %v10122_v60  ;;  %v9850_v24 = vld [vmem:[%s22024_s5 + $0x138] sm:$0xf0]  ;;  %v10768_v60 = vld [vmem:[%s22028_s9 + $0x460] sm:$0xf] }
 0x18a   :  { %2552 = vmatpush.bf16.msra.mxu0 %v9721_v54  ;;  %2565 = vmatpush.bf16.msra.mxu1 %v9849_v4  ;;  %v10173_v54 = vor.u32 %v13717_v25, %v10170_v26  ;;  %v13649_v4 = vld [vmem:[%s22024_s5 + $0x18c] sm:$0xf]  ;;  %v9978_v26 = vld [vmem:[%s22024_s5 + $0x238] sm:$0xf0] }
 0x18b   :  { %2578 = vmatpush.bf16.msra.mxu2 %v9977_v52  ;;  %2591 = vmatpush.bf16.msra.mxu3 %v10105_v8  ;;  %v13713_v52 = vld [vmem:[%s22024_s5 + $0x38c] sm:$0xf]  ;;  %v10154_v8 = vld [vmem:[%s22024_s5 + $0x398] sm:$0xf0]  ;;  %v9901_v18 = vor.u32 %v13649_v4, %v9898_v31 }
 0x18c   :  { %v10157_v35 = vor.u32 %v13713_v52, %v10154_v8  ;;  %v13669_v25 = vld [vmem:[%s22024_s5 + $0x22c] sm:$0xf]  ;;  %v9834_v31 = vld [vmem:[%s22024_s5 + $0x118] sm:$0xf0] }
 0x18d   :  { %v13633_v4 = vld [vmem:[%s22024_s5 + $0x10c] sm:$0xf]  ;;  %v9981_v49 = vor.u32 %v13669_v25, %v9978_v26  ;;  %v9962_v8 = vld [vmem:[%s22024_s5 + $0x218] sm:$0xf0]  ;;  %v14343_v25 = vld [vmem:[%s22028_s9 + $0x434] sm:$0xf0] }
 0x18e   :  { %2553 = vmatpush.bf16.msra.mxu0 %v9705_v41  ;;  %2566 = vmatpush.bf16.msra.mxu1 %v9833_v47  ;;  %v16787_v40 = vpop.f32.mrf.mxu0  ;;  %v16789_v33 = vpop.f32.mrf.mxu1  ;;  %v10010_v41 = vld [vmem:[%s22024_s5 + $0x278] sm:$0xf0]  ;;  %v13709_v47 = vld [vmem:[%s22024_s5 + $0x36c] sm:$0xf]  ;;  %v11048_v26 = vld [vmem:[%s22028_s9 + $0x690] sm:$0xf] }
 0x18f   :  { %2579 = vmatpush.bf16.msra.mxu2 %v9961_v43  ;;  %2592 = vmatpush.bf16.msra.mxu3 %v10089_v44  ;;  %v13609_v43 = vld [vmem:[%s22024_s5 + $0x4c] sm:$0xf]  ;;  %v9738_v44 = vld [vmem:[%s22024_s5 + $0x58] sm:$0xf0] }
 0x190   :  { %v9741_v2 = vor.u32 %v13609_v43, %v9738_v44  ;;  %v13665_v52 = vld [vmem:[%s22024_s5 + $0x20c] sm:$0xf] }
 0x191   :  { %2554 = vmatmul.bf16.vlgmr.msra.gmra.mxu0 %v16302_v14  ;;  %2567 = vmatmul.bf16.vlgmr.msra.gmra.mxu1 %v16306_v17  ;;  %v9965_v43 = vor.u32 %v13665_v52, %v9962_v8  ;;  %v14493_v52 = vld [vmem:[%s22028_s9 + $0x8e4] sm:$0xf0] }
 0x192   :  { %2598 = vmatpush.bf16.msrb.mxu0 %v9821_v46  ;;  %2611 = vmatpush.bf16.msrb.mxu1 %v9949_v50  ;;  %v10013_v46 = vor.u32 %v13677_v0, %v10010_v41  ;;  %v10141_v50 = vor.u32 %v13709_v47, %v10138_v48  ;;  %v11128_v0 = vld [vmem:[%s22028_s9 + $0x730] sm:$0xf]  ;;  %v9837_v47 = vor.u32 %v13633_v4, %v9834_v31  ;;  %v14443_v48 = vld [vmem:[%s22028_s9 + $0x754] sm:$0xf0]  ;;  %v14253_v4 = vld [vmem:[%s22028_s9 + $0x164] sm:$0xf0] }
 0x193   :  { %2624 = vmatpush.bf16.msrb.mxu2 %v10077_v6  ;;  %2637 = vmatpush.bf16.msrb.mxu3 %v10205_v56  ;;  %v13673_v6 = vld [vmem:[%s22024_s5 + $0x24c] sm:$0xf]  ;;  %v11008_v31 = vld [vmem:[%s22028_s9 + $0x640] sm:$0xf] }
 0x194   :  { %2580 = vmatmul.bf16.vlgmr.msra.gmra.mxu2 %v16319_v22  ;;  %2593 = vmatmul.bf16.vlgmr.msra.gmra.mxu3 %v16323_v15  ;;  %v9997_v20 = vor.u32 %v13673_v6, %v9994_v59  ;;  %v14273_v6 = vld [vmem:[%s22028_s9 + $0x204] sm:$0xf0]  ;;  %v11129_v59 = vor.u32 %v14443_v48, %v11128_v0  ;;  %v14323_v0 = vld [vmem:[%s22028_s9 + $0x394] sm:$0xf0]  ;;  %v11288_v48 = vld [vmem:[%s22028_s9 + $0x870] sm:$0xf] }
 0x196   :  { %2599 = vmatpush.bf16.msrb.mxu0 %v9805_v7  ;;  %2612 = vmatpush.bf16.msrb.mxu1 %v9933_v12  ;;  %v1563_v62 = vpop.f32.mrf.mxu0  ;;  %v1576_v5 = vpop.f32.mrf.mxu1  ;;  %v16846_v7 = vld [vmem:[%s22022_s3] sm:$0xf] }
 0x197   :  { %2625 = vmatpush.bf16.msrb.mxu2 %v10061_v3  ;;  %2638 = vmatpush.bf16.msrb.mxu3 %v10189_v19  ;;  %v16830_v56 = vpop.f32.mrf.mxu2  ;;  %v16832_v58 = vpop.f32.mrf.mxu3  ;;  %v378_v12 = vperm.slane %v16846_v7, 2  ;;  %v13605_v3 = vld [vmem:[%s22024_s5 + $0x2c] sm:$0xf]  ;;  %v9722_v19 = vld [vmem:[%s22024_s5 + $0x38] sm:$0xf0] }
 0x198   :  { %v9725_v29 = vor.u32 %v13605_v3, %v9722_v19  ;;  %v11088_v62 = vld [vmem:[%s22028_s9 + $0x6e0] sm:$0xf]  ;;  %v379_v3 = vperm.slane %v16846_v7, 3  ;;  %v10728_v7 = vld [vmem:[%s22028_s9 + $0x410] sm:$0xf] }
 0x19a   :  { %2600 = vmatpush.bf16.msrb.mxu0 %v9789_v21  ;;  %2613 = vmatpush.bf16.msrb.mxu1 %v9917_v28  ;;  %v13701_v21 = vld [vmem:[%s22024_s5 + $0x32c] sm:$0xf]  ;;  %v10106_v28 = vld [vmem:[%s22024_s5 + $0x338] sm:$0xf0] }
 0x19b   :  { %2626 = vmatpush.bf16.msrb.mxu2 %v10045_v30  ;;  %2639 = vmatpush.bf16.msrb.mxu3 %v10173_v54  ;;  %v9853_v30 = vor.u32 %v13637_v23, %v9850_v24  ;;  %v9706_v54 = vld [vmem:[%s22024_s5 + $0x18] sm:$0xf0]  ;;  %v10109_v32 = vor.u32 %v13701_v21, %v10106_v28  ;;  %v14423_v28 = vld [vmem:[%s22028_s9 + $0x6b4] sm:$0xf0] }
 0x19c   :  { %v9709_v41 = vor.u32 %v13601_v27, %v9706_v54  ;;  %v11368_v27 = vld [vmem:[%s22028_s9 + $0x910] sm:$0xf]  ;;  %v10368_v54 = vld [vmem:[%s22028_s9 + $0x140] sm:$0xf] }
 0x19e   :  { %2601 = vmatpush.bf16.msrb.mxu0 %v9773_v10  ;;  %2614 = vmatpush.bf16.msrb.mxu1 %v9901_v18  ;;  %v13697_v10 = vld [vmem:[%s22024_s5 + $0x30c] sm:$0xf]  ;;  %v1510_v18 = vadd.f32 %v16583_v36, %v378_v12  ;;  %v14363_v36 = vld [vmem:[%s22028_s9 + $0x4d4] sm:$0xf0]  ;;  %v14433_v12 = vld [vmem:[%s22028_s9 + $0x704] sm:$0xf0] }
 0x19f   :  { %2627 = vmatpush.bf16.msrb.mxu2 %v10029_v53  ;;  %2640 = vmatpush.bf16.msrb.mxu3 %v10157_v35  ;;  %v1589_v51 = vpop.f32.mrf.mxu2  ;;  %v1602_v34 = vpop.f32.mrf.mxu3  ;;  %v10090_v53 = vld [vmem:[%s22024_s5 + $0x318] sm:$0xf0]  ;;  %v10488_v35 = vld [vmem:[%s22028_s9 + $0x230] sm:$0xf]  ;;  %v10809_v55 = vor.u32 %v14363_v36, %v10808_v9  ;;  %v11089_v23 = vor.u32 %v14433_v12, %v11088_v62  ;;  %v14393_v12 = vld [vmem:[%s22028_s9 + $0x5c4] sm:$0xf0] }
 0x1a0   :  { %v10093_v44 = vor.u32 %v13697_v10, %v10090_v53  ;;  %v10369_v34 = vor.u32 %v14253_v4, %v10368_v54  ;;  %v10208_v4 = vld [vmem:[%s22028_s9] sm:$0xf] }
 0x1a2   :  { %2602 = vmatpush.bf16.msrb.mxu0 %v9757_v42  ;;  %2615 = vmatpush.bf16.msrb.mxu1 %v9885_v16  ;;  %v11448_v42 = vld [vmem:[%s22028_s9 + $0x9b0] sm:$0xf]  ;;  %v14523_v16 = vld [vmem:[%s22028_s9 + $0x9d4] sm:$0xf0] }
 0x1a3   :  { %2628 = vmatpush.bf16.msrb.mxu2 %v10013_v46  ;;  %2641 = vmatpush.bf16.msrb.mxu3 %v10141_v50  ;;  %v1523_v46 = vadd.f32 %v16585_v37, %v1510_v18  ;;  %v10489_v50 = vor.u32 %v14283_v38, %v10488_v35  ;;  %v11449_v1 = vor.u32 %v14523_v16, %v11448_v42  ;;  %v14353_v37 = vld [vmem:[%s22028_s9 + $0x484] sm:$0xf0]  ;;  %v10328_v35 = vld [vmem:[%s22028_s9 + $0xf0] sm:$0xf]  ;;  %v14243_v38 = vld [vmem:[%s22028_s9 + $0x114] sm:$0xf0] }
 0x1a4   :  { %v10769_v19 = vor.u32 %v14353_v37, %v10768_v60  ;;  %v14483_v42 = vld [vmem:[%s22028_s9 + $0x894] sm:$0xf0]  ;;  %v14313_v60 = vld [vmem:[%s22028_s9 + $0x344] sm:$0xf0]  ;;  %v10928_v37 = vld [vmem:[%s22028_s9 + $0x5a0] sm:$0xf] }
 0x1a5   :  { %v1536_v5 = vadd.f32 %v16626_v63, %v1523_v46  ;;  %v10449_v63 = vor.u32 %v14273_v6, %v10448_v45 }
 0x1a6   :  { %2603 = vmatpush.bf16.msrb.mxu0 %v9741_v2  ;;  %2616 = vmatpush.bf16.msrb.mxu1 %v9869_v13  ;;  %v11408_v2 = vld [vmem:[%s22028_s9 + $0x960] sm:$0xf]  ;;  %v14513_v13 = vld [vmem:[%s22028_s9 + $0x984] sm:$0xf0] }
 0x1a7   :  { %2629 = vmatpush.bf16.msrb.mxu2 %v9997_v20  ;;  %2642 = vmatpush.bf16.msrb.mxu3 %v10125_v11  ;;  %v10408_v20 = vld [vmem:[%s22028_s9 + $0x190] sm:$0xf]  ;;  %v14263_v11 = vld [vmem:[%s22028_s9 + $0x1b4] sm:$0xf0]  ;;  %v11409_v24 = vor.u32 %v14513_v13, %v11408_v2  ;;  %v1549_v21 = vadd.f32 %v16628_v61, %v1536_v5  ;;  %v10729_v61 = vor.u32 %v14343_v25, %v10728_v7  ;;  %v11248_v2 = vld [vmem:[%s22028_s9 + $0x820] sm:$0xf] }
 0x1a8   :  { %v14473_v13 = vld [vmem:[%s22028_s9 + $0x844] sm:$0xf0]  ;;  %v14223_v7 = vld [vmem:[%s22028_s9 + $0x74] sm:$0xf0]  ;;  %v10568_v25 = vld [vmem:[%s22028_s9 + $0x2d0] sm:$0xf] }
 0x1aa   :  { %2604 = vmatpush.bf16.msrb.mxu0 %v9725_v29  ;;  %2617 = vmatpush.bf16.msrb.mxu1 %v9853_v30  ;;  %v14503_v29 = vld [vmem:[%s22028_s9 + $0x934] sm:$0xf0]  ;;  %v1588_v30 = vadd.f32 %v16830_v56, %v379_v3  ;;  %v11049_v56 = vor.u32 %v14423_v28, %v11048_v26  ;;  %v11249_v28 = vor.u32 %v14473_v13, %v11248_v2 }
 0x1ab   :  { %2630 = vmatpush.bf16.msrb.mxu2 %v9981_v49  ;;  %2643 = vmatpush.bf16.msrb.mxu3 %v10109_v32  ;;  %v14413_v49 = vld [vmem:[%s22028_s9 + $0x664] sm:$0xf0]  ;;  %v11328_v32 = vld [vmem:[%s22028_s9 + $0x8c0] sm:$0xf]  ;;  %v14547_v2 = vld [vmem:[%s22034_s15 + $0x38] sm:$0xff] }
 0x1ac   :  { %v1601_v8 = vadd.f32 %v16832_v58, %v1588_v30  ;;  %v11009_v58 = vor.u32 %v14413_v49, %v11008_v31  ;;  %v11329_v36 = vor.u32 %v14493_v52, %v11328_v32  ;;  %v8813_v30 = vperm.slane %v16404_v57, 3  ;;  %v14293_v31 = vld [vmem:[%s22028_s9 + $0x2a4] sm:$0xf0] }
 0x1ad   :  { %v17161_v13 = vpack.c.bf16 %v14547_v2, %v14547_v2 }
 0x1ae   :  { %2605 = vmatpush.bf16.msrb.mxu0 %v9709_v41  ;;  %2618 = vmatpush.bf16.msrb.mxu1 %v9837_v47  ;;  %v1613_v10 = vpop.f32.mrf.mxu0  ;;  %v1626_v18 = vpop.f32.mrf.mxu1  ;;  %v10968_v41 = vld [vmem:[%s22028_s9 + $0x5f0] sm:$0xf]  ;;  %v14403_v47 = vld [vmem:[%s22028_s9 + $0x614] sm:$0xf0] }
 0x1af   :  { %2631 = vmatpush.bf16.msrb.mxu2 %v9965_v43  ;;  %2644 = vmatpush.bf16.msrb.mxu3 %v10093_v44  ;;  %v1614_v9 = vadd.f32 %v1613_v10, %v1601_v8  ;;  %v8812_v43 = vperm.slane %v16404_v57, 2  ;;  %v10329_v44 = vor.u32 %v14243_v38, %v10328_v35  ;;  %v10969_v6 = vor.u32 %v14403_v47, %v10968_v41  ;;  %v14373_v8 = vld [vmem:[%s22028_s9 + $0x524] sm:$0xf0]  ;;  %v11168_v10 = vld [vmem:[%s22028_s9 + $0x780] sm:$0xf] }
 0x1b0   :  { %v10490_v35 = vld [vmem:[%s22028_s9 + $0x258] sm:$0xf0]  ;;  %v14518_v47 = vld [vmem:[%s22028_s9 + $0x9b4] sm:$0xf] }
 0x1b1   :  { %2606 = vmatmul.bf16.vlgmr.msrb.gmra.mxu0 %v16302_v14  ;;  %2619 = vmatmul.bf16.vlgmr.msrb.gmra.mxu1 %v16306_v17  ;;  %v1562_v14 = vadd.f32 %v16787_v40, %v1549_v21  ;;  %v10409_v17 = vor.u32 %v14263_v11, %v10408_v20  ;;  %v14333_v40 = vld [vmem:[%s22028_s9 + $0x3e4] sm:$0xf0]  ;;  %v1627_v45 = vadd.f32 %v1626_v18, %v1614_v9  ;;  %v14358_v9 = vld [vmem:[%s22028_s9 + $0x4b4] sm:$0xf]  ;;  %v11130_v41 = vld [vmem:[%s22028_s9 + $0x758] sm:$0xf0] }
 0x1b2   :  { %5064 = vmatpush.bf16.msra.mxu0 %v10489_v50  ;;  %5077 = vmatpush.bf16.msra.mxu1 %v10809_v55  ;;  %v10288_v50 = vld [vmem:[%s22028_s9 + $0xa0] sm:$0xf]  ;;  %v14233_v55 = vld [vmem:[%s22028_s9 + $0xc4] sm:$0xf0]  ;;  %v10929_v21 = vor.u32 %v14393_v12, %v10928_v37  ;;  %v14508_v37 = vld [vmem:[%s22028_s9 + $0x964] sm:$0xf] }
 0x1b3   :  { %5090 = vmatpush.bf16.msra.mxu2 %v11129_v59  ;;  %5103 = vmatpush.bf16.msra.mxu3 %v11449_v1  ;;  %v1575_v51 = vadd.f32 %v16789_v33, %v1562_v14  ;;  %v10648_v33 = vld [vmem:[%s22028_s9 + $0x370] sm:$0xf]  ;;  %v11289_v59 = vor.u32 %v14483_v42, %v11288_v48  ;;  %v10608_v1 = vld [vmem:[%s22028_s9 + $0x320] sm:$0xf]  ;;  %v10289_v11 = vor.u32 %v14233_v55, %v10288_v50  ;;  %v14383_v14 = vld [vmem:[%s22028_s9 + $0x574] sm:$0xf0] }
 0x1b4   :  { %2632 = vmatmul.bf16.vlgmr.msrb.gmra.mxu2 %v16319_v22  ;;  %2645 = vmatmul.bf16.vlgmr.msrb.gmra.mxu3 %v16323_v15  ;;  %v11369_v22 = vor.u32 %v14503_v29, %v11368_v27  ;;  %v10688_v15 = vld [vmem:[%s22028_s9 + $0x3c0] sm:$0xf]  ;;  %v10649_v46 = vor.u32 %v14323_v0, %v10648_v33  ;;  %v14303_v27 = vld [vmem:[%s22028_s9 + $0x2f4] sm:$0xf0]  ;;  %v10888_v29 = vld [vmem:[%s22028_s9 + $0x550] sm:$0xf] }
 0x1b5   :  { %v10689_v53 = vor.u32 %v14333_v40, %v10688_v15  ;;  %v1658_v16 = vmax.f32 %v1575_v51, 0.0  ;;  %v14213_v15 = vld [vmem:[%s22028_s9 + $0x24] sm:$0xf0]  ;;  %v10528_v40 = vld [vmem:[%s22028_s9 + $0x280] sm:$0xf]  ;;  %v10889_v49 = vor.u32 %v14383_v14, %v10888_v29 }
 0x1b6   :  { %5065 = vmatpush.bf16.msra.mxu0 %v10449_v63  ;;  %5078 = vmatpush.bf16.msra.mxu1 %v10769_v19  ;;  %v1615_v63 = vpop.f32.mrf.mxu0  ;;  %v1628_v19 = vpop.f32.mrf.mxu1  ;;  %v10209_v33 = vor.u32 %v14213_v15, %v10208_v4  ;;  %v10529_v0 = vor.u32 %v14293_v31, %v10528_v40  ;;  %v11450_v48 = vld [vmem:[%s22028_s9 + $0x9d8] sm:$0xf0]  ;;  %v10450_v50 = vld [vmem:[%s22028_s9 + $0x208] sm:$0xf0]  ;;  %v17191_v29 = vld [vmem:[%s22025_s6] sm:$0xf] }
 0x1b7   :  { %5091 = vmatpush.bf16.msra.mxu2 %v11089_v23  ;;  %5104 = vmatpush.bf16.msra.mxu3 %v11409_v24  ;;  %v1639_v62 = vpop.f32.mrf.mxu2  ;;  %v1652_v5 = vpop.f32.mrf.mxu3  ;;  %v8820_v20 = vmul.f32 %v8812_v43, %v1658_v16  ;;  %v10609_v23 = vor.u32 %v14313_v60, %v10608_v1  ;;  %v10248_v24 = vld [vmem:[%s22028_s9 + $0x50] sm:$0xf]  ;;  %v14428_v1 = vld [vmem:[%s22028_s9 + $0x6e4] sm:$0xf]  ;;  %v11090_v60 = vld [vmem:[%s22028_s9 + $0x708] sm:$0xf0] }
 0x1b8   :  { %v1640_v3 = vadd.f32 %v1639_v62, %v1627_v45  ;;  %v10249_v57 = vor.u32 %v14223_v7, %v10248_v24  ;;  %v11453_v45 = vor.u32 %v14518_v47, %v11450_v48  ;;  %v11410_v62 = vld [vmem:[%s22028_s9 + $0x988] sm:$0xf0]  ;;  %v14338_v24 = vld [vmem:[%s22028_s9 + $0x414] sm:$0xf]  ;;  %v1794_v4 = vperm.slane %v17191_v29, 0 }
 0x1b9   :  { %v14549_v7 = vld [vmem:[%s22034_s15 + $0x48] sm:$0xff]  ;;  %v14498_v14 = vld [vmem:[%s22028_s9 + $0x914] sm:$0xf]  ;;  %v14328_v40 = vld [vmem:[%s22028_s9 + $0x3c4] sm:$0xf] }
 0x1ba   :  { %5066 = vmatpush.bf16.msra.mxu0 %v10409_v17  ;;  %5079 = vmatpush.bf16.msra.mxu1 %v10729_v61  ;;  %v1653_v26 = vadd.f32 %v1652_v5, %v1640_v3  ;;  %v11208_v17 = vld [vmem:[%s22028_s9 + $0x7d0] sm:$0xf]  ;;  %v14463_v61 = vld [vmem:[%s22028_s9 + $0x7f4] sm:$0xf0]  ;;  %v14548_v3 = vld [vmem:[%s22034_s15 + $0x40] sm:$0xff] }
 0x1bb   :  { %5092 = vmatpush.bf16.msra.mxu2 %v11049_v56  ;;  %5105 = vmatpush.bf16.msra.mxu3 %v11369_v22  ;;  %v10569_v56 = vor.u32 %v14303_v27, %v10568_v25  ;;  %v8823_v22 = vadd.f32 %v16496_v39, %v8820_v20  ;;  %v11209_v32 = vor.u32 %v14463_v61, %v11208_v17  ;;  %v10848_v39 = vld [vmem:[%s22028_s9 + $0x500] sm:$0xf]  ;;  %v14546_v5 = vld [vmem:[%s22034_s15 + $0x30] sm:$0xff]  ;;  %v11370_v17 = vld [vmem:[%s22028_s9 + $0x938] sm:$0xf0] }
 0x1bc   :  { %v1659_v54 = vmax.f32 %v1653_v26, 0.0  ;;  %v10849_v42 = vor.u32 %v14373_v8, %v10848_v39  ;;  %v17156_v12 = vpack.c.bf16 %v14546_v5, %v14546_v5  ;;  %v17166_v63 = vpack.c.bf16 %v14548_v3, %v14548_v3  ;;  %v14418_v27 = vld [vmem:[%s22028_s9 + $0x694] sm:$0xf]  ;;  %v10690_v31 = vld [vmem:[%s22028_s9 + $0x3e8] sm:$0xf0] }
 0x1bd   :  { %v17180_v25 = vpack.c.bf16 %v14549_v7, %v14549_v7  ;;  %v11093_v26 = vor.u32 %v14428_v1, %v11090_v60  ;;  %v11373_v15 = vor.u32 %v14498_v14, %v11370_v17  ;;  %v11330_v39 = vld [vmem:[%s22028_s9 + $0x8e8] sm:$0xf0]  ;;  %v14478_v47 = vld [vmem:[%s22028_s9 + $0x874] sm:$0xf]  ;;  %v11290_v48 = vld [vmem:[%s22028_s9 + $0x898] sm:$0xf0] }
 0x1be   :  { %5067 = vmatpush.bf16.msra.mxu0 %v10369_v34  ;;  %5080 = vmatpush.bf16.msra.mxu1 %v10689_v53  ;;  %v8821_v52 = vmul.f32 %v8813_v30, %v1659_v54  ;;  %v14453_v34 = vld [vmem:[%s22028_s9 + $0x7a4] sm:$0xf0]  ;;  %v14278_v53 = vld [vmem:[%s22028_s9 + $0x234] sm:$0xf]  ;;  %v11050_v30 = vld [vmem:[%s22028_s9 + $0x6b8] sm:$0xf0] }
 0x1bf   :  { %5093 = vmatpush.bf16.msra.mxu2 %v11009_v58  ;;  %5106 = vmatpush.bf16.msra.mxu3 %v11329_v36  ;;  %v1641_v18 = vpop.f32.mrf.mxu2  ;;  %v1654_v51 = vpop.f32.mrf.mxu3  ;;  %v10810_v58 = vld [vmem:[%s22028_s9 + $0x4d8] sm:$0xf0]  ;;  %v14438_v36 = vld [vmem:[%s22028_s9 + $0x734] sm:$0xf]  ;;  %v11169_v16 = vor.u32 %v14453_v34, %v11168_v10  ;;  %v10493_v43 = vor.u32 %v14278_v53, %v10490_v35  ;;  %v10693_v34 = vor.u32 %v14328_v40, %v10690_v31  ;;  %v10930_v60 = vld [vmem:[%s22028_s9 + $0x5c8] sm:$0xf0] }
 0x1c0   :  { %v8824_v38 = vadd.f32 %v8823_v22, %v8821_v52  ;;  %v11133_v55 = vor.u32 %v14438_v36, %v11130_v41  ;;  %v11053_v22 = vor.u32 %v14418_v27, %v11050_v30  ;;  %v14488_v52 = vld [vmem:[%s22028_s9 + $0x8c4] sm:$0xf]  ;;  %v14238_v53 = vld [vmem:[%s22028_s9 + $0xf4] sm:$0xf]  ;;  %v10330_v35 = vld [vmem:[%s22028_s9 + $0x118] sm:$0xf0] }
 0x1c1   :  { %v10650_v36 = vld [vmem:[%s22028_s9 + $0x398] sm:$0xf0]  ;;  %v14378_v27 = vld [vmem:[%s22028_s9 + $0x554] sm:$0xf]  ;;  %v14368_v31 = vld [vmem:[%s22028_s9 + $0x504] sm:$0xf] }
 0x1c2   :  { %5068 = vmatpush.bf16.msra.mxu0 %v10329_v44  ;;  %5081 = vmatpush.bf16.msra.mxu1 %v10649_v46  ;;  %v10813_v44 = vor.u32 %v14358_v9, %v10810_v58  ;;  %v14268_v46 = vld [vmem:[%s22028_s9 + $0x1e4] sm:$0xf]  ;;  %v11333_v9 = vor.u32 %v14488_v52, %v11330_v39  ;;  %v14318_v58 = vld [vmem:[%s22028_s9 + $0x374] sm:$0xf]  ;;  %v10970_v41 = vld [vmem:[%s22028_s9 + $0x618] sm:$0xf0] }
 0x1c3   :  { %5094 = vmatpush.bf16.msra.mxu2 %v10969_v6  ;;  %5107 = vmatpush.bf16.msra.mxu3 %v11289_v59  ;;  %v14348_v6 = vld [vmem:[%s22028_s9 + $0x464] sm:$0xf]  ;;  %v10770_v59 = vld [vmem:[%s22028_s9 + $0x488] sm:$0xf0]  ;;  %v10453_v19 = vor.u32 %v14268_v46, %v10450_v50  ;;  %v11293_v50 = vor.u32 %v14478_v47, %v11290_v48  ;;  %v10890_v30 = vld [vmem:[%s22028_s9 + $0x578] sm:$0xf0] }
 0x1c4   :  { %8825 = vadd.xlane.f32.xlu1 %v8824_v38  ;;  %v10773_v20 = vor.u32 %v14348_v6, %v10770_v59  ;;  %v14388_v6 = vld [vmem:[%s22028_s9 + $0x5a4] sm:$0xf]  ;;  %v14458_v14 = vld [vmem:[%s22028_s9 + $0x7d4] sm:$0xf]  ;;  %v11210_v17 = vld [vmem:[%s22028_s9 + $0x7f8] sm:$0xf0] }
 0x1c5   :  { %v10933_v7 = vor.u32 %v14388_v6, %v10930_v60  ;;  %v11213_v40 = vor.u32 %v14458_v14, %v11210_v17  ;;  %v10456_v48 = vld [vmem:[%s22028_s9 + $0x1e8] sm:$0xf]  ;;  %v14514_v6 = vld [vmem:[%s22028_s9 + $0x98c] sm:$0xf0]  ;;  %v10416_v60 = vld [vmem:[%s22028_s9 + $0x198] sm:$0xf] }
 0x1c6   :  { %5069 = vmatpush.bf16.msra.mxu0 %v10289_v11  ;;  %5082 = vmatpush.bf16.msra.mxu1 %v10609_v23  ;;  %v14258_v11 = vld [vmem:[%s22028_s9 + $0x194] sm:$0xf]  ;;  %v10410_v23 = vld [vmem:[%s22028_s9 + $0x1b8] sm:$0xf0]  ;;  %v10696_v14 = vld [vmem:[%s22028_s9 + $0x3c8] sm:$0xf] }
 0x1c7   :  { %5095 = vmatpush.bf16.msra.mxu2 %v10929_v21  ;;  %5108 = vmatpush.bf16.msra.mxu3 %v11249_v28  ;;  %v11413_v21 = vor.u32 %v14508_v37, %v11410_v62  ;;  %v10730_v28 = vld [vmem:[%s22028_s9 + $0x438] sm:$0xf0]  ;;  %v10413_v61 = vor.u32 %v14258_v11, %v10410_v23  ;;  %v14468_v37 = vld [vmem:[%s22028_s9 + $0x824] sm:$0xf]  ;;  %v11250_v62 = vld [vmem:[%s22028_s9 + $0x848] sm:$0xf0] }
 0x1c8   :  { %v10733_v54 = vor.u32 %v14338_v24, %v10730_v28  ;;  %v14218_v11 = vld [vmem:[%s22028_s9 + $0x54] sm:$0xf]  ;;  %v10250_v23 = vld [vmem:[%s22028_s9 + $0x78] sm:$0xf0]  ;;  %v14334_v17 = vld [vmem:[%s22028_s9 + $0x3ec] sm:$0xf0] }
 0x1c9   :  { %v10570_v28 = vld [vmem:[%s22028_s9 + $0x2f8] sm:$0xf0] }
 0x1ca   :  { %5070 = vmatpush.bf16.msra.mxu0 %v10249_v57  ;;  %5083 = vmatpush.bf16.msra.mxu1 %v10569_v56  ;;  %v14248_v57 = vld [vmem:[%s22028_s9 + $0x144] sm:$0xf]  ;;  %v10370_v56 = vld [vmem:[%s22028_s9 + $0x168] sm:$0xf0] }
 0x1cb   :  { %5096 = vmatpush.bf16.msra.mxu2 %v10889_v49  ;;  %5109 = vmatpush.bf16.msra.mxu3 %v11209_v32  ;;  %v14408_v49 = vld [vmem:[%s22028_s9 + $0x644] sm:$0xf]  ;;  %v11010_v32 = vld [vmem:[%s22028_s9 + $0x668] sm:$0xf0]  ;;  %v10373_v51 = vor.u32 %v14248_v57, %v10370_v56 }
 0x1cc   :  { %v11013_v38 = vor.u32 %v14408_v49, %v11010_v32  ;;  %v10210_v57 = vld [vmem:[%s22028_s9 + $0x28] sm:$0xf0]  ;;  %v14288_v56 = vld [vmem:[%s22028_s9 + $0x284] sm:$0xf] }
 0x1cd   :  { %v10850_v49 = vld [vmem:[%s22028_s9 + $0x528] sm:$0xf0]  ;;  %v14448_v32 = vld [vmem:[%s22028_s9 + $0x784] sm:$0xf] }
 0x1ce   :  { %5071 = vmatpush.bf16.msra.mxu0 %v10209_v33  ;;  %5084 = vmatpush.bf16.msra.mxu1 %v10529_v0  ;;  %v2451_v8 = vpop.f32.mrf.mxu0  ;;  %v2464_v10 = vpop.f32.mrf.mxu1  ;;  %v14398_v33 = vld [vmem:[%s22028_s9 + $0x5f4] sm:$0xf] }
 0x1cf   :  { %5097 = vmatpush.bf16.msra.mxu2 %v10849_v42  ;;  %5110 = vmatpush.bf16.msra.mxu3 %v11169_v16  ;;  %v2452_v18 = vadd.f32 %v2451_v8, %v1794_v4  ;;  %v10333_v42 = vor.u32 %v14238_v53, %v10330_v35  ;;  %v10653_v16 = vor.u32 %v14318_v58, %v10650_v36  ;;  %v11170_v8 = vld [vmem:[%s22028_s9 + $0x7a8] sm:$0xf0]  ;;  %v11136_v53 = vld [vmem:[%s22028_s9 + $0x738] sm:$0xf]  ;;  %v14524_v36 = vld [vmem:[%s22028_s9 + $0x9dc] sm:$0xf0] }
 0x1d0   :  { %v10973_v46 = vor.u32 %v14398_v33, %v10970_v41  ;;  %v11456_v58 = vld [vmem:[%s22028_s9 + $0x9b8] sm:$0xf]  ;;  %v10853_v33 = vor.u32 %v14368_v31, %v10850_v49  ;;  %v14244_v49 = vld [vmem:[%s22028_s9 + $0x11c] sm:$0xf0] }
 0x1d1   :  { %5072 = vmatmul.bf16.vlgmr.msra.gmra.mxu0 %v17156_v12  ;;  %5085 = vmatmul.bf16.vlgmr.msra.gmra.mxu1 %v17161_v13  ;;  %v2465_v0 = vadd.f32 %v2464_v10, %v2452_v18  ;;  %v10496_v10 = vld [vmem:[%s22028_s9 + $0x238] sm:$0xf]  ;;  %v14284_v18 = vld [vmem:[%s22028_s9 + $0x25c] sm:$0xf0] }
 0x1d2   :  { %5116 = vmatpush.bf16.msrb.mxu0 %v10493_v43  ;;  %5129 = vmatpush.bf16.msrb.mxu1 %v10813_v44  ;;  %v14228_v43 = vld [vmem:[%s22028_s9 + $0xa4] sm:$0xf]  ;;  %v10290_v44 = vld [vmem:[%s22028_s9 + $0xc8] sm:$0xf0]  ;;  %v10497_v41 = vor.u32 %v14284_v18, %v10496_v10  ;;  %v10336_v31 = vld [vmem:[%s22028_s9 + $0xf8] sm:$0xf] }
 0x1d3   :  { %5142 = vmatpush.bf16.msrb.mxu2 %v11133_v55  ;;  %5155 = vmatpush.bf16.msrb.mxu3 %v11453_v45  ;;  %v14308_v55 = vld [vmem:[%s22028_s9 + $0x324] sm:$0xf]  ;;  %v10610_v45 = vld [vmem:[%s22028_s9 + $0x348] sm:$0xf0]  ;;  %v10976_v10 = vld [vmem:[%s22028_s9 + $0x5f8] sm:$0xf] }
 0x1d4   :  { %5098 = vmatmul.bf16.vlgmr.msra.gmra.mxu2 %v17166_v63  ;;  %5111 = vmatmul.bf16.vlgmr.msra.gmra.mxu3 %v17180_v25  ;;  %v14404_v18 = vld [vmem:[%s22028_s9 + $0x61c] sm:$0xf0] }
 0x1d6   :  { %5117 = vmatpush.bf16.msrb.mxu0 %v10453_v19  ;;  %5130 = vmatpush.bf16.msrb.mxu1 %v10773_v20  ;;  %v2453_v2 = vpop.f32.mrf.mxu0  ;;  %v2466_v3 = vpop.f32.mrf.mxu1  ;;  %v10293_v19 = vor.u32 %v14228_v43, %v10290_v44  ;;  %v10613_v20 = vor.u32 %v14308_v55, %v10610_v45  ;;  %v11457_v43 = vor.u32 %v14524_v36, %v11456_v58  ;;  %v10776_v44 = vld [vmem:[%s22028_s9 + $0x468] sm:$0xf]  ;;  %v14434_v55 = vld [vmem:[%s22028_s9 + $0x70c] sm:$0xf0] }
 0x1d7   :  { %5143 = vmatpush.bf16.msrb.mxu2 %v11093_v26  ;;  %5156 = vmatpush.bf16.msrb.mxu3 %v11413_v21  ;;  %v2477_v59 = vpop.f32.mrf.mxu2  ;;  %v2490_v1 = vpop.f32.mrf.mxu3  ;;  %v11253_v26 = vor.u32 %v14468_v37, %v11250_v62  ;;  %v14298_v21 = vld [vmem:[%s22028_s9 + $0x2d4] sm:$0xf]  ;;  %v11416_v45 = vld [vmem:[%s22028_s9 + $0x968] sm:$0xf]  ;;  %v14264_v37 = vld [vmem:[%s22028_s9 + $0x1bc] sm:$0xf0]  ;;  %v10977_v58 = vor.u32 %v14404_v18, %v10976_v10 }
 0x1d8   :  { %v2478_v5 = vadd.f32 %v2477_v59, %v2465_v0  ;;  %v10573_v4 = vor.u32 %v14298_v21, %v10570_v28  ;;  %v11173_v0 = vor.u32 %v14448_v32, %v11170_v8  ;;  %v10736_v2 = vld [vmem:[%s22028_s9 + $0x418] sm:$0xf]  ;;  %v14344_v3 = vld [vmem:[%s22028_s9 + $0x43c] sm:$0xf0]  ;;  %v10376_v21 = vld [vmem:[%s22028_s9 + $0x148] sm:$0xf] }
 0x1d9   :  { %v14254_v28 = vld [vmem:[%s22028_s9 + $0x16c] sm:$0xf0]  ;;  %v14324_v8 = vld [vmem:[%s22028_s9 + $0x39c] sm:$0xf0] }
 0x1da   :  { %5118 = vmatpush.bf16.msrb.mxu0 %v10413_v61  ;;  %5131 = vmatpush.bf16.msrb.mxu1 %v10733_v54  ;;  %v17285_v24 = vadd.f32 %v2490_v1, %v2478_v5  ;;  %v14208_v61 = vld [vmem:[%s22028_s9 + $0x4] sm:$0xf]  ;;  %v10253_v54 = vor.u32 %v14218_v11, %v10250_v23  ;;  %v11417_v5 = vor.u32 %v14514_v6, %v11416_v45  ;;  %v11376_v11 = vld [vmem:[%s22028_s9 + $0x918] sm:$0xf]  ;;  %v14504_v23 = vld [vmem:[%s22028_s9 + $0x93c] sm:$0xf0] }
 0x1db   :  { %5144 = vmatpush.bf16.msrb.mxu2 %v11053_v22  ;;  %5157 = vmatpush.bf16.msrb.mxu3 %v11373_v15  ;;  %v10530_v22 = vld [vmem:[%s22028_s9 + $0x2a8] sm:$0xf0]  ;;  %v10893_v15 = vor.u32 %v14378_v27, %v10890_v30  ;;  %v10213_v35 = vor.u32 %v14208_v61, %v10210_v57  ;;  %v11377_v30 = vor.u32 %v14504_v23, %v11376_v11  ;;  %v11016_v61 = vld [vmem:[%s22028_s9 + $0x648] sm:$0xf]  ;;  %v14494_v57 = vld [vmem:[%s22028_s9 + $0x8ec] sm:$0xf0] }
 0x1dc   :  { %v10256_v45 = vld [vmem:[%s22028_s9 + $0x58] sm:$0xf]  ;;  %v14224_v6 = vld [vmem:[%s22028_s9 + $0x7c] sm:$0xf0]  ;;  %v14214_v23 = vld [vmem:[%s22028_s9 + $0x2c] sm:$0xf0] }
 0x1de   :  { %5119 = vmatpush.bf16.msrb.mxu0 %v10373_v51  ;;  %5132 = vmatpush.bf16.msrb.mxu1 %v10693_v34  ;;  %v10816_v51 = vld [vmem:[%s22028_s9 + $0x4b8] sm:$0xf]  ;;  %v14364_v34 = vld [vmem:[%s22028_s9 + $0x4dc] sm:$0xf0] }
 0x1df   :  { %5145 = vmatpush.bf16.msrb.mxu2 %v11013_v38  ;;  %5158 = vmatpush.bf16.msrb.mxu3 %v11333_v9  ;;  %v2479_v52 = vpop.f32.mrf.mxu2  ;;  %v2492_v39 = vpop.f32.mrf.mxu3  ;;  %v10533_v38 = vor.u32 %v14288_v56, %v10530_v22  ;;  %v14444_v9 = vld [vmem:[%s22028_s9 + $0x75c] sm:$0xf0]  ;;  %v10817_v47 = vor.u32 %v14364_v34, %v10816_v51  ;;  %v11296_v51 = vld [vmem:[%s22028_s9 + $0x878] sm:$0xf] }
 0x1e0   :  { %v10656_v39 = vld [vmem:[%s22028_s9 + $0x378] sm:$0xf]  ;;  %v14484_v34 = vld [vmem:[%s22028_s9 + $0x89c] sm:$0xf0] }
 0x1e1   :  { %v11297_v36 = vor.u32 %v14484_v34, %v11296_v51 }
 0x1e2   :  { %5120 = vmatpush.bf16.msrb.mxu0 %v10333_v42  ;;  %5133 = vmatpush.bf16.msrb.mxu1 %v10653_v16  ;;  %v14274_v42 = vld [vmem:[%s22028_s9 + $0x20c] sm:$0xf0]  ;;  %v11137_v16 = vor.u32 %v14444_v9, %v11136_v53  ;;  %v10337_v53 = vor.u32 %v14244_v49, %v10336_v31  ;;  %v14439_v31 = vld [vmem:[%s22028_s9 + $0x73c] sm:$0xf] }
 0x1e3   :  { %5146 = vmatpush.bf16.msrb.mxu2 %v10973_v46  ;;  %5159 = vmatpush.bf16.msrb.mxu3 %v11293_v50  ;;  %v14354_v46 = vld [vmem:[%s22028_s9 + $0x48c] sm:$0xf0]  ;;  %v11096_v50 = vld [vmem:[%s22028_s9 + $0x6e8] sm:$0xf]  ;;  %v10457_v59 = vor.u32 %v14274_v42, %v10456_v48 }
 0x1e4   :  { %v10777_v1 = vor.u32 %v14354_v46, %v10776_v44  ;;  %v11097_v62 = vor.u32 %v14434_v55, %v11096_v50  ;;  %v14234_v9 = vld [vmem:[%s22028_s9 + $0xcc] sm:$0xf0] }
 0x1e5   :  { %v14394_v42 = vld [vmem:[%s22028_s9 + $0x5cc] sm:$0xf0] }
 0x1e6   :  { %5121 = vmatpush.bf16.msrb.mxu0 %v10293_v19  ;;  %5134 = vmatpush.bf16.msrb.mxu1 %v10613_v20  ;;  %v11056_v19 = vld [vmem:[%s22028_s9 + $0x698] sm:$0xf]  ;;  %v14424_v20 = vld [vmem:[%s22028_s9 + $0x6bc] sm:$0xf0] }
 0x1e7   :  { %5147 = vmatpush.bf16.msrb.mxu2 %v10933_v7  ;;  %5160 = vmatpush.bf16.msrb.mxu3 %v11253_v26  ;;  %v10417_v7 = vor.u32 %v14264_v37, %v10416_v60  ;;  %v10737_v26 = vor.u32 %v14344_v3, %v10736_v2  ;;  %v11057_v27 = vor.u32 %v14424_v20, %v11056_v19  ;;  %v10576_v60 = vld [vmem:[%s22028_s9 + $0x2d8] sm:$0xf]  ;;  %v14304_v37 = vld [vmem:[%s22028_s9 + $0x2fc] sm:$0xf0]  ;;  %v10216_v19 = vld [vmem:[%s22028_s9 + $0x8] sm:$0xf] }
 0x1e8   :  { %v11216_v2 = vld [vmem:[%s22028_s9 + $0x7d8] sm:$0xf]  ;;  %v14464_v3 = vld [vmem:[%s22028_s9 + $0x7fc] sm:$0xf0]  ;;  %v10257_v20 = vor.u32 %v14224_v6, %v10256_v45  ;;  %v10577_v11 = vor.u32 %v14304_v37, %v10576_v60  ;;  %v10217_v49 = vor.u32 %v14214_v23, %v10216_v19  ;;  %v14339_v45 = vld [vmem:[%s22028_s9 + $0x41c] sm:$0xf] }
 0x1e9   :  { %v10738_v6 = vld [vmem:[%s22028_s9 + $0x440] sm:$0xf0]  ;;  %v14499_v60 = vld [vmem:[%s22028_s9 + $0x91c] sm:$0xf]  ;;  %v10698_v23 = vld [vmem:[%s22028_s9 + $0x3f0] sm:$0xf0] }
 0x1ea   :  { %5122 = vmatpush.bf16.msrb.mxu0 %v10253_v54  ;;  %5135 = vmatpush.bf16.msrb.mxu1 %v10573_v4  ;;  %v14414_v54 = vld [vmem:[%s22028_s9 + $0x66c] sm:$0xf0]  ;;  %v11336_v4 = vld [vmem:[%s22028_s9 + $0x8c8] sm:$0xf]  ;;  %v11378_v37 = vld [vmem:[%s22028_s9 + $0x940] sm:$0xf0] }
 0x1eb   :  { %5148 = vmatpush.bf16.msrb.mxu2 %v10893_v15  ;;  %5161 = vmatpush.bf16.msrb.mxu3 %v11213_v40  ;;  %v10377_v15 = vor.u32 %v14254_v28, %v10376_v21  ;;  %v10697_v40 = vor.u32 %v14334_v17, %v10696_v14  ;;  %v11017_v32 = vor.u32 %v14414_v54, %v11016_v61  ;;  %v11176_v14 = vld [vmem:[%s22028_s9 + $0x788] sm:$0xf]  ;;  %v14454_v54 = vld [vmem:[%s22028_s9 + $0x7ac] sm:$0xf0] }
 0x1ec   :  { %v11337_v52 = vor.u32 %v14494_v57, %v11336_v4  ;;  %v11217_v28 = vor.u32 %v14464_v3, %v11216_v2  ;;  %v14279_v4 = vld [vmem:[%s22028_s9 + $0x23c] sm:$0xf]  ;;  %v10498_v57 = vld [vmem:[%s22028_s9 + $0x260] sm:$0xf0]  ;;  %v11177_v18 = vor.u32 %v14454_v54, %v11176_v14  ;;  %v14249_v2 = vld [vmem:[%s22028_s9 + $0x14c] sm:$0xf] }
 0x1ed   :  { %v10501_v51 = vor.u32 %v14279_v4, %v10498_v57  ;;  %v10378_v3 = vld [vmem:[%s22028_s9 + $0x170] sm:$0xf0]  ;;  %v10338_v54 = vld [vmem:[%s22028_s9 + $0x120] sm:$0xf0] }
 0x1ee   :  { %5123 = vmatpush.bf16.msrb.mxu0 %v10213_v35  ;;  %5136 = vmatpush.bf16.msrb.mxu1 %v10533_v38  ;;  %v17429_v56 = vpop.f32.mrf.mxu0  ;;  %v17431_v22 = vpop.f32.mrf.mxu1  ;;  %v10657_v35 = vor.u32 %v14324_v8, %v10656_v39  ;;  %v10296_v38 = vld [vmem:[%s22028_s9 + $0xa8] sm:$0xf]  ;;  %v14519_v39 = vld [vmem:[%s22028_s9 + $0x9bc] sm:$0xf]  ;;  %v11458_v8 = vld [vmem:[%s22028_s9 + $0x9e0] sm:$0xf0]  ;;  %v10381_v14 = vor.u32 %v14249_v2, %v10378_v3 }
 0x1ef   :  { %5149 = vmatpush.bf16.msrb.mxu2 %v10853_v33  ;;  %5162 = vmatpush.bf16.msrb.mxu3 %v11173_v0  ;;  %v10616_v33 = vld [vmem:[%s22028_s9 + $0x328] sm:$0xf]  ;;  %v14314_v0 = vld [vmem:[%s22028_s9 + $0x34c] sm:$0xf0]  ;;  %v10297_v50 = vor.u32 %v14234_v9, %v10296_v38  ;;  %v11461_v9 = vor.u32 %v14519_v39, %v11458_v8 }
 0x1f0   :  { %v10617_v55 = vor.u32 %v14314_v0, %v10616_v33  ;;  %v14429_v33 = vld [vmem:[%s22028_s9 + $0x6ec] sm:$0xf]  ;;  %v11098_v0 = vld [vmem:[%s22028_s9 + $0x710] sm:$0xf0] }
 0x1f1   :  { %5124 = vmatmul.bf16.vlgmr.msrb.gmra.mxu0 %v17156_v12  ;;  %5137 = vmatmul.bf16.vlgmr.msrb.gmra.mxu1 %v17161_v13 }
 0x1f2   :  { %5168 = vmatpush.bf16.msra.mxu0 %v10497_v41  ;;  %5181 = vmatpush.bf16.msra.mxu1 %v10817_v47  ;;  %v10936_v41 = vld [vmem:[%s22028_s9 + $0x5a8] sm:$0xf] }
 0x1f3   :  { %5194 = vmatpush.bf16.msra.mxu2 %v11137_v16  ;;  %5207 = vmatpush.bf16.msra.mxu3 %v11457_v43  ;;  %v11256_v16 = vld [vmem:[%s22028_s9 + $0x828] sm:$0xf]  ;;  %v14474_v43 = vld [vmem:[%s22028_s9 + $0x84c] sm:$0xf0] }
 0x1f4   :  { %5150 = vmatmul.bf16.vlgmr.msrb.gmra.mxu2 %v17166_v63  ;;  %5163 = vmatmul.bf16.vlgmr.msrb.gmra.mxu3 %v17180_v25 }
 0x1f6   :  { %5169 = vmatpush.bf16.msra.mxu0 %v10457_v59  ;;  %5182 = vmatpush.bf16.msra.mxu1 %v10777_v1  ;;  %v2505_v44 = vpop.f32.mrf.mxu0  ;;  %v2518_v46 = vpop.f32.mrf.mxu1  ;;  %v10937_v59 = vor.u32 %v14394_v42, %v10936_v41  ;;  %v11257_v1 = vor.u32 %v14474_v43, %v11256_v16  ;;  %v14509_v41 = vld [vmem:[%s22028_s9 + $0x96c] sm:$0xf]  ;;  %v11418_v42 = vld [vmem:[%s22028_s9 + $0x990] sm:$0xf0] }
 0x1f7   :  { %5195 = vmatpush.bf16.msra.mxu2 %v11097_v62  ;;  %5208 = vmatpush.bf16.msra.mxu3 %v11417_v5  ;;  %v17472_v47 = vpop.f32.mrf.mxu2  ;;  %v17474_v48 = vpop.f32.mrf.mxu3  ;;  %v10896_v62 = vld [vmem:[%s22028_s9 + $0x558] sm:$0xf]  ;;  %v14384_v5 = vld [vmem:[%s22028_s9 + $0x57c] sm:$0xf0]  ;;  %v14259_v44 = vld [vmem:[%s22028_s9 + $0x19c] sm:$0xf] }
 0x1f8   :  { %v10897_v21 = vor.u32 %v14384_v5, %v10896_v62  ;;  %v10418_v46 = vld [vmem:[%s22028_s9 + $0x1c0] sm:$0xf0]  ;;  %v10741_v5 = vor.u32 %v14339_v45, %v10738_v6  ;;  %v14299_v45 = vld [vmem:[%s22028_s9 + $0x2dc] sm:$0xf] }
 0x1f9   :  { %v10421_v62 = vor.u32 %v14259_v44, %v10418_v46  ;;  %v14219_v44 = vld [vmem:[%s22028_s9 + $0x5c] sm:$0xf]  ;;  %v10258_v46 = vld [vmem:[%s22028_s9 + $0x80] sm:$0xf0] }
 0x1fa   :  { %5170 = vmatpush.bf16.msra.mxu0 %v10417_v7  ;;  %5183 = vmatpush.bf16.msra.mxu1 %v10737_v26  ;;  %v10536_v7 = vld [vmem:[%s22028_s9 + $0x288] sm:$0xf]  ;;  %v14294_v26 = vld [vmem:[%s22028_s9 + $0x2ac] sm:$0xf0]  ;;  %v10578_v6 = vld [vmem:[%s22028_s9 + $0x300] sm:$0xf0]  ;;  %v10261_v2 = vor.u32 %v14219_v44, %v10258_v46 }
 0x1fb   :  { %5196 = vmatpush.bf16.msra.mxu2 %v11057_v27  ;;  %5209 = vmatpush.bf16.msra.mxu3 %v11377_v30  ;;  %v10856_v27 = vld [vmem:[%s22028_s9 + $0x508] sm:$0xf]  ;;  %v14374_v30 = vld [vmem:[%s22028_s9 + $0x52c] sm:$0xf0]  ;;  %v10581_v3 = vor.u32 %v14299_v45, %v10578_v6 }
 0x1fc   :  { %v10857_v10 = vor.u32 %v14374_v30, %v10856_v27  ;;  %v14265_v45 = vld [vmem:[%s22028_s9 + $0x1c4] sm:$0xf0] }
 0x1fe   :  { %5171 = vmatpush.bf16.msra.mxu0 %v10377_v15  ;;  %5184 = vmatpush.bf16.msra.mxu1 %v10697_v40  ;;  %v14359_v15 = vld [vmem:[%s22028_s9 + $0x4bc] sm:$0xf]  ;;  %v10818_v40 = vld [vmem:[%s22028_s9 + $0x4e0] sm:$0xf0] }
 0x1ff   :  { %5197 = vmatpush.bf16.msra.mxu2 %v11017_v32  ;;  %5210 = vmatpush.bf16.msra.mxu3 %v11337_v52  ;;  %v2531_v17 = vpop.f32.mrf.mxu2  ;;  %v2544_v61 = vpop.f32.mrf.mxu3  ;;  %v10537_v32 = vor.u32 %v14294_v26, %v10536_v7  ;;  %v11138_v52 = vld [vmem:[%s22028_s9 + $0x760] sm:$0xf0]  ;;  %v10821_v34 = vor.u32 %v14359_v15, %v10818_v40  ;;  %v14409_v7 = vld [vmem:[%s22028_s9 + $0x64c] sm:$0xf]  ;;  %v11018_v26 = vld [vmem:[%s22028_s9 + $0x670] sm:$0xf0] }
 0x200   :  { %v11141_v38 = vor.u32 %v14439_v31, %v11138_v52  ;;  %v14239_v61 = vld [vmem:[%s22028_s9 + $0xfc] sm:$0xf]  ;;  %v11021_v4 = vor.u32 %v14409_v7, %v11018_v26  ;;  %v10658_v40 = vld [vmem:[%s22028_s9 + $0x3a0] sm:$0xf0]  ;;  %v14369_v26 = vld [vmem:[%s22028_s9 + $0x50c] sm:$0xf] }
 0x201   :  { %v14319_v15 = vld [vmem:[%s22028_s9 + $0x37c] sm:$0xf]  ;;  %v11298_v52 = vld [vmem:[%s22028_s9 + $0x8a0] sm:$0xf0]  ;;  %v10341_v39 = vor.u32 %v14239_v61, %v10338_v54  ;;  %v11178_v61 = vld [vmem:[%s22028_s9 + $0x7b0] sm:$0xf0] }
 0x202   :  { %5172 = vmatpush.bf16.msra.mxu0 %v10337_v53  ;;  %5185 = vmatpush.bf16.msra.mxu1 %v10657_v35  ;;  %v14269_v53 = vld [vmem:[%s22028_s9 + $0x1ec] sm:$0xf]  ;;  %v10458_v35 = vld [vmem:[%s22028_s9 + $0x210] sm:$0xf0]  ;;  %v14399_v31 = vld [vmem:[%s22028_s9 + $0x5fc] sm:$0xf]  ;;  %v10661_v8 = vor.u32 %v14319_v15, %v10658_v40 }
 0x203   :  { %5198 = vmatpush.bf16.msra.mxu2 %v10977_v58  ;;  %5211 = vmatpush.bf16.msra.mxu3 %v11297_v36  ;;  %v14349_v58 = vld [vmem:[%s22028_s9 + $0x46c] sm:$0xf]  ;;  %v10778_v36 = vld [vmem:[%s22028_s9 + $0x490] sm:$0xf0]  ;;  %v10461_v16 = vor.u32 %v14269_v53, %v10458_v35  ;;  %v10504_v54 = vld [vmem:[%s22028_s9 + $0x240] sm:$0xf] }
 0x204   :  { %v10781_v43 = vor.u32 %v14349_v58, %v10778_v36  ;;  %v14309_v53 = vld [vmem:[%s22028_s9 + $0x32c] sm:$0xf]  ;;  %v10618_v35 = vld [vmem:[%s22028_s9 + $0x350] sm:$0xf0]  ;;  %v14365_v15 = vld [vmem:[%s22028_s9 + $0x4e4] sm:$0xf0] }
 0x205   :  { %v10938_v36 = vld [vmem:[%s22028_s9 + $0x5d0] sm:$0xf0]  ;;  %v11144_v40 = vld [vmem:[%s22028_s9 + $0x740] sm:$0xf] }
 0x206   :  { %5173 = vmatpush.bf16.msra.mxu0 %v10297_v50  ;;  %5186 = vmatpush.bf16.msra.mxu1 %v10617_v55  ;;  %v11101_v50 = vor.u32 %v14429_v33, %v11098_v0  ;;  %v11421_v55 = vor.u32 %v14509_v41, %v11418_v42  ;;  %v14469_v33 = vld [vmem:[%s22028_s9 + $0x82c] sm:$0xf]  ;;  %v11258_v0 = vld [vmem:[%s22028_s9 + $0x850] sm:$0xf0] }
 0x207   :  { %5199 = vmatpush.bf16.msra.mxu2 %v10937_v59  ;;  %5212 = vmatpush.bf16.msra.mxu3 %v11257_v1  ;;  %v14419_v59 = vld [vmem:[%s22028_s9 + $0x69c] sm:$0xf]  ;;  %v11058_v1 = vld [vmem:[%s22028_s9 + $0x6c0] sm:$0xf0] }
 0x208   :  { %v11061_v19 = vor.u32 %v14419_v59, %v11058_v1  ;;  %v14379_v59 = vld [vmem:[%s22028_s9 + $0x55c] sm:$0xf]  ;;  %v10898_v1 = vld [vmem:[%s22028_s9 + $0x580] sm:$0xf0] }
 0x20a   :  { %5174 = vmatpush.bf16.msra.mxu0 %v10257_v20  ;;  %5187 = vmatpush.bf16.msra.mxu1 %v10577_v11  ;;  %v11381_v20 = vor.u32 %v14499_v60, %v11378_v37  ;;  %v14329_v11 = vld [vmem:[%s22028_s9 + $0x3cc] sm:$0xf]  ;;  %v14459_v60 = vld [vmem:[%s22028_s9 + $0x7dc] sm:$0xf]  ;;  %v11218_v37 = vld [vmem:[%s22028_s9 + $0x800] sm:$0xf0] }
 0x20b   :  { %5200 = vmatpush.bf16.msra.mxu2 %v10897_v21  ;;  %5213 = vmatpush.bf16.msra.mxu3 %v11217_v28  ;;  %v14489_v21 = vld [vmem:[%s22028_s9 + $0x8cc] sm:$0xf]  ;;  %v11338_v28 = vld [vmem:[%s22028_s9 + $0x8f0] sm:$0xf0]  ;;  %v10701_v17 = vor.u32 %v14329_v11, %v10698_v23  ;;  %v10901_v23 = vor.u32 %v14379_v59, %v10898_v1  ;;  %v11221_v7 = vor.u32 %v14459_v60, %v11218_v37  ;;  %v10744_v1 = vld [vmem:[%s22028_s9 + $0x420] sm:$0xf] }
 0x20c   :  { %v11341_v57 = vor.u32 %v14489_v21, %v11338_v28  ;;  %v10538_v11 = vld [vmem:[%s22028_s9 + $0x2b0] sm:$0xf0]  ;;  %v14449_v28 = vld [vmem:[%s22028_s9 + $0x78c] sm:$0xf]  ;;  %v14345_v60 = vld [vmem:[%s22028_s9 + $0x444] sm:$0xf0] }
 0x20d   :  { %v10858_v21 = vld [vmem:[%s22028_s9 + $0x530] sm:$0xf0]  ;;  %v11064_v37 = vld [vmem:[%s22028_s9 + $0x6a0] sm:$0xf] }
 0x20e   :  { %5175 = vmatpush.bf16.msra.mxu0 %v10217_v49  ;;  %5188 = vmatpush.bf16.msra.mxu1 %v10537_v32  ;;  %v17633_v27 = vpop.f32.mrf.mxu0  ;;  %v17635_v30 = vpop.f32.mrf.mxu1  ;;  %v10978_v49 = vld [vmem:[%s22028_s9 + $0x620] sm:$0xf0]  ;;  %v14479_v32 = vld [vmem:[%s22028_s9 + $0x87c] sm:$0xf] }
 0x20f   :  { %5201 = vmatpush.bf16.msra.mxu2 %v10857_v10  ;;  %5214 = vmatpush.bf16.msra.mxu3 %v11177_v18  ;;  %v14229_v10 = vld [vmem:[%s22028_s9 + $0xac] sm:$0xf]  ;;  %v10298_v18 = vld [vmem:[%s22028_s9 + $0xd0] sm:$0xf0] }
 0x211   :  { %5176 = vmatmul.bf16.vlgmr.msra.gmra.mxu0 %v17156_v12  ;;  %5189 = vmatmul.bf16.vlgmr.msra.gmra.mxu1 %v17161_v13 }
 0x212   :  { %5220 = vmatpush.bf16.msrb.mxu0 %v10501_v51  ;;  %5233 = vmatpush.bf16.msrb.mxu1 %v10821_v34  ;;  %v10981_v51 = vor.u32 %v14399_v31, %v10978_v49  ;;  %v11301_v34 = vor.u32 %v14479_v32, %v11298_v52  ;;  %v14445_v32 = vld [vmem:[%s22028_s9 + $0x764] sm:$0xf0]  ;;  %v11464_v52 = vld [vmem:[%s22028_s9 + $0x9c0] sm:$0xf] }
 0x213   :  { %5246 = vmatpush.bf16.msrb.mxu2 %v11141_v38  ;;  %5259 = vmatpush.bf16.msrb.mxu3 %v11461_v9  ;;  %v14389_v38 = vld [vmem:[%s22028_s9 + $0x5ac] sm:$0xf] }
 0x214   :  { %5202 = vmatmul.bf16.vlgmr.msra.gmra.mxu2 %v17166_v63  ;;  %5215 = vmatmul.bf16.vlgmr.msra.gmra.mxu3 %v17180_v25 }
 0x216   :  { %5221 = vmatpush.bf16.msrb.mxu0 %v10461_v16  ;;  %5234 = vmatpush.bf16.msrb.mxu1 %v10781_v43  ;;  %v2557_v41 = vpop.f32.mrf.mxu0  ;;  %v2570_v42 = vpop.f32.mrf.mxu1  ;;  %v10301_v16 = vor.u32 %v14229_v10, %v10298_v18  ;;  %v10621_v43 = vor.u32 %v14309_v53, %v10618_v35  ;;  %v10861_v10 = vor.u32 %v14369_v26, %v10858_v21  ;;  %v10464_v53 = vld [vmem:[%s22028_s9 + $0x1f0] sm:$0xf]  ;;  %v14275_v35 = vld [vmem:[%s22028_s9 + $0x214] sm:$0xf0] }
 0x217   :  { %5247 = vmatpush.bf16.msrb.mxu2 %v11101_v50  ;;  %5260 = vmatpush.bf16.msrb.mxu3 %v11421_v55  ;;  %v17676_v9 = vpop.f32.mrf.mxu2  ;;  %v17678_v58 = vpop.f32.mrf.mxu3  ;;  %v10941_v50 = vor.u32 %v14389_v38, %v10938_v36  ;;  %v11261_v55 = vor.u32 %v14469_v33, %v11258_v0  ;;  %v11181_v18 = vor.u32 %v14449_v28, %v11178_v61  ;;  %v10784_v0 = vld [vmem:[%s22028_s9 + $0x470] sm:$0xf]  ;;  %v14355_v41 = vld [vmem:[%s22028_s9 + $0x494] sm:$0xf0] }
 0x218   :  { %v11145_v36 = vor.u32 %v14445_v32, %v11144_v40  ;;  %v11104_v42 = vld [vmem:[%s22028_s9 + $0x6f0] sm:$0xf]  ;;  %v10465_v46 = vor.u32 %v14275_v35, %v10464_v53  ;;  %v14335_v28 = vld [vmem:[%s22028_s9 + $0x3f4] sm:$0xf0]  ;;  %v10344_v32 = vld [vmem:[%s22028_s9 + $0x100] sm:$0xf] }
 0x219   :  { %v14495_v61 = vld [vmem:[%s22028_s9 + $0x8f4] sm:$0xf0]  ;;  %v14485_v53 = vld [vmem:[%s22028_s9 + $0x8a4] sm:$0xf0]  ;;  %v2650_v35 = vmax.f32 %v17285_v24, 0.0 }
 0x21a   :  { %5222 = vmatpush.bf16.msrb.mxu0 %v10421_v62  ;;  %5235 = vmatpush.bf16.msrb.mxu1 %v10741_v5  ;;  %v1795_v62 = vperm.slane %v17191_v29, 1  ;;  %v14209_v5 = vld [vmem:[%s22028_s9 + $0xc] sm:$0xf]  ;;  %v10624_v24 = vld [vmem:[%s22028_s9 + $0x330] sm:$0xf] }
 0x21b   :  { %5248 = vmatpush.bf16.msrb.mxu2 %v11061_v19  ;;  %5261 = vmatpush.bf16.msrb.mxu3 %v11381_v20  ;;  %v10218_v19 = vld [vmem:[%s22028_s9 + $0x30] sm:$0xf0]  ;;  %v14289_v20 = vld [vmem:[%s22028_s9 + $0x28c] sm:$0xf] }
 0x21c   :  { %v10221_v31 = vor.u32 %v14209_v5, %v10218_v19  ;;  %v10541_v49 = vor.u32 %v14289_v20, %v10538_v11  ;;  %v2504_v38 = vadd.f32 %v17429_v56, %v1795_v62  ;;  %v14435_v56 = vld [vmem:[%s22028_s9 + $0x714] sm:$0xf0]  ;;  %v11384_v62 = vld [vmem:[%s22028_s9 + $0x920] sm:$0xf]  ;;  %v14505_v5 = vld [vmem:[%s22028_s9 + $0x944] sm:$0xf0] }
 0x21d   :  { %v11105_v59 = vor.u32 %v14435_v56, %v11104_v42  ;;  %v1797_v20 = vperm.slane %v17191_v29, 3  ;;  %v11385_v21 = vor.u32 %v14505_v5, %v11384_v62  ;;  %v14235_v56 = vld [vmem:[%s22028_s9 + $0xd4] sm:$0xf0] }
 0x21e   :  { %5223 = vmatpush.bf16.msrb.mxu0 %v10381_v14  ;;  %5236 = vmatpush.bf16.msrb.mxu1 %v10701_v17  ;;  %v2517_v6 = vadd.f32 %v17431_v22, %v2504_v38  ;;  %v14425_v22 = vld [vmem:[%s22028_s9 + $0x6c4] sm:$0xf0] }
 0x21f   :  { %5249 = vmatpush.bf16.msrb.mxu2 %v11021_v4  ;;  %5262 = vmatpush.bf16.msrb.mxu3 %v11341_v57  ;;  %v2583_v14 = vpop.f32.mrf.mxu2  ;;  %v2596_v17 = vpop.f32.mrf.mxu3  ;;  %v14285_v4 = vld [vmem:[%s22028_s9 + $0x264] sm:$0xf0]  ;;  %v10824_v57 = vld [vmem:[%s22028_s9 + $0x4c0] sm:$0xf] }
 0x220   :  { %v11024_v14 = vld [vmem:[%s22028_s9 + $0x650] sm:$0xf]  ;;  %v14415_v17 = vld [vmem:[%s22028_s9 + $0x674] sm:$0xf0] }
 0x222   :  { %5224 = vmatpush.bf16.msrb.mxu0 %v10341_v39  ;;  %5237 = vmatpush.bf16.msrb.mxu1 %v10661_v8  ;;  %v14525_v39 = vld [vmem:[%s22028_s9 + $0x9e4] sm:$0xf0]  ;;  %v1796_v8 = vperm.slane %v17191_v29, 2  ;;  %v11065_v29 = vor.u32 %v14425_v22, %v11064_v37 }
 0x223   :  { %5250 = vmatpush.bf16.msrb.mxu2 %v10981_v51  ;;  %5263 = vmatpush.bf16.msrb.mxu3 %v11301_v34  ;;  %v10505_v51 = vor.u32 %v14285_v4, %v10504_v54  ;;  %v10825_v34 = vor.u32 %v14365_v15, %v10824_v57  ;;  %v11465_v33 = vor.u32 %v14525_v39, %v11464_v52  ;;  %v14245_v52 = vld [vmem:[%s22028_s9 + $0x124] sm:$0xf0] }
 0x224   :  { %v2556_v44 = vadd.f32 %v17633_v27, %v1796_v8 }
 0x226   :  { %5225 = vmatpush.bf16.msrb.mxu0 %v10301_v16  ;;  %5238 = vmatpush.bf16.msrb.mxu1 %v10621_v43  ;;  %v11424_v16 = vld [vmem:[%s22028_s9 + $0x970] sm:$0xf]  ;;  %v14515_v43 = vld [vmem:[%s22028_s9 + $0x994] sm:$0xf0]  ;;  %v2569_v19 = vadd.f32 %v17635_v30, %v2556_v44 }
 0x227   :  { %5251 = vmatpush.bf16.msrb.mxu2 %v10941_v50  ;;  %5264 = vmatpush.bf16.msrb.mxu3 %v11261_v55  ;;  %v10785_v50 = vor.u32 %v14355_v41, %v10784_v0  ;;  %v10424_v55 = vld [vmem:[%s22028_s9 + $0x1a0] sm:$0xf]  ;;  %v11425_v27 = vor.u32 %v14515_v43, %v11424_v16  ;;  %v10704_v30 = vld [vmem:[%s22028_s9 + $0x3d0] sm:$0xf]  ;;  %v10345_v41 = vor.u32 %v14245_v52, %v10344_v32  ;;  %v14315_v16 = vld [vmem:[%s22028_s9 + $0x354] sm:$0xf0] }
 0x228   :  { %v10425_v11 = vor.u32 %v14265_v45, %v10424_v55  ;;  %v2582_v26 = vadd.f32 %v17676_v9, %v2569_v19  ;;  %v11344_v9 = vld [vmem:[%s22028_s9 + $0x8d0] sm:$0xf]  ;;  %v14395_v45 = vld [vmem:[%s22028_s9 + $0x5d4] sm:$0xf0] }
 0x229   :  { %v11345_v8 = vor.u32 %v14495_v61, %v11344_v9  ;;  %v10304_v0 = vld [vmem:[%s22028_s9 + $0xb0] sm:$0xf] }
 0x22a   :  { %5226 = vmatpush.bf16.msrb.mxu0 %v10261_v2  ;;  %5239 = vmatpush.bf16.msrb.mxu1 %v10581_v3  ;;  %v17819_v2 = vld [vmem:[%s22026_s7] sm:$0xf]  ;;  %v2530_v3 = vadd.f32 %v17472_v47, %v2517_v6  ;;  %v14255_v47 = vld [vmem:[%s22028_s9 + $0x174] sm:$0xf0]  ;;  %v2595_v39 = vadd.f32 %v17678_v58, %v2582_v26  ;;  %v14405_v58 = vld [vmem:[%s22028_s9 + $0x624] sm:$0xf0]  ;;  %v10305_v19 = vor.u32 %v14235_v56, %v10304_v0 }
 0x22b   :  { %5252 = vmatpush.bf16.msrb.mxu2 %v10901_v23  ;;  %5265 = vmatpush.bf16.msrb.mxu3 %v11221_v7  ;;  %v10745_v23 = vor.u32 %v14345_v60, %v10744_v1  ;;  %v10384_v7 = vld [vmem:[%s22028_s9 + $0x150] sm:$0xf]  ;;  %v8832_v15 = vperm.slane %v17819_v2, 0  ;;  %v14475_v1 = vld [vmem:[%s22028_s9 + $0x854] sm:$0xf0]  ;;  %v8835_v62 = vperm.slane %v17819_v2, 3 }
 0x22c   :  { %v2543_v54 = vadd.f32 %v17474_v48, %v2530_v3  ;;  %v10385_v40 = vor.u32 %v14255_v47, %v10384_v7  ;;  %v2652_v43 = vmax.f32 %v2595_v39, 0.0  ;;  %v10944_v55 = vld [vmem:[%s22028_s9 + $0x5b0] sm:$0xf]  ;;  %v14225_v7 = vld [vmem:[%s22028_s9 + $0x84] sm:$0xf0] }
 0x22d   :  { %v8840_v60 = vmul.f32 %v8832_v15, %v2650_v35  ;;  %v10584_v47 = vld [vmem:[%s22028_s9 + $0x2e0] sm:$0xf]  ;;  %v10864_v39 = vld [vmem:[%s22028_s9 + $0x510] sm:$0xf]  ;;  %v14520_v56 = vld [vmem:[%s22028_s9 + $0x9c4] sm:$0xf] }
 0x22e   :  { %5227 = vmatpush.bf16.msrb.mxu0 %v10221_v31  ;;  %5240 = vmatpush.bf16.msrb.mxu1 %v10541_v49  ;;  %v2607_v4 = vpop.f32.mrf.mxu0  ;;  %v2620_v57 = vpop.f32.mrf.mxu1  ;;  %v10705_v31 = vor.u32 %v14335_v28, %v10704_v30  ;;  %v11025_v49 = vor.u32 %v14415_v17, %v11024_v14  ;;  %v2651_v38 = vmax.f32 %v2543_v54, 0.0  ;;  %v14385_v28 = vld [vmem:[%s22028_s9 + $0x584] sm:$0xf0]  ;;  %v11224_v14 = vld [vmem:[%s22028_s9 + $0x7e0] sm:$0xf] }
 0x22f   :  { %5253 = vmatpush.bf16.msrb.mxu2 %v10861_v10  ;;  %5266 = vmatpush.bf16.msrb.mxu3 %v11181_v18  ;;  %v2608_v48 = vadd.f32 %v2607_v4, %v1797_v20  ;;  %v10664_v10 = vld [vmem:[%s22028_s9 + $0x380] sm:$0xf]  ;;  %v14325_v18 = vld [vmem:[%s22028_s9 + $0x3a4] sm:$0xf0]  ;;  %v10625_v20 = vor.u32 %v14315_v16, %v10624_v24  ;;  %v10224_v54 = vld [vmem:[%s22028_s9 + $0x10] sm:$0xf] }
 0x230   :  { %v10665_v42 = vor.u32 %v14325_v18, %v10664_v10  ;;  %v14465_v17 = vld [vmem:[%s22028_s9 + $0x804] sm:$0xf0]  ;;  %v11466_v24 = vld [vmem:[%s22028_s9 + $0x9e8] sm:$0xf0] }
 0x231   :  { %5228 = vmatmul.bf16.vlgmr.msrb.gmra.mxu0 %v17156_v12  ;;  %5241 = vmatmul.bf16.vlgmr.msrb.gmra.mxu1 %v17161_v13  ;;  %v2621_v44 = vadd.f32 %v2620_v57, %v2608_v48  ;;  %v11225_v52 = vor.u32 %v14465_v17, %v11224_v14  ;;  %v14375_v48 = vld [vmem:[%s22028_s9 + $0x534] sm:$0xf0]  ;;  %v10386_v14 = vld [vmem:[%s22028_s9 + $0x178] sm:$0xf0] }
 0x232   :  { %5272 = vmatpush.bf16.msra.mxu0 %v10505_v51  ;;  %5285 = vmatpush.bf16.msra.mxu1 %v10825_v34  ;;  %v10984_v51 = vld [vmem:[%s22028_s9 + $0x600] sm:$0xf]  ;;  %v10865_v16 = vor.u32 %v14375_v48, %v10864_v39  ;;  %v14240_v48 = vld [vmem:[%s22028_s9 + $0x104] sm:$0xf] }
 0x233   :  { %5298 = vmatpush.bf16.msra.mxu2 %v11145_v36  ;;  %5311 = vmatpush.bf16.msra.mxu3 %v11465_v33  ;;  %v11304_v34 = vld [vmem:[%s22028_s9 + $0x880] sm:$0xf]  ;;  %v8833_v36 = vperm.slane %v17819_v2, 1  ;;  %v8834_v33 = vperm.slane %v17819_v2, 2 }
 0x234   :  { %5254 = vmatmul.bf16.vlgmr.msrb.gmra.mxu2 %v17166_v63  ;;  %5267 = vmatmul.bf16.vlgmr.msrb.gmra.mxu3 %v17180_v25 }
 0x235   :  { %v8841_v37 = vmul.f32 %v8833_v36, %v2651_v38  ;;  %v8842_v2 = vmul.f32 %v8834_v33, %v2652_v43  ;;  %v14360_v38 = vld [vmem:[%s22028_s9 + $0x4c4] sm:$0xf]  ;;  %v10826_v36 = vld [vmem:[%s22028_s9 + $0x4e8] sm:$0xf0] }
 0x236   :  { %5273 = vmatpush.bf16.msra.mxu0 %v10465_v46  ;;  %5286 = vmatpush.bf16.msra.mxu1 %v10785_v50  ;;  %v10985_v46 = vor.u32 %v14405_v58, %v10984_v51  ;;  %v11305_v50 = vor.u32 %v14485_v53, %v11304_v34  ;;  %v2609_v5 = vpop.f32.mrf.mxu0  ;;  %v2622_v3 = vpop.f32.mrf.mxu1  ;;  %v14455_v58 = vld [vmem:[%s22028_s9 + $0x7b4] sm:$0xf0]  ;;  %v14280_v34 = vld [vmem:[%s22028_s9 + $0x244] sm:$0xf]  ;;  %v10506_v53 = vld [vmem:[%s22028_s9 + $0x268] sm:$0xf0] }
 0x237   :  { %5299 = vmatpush.bf16.msra.mxu2 %v11105_v59  ;;  %5312 = vmatpush.bf16.msra.mxu3 %v11425_v27  ;;  %v2633_v6 = vpop.f32.mrf.mxu2  ;;  %v2646_v59 = vpop.f32.mrf.mxu3  ;;  %v11264_v27 = vld [vmem:[%s22028_s9 + $0x830] sm:$0xf]  ;;  %v8844_v9 = vadd.f32 %v8841_v37, %v8840_v60  ;;  %v14440_v33 = vld [vmem:[%s22028_s9 + $0x744] sm:$0xf]  ;;  %v11106_v60 = vld [vmem:[%s22028_s9 + $0x718] sm:$0xf0] }
 0x238   :  { %v2634_v22 = vadd.f32 %v2633_v6, %v2621_v44  ;;  %v11265_v26 = vor.u32 %v14475_v1, %v11264_v27  ;;  %v10509_v44 = vor.u32 %v14280_v34, %v10506_v53  ;;  %v11469_v6 = vor.u32 %v14520_v56, %v11466_v24  ;;  %v10786_v27 = vld [vmem:[%s22028_s9 + $0x498] sm:$0xf0]  ;;  %v14430_v1 = vld [vmem:[%s22028_s9 + $0x6f4] sm:$0xf]  ;;  %v14260_v3 = vld [vmem:[%s22028_s9 + $0x1a4] sm:$0xf] }
 0x239   :  { %v8845_v10 = vadd.f32 %v8844_v9, %v8842_v2  ;;  %v14510_v37 = vld [vmem:[%s22028_s9 + $0x974] sm:$0xf]  ;;  %v11066_v2 = vld [vmem:[%s22028_s9 + $0x6c8] sm:$0xf0]  ;;  %v14400_v34 = vld [vmem:[%s22028_s9 + $0x604] sm:$0xf] }
 0x23a   :  { %5274 = vmatpush.bf16.msra.mxu0 %v10425_v11  ;;  %5287 = vmatpush.bf16.msra.mxu1 %v10745_v23  ;;  %v10945_v11 = vor.u32 %v14395_v45, %v10944_v55  ;;  %v10264_v23 = vld [vmem:[%s22028_s9 + $0x60] sm:$0xf]  ;;  %v2647_v30 = vadd.f32 %v2646_v59, %v2634_v22  ;;  %v10466_v55 = vld [vmem:[%s22028_s9 + $0x218] sm:$0xf0]  ;;  %v14350_v59 = vld [vmem:[%s22028_s9 + $0x474] sm:$0xf] }
 0x23b   :  { %5300 = vmatpush.bf16.msra.mxu2 %v11065_v29  ;;  %5313 = vmatpush.bf16.msra.mxu3 %v11385_v21  ;;  %v14305_v29 = vld [vmem:[%s22028_s9 + $0x304] sm:$0xf0]  ;;  %v10904_v21 = vld [vmem:[%s22028_s9 + $0x560] sm:$0xf]  ;;  %v10265_v4 = vor.u32 %v14225_v7, %v10264_v23  ;;  %v11426_v22 = vld [vmem:[%s22028_s9 + $0x998] sm:$0xf0]  ;;  %v10789_v5 = vor.u32 %v14350_v59, %v10786_v27 }
 0x23c   :  { %v2653_v61 = vmax.f32 %v2647_v30, 0.0  ;;  %v10585_v57 = vor.u32 %v14305_v29, %v10584_v47  ;;  %v10905_v15 = vor.u32 %v14385_v28, %v10904_v21  ;;  %v14340_v23 = vld [vmem:[%s22028_s9 + $0x424] sm:$0xf]  ;;  %v10746_v7 = vld [vmem:[%s22028_s9 + $0x448] sm:$0xf0] }
 0x23d   :  { %v14420_v47 = vld [vmem:[%s22028_s9 + $0x6a4] sm:$0xf]  ;;  %v10749_v21 = vor.u32 %v14340_v23, %v10746_v7  ;;  %v14250_v28 = vld [vmem:[%s22028_s9 + $0x154] sm:$0xf]  ;;  %v10986_v53 = vld [vmem:[%s22028_s9 + $0x628] sm:$0xf0] }
 0x23e   :  { %5275 = vmatpush.bf16.msra.mxu0 %v10385_v40  ;;  %5288 = vmatpush.bf16.msra.mxu1 %v10705_v31  ;;  %v14215_v40 = vld [vmem:[%s22028_s9 + $0x34] sm:$0xf0]  ;;  %v10544_v31 = vld [vmem:[%s22028_s9 + $0x290] sm:$0xf]  ;;  %v8843_v32 = vmul.f32 %v8835_v62, %v2653_v61  ;;  %v14500_v30 = vld [vmem:[%s22028_s9 + $0x924] sm:$0xf]  ;;  %v11069_v17 = vor.u32 %v14420_v47, %v11066_v2 }
 0x23f   :  { %5301 = vmatpush.bf16.msra.mxu2 %v11025_v49  ;;  %5314 = vmatpush.bf16.msra.mxu3 %v11345_v8  ;;  %v14295_v49 = vld [vmem:[%s22028_s9 + $0x2b4] sm:$0xf0]  ;;  %v11184_v8 = vld [vmem:[%s22028_s9 + $0x790] sm:$0xf]  ;;  %v2635_v18 = vpop.f32.mrf.mxu2  ;;  %v2648_v51 = vpop.f32.mrf.mxu3  ;;  %v10225_v0 = vor.u32 %v14215_v40, %v10224_v54  ;;  %v14330_v61 = vld [vmem:[%s22028_s9 + $0x3d4] sm:$0xf] }
 0x240   :  { %v8846_v35 = vadd.f32 %v8845_v10, %v8843_v32  ;;  %v11185_v43 = vor.u32 %v14455_v58, %v11184_v8  ;;  %v10706_v54 = vld [vmem:[%s22028_s9 + $0x3f8] sm:$0xf0]  ;;  %v10346_v8 = vld [vmem:[%s22028_s9 + $0x128] sm:$0xf0]  ;;  %v14320_v51 = vld [vmem:[%s22028_s9 + $0x384] sm:$0xf] }
 0x241   :  { %v11346_v40 = vld [vmem:[%s22028_s9 + $0x8f8] sm:$0xf0]  ;;  %v10709_v39 = vor.u32 %v14330_v61, %v10706_v54  ;;  %v10666_v58 = vld [vmem:[%s22028_s9 + $0x3a8] sm:$0xf0]  ;;  %v14310_v24 = vld [vmem:[%s22028_s9 + $0x334] sm:$0xf] }
 0x242   :  { %5276 = vmatpush.bf16.msra.mxu0 %v10345_v41  ;;  %5289 = vmatpush.bf16.msra.mxu1 %v10665_v42  ;;  %v10545_v41 = vor.u32 %v14295_v49, %v10544_v31  ;;  %v11146_v42 = vld [vmem:[%s22028_s9 + $0x768] sm:$0xf0]  ;;  %v14460_v7 = vld [vmem:[%s22028_s9 + $0x7e4] sm:$0xf]  ;;  %v14210_v2 = vld [vmem:[%s22028_s9 + $0x14] sm:$0xf] }
 0x243   :  { %5302 = vmatpush.bf16.msra.mxu2 %v10985_v46  ;;  %5315 = vmatpush.bf16.msra.mxu3 %v11305_v50  ;;  %v10829_v46 = vor.u32 %v14360_v38, %v10826_v36  ;;  %v14270_v50 = vld [vmem:[%s22028_s9 + $0x1f4] sm:$0xf]  ;;  %v11149_v45 = vor.u32 %v14440_v33, %v11146_v42  ;;  %v11306_v38 = vld [vmem:[%s22028_s9 + $0x8a8] sm:$0xf0]  ;;  %v10349_v36 = vor.u32 %v14240_v48, %v10346_v8  ;;  %v10866_v61 = vld [vmem:[%s22028_s9 + $0x538] sm:$0xf0] }
 0x244   :  { %8847 = vadd.xlane.f32.xlu1 %v8846_v35  ;;  %v10469_v62 = vor.u32 %v14270_v50, %v10466_v55  ;;  %v14480_v35 = vld [vmem:[%s22028_s9 + $0x884] sm:$0xf]  ;;  %v10669_v33 = vor.u32 %v14320_v51, %v10666_v58  ;;  %v10989_v42 = vor.u32 %v14400_v34, %v10986_v53  ;;  %v10946_v50 = vld [vmem:[%s22028_s9 + $0x5d8] sm:$0xf0]  ;;  %v14470_v55 = vld [vmem:[%s22028_s9 + $0x834] sm:$0xf] }
 0x245   :  { %v11309_v56 = vor.u32 %v14480_v35, %v11306_v38  ;;  %v10906_v23 = vld [vmem:[%s22028_s9 + $0x588] sm:$0xf0]  ;;  %v14450_v54 = vld [vmem:[%s22028_s9 + $0x794] sm:$0xf]  ;;  %v14446_v8 = vld [vmem:[%s22028_s9 + $0x76c] sm:$0xf0] }
 0x246   :  { %5277 = vmatpush.bf16.msra.mxu0 %v10305_v19  ;;  %5290 = vmatpush.bf16.msra.mxu1 %v10625_v20  ;;  %v10426_v19 = vld [vmem:[%s22028_s9 + $0x1c8] sm:$0xf0]  ;;  %v11109_v20 = vor.u32 %v14430_v1, %v11106_v60  ;;  %v10472_v35 = vld [vmem:[%s22028_s9 + $0x1f8] sm:$0xf]  ;;  %v14276_v38 = vld [vmem:[%s22028_s9 + $0x21c] sm:$0xf0] }
 0x247   :  { %5303 = vmatpush.bf16.msra.mxu2 %v10945_v11  ;;  %5316 = vmatpush.bf16.msra.mxu3 %v11265_v26  ;;  %v11429_v11 = vor.u32 %v14510_v37, %v11426_v22  ;;  %v11386_v26 = vld [vmem:[%s22028_s9 + $0x948] sm:$0xf0]  ;;  %v10429_v29 = vor.u32 %v14260_v3, %v10426_v19  ;;  %v14220_v37 = vld [vmem:[%s22028_s9 + $0x64] sm:$0xf] }
 0x248   :  { %v11389_v9 = vor.u32 %v14500_v30, %v11386_v26  ;;  %v10266_v22 = vld [vmem:[%s22028_s9 + $0x88] sm:$0xf0]  ;;  %v14300_v19 = vld [vmem:[%s22028_s9 + $0x2e4] sm:$0xf] }
 0x249   :  { %v11226_v47 = vld [vmem:[%s22028_s9 + $0x808] sm:$0xf0]  ;;  %v10269_v30 = vor.u32 %v14220_v37, %v10266_v22  ;;  %v14506_v37 = vld [vmem:[%s22028_s9 + $0x94c] sm:$0xf0] }
 0x24a   :  { %5278 = vmatpush.bf16.msra.mxu0 %v10265_v4  ;;  %5291 = vmatpush.bf16.msra.mxu1 %v10585_v57  ;;  %v14410_v4 = vld [vmem:[%s22028_s9 + $0x654] sm:$0xf]  ;;  %v11026_v57 = vld [vmem:[%s22028_s9 + $0x678] sm:$0xf0] }
 0x24b   :  { %5304 = vmatpush.bf16.msra.mxu2 %v10905_v15  ;;  %5317 = vmatpush.bf16.msra.mxu3 %v11225_v52  ;;  %v14490_v15 = vld [vmem:[%s22028_s9 + $0x8d4] sm:$0xf]  ;;  %v10389_v52 = vor.u32 %v14250_v28, %v10386_v14  ;;  %v11029_v10 = vor.u32 %v14410_v4, %v11026_v57  ;;  %v10546_v28 = vld [vmem:[%s22028_s9 + $0x2b8] sm:$0xf0] }
 0x24c   :  { %v11349_v18 = vor.u32 %v14490_v15, %v11346_v40  ;;  %v11186_v15 = vld [vmem:[%s22028_s9 + $0x7b8] sm:$0xf0]  ;;  %v10512_v40 = vld [vmem:[%s22028_s9 + $0x248] sm:$0xf] }
 0x24d   :  { %v11189_v58 = vor.u32 %v14450_v54, %v11186_v15  ;;  %v14326_v15 = vld [vmem:[%s22028_s9 + $0x3ac] sm:$0xf0] }
 0x24e   :  { %5279 = vmatpush.bf16.msra.mxu0 %v10225_v0  ;;  %5292 = vmatpush.bf16.msra.mxu1 %v10545_v41  ;;  %v5073_v31 = vpop.f32.mrf.mxu0  ;;  %v5086_v49 = vpop.f32.mrf.mxu1  ;;  %v14230_v0 = vld [vmem:[%s22028_s9 + $0xb4] sm:$0xf]  ;;  %v10306_v41 = vld [vmem:[%s22028_s9 + $0xd8] sm:$0xf0] }
 0x24f   :  { %5305 = vmatpush.bf16.msra.mxu2 %v10865_v16  ;;  %5318 = vmatpush.bf16.msra.mxu3 %v11185_v43  ;;  %v5087_v32 = vadd.f32 %v5086_v49, %v5073_v31  ;;  %v10626_v16 = vld [vmem:[%s22028_s9 + $0x358] sm:$0xf0]  ;;  %v14390_v43 = vld [vmem:[%s22028_s9 + $0x5b4] sm:$0xf]  ;;  %v10309_v1 = vor.u32 %v14230_v0, %v10306_v41  ;;  %v14286_v31 = vld [vmem:[%s22028_s9 + $0x26c] sm:$0xf0] }
 0x250   :  { %v10629_v60 = vor.u32 %v14310_v24, %v10626_v16  ;;  %v10832_v49 = vld [vmem:[%s22028_s9 + $0x4c8] sm:$0xf]  ;;  %v10513_v34 = vor.u32 %v14286_v31, %v10512_v40  ;;  %v10792_v0 = vld [vmem:[%s22028_s9 + $0x478] sm:$0xf]  ;;  %v14356_v41 = vld [vmem:[%s22028_s9 + $0x49c] sm:$0xf0] }
 0x251   :  { %5280 = vmatmul.bf16.vlgmr.msra.gmra.mxu0 %v17156_v12  ;;  %5293 = vmatmul.bf16.vlgmr.msra.gmra.mxu1 %v17161_v13  ;;  %v11432_v24 = vld [vmem:[%s22028_s9 + $0x978] sm:$0xf]  ;;  %v14516_v16 = vld [vmem:[%s22028_s9 + $0x99c] sm:$0xf0]  ;;  %v10992_v40 = vld [vmem:[%s22028_s9 + $0x608] sm:$0xf] }
 0x252   :  { %5324 = vmatpush.bf16.msrb.mxu0 %v10509_v44  ;;  %5337 = vmatpush.bf16.msrb.mxu1 %v10829_v46  ;;  %v14406_v31 = vld [vmem:[%s22028_s9 + $0x62c] sm:$0xf0] }
 0x253   :  { %5350 = vmatpush.bf16.msrb.mxu2 %v11149_v45  ;;  %5363 = vmatpush.bf16.msrb.mxu3 %v11469_v6  ;;  %v11266_v45 = vld [vmem:[%s22028_s9 + $0x858] sm:$0xf0] }
 0x254   :  { %5306 = vmatmul.bf16.vlgmr.msra.gmra.mxu2 %v17166_v63  ;;  %5319 = vmatmul.bf16.vlgmr.msra.gmra.mxu3 %v17180_v25  ;;  %v11269_v3 = vor.u32 %v14470_v55, %v11266_v45  ;;  %v11433_v45 = vor.u32 %v14516_v16, %v11432_v24  ;;  %v10272_v16 = vld [vmem:[%s22028_s9 + $0x68] sm:$0xf] }
 0x256   :  { %5325 = vmatpush.bf16.msrb.mxu0 %v10469_v62  ;;  %5338 = vmatpush.bf16.msrb.mxu1 %v10789_v5  ;;  %v5075_v59 = vpop.f32.mrf.mxu0  ;;  %v5088_v27 = vpop.f32.mrf.mxu1  ;;  %v10949_v5 = vor.u32 %v14390_v43, %v10946_v50  ;;  %v10473_v43 = vor.u32 %v14276_v38, %v10472_v35  ;;  %v14266_v50 = vld [vmem:[%s22028_s9 + $0x1cc] sm:$0xf0]  ;;  %v14396_v38 = vld [vmem:[%s22028_s9 + $0x5dc] sm:$0xf0] }
 0x257   :  { %5351 = vmatpush.bf16.msrb.mxu2 %v11109_v20  ;;  %5364 = vmatpush.bf16.msrb.mxu3 %v11429_v11  ;;  %v5099_v44 = vpop.f32.mrf.mxu2  ;;  %v5112_v46 = vpop.f32.mrf.mxu3  ;;  %v10586_v20 = vld [vmem:[%s22028_s9 + $0x308] sm:$0xf0]  ;;  %v14380_v11 = vld [vmem:[%s22028_s9 + $0x564] sm:$0xf]  ;;  %v14346_v59 = vld [vmem:[%s22028_s9 + $0x44c] sm:$0xf0] }
 0x258   :  { %v5100_v6 = vadd.f32 %v5099_v44, %v5087_v32  ;;  %v10589_v26 = vor.u32 %v14300_v19, %v10586_v20  ;;  %v10909_v14 = vor.u32 %v14380_v11, %v10906_v23  ;;  %v14366_v32 = vld [vmem:[%s22028_s9 + $0x4ec] sm:$0xf0]  ;;  %v10793_v44 = vor.u32 %v14356_v41, %v10792_v0  ;;  %v11072_v27 = vld [vmem:[%s22028_s9 + $0x6a8] sm:$0xf]  ;;  %v14256_v19 = vld [vmem:[%s22028_s9 + $0x17c] sm:$0xf0] }
 0x259   :  { %v10833_v53 = vor.u32 %v14366_v32, %v10832_v49  ;;  %v10712_v23 = vld [vmem:[%s22028_s9 + $0x3d8] sm:$0xf]  ;;  %v11312_v49 = vld [vmem:[%s22028_s9 + $0x888] sm:$0xf]  ;;  %v14486_v32 = vld [vmem:[%s22028_s9 + $0x8ac] sm:$0xf0] }
 0x25a   :  { %5326 = vmatpush.bf16.msrb.mxu0 %v10429_v29  ;;  %5339 = vmatpush.bf16.msrb.mxu1 %v10749_v21  ;;  %v18108_v62 = vadd.f32 %v5112_v46, %v5100_v6  ;;  %v10226_v29 = vld [vmem:[%s22028_s9 + $0x38] sm:$0xf0]  ;;  %v14290_v21 = vld [vmem:[%s22028_s9 + $0x294] sm:$0xf]  ;;  %v10432_v46 = vld [vmem:[%s22028_s9 + $0x1a8] sm:$0xf] }
 0x25b   :  { %5352 = vmatpush.bf16.msrb.mxu2 %v11069_v17  ;;  %5365 = vmatpush.bf16.msrb.mxu3 %v11389_v9  ;;  %v11229_v17 = vor.u32 %v14460_v7, %v11226_v47  ;;  %v14370_v9 = vld [vmem:[%s22028_s9 + $0x514] sm:$0xf]  ;;  %v10549_v48 = vor.u32 %v14290_v21, %v10546_v28  ;;  %v10752_v6 = vld [vmem:[%s22028_s9 + $0x428] sm:$0xf]  ;;  %v10433_v22 = vor.u32 %v14266_v50, %v10432_v46  ;;  %v14336_v7 = vld [vmem:[%s22028_s9 + $0x3fc] sm:$0xf0] }
 0x25c   :  { %v10869_v51 = vor.u32 %v14370_v9, %v10866_v61  ;;  %v11032_v47 = vld [vmem:[%s22028_s9 + $0x658] sm:$0xf]  ;;  %v10352_v9 = vld [vmem:[%s22028_s9 + $0x108] sm:$0xf]  ;;  %v14246_v61 = vld [vmem:[%s22028_s9 + $0x12c] sm:$0xf0] }
 0x25e   :  { %5327 = vmatpush.bf16.msrb.mxu0 %v10389_v52  ;;  %5340 = vmatpush.bf16.msrb.mxu1 %v10709_v39  ;;  %v11152_v52 = vld [vmem:[%s22028_s9 + $0x748] sm:$0xf]  ;;  %v10229_v39 = vor.u32 %v14210_v2, %v10226_v29  ;;  %v14416_v2 = vld [vmem:[%s22028_s9 + $0x67c] sm:$0xf0] }
 0x25f   :  { %5353 = vmatpush.bf16.msrb.mxu2 %v11029_v10  ;;  %5366 = vmatpush.bf16.msrb.mxu3 %v11349_v18  ;;  %v5101_v4 = vpop.f32.mrf.mxu2  ;;  %v5114_v57 = vpop.f32.mrf.mxu3  ;;  %v11472_v10 = vld [vmem:[%s22028_s9 + $0x9c8] sm:$0xf]  ;;  %v14526_v18 = vld [vmem:[%s22028_s9 + $0x9ec] sm:$0xf0]  ;;  %v11033_v54 = vor.u32 %v14416_v2, %v11032_v47  ;;  %v11192_v47 = vld [vmem:[%s22028_s9 + $0x798] sm:$0xf] }
 0x260   :  { %v10672_v57 = vld [vmem:[%s22028_s9 + $0x388] sm:$0xf] }
 0x262   :  { %5328 = vmatpush.bf16.msrb.mxu0 %v10349_v36  ;;  %5341 = vmatpush.bf16.msrb.mxu1 %v10669_v33  ;;  %v11153_v36 = vor.u32 %v14446_v8, %v11152_v52  ;;  %v11473_v33 = vor.u32 %v14526_v18, %v11472_v10  ;;  %v10353_v52 = vor.u32 %v14246_v61, %v10352_v9  ;;  %v14236_v8 = vld [vmem:[%s22028_s9 + $0xdc] sm:$0xf0] }
 0x263   :  { %5354 = vmatpush.bf16.msrb.mxu2 %v10989_v42  ;;  %5367 = vmatpush.bf16.msrb.mxu3 %v11309_v56  ;;  %v11112_v42 = vld [vmem:[%s22028_s9 + $0x6f8] sm:$0xf]  ;;  %v14436_v56 = vld [vmem:[%s22028_s9 + $0x71c] sm:$0xf0]  ;;  %v10993_v10 = vor.u32 %v14406_v31, %v10992_v40  ;;  %v11313_v18 = vor.u32 %v14486_v32, %v11312_v49  ;;  %v14271_v32 = vld [vmem:[%s22028_s9 + $0x1fc] sm:$0xf] }
 0x264   :  { %v11113_v55 = vor.u32 %v14436_v56, %v11112_v42 }
 0x266   :  { %5329 = vmatpush.bf16.msrb.mxu0 %v10309_v1  ;;  %5342 = vmatpush.bf16.msrb.mxu1 %v10629_v60  ;;  %v14426_v1 = vld [vmem:[%s22028_s9 + $0x6cc] sm:$0xf0]  ;;  %v11392_v60 = vld [vmem:[%s22028_s9 + $0x928] sm:$0xf] }
 0x267   :  { %5355 = vmatpush.bf16.msrb.mxu2 %v10949_v5  ;;  %5368 = vmatpush.bf16.msrb.mxu3 %v11269_v3  ;;  %v10753_v5 = vor.u32 %v14346_v59, %v10752_v6  ;;  %v10392_v3 = vld [vmem:[%s22028_s9 + $0x158] sm:$0xf]  ;;  %v11073_v20 = vor.u32 %v14426_v1, %v11072_v27  ;;  %v11393_v11 = vor.u32 %v14506_v37, %v11392_v60  ;;  %v10912_v6 = vld [vmem:[%s22028_s9 + $0x568] sm:$0xf]  ;;  %v14386_v59 = vld [vmem:[%s22028_s9 + $0x58c] sm:$0xf0] }
 0x268   :  { %v11232_v27 = vld [vmem:[%s22028_s9 + $0x7e8] sm:$0xf]  ;;  %v14466_v1 = vld [vmem:[%s22028_s9 + $0x80c] sm:$0xf0]  ;;  %v10232_v60 = vld [vmem:[%s22028_s9 + $0x18] sm:$0xf] }
 0x26a   :  { %5330 = vmatpush.bf16.msrb.mxu0 %v10269_v30  ;;  %5343 = vmatpush.bf16.msrb.mxu1 %v10589_v26  ;;  %v11352_v30 = vld [vmem:[%s22028_s9 + $0x8d8] sm:$0xf]  ;;  %v14496_v26 = vld [vmem:[%s22028_s9 + $0x8fc] sm:$0xf0] }
 0x26b   :  { %5356 = vmatpush.bf16.msrb.mxu2 %v10909_v14  ;;  %5369 = vmatpush.bf16.msrb.mxu3 %v11229_v17  ;;  %v10393_v14 = vor.u32 %v14256_v19, %v10392_v3  ;;  %v10713_v17 = vor.u32 %v14336_v7, %v10712_v23  ;;  %v11353_v4 = vor.u32 %v14496_v26, %v11352_v30  ;;  %v10552_v3 = vld [vmem:[%s22028_s9 + $0x298] sm:$0xf]  ;;  %v14296_v19 = vld [vmem:[%s22028_s9 + $0x2bc] sm:$0xf0] }
 0x26c   :  { %v10872_v23 = vld [vmem:[%s22028_s9 + $0x518] sm:$0xf]  ;;  %v14376_v7 = vld [vmem:[%s22028_s9 + $0x53c] sm:$0xf0]  ;;  %v10553_v61 = vor.u32 %v14296_v19, %v10552_v3 }
 0x26d   :  { %v14456_v26 = vld [vmem:[%s22028_s9 + $0x7bc] sm:$0xf0] }
 0x26e   :  { %5331 = vmatpush.bf16.msrb.mxu0 %v10229_v39  ;;  %5344 = vmatpush.bf16.msrb.mxu1 %v10549_v48  ;;  %v5125_v29 = vpop.f32.mrf.mxu0  ;;  %v5138_v21 = vpop.f32.mrf.mxu1  ;;  %v10673_v39 = vor.u32 %v14326_v15, %v10672_v57  ;;  %v10312_v48 = vld [vmem:[%s22028_s9 + $0xb8] sm:$0xf]  ;;  %v11474_v57 = vld [vmem:[%s22028_s9 + $0x9f0] sm:$0xf0]  ;;  %v10873_v15 = vor.u32 %v14376_v7, %v10872_v23  ;;  %v11193_v40 = vor.u32 %v14456_v26, %v11192_v47  ;;  %v14241_v7 = vld [vmem:[%s22028_s9 + $0x10c] sm:$0xf] }
 0x26f   :  { %5357 = vmatpush.bf16.msrb.mxu2 %v10869_v51  ;;  %5370 = vmatpush.bf16.msrb.mxu3 %v11189_v58  ;;  %v5139_v28 = vadd.f32 %v5138_v21, %v5125_v29  ;;  %v10632_v51 = vld [vmem:[%s22028_s9 + $0x338] sm:$0xf]  ;;  %v14316_v58 = vld [vmem:[%s22028_s9 + $0x35c] sm:$0xf0]  ;;  %v10313_v56 = vor.u32 %v14236_v8, %v10312_v48  ;;  %v14281_v29 = vld [vmem:[%s22028_s9 + $0x24c] sm:$0xf] }
 0x270   :  { %v10633_v24 = vor.u32 %v14316_v58, %v10632_v51  ;;  %v10514_v21 = vld [vmem:[%s22028_s9 + $0x270] sm:$0xf0]  ;;  %v14351_v8 = vld [vmem:[%s22028_s9 + $0x47c] sm:$0xf]  ;;  %v11114_v51 = vld [vmem:[%s22028_s9 + $0x720] sm:$0xf0] }
 0x271   :  { %5332 = vmatmul.bf16.vlgmr.msrb.gmra.mxu0 %v17156_v12  ;;  %5345 = vmatmul.bf16.vlgmr.msrb.gmra.mxu1 %v17161_v13  ;;  %v10517_v31 = vor.u32 %v14281_v29, %v10514_v21  ;;  %v14511_v58 = vld [vmem:[%s22028_s9 + $0x97c] sm:$0xf]  ;;  %v10354_v47 = vld [vmem:[%s22028_s9 + $0x130] sm:$0xf0]  ;;  %v14321_v26 = vld [vmem:[%s22028_s9 + $0x38c] sm:$0xf] }
 0x272   :  { %5376 = vmatpush.bf16.msra.mxu0 %v10513_v34  ;;  %5389 = vmatpush.bf16.msra.mxu1 %v10833_v53  ;;  %v10952_v34 = vld [vmem:[%s22028_s9 + $0x5b8] sm:$0xf]  ;;  %v10674_v29 = vld [vmem:[%s22028_s9 + $0x3b0] sm:$0xf0]  ;;  %v14401_v21 = vld [vmem:[%s22028_s9 + $0x60c] sm:$0xf] }
 0x273   :  { %5402 = vmatpush.bf16.msra.mxu2 %v11153_v36  ;;  %5415 = vmatpush.bf16.msra.mxu3 %v11473_v33  ;;  %v11272_v36 = vld [vmem:[%s22028_s9 + $0x838] sm:$0xf]  ;;  %v14476_v33 = vld [vmem:[%s22028_s9 + $0x85c] sm:$0xf0]  ;;  %v10953_v46 = vor.u32 %v14396_v38, %v10952_v34  ;;  %v11434_v34 = vld [vmem:[%s22028_s9 + $0x9a0] sm:$0xf0] }
 0x274   :  { %5358 = vmatmul.bf16.vlgmr.msrb.gmra.mxu2 %v17166_v63  ;;  %5371 = vmatmul.bf16.vlgmr.msrb.gmra.mxu3 %v17180_v25  ;;  %v11273_v50 = vor.u32 %v14476_v33, %v11272_v36  ;;  %v14261_v38 = vld [vmem:[%s22028_s9 + $0x1ac] sm:$0xf]  ;;  %v10434_v36 = vld [vmem:[%s22028_s9 + $0x1d0] sm:$0xf0] }
 0x276   :  { %5377 = vmatpush.bf16.msra.mxu0 %v10473_v43  ;;  %5390 = vmatpush.bf16.msra.mxu1 %v10793_v44  ;;  %v5127_v41 = vpop.f32.mrf.mxu0  ;;  %v5140_v42 = vpop.f32.mrf.mxu1  ;;  %v14226_v43 = vld [vmem:[%s22028_s9 + $0x8c] sm:$0xf0] }
 0x277   :  { %5403 = vmatpush.bf16.msra.mxu2 %v11113_v55  ;;  %5416 = vmatpush.bf16.msra.mxu3 %v11433_v45  ;;  %v5151_v53 = vpop.f32.mrf.mxu2  ;;  %v5164_v35 = vpop.f32.mrf.mxu3  ;;  %v10592_v55 = vld [vmem:[%s22028_s9 + $0x2e8] sm:$0xf]  ;;  %v14306_v45 = vld [vmem:[%s22028_s9 + $0x30c] sm:$0xf0]  ;;  %v10273_v37 = vor.u32 %v14226_v43, %v10272_v16  ;;  %v14341_v41 = vld [vmem:[%s22028_s9 + $0x42c] sm:$0xf] }
 0x278   :  { %v5152_v0 = vadd.f32 %v5151_v53, %v5139_v28  ;;  %v14361_v28 = vld [vmem:[%s22028_s9 + $0x4cc] sm:$0xf]  ;;  %v10754_v42 = vld [vmem:[%s22028_s9 + $0x450] sm:$0xf0] }
 0x279   :  { %v14501_v16 = vld [vmem:[%s22028_s9 + $0x92c] sm:$0xf]  ;;  %v11394_v43 = vld [vmem:[%s22028_s9 + $0x950] sm:$0xf0] }
 0x27a   :  { %5378 = vmatpush.bf16.msra.mxu0 %v10433_v22  ;;  %5391 = vmatpush.bf16.msra.mxu1 %v10753_v5  ;;  %v18306_v44 = vadd.f32 %v5164_v35, %v5152_v0  ;;  %v10593_v22 = vor.u32 %v14306_v45, %v10592_v55  ;;  %v14216_v5 = vld [vmem:[%s22028_s9 + $0x3c] sm:$0xf0]  ;;  %v11437_v0 = vor.u32 %v14511_v58, %v11434_v34  ;;  %v14251_v55 = vld [vmem:[%s22028_s9 + $0x15c] sm:$0xf]  ;;  %v10394_v45 = vld [vmem:[%s22028_s9 + $0x180] sm:$0xf0] }
 0x27b   :  { %5404 = vmatpush.bf16.msra.mxu2 %v11073_v20  ;;  %5417 = vmatpush.bf16.msra.mxu3 %v11393_v11  ;;  %v10913_v20 = vor.u32 %v14386_v59, %v10912_v6  ;;  %v11233_v11 = vor.u32 %v14466_v1, %v11232_v27  ;;  %v10233_v9 = vor.u32 %v14216_v5, %v10232_v60  ;;  %v14331_v27 = vld [vmem:[%s22028_s9 + $0x3dc] sm:$0xf]  ;;  %v10714_v1 = vld [vmem:[%s22028_s9 + $0x400] sm:$0xf0] }
 0x27c   :  { %v11397_v59 = vor.u32 %v14501_v16, %v11394_v43  ;;  %v14411_v60 = vld [vmem:[%s22028_s9 + $0x65c] sm:$0xf]  ;;  %v11354_v5 = vld [vmem:[%s22028_s9 + $0x900] sm:$0xf0]  ;;  %v10717_v23 = vor.u32 %v14331_v27, %v10714_v1  ;;  %v11234_v16 = vld [vmem:[%s22028_s9 + $0x810] sm:$0xf0] }
 0x27d   :  { %v14211_v43 = vld [vmem:[%s22028_s9 + $0x1c] sm:$0xf] }
 0x27e   :  { %5379 = vmatpush.bf16.msra.mxu0 %v10393_v14  ;;  %5392 = vmatpush.bf16.msra.mxu1 %v10713_v17  ;;  %v10834_v14 = vld [vmem:[%s22028_s9 + $0x4f0] sm:$0xf0]  ;;  %v14441_v17 = vld [vmem:[%s22028_s9 + $0x74c] sm:$0xf]  ;;  %v14371_v1 = vld [vmem:[%s22028_s9 + $0x51c] sm:$0xf] }
 0x27f   :  { %5405 = vmatpush.bf16.msra.mxu2 %v11033_v54  ;;  %5418 = vmatpush.bf16.msra.mxu3 %v11353_v4  ;;  %v5153_v2 = vpop.f32.mrf.mxu2  ;;  %v5166_v30 = vpop.f32.mrf.mxu3  ;;  %v11154_v54 = vld [vmem:[%s22028_s9 + $0x770] sm:$0xf0]  ;;  %v14521_v4 = vld [vmem:[%s22028_s9 + $0x9cc] sm:$0xf]  ;;  %v10837_v49 = vor.u32 %v14361_v28, %v10834_v14 }
 0x280   :  { %v11477_v48 = vor.u32 %v14521_v4, %v11474_v57  ;;  %v10994_v28 = vld [vmem:[%s22028_s9 + $0x630] sm:$0xf0]  ;;  %v14481_v14 = vld [vmem:[%s22028_s9 + $0x88c] sm:$0xf]  ;;  %v10314_v4 = vld [vmem:[%s22028_s9 + $0xe0] sm:$0xf0] }
 0x281   :  { %v10997_v57 = vor.u32 %v14401_v21, %v10994_v28 }
 0x282   :  { %5380 = vmatpush.bf16.msra.mxu0 %v10353_v52  ;;  %5393 = vmatpush.bf16.msra.mxu1 %v10673_v39  ;;  %v10474_v52 = vld [vmem:[%s22028_s9 + $0x220] sm:$0xf0]  ;;  %v11157_v39 = vor.u32 %v14441_v17, %v11154_v54  ;;  %v11314_v17 = vld [vmem:[%s22028_s9 + $0x8b0] sm:$0xf0]  ;;  %v14231_v54 = vld [vmem:[%s22028_s9 + $0xbc] sm:$0xf] }
 0x283   :  { %5406 = vmatpush.bf16.msra.mxu2 %v10993_v10  ;;  %5419 = vmatpush.bf16.msra.mxu3 %v11313_v18  ;;  %v10794_v10 = vld [vmem:[%s22028_s9 + $0x4a0] sm:$0xf0]  ;;  %v14431_v18 = vld [vmem:[%s22028_s9 + $0x6fc] sm:$0xf]  ;;  %v10477_v53 = vor.u32 %v14271_v32, %v10474_v52  ;;  %v10317_v58 = vor.u32 %v14231_v54, %v10314_v4 }
 0x284   :  { %v10797_v35 = vor.u32 %v14351_v8, %v10794_v10  ;;  %v11117_v33 = vor.u32 %v14431_v18, %v11114_v51  ;;  %v11274_v8 = vld [vmem:[%s22028_s9 + $0x860] sm:$0xf0] }
 0x286   :  { %5381 = vmatpush.bf16.msra.mxu0 %v10313_v56  ;;  %5394 = vmatpush.bf16.msra.mxu1 %v10633_v24  ;;  %v14421_v56 = vld [vmem:[%s22028_s9 + $0x6ac] sm:$0xf]  ;;  %v11074_v24 = vld [vmem:[%s22028_s9 + $0x6d0] sm:$0xf0] }
 0x287   :  { %5407 = vmatpush.bf16.msra.mxu2 %v10953_v46  ;;  %5420 = vmatpush.bf16.msra.mxu3 %v11273_v50  ;;  %v10437_v46 = vor.u32 %v14261_v38, %v10434_v36  ;;  %v10757_v50 = vor.u32 %v14341_v41, %v10754_v42  ;;  %v11077_v6 = vor.u32 %v14421_v56, %v11074_v24  ;;  %v10594_v41 = vld [vmem:[%s22028_s9 + $0x310] sm:$0xf0]  ;;  %v14381_v42 = vld [vmem:[%s22028_s9 + $0x56c] sm:$0xf] }
 0x288   :  { %v10914_v56 = vld [vmem:[%s22028_s9 + $0x590] sm:$0xf0]  ;;  %v14461_v24 = vld [vmem:[%s22028_s9 + $0x7ec] sm:$0xf] }
 0x289   :  { %v11237_v27 = vor.u32 %v14461_v24, %v11234_v16  ;;  %v10720_v16 = vld [vmem:[%s22028_s9 + $0x3e0] sm:$0xf] }
 0x28a   :  { %5382 = vmatpush.bf16.msra.mxu0 %v10273_v37  ;;  %5395 = vmatpush.bf16.msra.mxu1 %v10593_v22  ;;  %v11034_v37 = vld [vmem:[%s22028_s9 + $0x680] sm:$0xf0]  ;;  %v14491_v22 = vld [vmem:[%s22028_s9 + $0x8dc] sm:$0xf] }
 0x28b   :  { %5408 = vmatpush.bf16.msra.mxu2 %v10913_v20  ;;  %5421 = vmatpush.bf16.msra.mxu3 %v11233_v11  ;;  %v10397_v11 = vor.u32 %v14251_v55, %v10394_v45  ;;  %v11037_v2 = vor.u32 %v14411_v60, %v11034_v37  ;;  %v11357_v30 = vor.u32 %v14491_v22, %v11354_v5  ;;  %v10234_v55 = vld [vmem:[%s22028_s9 + $0x40] sm:$0xf0]  ;;  %v14291_v45 = vld [vmem:[%s22028_s9 + $0x29c] sm:$0xf] }
 0x28c   :  { %v10874_v60 = vld [vmem:[%s22028_s9 + $0x540] sm:$0xf0]  ;;  %v14451_v37 = vld [vmem:[%s22028_s9 + $0x79c] sm:$0xf] }
 0x28d   :  { %v10877_v21 = vor.u32 %v14371_v1, %v10874_v60 }
 0x28e   :  { %5383 = vmatpush.bf16.msra.mxu0 %v10233_v9  ;;  %5396 = vmatpush.bf16.msra.mxu1 %v10553_v61  ;;  %v5177_v3 = vpop.f32.mrf.mxu0  ;;  %v5190_v19 = vpop.f32.mrf.mxu1  ;;  %v10357_v9 = vor.u32 %v14241_v7, %v10354_v47  ;;  %v10677_v61 = vor.u32 %v14321_v26, %v10674_v29  ;;  %v11160_v7 = vld [vmem:[%s22028_s9 + $0x750] sm:$0xf]  ;;  %v10237_v47 = vor.u32 %v14211_v43, %v10234_v55  ;;  %v14527_v29 = vld [vmem:[%s22028_s9 + $0x9f4] sm:$0xf0]  ;;  %v14337_v43 = vld [vmem:[%s22028_s9 + $0x404] sm:$0xf0] }
 0x28f   :  { %5409 = vmatpush.bf16.msra.mxu2 %v10873_v15  ;;  %5422 = vmatpush.bf16.msra.mxu3 %v11193_v40  ;;  %v5191_v20 = vadd.f32 %v5190_v19, %v5177_v3  ;;  %v11317_v15 = vor.u32 %v14481_v14, %v11314_v17  ;;  %v14311_v40 = vld [vmem:[%s22028_s9 + $0x33c] sm:$0xf]  ;;  %v11194_v3 = vld [vmem:[%s22028_s9 + $0x7c0] sm:$0xf0]  ;;  %v10520_v19 = vld [vmem:[%s22028_s9 + $0x250] sm:$0xf]  ;;  %v10721_v60 = vor.u32 %v14337_v43, %v10720_v16 }
 0x290   :  { %v11480_v26 = vld [vmem:[%s22028_s9 + $0x9d0] sm:$0xf]  ;;  %v11197_v28 = vor.u32 %v14451_v37, %v11194_v3  ;;  %v11360_v55 = vld [vmem:[%s22028_s9 + $0x8e0] sm:$0xf] }
 0x291   :  { %5384 = vmatmul.bf16.vlgmr.msra.gmra.mxu0 %v17156_v12  ;;  %5397 = vmatmul.bf16.vlgmr.msra.gmra.mxu1 %v17161_v13  ;;  %v11481_v4 = vor.u32 %v14527_v29, %v11480_v26  ;;  %v10360_v37 = vld [vmem:[%s22028_s9 + $0x110] sm:$0xf]  ;;  %v10320_v26 = vld [vmem:[%s22028_s9 + $0xc0] sm:$0xf]  ;;  %v14237_v29 = vld [vmem:[%s22028_s9 + $0xe4] sm:$0xf0] }
 0x292   :  { %5428 = vmatpush.bf16.msrb.mxu0 %v10517_v31  ;;  %5441 = vmatpush.bf16.msrb.mxu1 %v10837_v49  ;;  %v10634_v31 = vld [vmem:[%s22028_s9 + $0x360] sm:$0xf0]  ;;  %v14391_v49 = vld [vmem:[%s22028_s9 + $0x5bc] sm:$0xf] }
 0x293   :  { %5454 = vmatpush.bf16.msrb.mxu2 %v11157_v39  ;;  %5467 = vmatpush.bf16.msrb.mxu3 %v11477_v48  ;;  %v10954_v39 = vld [vmem:[%s22028_s9 + $0x5e0] sm:$0xf0]  ;;  %v14471_v48 = vld [vmem:[%s22028_s9 + $0x83c] sm:$0xf]  ;;  %v10637_v34 = vor.u32 %v14311_v40, %v10634_v31  ;;  %v11120_v40 = vld [vmem:[%s22028_s9 + $0x700] sm:$0xf] }
 0x294   :  { %5410 = vmatmul.bf16.vlgmr.msra.gmra.mxu2 %v17166_v63  ;;  %5423 = vmatmul.bf16.vlgmr.msra.gmra.mxu3 %v17180_v25  ;;  %v10957_v36 = vor.u32 %v14391_v49, %v10954_v39  ;;  %v14437_v31 = vld [vmem:[%s22028_s9 + $0x724] sm:$0xf0]  ;;  %v11440_v49 = vld [vmem:[%s22028_s9 + $0x980] sm:$0xf] }
 0x296   :  { %5429 = vmatpush.bf16.msrb.mxu0 %v10477_v53  ;;  %5442 = vmatpush.bf16.msrb.mxu1 %v10797_v35  ;;  %v5179_v18 = vpop.f32.mrf.mxu0  ;;  %v5192_v51 = vpop.f32.mrf.mxu1  ;;  %v14221_v53 = vld [vmem:[%s22028_s9 + $0x6c] sm:$0xf]  ;;  %v10274_v35 = vld [vmem:[%s22028_s9 + $0x90] sm:$0xf0] }
 0x297   :  { %5455 = vmatpush.bf16.msrb.mxu2 %v11117_v33  ;;  %5468 = vmatpush.bf16.msrb.mxu3 %v11437_v0  ;;  %v5203_v32 = vpop.f32.mrf.mxu2  ;;  %v5216_v52 = vpop.f32.mrf.mxu3  ;;  %v11277_v33 = vor.u32 %v14471_v48, %v11274_v8  ;;  %v14301_v0 = vld [vmem:[%s22028_s9 + $0x2ec] sm:$0xf]  ;;  %v10440_v48 = vld [vmem:[%s22028_s9 + $0x1b0] sm:$0xf]  ;;  %v14267_v8 = vld [vmem:[%s22028_s9 + $0x1d4] sm:$0xf0] }
 0x298   :  { %v5204_v10 = vadd.f32 %v5203_v32, %v5191_v20  ;;  %v14287_v20 = vld [vmem:[%s22028_s9 + $0x274] sm:$0xf0]  ;;  %v14517_v32 = vld [vmem:[%s22028_s9 + $0x9a4] sm:$0xf0]  ;;  %v10760_v51 = vld [vmem:[%s22028_s9 + $0x430] sm:$0xf] }
 0x299   :  { %v10521_v14 = vor.u32 %v14287_v20, %v10520_v19  ;;  %v11441_v18 = vor.u32 %v14517_v32, %v11440_v49  ;;  %v10680_v19 = vld [vmem:[%s22028_s9 + $0x390] sm:$0xf]  ;;  %v14327_v20 = vld [vmem:[%s22028_s9 + $0x3b4] sm:$0xf0]  ;;  %v10321_v32 = vor.u32 %v14237_v29, %v10320_v26  ;;  %v10482_v26 = vld [vmem:[%s22028_s9 + $0x228] sm:$0xf0] }
 0x29a   :  { %5430 = vmatpush.bf16.msrb.mxu0 %v10437_v46  ;;  %5443 = vmatpush.bf16.msrb.mxu1 %v10757_v50  ;;  %v18504_v38 = vadd.f32 %v5216_v52, %v5204_v10  ;;  %v10277_v46 = vor.u32 %v14221_v53, %v10274_v35  ;;  %v10597_v50 = vor.u32 %v14301_v0, %v10594_v41  ;;  %v14427_v53 = vld [vmem:[%s22028_s9 + $0x6d4] sm:$0xf0]  ;;  %v11400_v35 = vld [vmem:[%s22028_s9 + $0x930] sm:$0xf]  ;;  %v10400_v41 = vld [vmem:[%s22028_s9 + $0x160] sm:$0xf] }
 0x29b   :  { %5456 = vmatpush.bf16.msrb.mxu2 %v11077_v6  ;;  %5469 = vmatpush.bf16.msrb.mxu3 %v11397_v59  ;;  %v10554_v6 = vld [vmem:[%s22028_s9 + $0x2c0] sm:$0xf0]  ;;  %v10917_v59 = vor.u32 %v14381_v42, %v10914_v56  ;;  %v11121_v10 = vor.u32 %v14437_v31, %v11120_v40  ;;  %v14257_v42 = vld [vmem:[%s22028_s9 + $0x184] sm:$0xf0] }
 0x29c   :  { %v10401_v1 = vor.u32 %v14257_v42, %v10400_v41  ;;  %v14217_v42 = vld [vmem:[%s22028_s9 + $0x44] sm:$0xf0] }
 0x29e   :  { %5431 = vmatpush.bf16.msrb.mxu0 %v10397_v11  ;;  %5444 = vmatpush.bf16.msrb.mxu1 %v10717_v23  ;;  %v10840_v11 = vld [vmem:[%s22028_s9 + $0x4d0] sm:$0xf]  ;;  %v14367_v23 = vld [vmem:[%s22028_s9 + $0x4f4] sm:$0xf0] }
 0x29f   :  { %5457 = vmatpush.bf16.msrb.mxu2 %v11037_v2  ;;  %5470 = vmatpush.bf16.msrb.mxu3 %v11357_v30  ;;  %v5205_v22 = vpop.f32.mrf.mxu2  ;;  %v5218_v5 = vpop.f32.mrf.mxu3  ;;  %v10557_v2 = vor.u32 %v14291_v45, %v10554_v6  ;;  %v14447_v30 = vld [vmem:[%s22028_s9 + $0x774] sm:$0xf0]  ;;  %v10841_v17 = vor.u32 %v14367_v23, %v10840_v11  ;;  %v14497_v45 = vld [vmem:[%s22028_s9 + $0x904] sm:$0xf0]  ;;  %v11000_v11 = vld [vmem:[%s22028_s9 + $0x610] sm:$0xf] }
 0x2a0   :  { %v11161_v54 = vor.u32 %v14447_v30, %v11160_v7  ;;  %v14247_v22 = vld [vmem:[%s22028_s9 + $0x134] sm:$0xf0]  ;;  %v11361_v3 = vor.u32 %v14497_v45, %v11360_v55  ;;  %v11320_v7 = vld [vmem:[%s22028_s9 + $0x890] sm:$0xf]  ;;  %v10681_v30 = vor.u32 %v14327_v20, %v10680_v19  ;;  %v11200_v55 = vld [vmem:[%s22028_s9 + $0x7a0] sm:$0xf] }
 0x2a1   :  { %v14407_v23 = vld [vmem:[%s22028_s9 + $0x634] sm:$0xf0]  ;;  %v11162_v19 = vld [vmem:[%s22028_s9 + $0x778] sm:$0xf0]  ;;  %v14522_v20 = vld [vmem:[%s22028_s9 + $0x9d4] sm:$0xf] }
 0x2a2   :  { %5432 = vmatpush.bf16.msrb.mxu0 %v10357_v9  ;;  %5445 = vmatpush.bf16.msrb.mxu1 %v10677_v61  ;;  %v10480_v9 = vld [vmem:[%s22028_s9 + $0x200] sm:$0xf]  ;;  %v14277_v61 = vld [vmem:[%s22028_s9 + $0x224] sm:$0xf0] }
 0x2a3   :  { %5458 = vmatpush.bf16.msrb.mxu2 %v10997_v57  ;;  %5471 = vmatpush.bf16.msrb.mxu3 %v11317_v15  ;;  %v10800_v57 = vld [vmem:[%s22028_s9 + $0x480] sm:$0xf]  ;;  %v14357_v15 = vld [vmem:[%s22028_s9 + $0x4a4] sm:$0xf0]  ;;  %v10481_v52 = vor.u32 %v14277_v61, %v10480_v9 }
 0x2a4   :  { %v10801_v39 = vor.u32 %v14357_v15, %v10800_v57  ;;  %v10960_v9 = vld [vmem:[%s22028_s9 + $0x5c0] sm:$0xf]  ;;  %v14477_v15 = vld [vmem:[%s22028_s9 + $0x864] sm:$0xf0] }
 0x2a5   :  { %v11280_v57 = vld [vmem:[%s22028_s9 + $0x840] sm:$0xf] }
 0x2a6   :  { %5433 = vmatpush.bf16.msrb.mxu0 %v10317_v58  ;;  %5446 = vmatpush.bf16.msrb.mxu1 %v10637_v34  ;;  %v14347_v58 = vld [vmem:[%s22028_s9 + $0x454] sm:$0xf0]  ;;  %v11080_v34 = vld [vmem:[%s22028_s9 + $0x6b0] sm:$0xf] }
 0x2a7   :  { %5459 = vmatpush.bf16.msrb.mxu2 %v10957_v36  ;;  %5472 = vmatpush.bf16.msrb.mxu3 %v11277_v33  ;;  %v14507_v36 = vld [vmem:[%s22028_s9 + $0x954] sm:$0xf0]  ;;  %v10441_v33 = vor.u32 %v14267_v8, %v10440_v48  ;;  %v10761_v0 = vor.u32 %v14347_v58, %v10760_v51  ;;  %v11081_v56 = vor.u32 %v14427_v53, %v11080_v34  ;;  %v10600_v51 = vld [vmem:[%s22028_s9 + $0x2f0] sm:$0xf] }
 0x2a8   :  { %v11401_v24 = vor.u32 %v14507_v36, %v11400_v35  ;;  %v14227_v48 = vld [vmem:[%s22028_s9 + $0x94] sm:$0xf0]  ;;  %v10920_v34 = vld [vmem:[%s22028_s9 + $0x570] sm:$0xf] }
 0x2a9   :  { %v14307_v58 = vld [vmem:[%s22028_s9 + $0x314] sm:$0xf0]  ;;  %v11240_v35 = vld [vmem:[%s22028_s9 + $0x7f0] sm:$0xf] }
 0x2aa   :  { %5434 = vmatpush.bf16.msrb.mxu0 %v10277_v46  ;;  %5447 = vmatpush.bf16.msrb.mxu1 %v10597_v50  ;;  %v11040_v46 = vld [vmem:[%s22028_s9 + $0x660] sm:$0xf]  ;;  %v14417_v50 = vld [vmem:[%s22028_s9 + $0x684] sm:$0xf0]  ;;  %v14387_v53 = vld [vmem:[%s22028_s9 + $0x594] sm:$0xf0]  ;;  %v10601_v41 = vor.u32 %v14307_v58, %v10600_v51 }
 0x2ab   :  { %5460 = vmatpush.bf16.msrb.mxu2 %v10917_v59  ;;  %5473 = vmatpush.bf16.msrb.mxu3 %v11237_v27  ;;  %v11041_v5 = vor.u32 %v14417_v50, %v11040_v46  ;;  %v14467_v36 = vld [vmem:[%s22028_s9 + $0x814] sm:$0xf0]  ;;  %v10921_v16 = vor.u32 %v14387_v53, %v10920_v34  ;;  %v10880_v46 = vld [vmem:[%s22028_s9 + $0x520] sm:$0xf]  ;;  %v14377_v50 = vld [vmem:[%s22028_s9 + $0x544] sm:$0xf0] }
 0x2ac   :  { %v11241_v43 = vor.u32 %v14467_v36, %v11240_v35  ;;  %v14252_v34 = vld [vmem:[%s22028_s9 + $0x164] sm:$0xf]  ;;  %v10402_v53 = vld [vmem:[%s22028_s9 + $0x188] sm:$0xf0] }
 0x2ae   :  { %5435 = vmatpush.bf16.msrb.mxu0 %v10237_v47  ;;  %5448 = vmatpush.bf16.msrb.mxu1 %v10557_v2  ;;  %v5229_v6 = vpop.f32.mrf.mxu0  ;;  %v5242_v59 = vpop.f32.mrf.mxu1  ;;  %v14487_v47 = vld [vmem:[%s22028_s9 + $0x8b4] sm:$0xf0]  ;;  %v10361_v2 = vor.u32 %v14247_v22, %v10360_v37  ;;  %v10842_v37 = vld [vmem:[%s22028_s9 + $0x4f8] sm:$0xf0]  ;;  %v14442_v22 = vld [vmem:[%s22028_s9 + $0x754] sm:$0xf] }
 0x2af   :  { %5461 = vmatpush.bf16.msrb.mxu2 %v10877_v21  ;;  %5474 = vmatpush.bf16.msrb.mxu3 %v11197_v28  ;;  %v5243_v27 = vadd.f32 %v5242_v59, %v5229_v6  ;;  %v11001_v21 = vor.u32 %v14407_v23, %v11000_v11  ;;  %v11321_v28 = vor.u32 %v14487_v47, %v11320_v7  ;;  %v14457_v59 = vld [vmem:[%s22028_s9 + $0x7c4] sm:$0xf0]  ;;  %v11482_v11 = vld [vmem:[%s22028_s9 + $0x9f8] sm:$0xf0] }
 0x2b0   :  { %v10881_v23 = vor.u32 %v14377_v50, %v10880_v46  ;;  %v11201_v7 = vor.u32 %v14457_v59, %v11200_v55  ;;  %v11165_v29 = vor.u32 %v14442_v22, %v11162_v19  ;;  %v10405_v50 = vor.u32 %v14252_v34, %v10402_v53  ;;  %v11002_v22 = vld [vmem:[%s22028_s9 + $0x638] sm:$0xf0] }
 0x2b1   :  { %5436 = vmatmul.bf16.vlgmr.msrb.gmra.mxu0 %v17156_v12  ;;  %5449 = vmatmul.bf16.vlgmr.msrb.gmra.mxu1 %v17161_v13 }
 0x2b2   :  { %5480 = vmatpush.bf16.msra.mxu0 %v10521_v14  ;;  %5493 = vmatpush.bf16.msra.mxu1 %v10841_v17  ;;  %v10640_v14 = vld [vmem:[%s22028_s9 + $0x340] sm:$0xf]  ;;  %v14317_v17 = vld [vmem:[%s22028_s9 + $0x364] sm:$0xf0] }
 0x2b3   :  { %5506 = vmatpush.bf16.msra.mxu2 %v11161_v54  ;;  %5519 = vmatpush.bf16.msra.mxu3 %v11481_v4  ;;  %v14397_v4 = vld [vmem:[%s22028_s9 + $0x5e4] sm:$0xf0] }
 0x2b4   :  { %5462 = vmatmul.bf16.vlgmr.msrb.gmra.mxu2 %v17166_v63  ;;  %5475 = vmatmul.bf16.vlgmr.msrb.gmra.mxu3 %v17180_v25 }
 0x2b6   :  { %5481 = vmatpush.bf16.msra.mxu0 %v10481_v52  ;;  %5494 = vmatpush.bf16.msra.mxu1 %v10801_v39  ;;  %v5231_v31 = vpop.f32.mrf.mxu0  ;;  %v5244_v49 = vpop.f32.mrf.mxu1  ;;  %v10641_v52 = vor.u32 %v14317_v17, %v10640_v14  ;;  %v10280_v39 = vld [vmem:[%s22028_s9 + $0x70] sm:$0xf]  ;;  %v10802_v14 = vld [vmem:[%s22028_s9 + $0x4a8] sm:$0xf0]  ;;  %v14432_v17 = vld [vmem:[%s22028_s9 + $0x704] sm:$0xf] }
 0x2b7   :  { %5507 = vmatpush.bf16.msra.mxu2 %v11121_v10  ;;  %5520 = vmatpush.bf16.msra.mxu3 %v11441_v18  ;;  %v5255_v61 = vpop.f32.mrf.mxu2  ;;  %v5268_v54 = vpop.f32.mrf.mxu3  ;;  %v10961_v10 = vor.u32 %v14397_v4, %v10960_v9  ;;  %v11281_v18 = vor.u32 %v14477_v15, %v11280_v57  ;;  %v11122_v9 = vld [vmem:[%s22028_s9 + $0x728] sm:$0xf0]  ;;  %v14262_v15 = vld [vmem:[%s22028_s9 + $0x1b4] sm:$0xf] }
 0x2b8   :  { %v5256_v40 = vadd.f32 %v5255_v61, %v5243_v27  ;;  %v14282_v27 = vld [vmem:[%s22028_s9 + $0x254] sm:$0xf]  ;;  %v14512_v61 = vld [vmem:[%s22028_s9 + $0x984] sm:$0xf]  ;;  %v11125_v31 = vor.u32 %v14432_v17, %v11122_v9  ;;  %v11282_v17 = vld [vmem:[%s22028_s9 + $0x868] sm:$0xf0] }
 0x2ba   :  { %5482 = vmatpush.bf16.msra.mxu0 %v10441_v33  ;;  %5495 = vmatpush.bf16.msra.mxu1 %v10761_v0  ;;  %v18702_v8 = vadd.f32 %v5268_v54, %v5256_v40  ;;  %v10240_v33 = vld [vmem:[%s22028_s9 + $0x20] sm:$0xf]  ;;  %v10281_v0 = vor.u32 %v14227_v48, %v10280_v39  ;;  %v11442_v54 = vld [vmem:[%s22028_s9 + $0x9a8] sm:$0xf0]  ;;  %v10442_v40 = vld [vmem:[%s22028_s9 + $0x1d8] sm:$0xf0] }
 0x2bb   :  { %5508 = vmatpush.bf16.msra.mxu2 %v11081_v56  ;;  %5521 = vmatpush.bf16.msra.mxu3 %v11401_v24  ;;  %v10560_v56 = vld [vmem:[%s22028_s9 + $0x2a0] sm:$0xf]  ;;  %v14297_v24 = vld [vmem:[%s22028_s9 + $0x2c4] sm:$0xf0]  ;;  %v11445_v49 = vor.u32 %v14512_v61, %v11442_v54  ;;  %v14422_v39 = vld [vmem:[%s22028_s9 + $0x6b4] sm:$0xf]  ;;  %v10445_v51 = vor.u32 %v14262_v15, %v10442_v40 }
 0x2bc   :  { %v11082_v48 = vld [vmem:[%s22028_s9 + $0x6d8] sm:$0xf0]  ;;  %v14222_v15 = vld [vmem:[%s22028_s9 + $0x74] sm:$0xf] }
 0x2bd   :  { %v11085_v35 = vor.u32 %v14422_v39, %v11082_v48  ;;  %v10282_v40 = vld [vmem:[%s22028_s9 + $0x98] sm:$0xf0]  ;;  %v14382_v48 = vld [vmem:[%s22028_s9 + $0x574] sm:$0xf] }
 0x2be   :  { %5483 = vmatpush.bf16.msra.mxu0 %v10401_v1  ;;  %5496 = vmatpush.bf16.msra.mxu1 %v10721_v60  ;;  %v10522_v1 = vld [vmem:[%s22028_s9 + $0x278] sm:$0xf0]  ;;  %v14362_v60 = vld [vmem:[%s22028_s9 + $0x4d4] sm:$0xf]  ;;  %v10285_v34 = vor.u32 %v14222_v15, %v10282_v40  ;;  %v13863_v15 = vld [vmem:[%s22027_s8 + $0x434] sm:$0xf0] }
 0x2bf   :  { %5509 = vmatpush.bf16.msra.mxu2 %v11041_v5  ;;  %5522 = vmatpush.bf16.msra.mxu3 %v11361_v3  ;;  %v5257_v45 = vpop.f32.mrf.mxu2  ;;  %v5270_v6 = vpop.f32.mrf.mxu3  ;;  %v10241_v5 = vor.u32 %v14217_v42, %v10240_v33  ;;  %v10561_v3 = vor.u32 %v14297_v24, %v10560_v56  ;;  %v10525_v47 = vor.u32 %v14282_v27, %v10522_v1  ;;  %v14332_v33 = vld [vmem:[%s22028_s9 + $0x3e4] sm:$0xf]  ;;  %v11042_v42 = vld [vmem:[%s22028_s9 + $0x688] sm:$0xf0]  ;;  %v14322_v1 = vld [vmem:[%s22028_s9 + $0x394] sm:$0xf] }
 0x2c0   :  { %v14492_v56 = vld [vmem:[%s22028_s9 + $0x8e4] sm:$0xf]  ;;  %v11362_v24 = vld [vmem:[%s22028_s9 + $0x908] sm:$0xf0]  ;;  %v14242_v45 = vld [vmem:[%s22028_s9 + $0x114] sm:$0xf] }
 0x2c1   :  { %v10362_v6 = vld [vmem:[%s22028_s9 + $0x138] sm:$0xf0]  ;;  %v11365_v27 = vor.u32 %v14492_v56, %v11362_v24  ;;  %v10882_v56 = vld [vmem:[%s22028_s9 + $0x548] sm:$0xf0]  ;;  %v14452_v24 = vld [vmem:[%s22028_s9 + $0x7a4] sm:$0xf] }
 0x2c2   :  { %5484 = vmatpush.bf16.msra.mxu0 %v10361_v2  ;;  %5497 = vmatpush.bf16.msra.mxu1 %v10681_v30  ;;  %v10845_v2 = vor.u32 %v14362_v60, %v10842_v37  ;;  %v14272_v30 = vld [vmem:[%s22028_s9 + $0x204] sm:$0xf]  ;;  %v10682_v60 = vld [vmem:[%s22028_s9 + $0x3b8] sm:$0xf0]  ;;  %v14402_v37 = vld [vmem:[%s22028_s9 + $0x614] sm:$0xf]  ;;  %v10365_v19 = vor.u32 %v14242_v45, %v10362_v6 }
 0x2c3   :  { %5510 = vmatpush.bf16.msra.mxu2 %v11001_v21  ;;  %5523 = vmatpush.bf16.msra.mxu3 %v11321_v28  ;;  %v11485_v21 = vor.u32 %v14522_v20, %v11482_v11  ;;  %v14352_v28 = vld [vmem:[%s22028_s9 + $0x484] sm:$0xf]  ;;  %v10485_v4 = vor.u32 %v14272_v30, %v10482_v26  ;;  %v10685_v20 = vor.u32 %v14322_v1, %v10682_v60  ;;  %v10642_v30 = vld [vmem:[%s22028_s9 + $0x368] sm:$0xf0]  ;;  %v10602_v39 = vld [vmem:[%s22028_s9 + $0x318] sm:$0xf0] }
 0x2c4   :  { %v10805_v57 = vor.u32 %v14352_v28, %v10802_v14  ;;  %v14232_v11 = vld [vmem:[%s22028_s9 + $0xc4] sm:$0xf]  ;;  %v10962_v28 = vld [vmem:[%s22028_s9 + $0x5e8] sm:$0xf0]  ;;  %v12088_v45 = vld [vmem:[%s22027_s8 + $0x4b0] sm:$0xf] }
 0x2c5   :  { %v14392_v26 = vld [vmem:[%s22028_s9 + $0x5c4] sm:$0xf]  ;;  %v13883_v6 = vld [vmem:[%s22027_s8 + $0x4d4] sm:$0xf0]  ;;  %v12328_v40 = vld [vmem:[%s22027_s8 + $0x690] sm:$0xf] }
 0x2c6   :  { %5485 = vmatpush.bf16.msra.mxu0 %v10321_v32  ;;  %5498 = vmatpush.bf16.msra.mxu1 %v10641_v52  ;;  %v14342_v32 = vld [vmem:[%s22028_s9 + $0x434] sm:$0xf]  ;;  %v10762_v52 = vld [vmem:[%s22028_s9 + $0x458] sm:$0xf0]  ;;  %v14472_v14 = vld [vmem:[%s22028_s9 + $0x844] sm:$0xf] }
 0x2c7   :  { %5511 = vmatpush.bf16.msra.mxu2 %v10961_v10  ;;  %5524 = vmatpush.bf16.msra.mxu3 %v11281_v18  ;;  %v14502_v10 = vld [vmem:[%s22028_s9 + $0x934] sm:$0xf]  ;;  %v11402_v18 = vld [vmem:[%s22028_s9 + $0x958] sm:$0xf0]  ;;  %v10765_v58 = vor.u32 %v14342_v32, %v10762_v52  ;;  %v11285_v32 = vor.u32 %v14472_v14, %v11282_v17  ;;  %v13963_v60 = vld [vmem:[%s22027_s8 + $0x754] sm:$0xf0] }
 0x2c8   :  { %v11405_v36 = vor.u32 %v14502_v10, %v11402_v18  ;;  %v14302_v52 = vld [vmem:[%s22028_s9 + $0x2f4] sm:$0xf]  ;;  %v10922_v10 = vld [vmem:[%s22028_s9 + $0x598] sm:$0xf0] }
 0x2c9   :  { %v14462_v18 = vld [vmem:[%s22028_s9 + $0x7f4] sm:$0xf]  ;;  %v10605_v53 = vor.u32 %v14302_v52, %v10602_v39  ;;  %v14023_v52 = vld [vmem:[%s22027_s8 + $0x934] sm:$0xf0]  ;;  %v11648_v39 = vld [vmem:[%s22027_s8 + $0x140] sm:$0xf] }
 0x2ca   :  { %5486 = vmatpush.bf16.msra.mxu0 %v10281_v0  ;;  %5499 = vmatpush.bf16.msra.mxu1 %v10601_v41  ;;  %v10722_v0 = vld [vmem:[%s22028_s9 + $0x408] sm:$0xf0]  ;;  %v14412_v41 = vld [vmem:[%s22028_s9 + $0x664] sm:$0xf] }
 0x2cb   :  { %5512 = vmatpush.bf16.msra.mxu2 %v10921_v16  ;;  %5525 = vmatpush.bf16.msra.mxu3 %v11241_v43  ;;  %v10725_v55 = vor.u32 %v14332_v33, %v10722_v0  ;;  %v11045_v59 = vor.u32 %v14412_v41, %v11042_v42  ;;  %v10562_v33 = vld [vmem:[%s22028_s9 + $0x2c8] sm:$0xf0]  ;;  %v10925_v0 = vor.u32 %v14382_v48, %v10922_v10  ;;  %v14372_v42 = vld [vmem:[%s22028_s9 + $0x524] sm:$0xf]  ;;  %v13773_v48 = vld [vmem:[%s22027_s8 + $0x164] sm:$0xf0] }
 0x2ce   :  { %5487 = vmatpush.bf16.msra.mxu0 %v10241_v5  ;;  %5500 = vmatpush.bf16.msra.mxu1 %v10561_v3  ;;  %v5281_v16 = vpop.f32.mrf.mxu0  ;;  %v5294_v43 = vpop.f32.mrf.mxu1  ;;  %v14482_v5 = vld [vmem:[%s22028_s9 + $0x894] sm:$0xf]  ;;  %v11322_v3 = vld [vmem:[%s22028_s9 + $0x8b8] sm:$0xf0] }
 0x2cf   :  { %5513 = vmatpush.bf16.msra.mxu2 %v10881_v23  ;;  %5526 = vmatpush.bf16.msra.mxu3 %v11201_v7  ;;  %v5295_v46 = vadd.f32 %v5294_v43, %v5281_v16  ;;  %v10322_v23 = vld [vmem:[%s22028_s9 + $0xe8] sm:$0xf0]  ;;  %v11005_v7 = vor.u32 %v14402_v37, %v11002_v22  ;;  %v12728_v37 = vld [vmem:[%s22027_s8 + $0x9b0] sm:$0xf]  ;;  %v14043_v22 = vld [vmem:[%s22027_s8 + $0x9d4] sm:$0xf0] }
 0x2d1   :  { %5488 = vmatmul.bf16.vlgmr.msra.gmra.mxu0 %v17156_v12  ;;  %5501 = vmatmul.bf16.vlgmr.msra.gmra.mxu1 %v17161_v13 }
 0x2d2   :  { %5532 = vmatpush.bf16.msrb.mxu0 %v10525_v47  ;;  %5545 = vmatpush.bf16.msrb.mxu1 %v10845_v2  ;;  %v11325_v47 = vor.u32 %v14482_v5, %v11322_v3  ;;  %v14312_v2 = vld [vmem:[%s22028_s9 + $0x344] sm:$0xf]  ;;  %v10885_v5 = vor.u32 %v14372_v42, %v10882_v56  ;;  %v11608_v42 = vld [vmem:[%s22027_s8 + $0xf0] sm:$0xf]  ;;  %v13763_v56 = vld [vmem:[%s22027_s8 + $0x114] sm:$0xf0] }
 0x2d3   :  { %5558 = vmatpush.bf16.msrb.mxu2 %v11165_v29  ;;  %5571 = vmatpush.bf16.msrb.mxu3 %v11485_v21 }
 0x2d4   :  { %5514 = vmatmul.bf16.vlgmr.msra.gmra.mxu2 %v17166_v63  ;;  %5527 = vmatmul.bf16.vlgmr.msra.gmra.mxu3 %v17180_v25 }
 0x2d6   :  { %5533 = vmatpush.bf16.msrb.mxu0 %v10485_v4  ;;  %5546 = vmatpush.bf16.msrb.mxu1 %v10805_v57  ;;  %v5283_v61 = vpop.f32.mrf.mxu0  ;;  %v5296_v54 = vpop.f32.mrf.mxu1  ;;  %v10325_v4 = vor.u32 %v14232_v11, %v10322_v23  ;;  %v10645_v57 = vor.u32 %v14312_v2, %v10642_v30  ;;  %v11728_v11 = vld [vmem:[%s22027_s8 + $0x1e0] sm:$0xf]  ;;  %v13793_v23 = vld [vmem:[%s22027_s8 + $0x204] sm:$0xf0] }
 0x2d7   :  { %5559 = vmatpush.bf16.msrb.mxu2 %v11125_v31  ;;  %5572 = vmatpush.bf16.msrb.mxu3 %v11445_v49  ;;  %v5307_v29 = vpop.f32.mrf.mxu2  ;;  %v5320_v21 = vpop.f32.mrf.mxu3  ;;  %v10965_v49 = vor.u32 %v14392_v26, %v10962_v28  ;;  %v12048_v2 = vld [vmem:[%s22027_s8 + $0x460] sm:$0xf]  ;;  %v13873_v30 = vld [vmem:[%s22027_s8 + $0x484] sm:$0xf0]  ;;  %v11729_v14 = vor.u32 %v13793_v23, %v11728_v11  ;;  %v13783_v61 = vld [vmem:[%s22027_s8 + $0x1b4] sm:$0xf0] }
 0x2d8   :  { %v5308_v9 = vadd.f32 %v5307_v29, %v5295_v46  ;;  %v11202_v46 = vld [vmem:[%s22028_s9 + $0x7c8] sm:$0xf0]  ;;  %v12368_v26 = vld [vmem:[%s22027_s8 + $0x6e0] sm:$0xf]  ;;  %v13953_v29 = vld [vmem:[%s22027_s8 + $0x704] sm:$0xf0]  ;;  %v12049_v17 = vor.u32 %v13873_v30, %v12048_v2 }
 0x2d9   :  { %v11205_v3 = vor.u32 %v14452_v24, %v11202_v46  ;;  %v14033_v28 = vld [vmem:[%s22027_s8 + $0x984] sm:$0xf0]  ;;  %v12369_v54 = vor.u32 %v13953_v29, %v12368_v26  ;;  %v13843_v46 = vld [vmem:[%s22027_s8 + $0x394] sm:$0xf0] }
 0x2da   :  { %5534 = vmatpush.bf16.msrb.mxu0 %v10445_v51  ;;  %5547 = vmatpush.bf16.msrb.mxu1 %v10765_v58  ;;  %v18900_v31 = vadd.f32 %v5320_v21, %v5308_v9  ;;  %v11242_v51 = vld [vmem:[%s22028_s9 + $0x818] sm:$0xf0]  ;;  %v14212_v58 = vld [vmem:[%s22028_s9 + $0x24] sm:$0xf]  ;;  %v12688_v21 = vld [vmem:[%s22027_s8 + $0x960] sm:$0xf] }
 0x2db   :  { %5560 = vmatpush.bf16.msrb.mxu2 %v11085_v35  ;;  %5573 = vmatpush.bf16.msrb.mxu3 %v11405_v36  ;;  %v10242_v35 = vld [vmem:[%s22028_s9 + $0x48] sm:$0xf0]  ;;  %v14292_v36 = vld [vmem:[%s22028_s9 + $0x2a4] sm:$0xf]  ;;  %v11245_v41 = vor.u32 %v14462_v18, %v11242_v51  ;;  %v11688_v9 = vld [vmem:[%s22027_s8 + $0x190] sm:$0xf] }
 0x2dc   :  { %v10565_v1 = vor.u32 %v14292_v36, %v10562_v33  ;;  %v12288_v51 = vld [vmem:[%s22027_s8 + $0x640] sm:$0xf]  ;;  %v13913_v23 = vld [vmem:[%s22027_s8 + $0x5c4] sm:$0xf0]  ;;  %s13407_s9 = sld [smem:[#allocation2 + $0x2]] }
 0x2de   :  { %5535 = vmatpush.bf16.msrb.mxu0 %v10405_v50  ;;  %5548 = vmatpush.bf16.msrb.mxu1 %v10725_v55  ;;  %v11768_v50 = vld [vmem:[%s22027_s8 + $0x230] sm:$0xf]  ;;  %v13803_v55 = vld [vmem:[%s22027_s8 + $0x254] sm:$0xf0] }
 0x2df   :  { %5561 = vmatpush.bf16.msrb.mxu2 %v11045_v59  ;;  %5574 = vmatpush.bf16.msrb.mxu3 %v11365_v27  ;;  %v5309_v16 = vpop.f32.mrf.mxu2  ;;  %v5322_v43 = vpop.f32.mrf.mxu3  ;;  %v12408_v59 = vld [vmem:[%s22027_s8 + $0x730] sm:$0xf]  ;;  %v10245_v27 = vor.u32 %v14212_v58, %v10242_v35  ;;  %v13933_v58 = vld [vmem:[%s22027_s8 + $0x664] sm:$0xf0] }
 0x2e0   :  { %v12289_v24 = vor.u32 %v13933_v58, %v12288_v51  ;;  %v11928_v43 = vld [vmem:[%s22027_s8 + $0x370] sm:$0xf]  ;;  %v12448_v51 = vld [vmem:[%s22027_s8 + $0x780] sm:$0xf] }
 0x2e2   :  { %5536 = vmatpush.bf16.msrb.mxu0 %v10365_v19  ;;  %5549 = vmatpush.bf16.msrb.mxu1 %v10685_v20  ;;  %v11769_v19 = vor.u32 %v13803_v55, %v11768_v50  ;;  %v12089_v20 = vor.u32 %v13883_v6, %v12088_v45  ;;  %v12248_v50 = vld [vmem:[%s22027_s8 + $0x5f0] sm:$0xf]  ;;  %v13923_v55 = vld [vmem:[%s22027_s8 + $0x614] sm:$0xf0] }
 0x2e3   :  { %5562 = vmatpush.bf16.msrb.mxu2 %v11005_v7  ;;  %5575 = vmatpush.bf16.msrb.mxu3 %v11325_v47  ;;  %v12409_v7 = vor.u32 %v13963_v60, %v12408_v59  ;;  %v12729_v47 = vor.u32 %v14043_v22, %v12728_v37  ;;  %v12568_v45 = vld [vmem:[%s22027_s8 + $0x870] sm:$0xf]  ;;  %v14003_v6 = vld [vmem:[%s22027_s8 + $0x894] sm:$0xf0]  ;;  %v11609_v59 = vor.u32 %v13763_v56, %v11608_v42  ;;  %v13753_v60 = vld [vmem:[%s22027_s8 + $0xc4] sm:$0xf0] }
 0x2e4   :  { %v12249_v37 = vor.u32 %v13923_v55, %v12248_v50  ;;  %v12569_v22 = vor.u32 %v14003_v6, %v12568_v45  ;;  %v13008_v6 = vld [vmem:[%s22027_s8 + $0xbe0] sm:$0xf] }
 0x2e6   :  { %5537 = vmatpush.bf16.msrb.mxu0 %v10325_v4  ;;  %5550 = vmatpush.bf16.msrb.mxu1 %v10645_v57  ;;  %v12689_v4 = vor.u32 %v14033_v28, %v12688_v21  ;;  %v12008_v57 = vld [vmem:[%s22027_s8 + $0x410] sm:$0xf] }
 0x2e7   :  { %5563 = vmatpush.bf16.msrb.mxu2 %v10965_v49  ;;  %5576 = vmatpush.bf16.msrb.mxu3 %v11285_v32  ;;  %v13943_v49 = vld [vmem:[%s22027_s8 + $0x6b4] sm:$0xf0]  ;;  %v12648_v32 = vld [vmem:[%s22027_s8 + $0x910] sm:$0xf] }
 0x2e8   :  { %v12329_v10 = vor.u32 %v13943_v49, %v12328_v40  ;;  %v12649_v18 = vor.u32 %v14023_v52, %v12648_v32  ;;  %v11528_v28 = vld [vmem:[%s22027_s8 + $0x50] sm:$0xf]  ;;  %v13983_v49 = vld [vmem:[%s22027_s8 + $0x7f4] sm:$0xf0]  ;;  %v11488_v32 = vld [vmem:[%s22027_s8] sm:$0xf] }
 0x2e9   :  { %v12488_v40 = vld [vmem:[%s22027_s8 + $0x7d0] sm:$0xf] }
 0x2ea   :  { %5538 = vmatpush.bf16.msrb.mxu0 %v10285_v34  ;;  %5551 = vmatpush.bf16.msrb.mxu1 %v10605_v53  ;;  %v12608_v34 = vld [vmem:[%s22027_s8 + $0x8c0] sm:$0xf]  ;;  %v14013_v53 = vld [vmem:[%s22027_s8 + $0x8e4] sm:$0xf0] }
 0x2eb   :  { %5564 = vmatpush.bf16.msrb.mxu2 %v10925_v0  ;;  %5577 = vmatpush.bf16.msrb.mxu3 %v11245_v41  ;;  %v11649_v0 = vor.u32 %v13773_v48, %v11648_v39  ;;  %v12609_v16 = vor.u32 %v14013_v53, %v12608_v34  ;;  %v11808_v39 = vld [vmem:[%s22027_s8 + $0x280] sm:$0xf]  ;;  %v13813_v48 = vld [vmem:[%s22027_s8 + $0x2a4] sm:$0xf0] }
 0x2ec   :  { %v13973_v53 = vld [vmem:[%s22027_s8 + $0x7a4] sm:$0xf0]  ;;  %v11809_v56 = vor.u32 %v13813_v48, %v11808_v39 }
 0x2ed   :  { %v12449_v50 = vor.u32 %v13973_v53, %v12448_v51  ;;  %v13848_v51 = vld [vmem:[%s22027_s8 + $0x3c4] sm:$0xf] }
 0x2ee   :  { %5539 = vmatpush.bf16.msrb.mxu0 %v10245_v27  ;;  %5552 = vmatpush.bf16.msrb.mxu1 %v10565_v1  ;;  %v5333_v35 = vpop.f32.mrf.mxu0  ;;  %v5346_v36 = vpop.f32.mrf.mxu1  ;;  %v11929_v27 = vor.u32 %v13843_v46, %v11928_v43  ;;  %v11568_v1 = vld [vmem:[%s22027_s8 + $0xa0] sm:$0xf]  ;;  %v12090_v43 = vld [vmem:[%s22027_s8 + $0x4d8] sm:$0xf0] }
 0x2ef   :  { %5565 = vmatpush.bf16.msrb.mxu2 %v10885_v5  ;;  %5578 = vmatpush.bf16.msrb.mxu3 %v11205_v3  ;;  %v5347_v33 = vadd.f32 %v5346_v36, %v5333_v35  ;;  %v11888_v5 = vld [vmem:[%s22027_s8 + $0x320] sm:$0xf]  ;;  %v13833_v3 = vld [vmem:[%s22027_s8 + $0x344] sm:$0xf0]  ;;  %v11569_v29 = vor.u32 %v13753_v60, %v11568_v1  ;;  %v13048_v35 = vld [vmem:[%s22027_s8 + $0xc30] sm:$0xf] }
 0x2f0   :  { %v11889_v21 = vor.u32 %v13833_v3, %v11888_v5  ;;  %v14123_v36 = vld [vmem:[%s22027_s8 + $0xc54] sm:$0xf0]  ;;  %v13328_v60 = vld [vmem:[%s22027_s8 + $0xe60] sm:$0xf]  ;;  %v11730_v5 = vld [vmem:[%s22027_s8 + $0x208] sm:$0xf0] }
 0x2f1   :  { %5540 = vmatmul.bf16.vlgmr.msrb.gmra.mxu0 %v17156_v12  ;;  %5553 = vmatmul.bf16.vlgmr.msrb.gmra.mxu1 %v17161_v13  ;;  %v11689_v12 = vor.u32 %v13783_v61, %v11688_v9  ;;  %v12009_v13 = vor.u32 %v13863_v15, %v12008_v57  ;;  %v12168_v57 = vld [vmem:[%s22027_s8 + $0x550] sm:$0xf]  ;;  %v13903_v15 = vld [vmem:[%s22027_s8 + $0x574] sm:$0xf0]  ;;  %v13049_v55 = vor.u32 %v14123_v36, %v13048_v35  ;;  %v13868_v3 = vld [vmem:[%s22027_s8 + $0x464] sm:$0xf] }
 0x2f2   :  { %7984 = vmatpush.bf16.msra.mxu0 %v11769_v19  ;;  %7997 = vmatpush.bf16.msra.mxu1 %v12089_v20  ;;  %v12208_v19 = vld [vmem:[%s22027_s8 + $0x5a0] sm:$0xf] }
 0x2f3   :  { %8010 = vmatpush.bf16.msra.mxu2 %v12409_v7  ;;  %8023 = vmatpush.bf16.msra.mxu3 %v12729_v47  ;;  %v12528_v7 = vld [vmem:[%s22027_s8 + $0x820] sm:$0xf]  ;;  %v13993_v47 = vld [vmem:[%s22027_s8 + $0x844] sm:$0xf0]  ;;  %v12209_v9 = vor.u32 %v13913_v23, %v12208_v19  ;;  %v12050_v19 = vld [vmem:[%s22027_s8 + $0x488] sm:$0xf0] }
 0x2f4   :  { %5566 = vmatmul.bf16.vlgmr.msrb.gmra.mxu2 %v17166_v63  ;;  %5579 = vmatmul.bf16.vlgmr.msrb.gmra.mxu3 %v17180_v25  ;;  %v11968_v63 = vld [vmem:[%s22027_s8 + $0x3c0] sm:$0xf]  ;;  %v13853_v25 = vld [vmem:[%s22027_s8 + $0x3e4] sm:$0xf0]  ;;  %v12529_v61 = vor.u32 %v13993_v47, %v12528_v7  ;;  %v14552_v47 = vld [vmem:[%s22034_s15 + $0x10] sm:$0xff] }
 0x2f5   :  { %v11969_v41 = vor.u32 %v13853_v25, %v11968_v63  ;;  %v12128_v63 = vld [vmem:[%s22027_s8 + $0x500] sm:$0xf]  ;;  %v13893_v25 = vld [vmem:[%s22027_s8 + $0x524] sm:$0xf0] }
 0x2f6   :  { %7985 = vmatpush.bf16.msra.mxu0 %v11729_v14  ;;  %7998 = vmatpush.bf16.msra.mxu1 %v12049_v17  ;;  %v5335_v30 = vpop.f32.mrf.mxu0  ;;  %v5348_v26 = vpop.f32.mrf.mxu1  ;;  %v13743_v14 = vld [vmem:[%s22027_s8 + $0x74] sm:$0xf0]  ;;  %v12129_v46 = vor.u32 %v13893_v25, %v12128_v63  ;;  %v14551_v23 = vld [vmem:[%s22034_s15 + $0x8] sm:$0xff]  ;;  %v13768_v63 = vld [vmem:[%s22027_s8 + $0x144] sm:$0xf] }
 0x2f7   :  { %8011 = vmatpush.bf16.msra.mxu2 %v12369_v54  ;;  %8024 = vmatpush.bf16.msra.mxu3 %v12689_v4  ;;  %v5359_v20 = vpop.f32.mrf.mxu2  ;;  %v5372_v11 = vpop.f32.mrf.mxu3  ;;  %v11848_v54 = vld [vmem:[%s22027_s8 + $0x2d0] sm:$0xf]  ;;  %v13823_v4 = vld [vmem:[%s22027_s8 + $0x2f4] sm:$0xf0]  ;;  %v11529_v52 = vor.u32 %v13743_v14, %v11528_v28  ;;  %v19198_v7 = vpack.c.bf16 %v14551_v23, %v14551_v23  ;;  %v11650_v25 = vld [vmem:[%s22027_s8 + $0x168] sm:$0xf0] }
 0x2f8   :  { %v5360_v2 = vadd.f32 %v5359_v20, %v5347_v33  ;;  %v13368_v33 = vld [vmem:[%s22027_s8 + $0xeb0] sm:$0xf]  ;;  %v14550_v20 = vld [vmem:[%s22034_s15] sm:$0xff]  ;;  %v14553_v28 = vld [vmem:[%s22034_s15 + $0x18] sm:$0xff] }
 0x2f9   :  { %v19214_v14 = vpack.c.bf16 %v14553_v28, %v14553_v28  ;;  %v13828_v23 = vld [vmem:[%s22027_s8 + $0x324] sm:$0xf] }
 0x2fa   :  { %7986 = vmatpush.bf16.msra.mxu0 %v11689_v12  ;;  %7999 = vmatpush.bf16.msra.mxu1 %v12009_v13  ;;  %v19098_v17 = vadd.f32 %v5372_v11, %v5360_v2  ;;  %v11849_v12 = vor.u32 %v13823_v4, %v11848_v54  ;;  %v13733_v13 = vld [vmem:[%s22027_s8 + $0x24] sm:$0xf0]  ;;  %v19193_v11 = vpack.c.bf16 %v14550_v20, %v14550_v20  ;;  %v13288_v54 = vld [vmem:[%s22027_s8 + $0xe10] sm:$0xf]  ;;  %v14183_v4 = vld [vmem:[%s22027_s8 + $0xe34] sm:$0xf0] }
 0x2fb   :  { %8012 = vmatpush.bf16.msra.mxu2 %v12329_v10  ;;  %8025 = vmatpush.bf16.msra.mxu3 %v12649_v18  ;;  %v12169_v10 = vor.u32 %v13903_v15, %v12168_v57  ;;  %v12489_v18 = vor.u32 %v13983_v49, %v12488_v40  ;;  %v11489_v42 = vor.u32 %v13733_v13, %v11488_v32  ;;  %v13778_v57 = vld [vmem:[%s22027_s8 + $0x194] sm:$0xf]  ;;  %v11690_v15 = vld [vmem:[%s22027_s8 + $0x1b8] sm:$0xf0]  ;;  %v14093_v13 = vld [vmem:[%s22027_s8 + $0xb64] sm:$0xf0] }
 0x2fc   :  { %v19203_v2 = vpack.c.bf16 %v14552_v47, %v14552_v47  ;;  %v13858_v40 = vld [vmem:[%s22027_s8 + $0x414] sm:$0xf]  ;;  %v12010_v49 = vld [vmem:[%s22027_s8 + $0x438] sm:$0xf0]  ;;  %v11693_v39 = vor.u32 %v13778_v57, %v11690_v15  ;;  %v11570_v20 = vld [vmem:[%s22027_s8 + $0xc8] sm:$0xf0] }
 0x2fd   :  { %v12013_v48 = vor.u32 %v13858_v40, %v12010_v49  ;;  %v11890_v47 = vld [vmem:[%s22027_s8 + $0x348] sm:$0xf0]  ;;  %v13128_v15 = vld [vmem:[%s22027_s8 + $0xcd0] sm:$0xf]  ;;  %v14143_v40 = vld [vmem:[%s22027_s8 + $0xcf4] sm:$0xf0] }
 0x2fe   :  { %7987 = vmatpush.bf16.msra.mxu0 %v11649_v0  ;;  %8000 = vmatpush.bf16.msra.mxu1 %v11969_v41  ;;  %v14203_v0 = vld [vmem:[%s22027_s8 + $0xed4] sm:$0xf0]  ;;  %v13798_v41 = vld [vmem:[%s22027_s8 + $0x234] sm:$0xf]  ;;  %v11893_v57 = vor.u32 %v13828_v23, %v11890_v47  ;;  %v14188_v23 = vld [vmem:[%s22027_s8 + $0xe64] sm:$0xf] }
 0x2ff   :  { %8013 = vmatpush.bf16.msra.mxu2 %v12289_v24  ;;  %8026 = vmatpush.bf16.msra.mxu3 %v12609_v16  ;;  %v5361_v58 = vpop.f32.mrf.mxu2  ;;  %v5374_v34 = vpop.f32.mrf.mxu3  ;;  %v11770_v24 = vld [vmem:[%s22027_s8 + $0x258] sm:$0xf0]  ;;  %v13878_v16 = vld [vmem:[%s22027_s8 + $0x4b4] sm:$0xf]  ;;  %v13369_v45 = vor.u32 %v14203_v0, %v13368_v33  ;;  %v12888_v0 = vld [vmem:[%s22027_s8 + $0xaf0] sm:$0xf] }
 0x300   :  { %v12093_v1 = vor.u32 %v13878_v16, %v12090_v43  ;;  %v11970_v58 = vld [vmem:[%s22027_s8 + $0x3e8] sm:$0xf0]  ;;  %v14163_v16 = vld [vmem:[%s22027_s8 + $0xd94] sm:$0xf0]  ;;  %v13758_v43 = vld [vmem:[%s22027_s8 + $0xf4] sm:$0xf] }
 0x301   :  { %v13738_v49 = vld [vmem:[%s22027_s8 + $0x54] sm:$0xf]  ;;  %v13330_v47 = vld [vmem:[%s22027_s8 + $0xe88] sm:$0xf0] }
 0x302   :  { %7988 = vmatpush.bf16.msra.mxu0 %v11609_v59  ;;  %8001 = vmatpush.bf16.msra.mxu1 %v11929_v27  ;;  %v14113_v59 = vld [vmem:[%s22027_s8 + $0xc04] sm:$0xf0]  ;;  %v11773_v27 = vor.u32 %v13798_v41, %v11770_v24  ;;  %v14083_v41 = vld [vmem:[%s22027_s8 + $0xb14] sm:$0xf0]  ;;  %v13208_v24 = vld [vmem:[%s22027_s8 + $0xd70] sm:$0xf] }
 0x303   :  { %8014 = vmatpush.bf16.msra.mxu2 %v12249_v37  ;;  %8027 = vmatpush.bf16.msra.mxu3 %v12569_v22  ;;  %v14193_v37 = vld [vmem:[%s22027_s8 + $0xe84] sm:$0xf0]  ;;  %v13788_v22 = vld [vmem:[%s22027_s8 + $0x1e4] sm:$0xf]  ;;  %v13009_v30 = vor.u32 %v14113_v59, %v13008_v6  ;;  %v13209_v6 = vor.u32 %v14163_v16, %v13208_v24  ;;  %v12848_v59 = vld [vmem:[%s22027_s8 + $0xaa0] sm:$0xf] }
 0x304   :  { %v13329_v26 = vor.u32 %v14193_v37, %v13328_v60  ;;  %v13168_v37 = vld [vmem:[%s22027_s8 + $0xd20] sm:$0xf]  ;;  %v14118_v24 = vld [vmem:[%s22027_s8 + $0xc34] sm:$0xf] }
 0x306   :  { %7989 = vmatpush.bf16.msra.mxu0 %v11569_v29  ;;  %8002 = vmatpush.bf16.msra.mxu1 %v11889_v21  ;;  %v12968_v29 = vld [vmem:[%s22027_s8 + $0xb90] sm:$0xf]  ;;  %v14103_v21 = vld [vmem:[%s22027_s8 + $0xbb4] sm:$0xf0] }
 0x307   :  { %8015 = vmatpush.bf16.msra.mxu2 %v12209_v9  ;;  %8028 = vmatpush.bf16.msra.mxu3 %v12529_v61  ;;  %v11733_v9 = vor.u32 %v13788_v22, %v11730_v5  ;;  %v12053_v61 = vor.u32 %v13868_v3, %v12050_v19  ;;  %v12969_v32 = vor.u32 %v14103_v21, %v12968_v29  ;;  %v14153_v22 = vld [vmem:[%s22027_s8 + $0xd44] sm:$0xf0]  ;;  %v13748_v5 = vld [vmem:[%s22027_s8 + $0xa4] sm:$0xf] }
 0x308   :  { %v13169_v28 = vor.u32 %v14153_v22, %v13168_v37 }
 0x30a   :  { %7990 = vmatpush.bf16.msra.mxu0 %v11529_v52  ;;  %8003 = vmatpush.bf16.msra.mxu1 %v11849_v12  ;;  %v13289_v52 = vor.u32 %v14183_v4, %v13288_v54  ;;  %v12928_v12 = vld [vmem:[%s22027_s8 + $0xb40] sm:$0xf]  ;;  %v11573_v4 = vor.u32 %v13748_v5, %v11570_v20  ;;  %v14028_v5 = vld [vmem:[%s22027_s8 + $0x964] sm:$0xf]  ;;  %v13010_v20 = vld [vmem:[%s22027_s8 + $0xc08] sm:$0xf0] }
 0x30b   :  { %8016 = vmatpush.bf16.msra.mxu2 %v12169_v10  ;;  %8029 = vmatpush.bf16.msra.mxu3 %v12489_v18  ;;  %v13248_v10 = vld [vmem:[%s22027_s8 + $0xdc0] sm:$0xf]  ;;  %v14173_v18 = vld [vmem:[%s22027_s8 + $0xde4] sm:$0xf0]  ;;  %v12929_v36 = vor.u32 %v14093_v13, %v12928_v12  ;;  %v11850_v12 = vld [vmem:[%s22027_s8 + $0x2f8] sm:$0xf0] }
 0x30c   :  { %v13249_v33 = vor.u32 %v14173_v18, %v13248_v10  ;;  %v12768_v13 = vld [vmem:[%s22027_s8 + $0xa00] sm:$0xf]  ;;  %v14053_v10 = vld [vmem:[%s22027_s8 + $0xa24] sm:$0xf0] }
 0x30d   :  { %v13088_v18 = vld [vmem:[%s22027_s8 + $0xc80] sm:$0xf]  ;;  %v12769_v16 = vor.u32 %v14053_v10, %v12768_v13  ;;  %v13290_v13 = vld [vmem:[%s22027_s8 + $0xe38] sm:$0xf0]  ;;  %v13928_v10 = vld [vmem:[%s22027_s8 + $0x644] sm:$0xf] }
 0x30e   :  { %7991 = vmatpush.bf16.msra.mxu0 %v11489_v42  ;;  %8004 = vmatpush.bf16.msra.mxu1 %v11809_v56  ;;  %v5385_v34 = vpop.f32.mrf.mxu0  ;;  %v5398_v53 = vpop.f32.mrf.mxu1  ;;  %v11653_v42 = vor.u32 %v13768_v63, %v11650_v25  ;;  %v11973_v56 = vor.u32 %v13848_v51, %v11970_v58  ;;  %v14133_v63 = vld [vmem:[%s22027_s8 + $0xca4] sm:$0xf0]  ;;  %v13728_v58 = vld [vmem:[%s22027_s8 + $0x4] sm:$0xf] }
 0x30f   :  { %8017 = vmatpush.bf16.msra.mxu2 %v12129_v46  ;;  %8030 = vmatpush.bf16.msra.mxu3 %v12449_v50  ;;  %v5399_v35 = vadd.f32 %v5398_v53, %v5385_v34  ;;  %v11610_v46 = vld [vmem:[%s22027_s8 + $0x118] sm:$0xf0]  ;;  %v13838_v50 = vld [vmem:[%s22027_s8 + $0x374] sm:$0xf]  ;;  %v11490_v34 = vld [vmem:[%s22027_s8 + $0x28] sm:$0xf0] }
 0x310   :  { %v13808_v53 = vld [vmem:[%s22027_s8 + $0x284] sm:$0xf] }
 0x311   :  { %7992 = vmatmul.bf16.vlgmr.msra.gmra.mxu0 %v19193_v11  ;;  %8005 = vmatmul.bf16.vlgmr.msra.gmra.mxu1 %v19198_v7 }
 0x312   :  { %8036 = vmatpush.bf16.msrb.mxu0 %v13049_v55  ;;  %8049 = vmatpush.bf16.msrb.mxu1 %v13369_v45  ;;  %v11930_v55 = vld [vmem:[%s22027_s8 + $0x398] sm:$0xf0]  ;;  %v12889_v45 = vor.u32 %v14083_v41, %v12888_v0  ;;  %v13958_v0 = vld [vmem:[%s22027_s8 + $0x734] sm:$0xf] }
 0x313   :  { %8062 = vmatpush.bf16.msrb.mxu2 %v11773_v27  ;;  %8075 = vmatpush.bf16.msrb.mxu3 %v12093_v1  ;;  %v14073_v27 = vld [vmem:[%s22027_s8 + $0xac4] sm:$0xf0]  ;;  %v11613_v1 = vor.u32 %v13758_v43, %v11610_v46  ;;  %v11933_v60 = vor.u32 %v13838_v50, %v11930_v55  ;;  %v12410_v41 = vld [vmem:[%s22027_s8 + $0x758] sm:$0xf0]  ;;  %v13089_v43 = vor.u32 %v14133_v63, %v13088_v18  ;;  %v14198_v50 = vld [vmem:[%s22027_s8 + $0xeb4] sm:$0xf] }
 0x314   :  { %8018 = vmatmul.bf16.vlgmr.msra.gmra.mxu2 %v19203_v2  ;;  %8031 = vmatmul.bf16.vlgmr.msra.gmra.mxu3 %v19214_v14  ;;  %v12849_v21 = vor.u32 %v14073_v27, %v12848_v59  ;;  %v13050_v46 = vld [vmem:[%s22027_s8 + $0xc58] sm:$0xf0]  ;;  %v12413_v59 = vor.u32 %v13958_v0, %v12410_v41  ;;  %v12290_v18 = vld [vmem:[%s22027_s8 + $0x668] sm:$0xf0] }
 0x315   :  { %v13370_v55 = vld [vmem:[%s22027_s8 + $0xed8] sm:$0xf0]  ;;  %v13053_v37 = vor.u32 %v14118_v24, %v13050_v46  ;;  %v13918_v24 = vld [vmem:[%s22027_s8 + $0x5f4] sm:$0xf] }
 0x316   :  { %8037 = vmatpush.bf16.msrb.mxu0 %v13009_v30  ;;  %8050 = vmatpush.bf16.msrb.mxu1 %v13329_v26  ;;  %v5387_v26 = vpop.f32.mrf.mxu0  ;;  %v5400_v29 = vpop.f32.mrf.mxu1  ;;  %v13373_v22 = vor.u32 %v14198_v50, %v13370_v55  ;;  %v13998_v50 = vld [vmem:[%s22027_s8 + $0x874] sm:$0xf]  ;;  %v12570_v55 = vld [vmem:[%s22027_s8 + $0x898] sm:$0xf0] }
 0x317   :  { %8063 = vmatpush.bf16.msrb.mxu2 %v11733_v9  ;;  %8076 = vmatpush.bf16.msrb.mxu3 %v12053_v61  ;;  %v5411_v3 = vpop.f32.mrf.mxu2  ;;  %v5424_v19 = vpop.f32.mrf.mxu3  ;;  %v12808_v9 = vld [vmem:[%s22027_s8 + $0xa50] sm:$0xf]  ;;  %v14063_v61 = vld [vmem:[%s22027_s8 + $0xa74] sm:$0xf0]  ;;  %v14555_v29 = vld [vmem:[%s22034_s15 + $0x28] sm:$0xff] }
 0x318   :  { %v5412_v30 = vadd.f32 %v5411_v3, %v5399_v35  ;;  %v12690_v3 = vld [vmem:[%s22027_s8 + $0x988] sm:$0xf0] }
 0x31a   :  { %8038 = vmatpush.bf16.msrb.mxu0 %v12969_v32  ;;  %8051 = vmatpush.bf16.msrb.mxu1 %v13289_v52  ;;  %v19316_v54 = vadd.f32 %v5424_v19, %v5412_v30  ;;  %v11530_v32 = vld [vmem:[%s22027_s8 + $0x78] sm:$0xf0]  ;;  %v13818_v52 = vld [vmem:[%s22027_s8 + $0x2d4] sm:$0xf]  ;;  %v14108_v19 = vld [vmem:[%s22027_s8 + $0xbe4] sm:$0xf] }
 0x31b   :  { %8064 = vmatpush.bf16.msrb.mxu2 %v11693_v39  ;;  %8077 = vmatpush.bf16.msrb.mxu3 %v12013_v48  ;;  %v12809_v39 = vor.u32 %v14063_v61, %v12808_v9  ;;  %v13129_v48 = vor.u32 %v14143_v40, %v13128_v15  ;;  %v11533_v25 = vor.u32 %v13738_v49, %v11530_v32  ;;  %v14554_v30 = vld [vmem:[%s22034_s15 + $0x20] sm:$0xff]  ;;  %v13938_v61 = vld [vmem:[%s22027_s8 + $0x694] sm:$0xf]  ;;  %v12650_v49 = vld [vmem:[%s22027_s8 + $0x938] sm:$0xf0] }
 0x31c   :  { %v11853_v51 = vor.u32 %v13818_v52, %v11850_v12  ;;  %v19411_v26 = vpack.c.bf16 %v14554_v30, %v14554_v30  ;;  %v12693_v9 = vor.u32 %v14028_v5, %v12690_v3  ;;  %v13333_v15 = vor.u32 %v14188_v23, %v13330_v47  ;;  %v14018_v40 = vld [vmem:[%s22027_s8 + $0x914] sm:$0xf]  ;;  %v12970_v52 = vld [vmem:[%s22027_s8 + $0xbb8] sm:$0xf0]  ;;  %v14068_v23 = vld [vmem:[%s22027_s8 + $0xaa4] sm:$0xf] }
 0x31d   :  { %v14098_v32 = vld [vmem:[%s22027_s8 + $0xb94] sm:$0xf] }
 0x31e   :  { %8039 = vmatpush.bf16.msrb.mxu0 %v12929_v36  ;;  %8052 = vmatpush.bf16.msrb.mxu1 %v13249_v33  ;;  %v11810_v33 = vld [vmem:[%s22027_s8 + $0x2a8] sm:$0xf0]  ;;  %v14178_v12 = vld [vmem:[%s22027_s8 + $0xe14] sm:$0xf]  ;;  %v12973_v63 = vor.u32 %v14098_v32, %v12970_v52  ;;  %v12170_v32 = vld [vmem:[%s22027_s8 + $0x578] sm:$0xf0] }
 0x31f   :  { %8065 = vmatpush.bf16.msrb.mxu2 %v11653_v42  ;;  %8078 = vmatpush.bf16.msrb.mxu3 %v11973_v56  ;;  %v5413_v35 = vpop.f32.mrf.mxu2  ;;  %v5426_v36 = vpop.f32.mrf.mxu3  ;;  %v14038_v42 = vld [vmem:[%s22027_s8 + $0x9b4] sm:$0xf]  ;;  %v12730_v56 = vld [vmem:[%s22027_s8 + $0x9d8] sm:$0xf0] }
 0x320   :  { %v12733_v27 = vor.u32 %v14038_v42, %v12730_v56  ;;  %v14168_v35 = vld [vmem:[%s22027_s8 + $0xdc4] sm:$0xf]  ;;  %v13250_v36 = vld [vmem:[%s22027_s8 + $0xde8] sm:$0xf0]  ;;  %v12293_v42 = vor.u32 %v13928_v10, %v12290_v18  ;;  %v14058_v10 = vld [vmem:[%s22027_s8 + $0xa54] sm:$0xf] }
 0x321   :  { %v13253_v46 = vor.u32 %v14168_v35, %v13250_v36  ;;  %v12810_v18 = vld [vmem:[%s22027_s8 + $0xa78] sm:$0xf0]  ;;  %v13968_v35 = vld [vmem:[%s22027_s8 + $0x784] sm:$0xf]  ;;  %v12450_v36 = vld [vmem:[%s22027_s8 + $0x7a8] sm:$0xf0] }
 0x322   :  { %8040 = vmatpush.bf16.msrb.mxu0 %v12889_v45  ;;  %8053 = vmatpush.bf16.msrb.mxu1 %v13209_v6  ;;  %v11493_v45 = vor.u32 %v13728_v58, %v11490_v34  ;;  %v11813_v6 = vor.u32 %v13808_v53, %v11810_v33  ;;  %v12610_v58 = vld [vmem:[%s22027_s8 + $0x8e8] sm:$0xf0]  ;;  %v14088_v34 = vld [vmem:[%s22027_s8 + $0xb44] sm:$0xf] }
 0x323   :  { %8066 = vmatpush.bf16.msrb.mxu2 %v11613_v1  ;;  %8079 = vmatpush.bf16.msrb.mxu3 %v11933_v60  ;;  %v13948_v1 = vld [vmem:[%s22027_s8 + $0x6e4] sm:$0xf]  ;;  %v12370_v60 = vld [vmem:[%s22027_s8 + $0x708] sm:$0xf0] }
 0x324   :  { %v12930_v53 = vld [vmem:[%s22027_s8 + $0xb68] sm:$0xf0] }
 0x326   :  { %8041 = vmatpush.bf16.msrb.mxu0 %v12849_v21  ;;  %8054 = vmatpush.bf16.msrb.mxu1 %v13169_v28  ;;  %v19416_v21 = vpack.c.bf16 %v14555_v29, %v14555_v29  ;;  %v12373_v28 = vor.u32 %v13948_v1, %v12370_v60  ;;  %v12573_v60 = vor.u32 %v13998_v50, %v12570_v55  ;;  %v12850_v29 = vld [vmem:[%s22027_s8 + $0xac8] sm:$0xf0]  ;;  %v13804_v50 = vld [vmem:[%s22027_s8 + $0x25c] sm:$0xf0]  ;;  %v12096_v55 = vld [vmem:[%s22027_s8 + $0x4b8] sm:$0xf] }
 0x327   :  { %8067 = vmatpush.bf16.msrb.mxu2 %v11573_v4  ;;  %8080 = vmatpush.bf16.msrb.mxu3 %v11893_v57  ;;  %v12330_v4 = vld [vmem:[%s22027_s8 + $0x6b8] sm:$0xf0]  ;;  %v13013_v57 = vor.u32 %v14108_v19, %v13010_v20  ;;  %v13988_v19 = vld [vmem:[%s22027_s8 + $0x824] sm:$0xf]  ;;  %v12530_v20 = vld [vmem:[%s22027_s8 + $0x848] sm:$0xf0] }
 0x32a   :  { %8042 = vmatpush.bf16.msrb.mxu0 %v12809_v39  ;;  %8055 = vmatpush.bf16.msrb.mxu1 %v13129_v48  ;;  %v12333_v39 = vor.u32 %v13938_v61, %v12330_v4  ;;  %v12653_v48 = vor.u32 %v14018_v40, %v12650_v49  ;;  %v12533_v40 = vor.u32 %v13988_v19, %v12530_v20  ;;  %v13898_v49 = vld [vmem:[%s22027_s8 + $0x554] sm:$0xf]  ;;  %v11736_v20 = vld [vmem:[%s22027_s8 + $0x1e8] sm:$0xf] }
 0x32b   :  { %8068 = vmatpush.bf16.msrb.mxu2 %v11533_v25  ;;  %8081 = vmatpush.bf16.msrb.mxu3 %v11853_v51  ;;  %v13293_v25 = vor.u32 %v14178_v12, %v13290_v13  ;;  %v14008_v51 = vld [vmem:[%s22027_s8 + $0x8c4] sm:$0xf]  ;;  %v12853_v12 = vor.u32 %v14068_v23, %v12850_v29  ;;  %v13794_v23 = vld [vmem:[%s22027_s8 + $0x20c] sm:$0xf0]  ;;  %v12056_v29 = vld [vmem:[%s22027_s8 + $0x468] sm:$0xf] }
 0x32c   :  { %v12613_v56 = vor.u32 %v14008_v51, %v12610_v58  ;;  %v13888_v51 = vld [vmem:[%s22027_s8 + $0x504] sm:$0xf]  ;;  %v12173_v58 = vor.u32 %v13898_v49, %v12170_v32  ;;  %v11696_v49 = vld [vmem:[%s22027_s8 + $0x198] sm:$0xf]  ;;  %v13784_v32 = vld [vmem:[%s22027_s8 + $0x1bc] sm:$0xf0] }
 0x32e   :  { %8043 = vmatpush.bf16.msrb.mxu0 %v12769_v16  ;;  %8056 = vmatpush.bf16.msrb.mxu1 %v13089_v43  ;;  %v5437_v33 = vpop.f32.mrf.mxu0  ;;  %v5450_v0 = vpop.f32.mrf.mxu1  ;;  %v12250_v16 = vld [vmem:[%s22027_s8 + $0x618] sm:$0xf0]  ;;  %v12933_v43 = vor.u32 %v14088_v34, %v12930_v53  ;;  %v12130_v53 = vld [vmem:[%s22027_s8 + $0x528] sm:$0xf0] }
 0x32f   :  { %8069 = vmatpush.bf16.msrb.mxu2 %v11493_v45  ;;  %8082 = vmatpush.bf16.msrb.mxu3 %v11813_v6  ;;  %v5451_v41 = vadd.f32 %v5450_v0, %v5437_v33  ;;  %v14078_v45 = vld [vmem:[%s22027_s8 + $0xaf4] sm:$0xf]  ;;  %v12890_v6 = vld [vmem:[%s22027_s8 + $0xb18] sm:$0xf0]  ;;  %v12253_v1 = vor.u32 %v13918_v24, %v12250_v16  ;;  %v12813_v33 = vor.u32 %v14058_v10, %v12810_v18  ;;  %v12336_v10 = vld [vmem:[%s22027_s8 + $0x698] sm:$0xf] }
 0x330   :  { %v12893_v5 = vor.u32 %v14078_v45, %v12890_v6  ;;  %v13884_v45 = vld [vmem:[%s22027_s8 + $0x4dc] sm:$0xf0]  ;;  %v12416_v6 = vld [vmem:[%s22027_s8 + $0x738] sm:$0xf] }
 0x331   :  { %8044 = vmatmul.bf16.vlgmr.msrb.gmra.mxu0 %v19411_v26  ;;  %8057 = vmatmul.bf16.vlgmr.msrb.gmra.mxu1 %v19416_v21  ;;  %v12097_v19 = vor.u32 %v13884_v45, %v12096_v55  ;;  %v13944_v18 = vld [vmem:[%s22027_s8 + $0x6bc] sm:$0xf0]  ;;  %v11616_v45 = vld [vmem:[%s22027_s8 + $0xf8] sm:$0xf] }
 0x332   :  { %8088 = vmatpush.bf16.msra.mxu0 %v12413_v59  ;;  %8101 = vmatpush.bf16.msra.mxu1 %v12733_v27  ;;  %v14158_v59 = vld [vmem:[%s22027_s8 + $0xd74] sm:$0xf]  ;;  %v13210_v27 = vld [vmem:[%s22027_s8 + $0xd98] sm:$0xf0] }
 0x333   :  { %8114 = vmatpush.bf16.msra.mxu2 %v13053_v37  ;;  %8127 = vmatpush.bf16.msra.mxu3 %v13373_v22  ;;  %v13908_v37 = vld [vmem:[%s22027_s8 + $0x5a4] sm:$0xf]  ;;  %v12210_v22 = vld [vmem:[%s22027_s8 + $0x5c8] sm:$0xf0]  ;;  %v13213_v3 = vor.u32 %v14158_v59, %v13210_v27  ;;  %v12133_v59 = vor.u32 %v13888_v51, %v12130_v53  ;;  %v12453_v27 = vor.u32 %v13968_v35, %v12450_v36  ;;  %v13774_v53 = vld [vmem:[%s22027_s8 + $0x16c] sm:$0xf0] }
 0x334   :  { %8070 = vmatmul.bf16.vlgmr.msrb.gmra.mxu2 %v19193_v11  ;;  %8083 = vmatmul.bf16.vlgmr.msrb.gmra.mxu3 %v19198_v7  ;;  %v11697_v51 = vor.u32 %v13784_v32, %v11696_v49  ;;  %v12337_v35 = vor.u32 %v13944_v18, %v12336_v10  ;;  %v13994_v49 = vld [vmem:[%s22027_s8 + $0x84c] sm:$0xf0]  ;;  %v11536_v10 = vld [vmem:[%s22027_s8 + $0x58] sm:$0xf]  ;;  %v13744_v18 = vld [vmem:[%s22027_s8 + $0x7c] sm:$0xf0] }
 0x336   :  { %8089 = vmatpush.bf16.msra.mxu0 %v12373_v28  ;;  %8102 = vmatpush.bf16.msra.mxu1 %v12693_v9  ;;  %v14148_v28 = vld [vmem:[%s22027_s8 + $0xd24] sm:$0xf]  ;;  %v13170_v9 = vld [vmem:[%s22027_s8 + $0xd48] sm:$0xf0]  ;;  %v5439_v4 = vpop.f32.mrf.mxu0 }
 0x337   :  { %8115 = vmatpush.bf16.msra.mxu2 %v13013_v57  ;;  %8128 = vmatpush.bf16.msra.mxu3 %v13333_v15  ;;  %v5463_v47 = vpop.f32.mrf.mxu2  ;;  %v5476_v30 = vpop.f32.mrf.mxu3  ;;  %v12213_v15 = vor.u32 %v13908_v37, %v12210_v22  ;;  %v13173_v13 = vor.u32 %v14148_v28, %v13170_v9  ;;  %v14044_v37 = vld [vmem:[%s22027_s8 + $0x9dc] sm:$0xf0]  ;;  %v13874_v28 = vld [vmem:[%s22027_s8 + $0x48c] sm:$0xf0]  ;;  %v12376_v9 = vld [vmem:[%s22027_s8 + $0x6e8] sm:$0xf] }
 0x338   :  { %v5464_v61 = vadd.f32 %v5463_v47, %v5451_v41  ;;  %v5452_v57 = vpop.f32.mrf.mxu1  ;;  %v14048_v41 = vld [vmem:[%s22027_s8 + $0xa04] sm:$0xf]  ;;  %v12696_v4 = vld [vmem:[%s22027_s8 + $0x968] sm:$0xf] }
 0x339   :  { %v14034_v57 = vld [vmem:[%s22027_s8 + $0x98c] sm:$0xf0] }
 0x33a   :  { %8090 = vmatpush.bf16.msra.mxu0 %v12333_v39  ;;  %8103 = vmatpush.bf16.msra.mxu1 %v12653_v48  ;;  %v19524_v52 = vadd.f32 %v5476_v30, %v5464_v61  ;;  %v13978_v39 = vld [vmem:[%s22027_s8 + $0x7d4] sm:$0xf]  ;;  %v12490_v48 = vld [vmem:[%s22027_s8 + $0x7f8] sm:$0xf0]  ;;  %v13954_v61 = vld [vmem:[%s22027_s8 + $0x70c] sm:$0xf0] }
 0x33b   :  { %8116 = vmatpush.bf16.msra.mxu2 %v12973_v63  ;;  %8129 = vmatpush.bf16.msra.mxu3 %v13293_v25  ;;  %v14138_v63 = vld [vmem:[%s22027_s8 + $0xcd4] sm:$0xf]  ;;  %v13130_v25 = vld [vmem:[%s22027_s8 + $0xcf8] sm:$0xf0]  ;;  %v12493_v34 = vor.u32 %v13978_v39, %v12490_v48  ;;  %v12016_v39 = vld [vmem:[%s22027_s8 + $0x418] sm:$0xf] }
 0x33c   :  { %v13133_v0 = vor.u32 %v14138_v63, %v13130_v25  ;;  %v13864_v48 = vld [vmem:[%s22027_s8 + $0x43c] sm:$0xf0]  ;;  %v12656_v63 = vld [vmem:[%s22027_s8 + $0x918] sm:$0xf] }
 0x33d   :  { %v14024_v25 = vld [vmem:[%s22027_s8 + $0x93c] sm:$0xf0] }
 0x33e   :  { %8091 = vmatpush.bf16.msra.mxu0 %v12293_v42  ;;  %8104 = vmatpush.bf16.msra.mxu1 %v12613_v56  ;;  %v12770_v42 = vld [vmem:[%s22027_s8 + $0xa28] sm:$0xf0]  ;;  %v14128_v56 = vld [vmem:[%s22027_s8 + $0xc84] sm:$0xf]  ;;  %v12657_v36 = vor.u32 %v14024_v25, %v12656_v63 }
 0x33f   :  { %8117 = vmatpush.bf16.msra.mxu2 %v12933_v43  ;;  %8130 = vmatpush.bf16.msra.mxu3 %v13253_v46  ;;  %v5465_v24 = vpop.f32.mrf.mxu2  ;;  %v5478_v16 = vpop.f32.mrf.mxu3  ;;  %v13090_v43 = vld [vmem:[%s22027_s8 + $0xca8] sm:$0xf0]  ;;  %v11776_v46 = vld [vmem:[%s22027_s8 + $0x238] sm:$0xf]  ;;  %v12773_v22 = vor.u32 %v14048_v41, %v12770_v42  ;;  %v12296_v41 = vld [vmem:[%s22027_s8 + $0x648] sm:$0xf] }
 0x340   :  { %v13934_v42 = vld [vmem:[%s22027_s8 + $0x66c] sm:$0xf0] }
 0x341   :  { %v14014_v24 = vld [vmem:[%s22027_s8 + $0x8ec] sm:$0xf0] }
 0x342   :  { %8092 = vmatpush.bf16.msra.mxu0 %v12253_v1  ;;  %8105 = vmatpush.bf16.msra.mxu1 %v12573_v60  ;;  %v13964_v1 = vld [vmem:[%s22027_s8 + $0x75c] sm:$0xf0]  ;;  %v12736_v60 = vld [vmem:[%s22027_s8 + $0x9b8] sm:$0xf] }
 0x343   :  { %8118 = vmatpush.bf16.msra.mxu2 %v12893_v5  ;;  %8131 = vmatpush.bf16.msra.mxu3 %v13213_v3  ;;  %v13093_v5 = vor.u32 %v14128_v56, %v13090_v43  ;;  %v11777_v3 = vor.u32 %v13804_v50, %v11776_v46  ;;  %v12417_v47 = vor.u32 %v13964_v1, %v12416_v6  ;;  %v12616_v56 = vld [vmem:[%s22027_s8 + $0x8c8] sm:$0xf]  ;;  %v13764_v6 = vld [vmem:[%s22027_s8 + $0x11c] sm:$0xf0]  ;;  %v11936_v1 = vld [vmem:[%s22027_s8 + $0x378] sm:$0xf] }
 0x344   :  { %v12737_v30 = vor.u32 %v14044_v37, %v12736_v60  ;;  %v13844_v60 = vld [vmem:[%s22027_s8 + $0x39c] sm:$0xf0]  ;;  %v12256_v37 = vld [vmem:[%s22027_s8 + $0x5f8] sm:$0xf] }
 0x346   :  { %8093 = vmatpush.bf16.msra.mxu0 %v12213_v15  ;;  %8106 = vmatpush.bf16.msra.mxu1 %v12533_v40  ;;  %v11737_v15 = vor.u32 %v13794_v23, %v11736_v20  ;;  %v12057_v40 = vor.u32 %v13874_v28, %v12056_v29  ;;  %v11937_v20 = vor.u32 %v13844_v60, %v11936_v1  ;;  %v11576_v23 = vld [vmem:[%s22027_s8 + $0xa8] sm:$0xf]  ;;  %v13056_v1 = vld [vmem:[%s22027_s8 + $0xc38] sm:$0xf]  ;;  %v14124_v60 = vld [vmem:[%s22027_s8 + $0xc5c] sm:$0xf0] }
 0x347   :  { %8119 = vmatpush.bf16.msra.mxu2 %v12853_v12  ;;  %8132 = vmatpush.bf16.msra.mxu3 %v13173_v13  ;;  %v12377_v12 = vor.u32 %v13954_v61, %v12376_v9  ;;  %v12697_v13 = vor.u32 %v14034_v57, %v12696_v4  ;;  %v11896_v28 = vld [vmem:[%s22027_s8 + $0x328] sm:$0xf]  ;;  %v13834_v9 = vld [vmem:[%s22027_s8 + $0x34c] sm:$0xf0] }
 0x348   :  { %v12216_v61 = vld [vmem:[%s22027_s8 + $0x5a8] sm:$0xf] }
 0x34a   :  { %8094 = vmatpush.bf16.msra.mxu0 %v12173_v58  ;;  %8107 = vmatpush.bf16.msra.mxu1 %v12493_v34  ;;  %v12017_v58 = vor.u32 %v13864_v48, %v12016_v39  ;;  %v11656_v34 = vld [vmem:[%s22027_s8 + $0x148] sm:$0xf]  ;;  %v11897_v48 = vor.u32 %v13834_v9, %v11896_v28  ;;  %v13057_v28 = vor.u32 %v14124_v60, %v13056_v1 }
 0x34b   :  { %8120 = vmatpush.bf16.msra.mxu2 %v12813_v33  ;;  %8133 = vmatpush.bf16.msra.mxu3 %v13133_v0  ;;  %v11976_v33 = vld [vmem:[%s22027_s8 + $0x3c8] sm:$0xf]  ;;  %v13854_v0 = vld [vmem:[%s22027_s8 + $0x3ec] sm:$0xf0]  ;;  %v11657_v50 = vor.u32 %v13774_v53, %v11656_v34  ;;  %v13824_v34 = vld [vmem:[%s22027_s8 + $0x2fc] sm:$0xf0] }
 0x34c   :  { %v11977_v55 = vor.u32 %v13854_v0, %v11976_v33  ;;  %v12176_v53 = vld [vmem:[%s22027_s8 + $0x558] sm:$0xf]  ;;  %v13984_v33 = vld [vmem:[%s22027_s8 + $0x7fc] sm:$0xf0]  ;;  %v11496_v0 = vld [vmem:[%s22027_s8 + $0x8] sm:$0xf] }
 0x34e   :  { %8095 = vmatpush.bf16.msra.mxu0 %v12133_v59  ;;  %8108 = vmatpush.bf16.msra.mxu1 %v12453_v27  ;;  %v5489_v16 = vpop.f32.mrf.mxu0  ;;  %v5502_v43 = vpop.f32.mrf.mxu1  ;;  %v12297_v59 = vor.u32 %v13934_v42, %v12296_v41  ;;  %v12617_v27 = vor.u32 %v14014_v24, %v12616_v56  ;;  %v11537_v41 = vor.u32 %v13744_v18, %v11536_v10  ;;  %v13734_v56 = vld [vmem:[%s22027_s8 + $0x2c] sm:$0xf0]  ;;  %v11816_v24 = vld [vmem:[%s22027_s8 + $0x288] sm:$0xf]  ;;  %v12976_v18 = vld [vmem:[%s22027_s8 + $0xb98] sm:$0xf] }
 0x34f   :  { %8121 = vmatpush.bf16.msra.mxu2 %v12773_v22  ;;  %8134 = vmatpush.bf16.msra.mxu3 %v13093_v5  ;;  %v5503_v46 = vadd.f32 %v5502_v43, %v5489_v16  ;;  %v13924_v22 = vld [vmem:[%s22027_s8 + $0x61c] sm:$0xf0]  ;;  %v12576_v5 = vld [vmem:[%s22027_s8 + $0x878] sm:$0xf]  ;;  %v13814_v16 = vld [vmem:[%s22027_s8 + $0x2ac] sm:$0xf0] }
 0x351   :  { %8096 = vmatmul.bf16.vlgmr.msra.gmra.mxu0 %v19203_v2  ;;  %8109 = vmatmul.bf16.vlgmr.msra.gmra.mxu1 %v19214_v14 }
 0x352   :  { %8140 = vmatpush.bf16.msrb.mxu0 %v11777_v3  ;;  %8153 = vmatpush.bf16.msrb.mxu1 %v12097_v19  ;;  %v14004_v3 = vld [vmem:[%s22027_s8 + $0x89c] sm:$0xf0]  ;;  %v11617_v19 = vor.u32 %v13764_v6, %v11616_v45  ;;  %v12456_v45 = vld [vmem:[%s22027_s8 + $0x788] sm:$0xf] }
 0x353   :  { %8166 = vmatpush.bf16.msrb.mxu2 %v12417_v47  ;;  %8179 = vmatpush.bf16.msrb.mxu3 %v12737_v30  ;;  %v13754_v47 = vld [vmem:[%s22027_s8 + $0xcc] sm:$0xf0]  ;;  %v12257_v30 = vor.u32 %v13924_v22, %v12256_v37  ;;  %v12577_v29 = vor.u32 %v14004_v3, %v12576_v5  ;;  %v13376_v37 = vld [vmem:[%s22027_s8 + $0xeb8] sm:$0xf]  ;;  %v14204_v22 = vld [vmem:[%s22027_s8 + $0xedc] sm:$0xf0]  ;;  %v11497_v3 = vor.u32 %v13734_v56, %v11496_v0 }
 0x354   :  { %8122 = vmatmul.bf16.vlgmr.msra.gmra.mxu2 %v19411_v26  ;;  %8135 = vmatmul.bf16.vlgmr.msra.gmra.mxu3 %v19416_v21  ;;  %v11577_v39 = vor.u32 %v13754_v47, %v11576_v23  ;;  %v13799_v5 = vld [vmem:[%s22027_s8 + $0x23c] sm:$0xf]  ;;  %v12098_v47 = vld [vmem:[%s22027_s8 + $0x4e0] sm:$0xf0]  ;;  %v13377_v9 = vor.u32 %v14204_v22, %v13376_v37  ;;  %v12936_v56 = vld [vmem:[%s22027_s8 + $0xb48] sm:$0xf] }
 0x355   :  { %v13879_v23 = vld [vmem:[%s22027_s8 + $0x4bc] sm:$0xf]  ;;  %v12018_v0 = vld [vmem:[%s22027_s8 + $0x440] sm:$0xf0] }
 0x356   :  { %8141 = vmatpush.bf16.msrb.mxu0 %v11737_v15  ;;  %8154 = vmatpush.bf16.msrb.mxu1 %v12057_v40  ;;  %v13914_v15 = vld [vmem:[%s22027_s8 + $0x5cc] sm:$0xf0]  ;;  %v12536_v40 = vld [vmem:[%s22027_s8 + $0x828] sm:$0xf] }
 0x357   :  { %8167 = vmatpush.bf16.msrb.mxu2 %v12377_v12  ;;  %8180 = vmatpush.bf16.msrb.mxu3 %v12697_v13  ;;  %v5515_v4 = vpop.f32.mrf.mxu2  ;;  %v5528_v57 = vpop.f32.mrf.mxu3  ;;  %v12217_v25 = vor.u32 %v13914_v15, %v12216_v61  ;;  %v13016_v61 = vld [vmem:[%s22027_s8 + $0xbe8] sm:$0xf]  ;;  %v12101_v15 = vor.u32 %v13879_v23, %v12098_v47  ;;  %v13216_v23 = vld [vmem:[%s22027_s8 + $0xd78] sm:$0xf]  ;;  %v14164_v47 = vld [vmem:[%s22027_s8 + $0xd9c] sm:$0xf0] }
 0x358   :  { %v5516_v32 = vadd.f32 %v5515_v4, %v5503_v46  ;;  %v5491_v12 = vpop.f32.mrf.mxu0  ;;  %v5504_v13 = vpop.f32.mrf.mxu1  ;;  %v14114_v4 = vld [vmem:[%s22027_s8 + $0xc0c] sm:$0xf0] }
 0x359   :  { %v11738_v12 = vld [vmem:[%s22027_s8 + $0x210] sm:$0xf0]  ;;  %v13869_v13 = vld [vmem:[%s22027_s8 + $0x46c] sm:$0xf] }
 0x35a   :  { %8142 = vmatpush.bf16.msrb.mxu0 %v11697_v51  ;;  %8155 = vmatpush.bf16.msrb.mxu1 %v12017_v58  ;;  %v19722_v63 = vadd.f32 %v5528_v57, %v5516_v32  ;;  %v12537_v51 = vor.u32 %v13994_v49, %v12536_v40  ;;  %v11856_v58 = vld [vmem:[%s22027_s8 + $0x2d8] sm:$0xf]  ;;  %v13336_v40 = vld [vmem:[%s22027_s8 + $0xe68] sm:$0xf]  ;;  %v14194_v49 = vld [vmem:[%s22027_s8 + $0xe8c] sm:$0xf0] }
 0x35b   :  { %8168 = vmatpush.bf16.msrb.mxu2 %v12337_v35  ;;  %8181 = vmatpush.bf16.msrb.mxu3 %v12657_v36  ;;  %v13904_v35 = vld [vmem:[%s22027_s8 + $0x57c] sm:$0xf0]  ;;  %v12496_v36 = vld [vmem:[%s22027_s8 + $0x7d8] sm:$0xf]  ;;  %v11857_v42 = vor.u32 %v13824_v34, %v11856_v58  ;;  %v13789_v32 = vld [vmem:[%s22027_s8 + $0x1ec] sm:$0xf]  ;;  %v13337_v10 = vor.u32 %v14194_v49, %v13336_v40 }
 0x35c   :  { %v12177_v43 = vor.u32 %v13904_v35, %v12176_v53  ;;  %v12497_v46 = vor.u32 %v13984_v33, %v12496_v36  ;;  %v13296_v34 = vld [vmem:[%s22027_s8 + $0xe18] sm:$0xf]  ;;  %v14184_v53 = vld [vmem:[%s22027_s8 + $0xe3c] sm:$0xf0]  ;;  %v13779_v35 = vld [vmem:[%s22027_s8 + $0x19c] sm:$0xf] }
 0x35d   :  { %v11698_v36 = vld [vmem:[%s22027_s8 + $0x1c0] sm:$0xf0]  ;;  %v13859_v33 = vld [vmem:[%s22027_s8 + $0x41c] sm:$0xf] }
 0x35e   :  { %8143 = vmatpush.bf16.msrb.mxu0 %v11657_v50  ;;  %8156 = vmatpush.bf16.msrb.mxu1 %v11977_v55  ;;  %v12136_v50 = vld [vmem:[%s22027_s8 + $0x508] sm:$0xf]  ;;  %v13894_v55 = vld [vmem:[%s22027_s8 + $0x52c] sm:$0xf0] }
 0x35f   :  { %8169 = vmatpush.bf16.msrb.mxu2 %v12297_v59  ;;  %8182 = vmatpush.bf16.msrb.mxu3 %v12617_v27  ;;  %v5517_v6 = vpop.f32.mrf.mxu2  ;;  %v5530_v59 = vpop.f32.mrf.mxu3  ;;  %v13974_v27 = vld [vmem:[%s22027_s8 + $0x7ac] sm:$0xf0] }
 0x360   :  { %v13849_v6 = vld [vmem:[%s22027_s8 + $0x3cc] sm:$0xf]  ;;  %v11978_v59 = vld [vmem:[%s22027_s8 + $0x3f0] sm:$0xf0] }
 0x362   :  { %8144 = vmatpush.bf16.msrb.mxu0 %v11617_v19  ;;  %8157 = vmatpush.bf16.msrb.mxu1 %v11937_v20  ;;  %v11817_v19 = vor.u32 %v13814_v16, %v11816_v24  ;;  %v11778_v20 = vld [vmem:[%s22027_s8 + $0x260] sm:$0xf0]  ;;  %v14094_v24 = vld [vmem:[%s22027_s8 + $0xb6c] sm:$0xf0]  ;;  %v11701_v16 = vor.u32 %v13779_v35, %v11698_v36  ;;  %v12816_v36 = vld [vmem:[%s22027_s8 + $0xa58] sm:$0xf] }
 0x363   :  { %8170 = vmatpush.bf16.msrb.mxu2 %v12257_v30  ;;  %8183 = vmatpush.bf16.msrb.mxu3 %v12577_v29  ;;  %v12137_v30 = vor.u32 %v13894_v55, %v12136_v50  ;;  %v12457_v29 = vor.u32 %v13974_v27, %v12456_v45  ;;  %v11781_v57 = vor.u32 %v13799_v5, %v11778_v20  ;;  %v14174_v50 = vld [vmem:[%s22027_s8 + $0xdec] sm:$0xf0]  ;;  %v13769_v55 = vld [vmem:[%s22027_s8 + $0x14c] sm:$0xf]  ;;  %v11658_v45 = vld [vmem:[%s22027_s8 + $0x170] sm:$0xf0] }
 0x364   :  { %v12937_v37 = vor.u32 %v14094_v24, %v12936_v56  ;;  %v12896_v5 = vld [vmem:[%s22027_s8 + $0xaf8] sm:$0xf]  ;;  %v11981_v20 = vor.u32 %v13849_v6, %v11978_v59  ;;  %v14144_v24 = vld [vmem:[%s22027_s8 + $0xcfc] sm:$0xf0]  ;;  %v14054_v59 = vld [vmem:[%s22027_s8 + $0xa2c] sm:$0xf0] }
 0x365   :  { %v13136_v56 = vld [vmem:[%s22027_s8 + $0xcd8] sm:$0xf] }
 0x366   :  { %8145 = vmatpush.bf16.msrb.mxu0 %v11577_v39  ;;  %8158 = vmatpush.bf16.msrb.mxu1 %v11897_v48  ;;  %v12058_v39 = vld [vmem:[%s22027_s8 + $0x490] sm:$0xf0]  ;;  %v13017_v48 = vor.u32 %v14114_v4, %v13016_v61  ;;  %v13217_v4 = vor.u32 %v14164_v47, %v13216_v23  ;;  %v13137_v6 = vor.u32 %v14144_v24, %v13136_v56  ;;  %v13959_v47 = vld [vmem:[%s22027_s8 + $0x73c] sm:$0xf] }
 0x367   :  { %8171 = vmatpush.bf16.msrb.mxu2 %v12217_v25  ;;  %8184 = vmatpush.bf16.msrb.mxu3 %v12537_v51  ;;  %v14104_v25 = vld [vmem:[%s22027_s8 + $0xbbc] sm:$0xf0]  ;;  %v11741_v51 = vor.u32 %v13789_v32, %v11738_v12  ;;  %v12061_v58 = vor.u32 %v13869_v13, %v12058_v39  ;;  %v13176_v32 = vld [vmem:[%s22027_s8 + $0xd28] sm:$0xf]  ;;  %v14154_v12 = vld [vmem:[%s22027_s8 + $0xd4c] sm:$0xf0] }
 0x368   :  { %v13749_v13 = vld [vmem:[%s22027_s8 + $0xac] sm:$0xf]  ;;  %v13177_v35 = vor.u32 %v14154_v12, %v13176_v32  ;;  %v11818_v23 = vld [vmem:[%s22027_s8 + $0x2b0] sm:$0xf0] }
 0x36a   :  { %8146 = vmatpush.bf16.msrb.mxu0 %v11537_v41  ;;  %8159 = vmatpush.bf16.msrb.mxu1 %v11857_v42  ;;  %v12977_v41 = vor.u32 %v14104_v25, %v12976_v18  ;;  %v13297_v42 = vor.u32 %v14184_v53, %v13296_v34  ;;  %v13829_v18 = vld [vmem:[%s22027_s8 + $0x32c] sm:$0xf]  ;;  %v11898_v25 = vld [vmem:[%s22027_s8 + $0x350] sm:$0xf0] }
 0x36b   :  { %8172 = vmatpush.bf16.msrb.mxu2 %v12177_v43  ;;  %8185 = vmatpush.bf16.msrb.mxu3 %v12497_v46  ;;  %v12021_v43 = vor.u32 %v13859_v33, %v12018_v0  ;;  %v13256_v46 = vld [vmem:[%s22027_s8 + $0xdc8] sm:$0xf]  ;;  %v14064_v33 = vld [vmem:[%s22027_s8 + $0xa7c] sm:$0xf0] }
 0x36c   :  { %v13257_v22 = vor.u32 %v14174_v50, %v13256_v46  ;;  %v13819_v46 = vld [vmem:[%s22027_s8 + $0x2dc] sm:$0xf]  ;;  %v11858_v50 = vld [vmem:[%s22027_s8 + $0x300] sm:$0xf0] }
 0x36e   :  { %8147 = vmatpush.bf16.msrb.mxu0 %v11497_v3  ;;  %8160 = vmatpush.bf16.msrb.mxu1 %v11817_v19  ;;  %v5541_v27 = vpop.f32.mrf.mxu0  ;;  %v5554_v1 = vpop.f32.mrf.mxu1  ;;  %v14084_v3 = vld [vmem:[%s22027_s8 + $0xb1c] sm:$0xf0]  ;;  %v11661_v19 = vor.u32 %v13769_v55, %v11658_v45  ;;  %v12776_v55 = vld [vmem:[%s22027_s8 + $0xa08] sm:$0xf]  ;;  %v12817_v45 = vor.u32 %v14064_v33, %v12816_v36 }
 0x36f   :  { %8173 = vmatpush.bf16.msrb.mxu2 %v12137_v30  ;;  %8186 = vmatpush.bf16.msrb.mxu3 %v12457_v29  ;;  %v5555_v60 = vadd.f32 %v5554_v1, %v5541_v27  ;;  %v13759_v30 = vld [vmem:[%s22027_s8 + $0xfc] sm:$0xf]  ;;  %v11618_v29 = vld [vmem:[%s22027_s8 + $0x120] sm:$0xf0]  ;;  %v12897_v61 = vor.u32 %v14084_v3, %v12896_v5  ;;  %v13096_v27 = vld [vmem:[%s22027_s8 + $0xc88] sm:$0xf] }
 0x370   :  { %v11621_v40 = vor.u32 %v13759_v30, %v11618_v29  ;;  %v14134_v1 = vld [vmem:[%s22027_s8 + $0xcac] sm:$0xf0]  ;;  %v11498_v5 = vld [vmem:[%s22027_s8 + $0x30] sm:$0xf0]  ;;  %v13809_v3 = vld [vmem:[%s22027_s8 + $0x28c] sm:$0xf] }
 0x371   :  { %8148 = vmatmul.bf16.vlgmr.msrb.gmra.mxu0 %v19193_v11  ;;  %8161 = vmatmul.bf16.vlgmr.msrb.gmra.mxu1 %v19198_v7  ;;  %v12418_v30 = vld [vmem:[%s22027_s8 + $0x760] sm:$0xf0]  ;;  %v14039_v29 = vld [vmem:[%s22027_s8 + $0x9bc] sm:$0xf]  ;;  %v11821_v32 = vor.u32 %v13809_v3, %v11818_v23  ;;  %v14089_v3 = vld [vmem:[%s22027_s8 + $0xb4c] sm:$0xf] }
 0x372   :  { %8192 = vmatpush.bf16.msra.mxu0 %v13057_v28  ;;  %8205 = vmatpush.bf16.msra.mxu1 %v13377_v9  ;;  %v13839_v28 = vld [vmem:[%s22027_s8 + $0x37c] sm:$0xf]  ;;  %v11938_v9 = vld [vmem:[%s22027_s8 + $0x3a0] sm:$0xf0]  ;;  %v12421_v12 = vor.u32 %v13959_v47, %v12418_v30  ;;  %v13258_v23 = vld [vmem:[%s22027_s8 + $0xdf0] sm:$0xf0] }
 0x373   :  { %8218 = vmatpush.bf16.msra.mxu2 %v11781_v57  ;;  %8231 = vmatpush.bf16.msra.mxu3 %v12101_v15  ;;  %v12856_v57 = vld [vmem:[%s22027_s8 + $0xaa8] sm:$0xf]  ;;  %v14074_v15 = vld [vmem:[%s22027_s8 + $0xacc] sm:$0xf0]  ;;  %v11941_v49 = vor.u32 %v13839_v28, %v11938_v9  ;;  %v12738_v28 = vld [vmem:[%s22027_s8 + $0x9e0] sm:$0xf0] }
 0x374   :  { %8174 = vmatmul.bf16.vlgmr.msrb.gmra.mxu2 %v19203_v2  ;;  %8187 = vmatmul.bf16.vlgmr.msrb.gmra.mxu3 %v19214_v14  ;;  %v12857_v53 = vor.u32 %v14074_v15, %v12856_v57  ;;  %v14119_v9 = vld [vmem:[%s22027_s8 + $0xc3c] sm:$0xf]  ;;  %v13058_v57 = vld [vmem:[%s22027_s8 + $0xc60] sm:$0xf0] }
 0x375   :  { %v14199_v15 = vld [vmem:[%s22027_s8 + $0xebc] sm:$0xf] }
 0x376   :  { %8193 = vmatpush.bf16.msra.mxu0 %v13017_v48  ;;  %8206 = vmatpush.bf16.msra.mxu1 %v13337_v10  ;;  %v11578_v10 = vld [vmem:[%s22027_s8 + $0xd0] sm:$0xf0]  ;;  %v5556_v34 = vpop.f32.mrf.mxu1 }
 0x377   :  { %8219 = vmatpush.bf16.msra.mxu2 %v11741_v51  ;;  %8232 = vmatpush.bf16.msra.mxu3 %v12061_v58  ;;  %v5567_v39 = vpop.f32.mrf.mxu2  ;;  %v5580_v48 = vpop.f32.mrf.mxu3  ;;  %v13018_v34 = vld [vmem:[%s22027_s8 + $0xc10] sm:$0xf0] }
 0x378   :  { %v5568_v51 = vadd.f32 %v5567_v39, %v5555_v60  ;;  %v5543_v58 = vpop.f32.mrf.mxu0  ;;  %v13949_v39 = vld [vmem:[%s22027_s8 + $0x6ec] sm:$0xf] }
 0x379   :  { %v14109_v58 = vld [vmem:[%s22027_s8 + $0xbec] sm:$0xf] }
 0x37a   :  { %8194 = vmatpush.bf16.msra.mxu0 %v12977_v41  ;;  %8207 = vmatpush.bf16.msra.mxu1 %v13297_v42  ;;  %v19920_v0 = vadd.f32 %v5580_v48, %v5568_v51  ;;  %v11581_v41 = vor.u32 %v13749_v13, %v11578_v10  ;;  %v11901_v42 = vor.u32 %v13829_v18, %v11898_v25  ;;  %v12378_v48 = vld [vmem:[%s22027_s8 + $0x710] sm:$0xf0]  ;;  %v14029_v25 = vld [vmem:[%s22027_s8 + $0x96c] sm:$0xf] }
 0x37b   :  { %8220 = vmatpush.bf16.msra.mxu2 %v11701_v16  ;;  %8233 = vmatpush.bf16.msra.mxu3 %v12021_v43  ;;  %v13739_v16 = vld [vmem:[%s22027_s8 + $0x5c] sm:$0xf]  ;;  %v11538_v43 = vld [vmem:[%s22027_s8 + $0x80] sm:$0xf0]  ;;  %v12741_v13 = vor.u32 %v14039_v29, %v12738_v28  ;;  %v13061_v10 = vor.u32 %v14119_v9, %v13058_v57  ;;  %v12698_v51 = vld [vmem:[%s22027_s8 + $0x990] sm:$0xf0]  ;;  %v12381_v36 = vor.u32 %v13949_v39, %v12378_v48 }
 0x37c   :  { %v11541_v60 = vor.u32 %v13739_v16, %v11538_v43  ;;  %v12701_v33 = vor.u32 %v14029_v25, %v12698_v51  ;;  %v13021_v56 = vor.u32 %v14109_v58, %v13018_v34  ;;  %v14019_v16 = vld [vmem:[%s22027_s8 + $0x91c] sm:$0xf]  ;;  %v12658_v43 = vld [vmem:[%s22027_s8 + $0x940] sm:$0xf0]  ;;  %v12218_v25 = vld [vmem:[%s22027_s8 + $0x5d0] sm:$0xf0] }
 0x37d   :  { %v13218_v39 = vld [vmem:[%s22027_s8 + $0xda0] sm:$0xf0]  ;;  %v13989_v34 = vld [vmem:[%s22027_s8 + $0x82c] sm:$0xf] }
 0x37e   :  { %8195 = vmatpush.bf16.msra.mxu0 %v12937_v37  ;;  %8208 = vmatpush.bf16.msra.mxu1 %v13257_v22  ;;  %v11861_v37 = vor.u32 %v13819_v46, %v11858_v50  ;;  %v13729_v22 = vld [vmem:[%s22027_s8 + $0xc] sm:$0xf]  ;;  %v14099_v46 = vld [vmem:[%s22027_s8 + $0xb9c] sm:$0xf]  ;;  %v12978_v50 = vld [vmem:[%s22027_s8 + $0xbc0] sm:$0xf0] }
 0x37f   :  { %8221 = vmatpush.bf16.msra.mxu2 %v11661_v19  ;;  %8234 = vmatpush.bf16.msra.mxu3 %v11981_v20  ;;  %v5569_v19 = vpop.f32.mrf.mxu2  ;;  %v5582_v20 = vpop.f32.mrf.mxu3 }
 0x380   :  { %v12938_v19 = vld [vmem:[%s22027_s8 + $0xb70] sm:$0xf0]  ;;  %v14169_v20 = vld [vmem:[%s22027_s8 + $0xdcc] sm:$0xf] }
 0x381   :  { %v12941_v57 = vor.u32 %v14089_v3, %v12938_v19  ;;  %v13138_v3 = vld [vmem:[%s22027_s8 + $0xd00] sm:$0xf0]  ;;  %v13889_v19 = vld [vmem:[%s22027_s8 + $0x50c] sm:$0xf] }
 0x382   :  { %8196 = vmatpush.bf16.msra.mxu0 %v12897_v61  ;;  %8209 = vmatpush.bf16.msra.mxu1 %v13217_v4  ;;  %v12777_v61 = vor.u32 %v14054_v59, %v12776_v55  ;;  %v13097_v4 = vor.u32 %v14134_v1, %v13096_v27  ;;  %v14179_v55 = vld [vmem:[%s22027_s8 + $0xe1c] sm:$0xf]  ;;  %v12661_v59 = vor.u32 %v14019_v16, %v12658_v43  ;;  %v13929_v27 = vld [vmem:[%s22027_s8 + $0x64c] sm:$0xf]  ;;  %v12298_v1 = vld [vmem:[%s22027_s8 + $0x670] sm:$0xf0] }
 0x383   :  { %8222 = vmatpush.bf16.msra.mxu2 %v11621_v40  ;;  %8235 = vmatpush.bf16.msra.mxu3 %v11941_v49  ;;  %v13378_v40 = vld [vmem:[%s22027_s8 + $0xee0] sm:$0xf0]  ;;  %v11501_v49 = vor.u32 %v13729_v22, %v11498_v5  ;;  %v14009_v22 = vld [vmem:[%s22027_s8 + $0x8cc] sm:$0xf]  ;;  %v12618_v5 = vld [vmem:[%s22027_s8 + $0x8f0] sm:$0xf0]  ;;  %v12301_v28 = vor.u32 %v13929_v27, %v12298_v1 }
 0x384   :  { %v13381_v18 = vor.u32 %v14199_v15, %v13378_v40  ;;  %v12621_v9 = vor.u32 %v14009_v22, %v12618_v5  ;;  %v13261_v15 = vor.u32 %v14169_v20, %v13258_v23  ;;  %v13999_v40 = vld [vmem:[%s22027_s8 + $0x87c] sm:$0xf]  ;;  %v12818_v22 = vld [vmem:[%s22027_s8 + $0xa80] sm:$0xf0] }
 0x385   :  { %v13979_v1 = vld [vmem:[%s22027_s8 + $0x7dc] sm:$0xf] }
 0x386   :  { %8197 = vmatpush.bf16.msra.mxu0 %v12857_v53  ;;  %8210 = vmatpush.bf16.msra.mxu1 %v13177_v35  ;;  %v14189_v53 = vld [vmem:[%s22027_s8 + $0xe6c] sm:$0xf]  ;;  %v13338_v35 = vld [vmem:[%s22027_s8 + $0xe90] sm:$0xf0]  ;;  %v14139_v5 = vld [vmem:[%s22027_s8 + $0xcdc] sm:$0xf] }
 0x387   :  { %8223 = vmatpush.bf16.msra.mxu2 %v11581_v41  ;;  %8236 = vmatpush.bf16.msra.mxu3 %v11901_v42  ;;  %v13939_v41 = vld [vmem:[%s22027_s8 + $0x69c] sm:$0xf]  ;;  %v12338_v42 = vld [vmem:[%s22027_s8 + $0x6c0] sm:$0xf0]  ;;  %v13341_v24 = vor.u32 %v14189_v53, %v13338_v35  ;;  %v12538_v53 = vld [vmem:[%s22027_s8 + $0x850] sm:$0xf0] }
 0x388   :  { %v14069_v35 = vld [vmem:[%s22027_s8 + $0xaac] sm:$0xf] }
 0x38a   :  { %8198 = vmatpush.bf16.msra.mxu0 %v12817_v45  ;;  %8211 = vmatpush.bf16.msra.mxu1 %v13137_v6  ;;  %v13298_v45 = vld [vmem:[%s22027_s8 + $0xe40] sm:$0xf0]  ;;  %v12341_v6 = vor.u32 %v13939_v41, %v12338_v42  ;;  %v12858_v41 = vld [vmem:[%s22027_s8 + $0xad0] sm:$0xf0]  ;;  %v14149_v42 = vld [vmem:[%s22027_s8 + $0xd2c] sm:$0xf] }
 0x38b   :  { %8224 = vmatpush.bf16.msra.mxu2 %v11541_v60  ;;  %8237 = vmatpush.bf16.msra.mxu3 %v11861_v37  ;;  %v12981_v60 = vor.u32 %v14099_v46, %v12978_v50  ;;  %v13301_v37 = vor.u32 %v14179_v55, %v13298_v45  ;;  %v12541_v50 = vor.u32 %v13989_v34, %v12538_v53  ;;  %v13899_v55 = vld [vmem:[%s22027_s8 + $0x55c] sm:$0xf]  ;;  %v12178_v45 = vld [vmem:[%s22027_s8 + $0x580] sm:$0xf0] }
 0x38c   :  { %v12181_v20 = vor.u32 %v13899_v55, %v12178_v45 }
 0x38e   :  { %8199 = vmatpush.bf16.msra.mxu0 %v12777_v61  ;;  %8212 = vmatpush.bf16.msra.mxu1 %v13097_v4  ;;  %v7993_v47 = vpop.f32.mrf.mxu0  ;;  %v8006_v30 = vpop.f32.mrf.mxu1  ;;  %v13919_v61 = vld [vmem:[%s22027_s8 + $0x5fc] sm:$0xf]  ;;  %v12258_v4 = vld [vmem:[%s22027_s8 + $0x620] sm:$0xf0] }
 0x38f   :  { %8225 = vmatpush.bf16.msra.mxu2 %v11501_v49  ;;  %8238 = vmatpush.bf16.msra.mxu3 %v11821_v32  ;;  %v7994_v29 = vadd.f32 %v7993_v47, %v18108_v62  ;;  %v12578_v62 = vld [vmem:[%s22027_s8 + $0x8a0] sm:$0xf0]  ;;  %v14079_v49 = vld [vmem:[%s22027_s8 + $0xafc] sm:$0xf]  ;;  %v12261_v48 = vor.u32 %v13919_v61, %v12258_v4  ;;  %v12138_v47 = vld [vmem:[%s22027_s8 + $0x530] sm:$0xf0] }
 0x390   :  { %v14049_v61 = vld [vmem:[%s22027_s8 + $0xa0c] sm:$0xf]  ;;  %v12778_v4 = vld [vmem:[%s22027_s8 + $0xa30] sm:$0xf0] }
 0x391   :  { %8200 = vmatmul.bf16.vlgmr.msra.gmra.mxu0 %v19411_v26  ;;  %8213 = vmatmul.bf16.vlgmr.msra.gmra.mxu1 %v19416_v21  ;;  %v8007_v32 = vadd.f32 %v8006_v30, %v7994_v29  ;;  %v13969_v30 = vld [vmem:[%s22027_s8 + $0x78c] sm:$0xf]  ;;  %v12458_v29 = vld [vmem:[%s22027_s8 + $0x7b0] sm:$0xf0] }
 0x392   :  { %8244 = vmatpush.bf16.msrb.mxu0 %v12421_v12  ;;  %8257 = vmatpush.bf16.msrb.mxu1 %v12741_v13  ;;  %v12898_v12 = vld [vmem:[%s22027_s8 + $0xb20] sm:$0xf0]  ;;  %v14159_v13 = vld [vmem:[%s22027_s8 + $0xd7c] sm:$0xf] }
 0x393   :  { %8270 = vmatpush.bf16.msrb.mxu2 %v13061_v10  ;;  %8283 = vmatpush.bf16.msrb.mxu3 %v13381_v18  ;;  %v12581_v10 = vor.u32 %v13999_v40, %v12578_v62  ;;  %v13909_v18 = vld [vmem:[%s22027_s8 + $0x5ac] sm:$0xf]  ;;  %v12901_v51 = vor.u32 %v14079_v49, %v12898_v12  ;;  %v13221_v58 = vor.u32 %v14159_v13, %v13218_v39  ;;  %v13098_v62 = vld [vmem:[%s22027_s8 + $0xcb0] sm:$0xf0]  ;;  %v11784_v49 = vld [vmem:[%s22027_s8 + $0x240] sm:$0xf] }
 0x394   :  { %8226 = vmatmul.bf16.vlgmr.msra.gmra.mxu2 %v19193_v11  ;;  %8239 = vmatmul.bf16.vlgmr.msra.gmra.mxu3 %v19198_v7  ;;  %v12221_v46 = vor.u32 %v13909_v18, %v12218_v25  ;;  %v12104_v12 = vld [vmem:[%s22027_s8 + $0x4c0] sm:$0xf]  ;;  %v13885_v13 = vld [vmem:[%s22027_s8 + $0x4e4] sm:$0xf0] }
 0x395   :  { %v12424_v39 = vld [vmem:[%s22027_s8 + $0x740] sm:$0xf]  ;;  %v13965_v18 = vld [vmem:[%s22027_s8 + $0x764] sm:$0xf0] }
 0x396   :  { %8245 = vmatpush.bf16.msrb.mxu0 %v12381_v36  ;;  %8258 = vmatpush.bf16.msrb.mxu1 %v12701_v33  ;;  %v7995_v16 = vpop.f32.mrf.mxu0  ;;  %v8008_v43 = vpop.f32.mrf.mxu1  ;;  %v12744_v25 = vld [vmem:[%s22027_s8 + $0x9c0] sm:$0xf] }
 0x397   :  { %8271 = vmatpush.bf16.msrb.mxu2 %v13021_v56  ;;  %8284 = vmatpush.bf16.msrb.mxu3 %v13341_v24  ;;  %v8019_v36 = vpop.f32.mrf.mxu2  ;;  %v8032_v33 = vpop.f32.mrf.mxu3  ;;  %v13178_v56 = vld [vmem:[%s22027_s8 + $0xd50] sm:$0xf0]  ;;  %v12384_v16 = vld [vmem:[%s22027_s8 + $0x6f0] sm:$0xf]  ;;  %v13955_v43 = vld [vmem:[%s22027_s8 + $0x714] sm:$0xf0] }
 0x398   :  { %v8020_v24 = vadd.f32 %v8019_v36, %v8007_v32  ;;  %v13181_v27 = vor.u32 %v14149_v42, %v13178_v56  ;;  %v13805_v32 = vld [vmem:[%s22027_s8 + $0x264] sm:$0xf0]  ;;  %v11744_v36 = vld [vmem:[%s22027_s8 + $0x1f0] sm:$0xf] }
 0x399   :  { %v11785_v53 = vor.u32 %v13805_v32, %v11784_v49  ;;  %v12064_v56 = vld [vmem:[%s22027_s8 + $0x470] sm:$0xf] }
 0x39a   :  { %8246 = vmatpush.bf16.msrb.mxu0 %v12341_v6  ;;  %8259 = vmatpush.bf16.msrb.mxu1 %v12661_v59  ;;  %v20119_v6 = vadd.f32 %v8032_v33, %v8020_v24  ;;  %v12861_v59 = vor.u32 %v14069_v35, %v12858_v41  ;;  %v12105_v35 = vor.u32 %v13885_v13, %v12104_v12  ;;  %v13795_v33 = vld [vmem:[%s22027_s8 + $0x214] sm:$0xf0] }
 0x39b   :  { %8272 = vmatpush.bf16.msrb.mxu2 %v12981_v60  ;;  %8285 = vmatpush.bf16.msrb.mxu3 %v13301_v37  ;;  %v12498_v60 = vld [vmem:[%s22027_s8 + $0x800] sm:$0xf0]  ;;  %v14059_v37 = vld [vmem:[%s22027_s8 + $0xa5c] sm:$0xf]  ;;  %v12425_v41 = vor.u32 %v13965_v18, %v12424_v39  ;;  %v13875_v24 = vld [vmem:[%s22027_s8 + $0x494] sm:$0xf0]  ;;  %v11745_v55 = vor.u32 %v13795_v33, %v11744_v36 }
 0x39c   :  { %v12501_v23 = vor.u32 %v13979_v1, %v12498_v60  ;;  %v12065_v45 = vor.u32 %v13875_v24, %v12064_v56  ;;  %v12385_v1 = vor.u32 %v13955_v43, %v12384_v16  ;;  %v14005_v36 = vld [vmem:[%s22027_s8 + $0x8a4] sm:$0xf0]  ;;  %v13755_v56 = vld [vmem:[%s22027_s8 + $0xd4] sm:$0xf0]  ;;  %v11904_v43 = vld [vmem:[%s22027_s8 + $0x330] sm:$0xf] }
 0x39e   :  { %8247 = vmatpush.bf16.msrb.mxu0 %v12301_v28  ;;  %8260 = vmatpush.bf16.msrb.mxu1 %v12621_v9  ;;  %v12821_v28 = vor.u32 %v14059_v37, %v12818_v22  ;;  %v13141_v9 = vor.u32 %v14139_v5, %v13138_v3  ;;  %v12024_v37 = vld [vmem:[%s22027_s8 + $0x420] sm:$0xf]  ;;  %v13865_v22 = vld [vmem:[%s22027_s8 + $0x444] sm:$0xf0] }
 0x39f   :  { %8273 = vmatpush.bf16.msrb.mxu2 %v12941_v57  ;;  %8286 = vmatpush.bf16.msrb.mxu3 %v13261_v15  ;;  %v14129_v57 = vld [vmem:[%s22027_s8 + $0xc8c] sm:$0xf]  ;;  %v8021_v15 = vpop.f32.mrf.mxu2  ;;  %v8034_v40 = vpop.f32.mrf.mxu3  ;;  %v12344_v5 = vld [vmem:[%s22027_s8 + $0x6a0] sm:$0xf]  ;;  %v13945_v3 = vld [vmem:[%s22027_s8 + $0x6c4] sm:$0xf0] }
 0x3a0   :  { %v13101_v34 = vor.u32 %v14129_v57, %v13098_v62  ;;  %v12304_v57 = vld [vmem:[%s22027_s8 + $0x650] sm:$0xf]  ;;  %v13935_v15 = vld [vmem:[%s22027_s8 + $0x674] sm:$0xf0] }
 0x3a1   :  { %v12624_v40 = vld [vmem:[%s22027_s8 + $0x8d0] sm:$0xf]  ;;  %v14015_v62 = vld [vmem:[%s22027_s8 + $0x8f4] sm:$0xf0]  ;;  %v12305_v18 = vor.u32 %v13935_v15, %v12304_v57 }
 0x3a2   :  { %8248 = vmatpush.bf16.msrb.mxu0 %v12261_v48  ;;  %8261 = vmatpush.bf16.msrb.mxu1 %v12581_v10  ;;  %v12141_v48 = vor.u32 %v13889_v19, %v12138_v47  ;;  %v12461_v10 = vor.u32 %v13969_v30, %v12458_v29  ;;  %v12664_v19 = vld [vmem:[%s22027_s8 + $0x920] sm:$0xf]  ;;  %v12025_v47 = vor.u32 %v13865_v22, %v12024_v37  ;;  %v11664_v30 = vld [vmem:[%s22027_s8 + $0x150] sm:$0xf]  ;;  %v13775_v29 = vld [vmem:[%s22027_s8 + $0x174] sm:$0xf0] }
 0x3a3   :  { %8274 = vmatpush.bf16.msrb.mxu2 %v12901_v51  ;;  %8287 = vmatpush.bf16.msrb.mxu3 %v13221_v58  ;;  %v14045_v51 = vld [vmem:[%s22027_s8 + $0x9e4] sm:$0xf0]  ;;  %v12781_v58 = vor.u32 %v14049_v61, %v12778_v4  ;;  %v11984_v61 = vld [vmem:[%s22027_s8 + $0x3d0] sm:$0xf]  ;;  %v13855_v4 = vld [vmem:[%s22027_s8 + $0x3f4] sm:$0xf0]  ;;  %v11665_v13 = vor.u32 %v13775_v29, %v11664_v30 }
 0x3a4   :  { %v12745_v42 = vor.u32 %v14045_v51, %v12744_v25  ;;  %v11985_v39 = vor.u32 %v13855_v4, %v11984_v61  ;;  %v12625_v25 = vor.u32 %v14015_v62, %v12624_v40  ;;  %v11944_v51 = vld [vmem:[%s22027_s8 + $0x380] sm:$0xf]  ;;  %v13825_v29 = vld [vmem:[%s22027_s8 + $0x304] sm:$0xf0]  ;;  %v11504_v57 = vld [vmem:[%s22027_s8 + $0x10] sm:$0xf] }
 0x3a5   :  { %v11864_v30 = vld [vmem:[%s22027_s8 + $0x2e0] sm:$0xf]  ;;  %v13985_v4 = vld [vmem:[%s22027_s8 + $0x804] sm:$0xf0]  ;;  %v13735_v62 = vld [vmem:[%s22027_s8 + $0x34] sm:$0xf0] }
 0x3a6   :  { %8249 = vmatpush.bf16.msrb.mxu0 %v12221_v46  ;;  %8262 = vmatpush.bf16.msrb.mxu1 %v12541_v50  ;;  %v12704_v46 = vld [vmem:[%s22027_s8 + $0x970] sm:$0xf]  ;;  %v14035_v50 = vld [vmem:[%s22027_s8 + $0x994] sm:$0xf0]  ;;  %v12504_v61 = vld [vmem:[%s22027_s8 + $0x7e0] sm:$0xf]  ;;  %v11865_v40 = vor.u32 %v13825_v29, %v11864_v30 }
 0x3a7   :  { %8275 = vmatpush.bf16.msrb.mxu2 %v12861_v59  ;;  %8288 = vmatpush.bf16.msrb.mxu3 %v13181_v27  ;;  %v11704_v59 = vld [vmem:[%s22027_s8 + $0x1a0] sm:$0xf]  ;;  %v13785_v27 = vld [vmem:[%s22027_s8 + $0x1c4] sm:$0xf0]  ;;  %v12705_v60 = vor.u32 %v14035_v50, %v12704_v46  ;;  %v13835_v46 = vld [vmem:[%s22027_s8 + $0x354] sm:$0xf0] }
 0x3a8   :  { %v12224_v50 = vld [vmem:[%s22027_s8 + $0x5b0] sm:$0xf] }
 0x3aa   :  { %8250 = vmatpush.bf16.msrb.mxu0 %v12181_v20  ;;  %8263 = vmatpush.bf16.msrb.mxu1 %v12501_v23  ;;  %v14025_v20 = vld [vmem:[%s22027_s8 + $0x944] sm:$0xf0]  ;;  %v11705_v23 = vor.u32 %v13785_v27, %v11704_v59  ;;  %v13915_v59 = vld [vmem:[%s22027_s8 + $0x5d4] sm:$0xf0]  ;;  %v12544_v27 = vld [vmem:[%s22027_s8 + $0x830] sm:$0xf] }
 0x3ab   :  { %8276 = vmatpush.bf16.msrb.mxu2 %v12821_v28  ;;  %8289 = vmatpush.bf16.msrb.mxu3 %v13141_v9  ;;  %v12345_v28 = vor.u32 %v13945_v3, %v12344_v5  ;;  %v12665_v9 = vor.u32 %v14025_v20, %v12664_v19  ;;  %v11905_v3 = vor.u32 %v13835_v46, %v11904_v43  ;;  %v11544_v19 = vld [vmem:[%s22027_s8 + $0x60] sm:$0xf]  ;;  %v13745_v20 = vld [vmem:[%s22027_s8 + $0x84] sm:$0xf0] }
 0x3ac   :  { %v11545_v15 = vor.u32 %v13745_v20, %v11544_v19 }
 0x3ae   :  { %8251 = vmatpush.bf16.msrb.mxu0 %v12141_v48  ;;  %8264 = vmatpush.bf16.msrb.mxu1 %v12461_v10  ;;  %v8045_v49 = vpop.f32.mrf.mxu0  ;;  %v8058_v32 = vpop.f32.mrf.mxu1  ;;  %v11624_v48 = vld [vmem:[%s22027_s8 + $0x100] sm:$0xf]  ;;  %v13765_v10 = vld [vmem:[%s22027_s8 + $0x124] sm:$0xf0] }
 0x3af   :  { %8277 = vmatpush.bf16.msrb.mxu2 %v12781_v58  ;;  %8290 = vmatpush.bf16.msrb.mxu3 %v13101_v34  ;;  %v8046_v12 = vadd.f32 %v8045_v49, %v20119_v6  ;;  %v13845_v6 = vld [vmem:[%s22027_s8 + $0x3a4] sm:$0xf0]  ;;  %v12264_v58 = vld [vmem:[%s22027_s8 + $0x600] sm:$0xf]  ;;  %v11625_v33 = vor.u32 %v13765_v10, %v11624_v48  ;;  %v11824_v49 = vld [vmem:[%s22027_s8 + $0x290] sm:$0xf] }
 0x3b0   :  { %v13895_v48 = vld [vmem:[%s22027_s8 + $0x534] sm:$0xf0]  ;;  %v12464_v10 = vld [vmem:[%s22027_s8 + $0x790] sm:$0xf] }
 0x3b1   :  { %8252 = vmatmul.bf16.vlgmr.msrb.gmra.mxu0 %v19203_v2  ;;  %8265 = vmatmul.bf16.vlgmr.msrb.gmra.mxu1 %v19214_v14  ;;  %v20279_v34 = vadd.f32 %v8058_v32, %v8046_v12  ;;  %v13815_v32 = vld [vmem:[%s22027_s8 + $0x2b4] sm:$0xf0] }
 0x3b2   :  { %8296 = vmatpush.bf16.msra.mxu0 %v11785_v53  ;;  %8309 = vmatpush.bf16.msra.mxu1 %v12105_v35  ;;  %v13925_v53 = vld [vmem:[%s22027_s8 + $0x624] sm:$0xf0]  ;;  %v12584_v35 = vld [vmem:[%s22027_s8 + $0x880] sm:$0xf] }
 0x3b3   :  { %8322 = vmatpush.bf16.msra.mxu2 %v12425_v41  ;;  %8335 = vmatpush.bf16.msra.mxu3 %v12745_v42  ;;  %v11945_v41 = vor.u32 %v13845_v6, %v11944_v51  ;;  %v11584_v42 = vld [vmem:[%s22027_s8 + $0xb0] sm:$0xf]  ;;  %v12265_v24 = vor.u32 %v13925_v53, %v12264_v58  ;;  %v12585_v16 = vor.u32 %v14005_v36, %v12584_v35  ;;  %v13975_v51 = vld [vmem:[%s22027_s8 + $0x7b4] sm:$0xf0]  ;;  %v13064_v6 = vld [vmem:[%s22027_s8 + $0xc40] sm:$0xf] }
 0x3b4   :  { %8278 = vmatmul.bf16.vlgmr.msrb.gmra.mxu2 %v19411_v26  ;;  %8291 = vmatmul.bf16.vlgmr.msrb.gmra.mxu3 %v19416_v21  ;;  %v11585_v5 = vor.u32 %v13755_v56, %v11584_v42  ;;  %v14125_v58 = vld [vmem:[%s22027_s8 + $0xc64] sm:$0xf0]  ;;  %v13384_v53 = vld [vmem:[%s22027_s8 + $0xec0] sm:$0xf]  ;;  %v13800_v36 = vld [vmem:[%s22027_s8 + $0x244] sm:$0xf]  ;;  %v12465_v43 = vor.u32 %v13975_v51, %v12464_v10 }
 0x3b5   :  { %v14205_v35 = vld [vmem:[%s22027_s8 + $0xee4] sm:$0xf0]  ;;  %v11786_v42 = vld [vmem:[%s22027_s8 + $0x268] sm:$0xf0]  ;;  %v13880_v56 = vld [vmem:[%s22027_s8 + $0x4c4] sm:$0xf]  ;;  %v13065_v46 = vor.u32 %v14125_v58, %v13064_v6 }
 0x3b6   :  { %8297 = vmatpush.bf16.msra.mxu0 %v11745_v55  ;;  %8310 = vmatpush.bf16.msra.mxu1 %v12065_v45  ;;  %v8047_v37 = vpop.f32.mrf.mxu0  ;;  %v8060_v22 = vpop.f32.mrf.mxu1  ;;  %v13770_v10 = vld [vmem:[%s22027_s8 + $0x154] sm:$0xf]  ;;  %v11986_v51 = vld [vmem:[%s22027_s8 + $0x3f8] sm:$0xf0] }
 0x3b7   :  { %8323 = vmatpush.bf16.msra.mxu2 %v12385_v1  ;;  %8336 = vmatpush.bf16.msra.mxu3 %v12705_v60  ;;  %v8071_v55 = vpop.f32.mrf.mxu2  ;;  %v8084_v45 = vpop.f32.mrf.mxu3  ;;  %v13995_v1 = vld [vmem:[%s22027_s8 + $0x854] sm:$0xf0]  ;;  %v13790_v37 = vld [vmem:[%s22027_s8 + $0x1f4] sm:$0xf]  ;;  %v11746_v22 = vld [vmem:[%s22027_s8 + $0x218] sm:$0xf0] }
 0x3b8   :  { %v8072_v60 = vadd.f32 %v8071_v55, %v18306_v44  ;;  %v12545_v44 = vor.u32 %v13995_v1, %v12544_v27  ;;  %v13024_v55 = vld [vmem:[%s22027_s8 + $0xbf0] sm:$0xf]  ;;  %v11749_v30 = vor.u32 %v13790_v37, %v11746_v22  ;;  %v14075_v22 = vld [vmem:[%s22027_s8 + $0xad4] sm:$0xf0] }
 0x3b9   :  { %v13344_v1 = vld [vmem:[%s22027_s8 + $0xe70] sm:$0xf] }
 0x3ba   :  { %8298 = vmatpush.bf16.msra.mxu0 %v11705_v23  ;;  %8311 = vmatpush.bf16.msra.mxu1 %v12025_v47  ;;  %v20321_v23 = vadd.f32 %v8084_v45, %v8072_v60  ;;  %v12225_v47 = vor.u32 %v13915_v59, %v12224_v50  ;;  %v13385_v50 = vor.u32 %v14205_v35, %v13384_v53  ;;  %v14115_v45 = vld [vmem:[%s22027_s8 + $0xc14] sm:$0xf0]  ;;  %v20468_v53 = vld [vmem:[%s22029_s10] sm:$0xff]  ;;  %v12864_v37 = vld [vmem:[%s22027_s8 + $0xab0] sm:$0xf] }
 0x3bb   :  { %8324 = vmatpush.bf16.msra.mxu2 %v12345_v28  ;;  %8337 = vmatpush.bf16.msra.mxu3 %v12665_v9  ;;  %v12184_v28 = vld [vmem:[%s22027_s8 + $0x560] sm:$0xf]  ;;  %v13905_v9 = vld [vmem:[%s22027_s8 + $0x584] sm:$0xf0]  ;;  %v11789_v59 = vor.u32 %v13800_v36, %v11786_v42  ;;  %v14195_v60 = vld [vmem:[%s22027_s8 + $0xe94] sm:$0xf0]  ;;  %v13025_v19 = vor.u32 %v14115_v45, %v13024_v55 }
 0x3bc   :  { %v12185_v12 = vor.u32 %v13905_v9, %v12184_v28  ;;  %v13345_v20 = vor.u32 %v14195_v60, %v13344_v1  ;;  %v13304_v28 = vld [vmem:[%s22027_s8 + $0xe20] sm:$0xf]  ;;  %v14185_v9 = vld [vmem:[%s22027_s8 + $0xe44] sm:$0xf0]  ;;  %v13840_v55 = vld [vmem:[%s22027_s8 + $0x384] sm:$0xf] }
 0x3bd   :  { %v14085_v42 = vld [vmem:[%s22027_s8 + $0xb24] sm:$0xf0]  ;;  %v11946_v45 = vld [vmem:[%s22027_s8 + $0x3a8] sm:$0xf0] }
 0x3be   :  { %8299 = vmatpush.bf16.msra.mxu0 %v11665_v13  ;;  %8312 = vmatpush.bf16.msra.mxu1 %v11985_v39  ;;  %v12505_v13 = vor.u32 %v13985_v4, %v12504_v61  ;;  %v12144_v39 = vld [vmem:[%s22027_s8 + $0x510] sm:$0xf]  ;;  %v13780_v61 = vld [vmem:[%s22027_s8 + $0x1a4] sm:$0xf]  ;;  %v11706_v4 = vld [vmem:[%s22027_s8 + $0x1c8] sm:$0xf0] }
 0x3bf   :  { %8325 = vmatpush.bf16.msra.mxu2 %v12305_v18  ;;  %8338 = vmatpush.bf16.msra.mxu3 %v12625_v25  ;;  %v8073_v18 = vpop.f32.mrf.mxu2  ;;  %v8086_v25 = vpop.f32.mrf.mxu3 }
 0x3c0   :  { %v11666_v18 = vld [vmem:[%s22027_s8 + $0x178] sm:$0xf0]  ;;  %v13850_v25 = vld [vmem:[%s22027_s8 + $0x3d4] sm:$0xf] }
 0x3c2   :  { %8300 = vmatpush.bf16.msra.mxu0 %v11625_v33  ;;  %8313 = vmatpush.bf16.msra.mxu1 %v11945_v41  ;;  %v11505_v33 = vor.u32 %v13735_v62, %v11504_v57  ;;  %v11825_v41 = vor.u32 %v13815_v32, %v11824_v49  ;;  %v13860_v57 = vld [vmem:[%s22027_s8 + $0x424] sm:$0xf]  ;;  %v13305_v62 = vor.u32 %v14185_v9, %v13304_v28  ;;  %v12944_v49 = vld [vmem:[%s22027_s8 + $0xb50] sm:$0xf]  ;;  %v14095_v32 = vld [vmem:[%s22027_s8 + $0xb74] sm:$0xf0] }
 0x3c3   :  { %8326 = vmatpush.bf16.msra.mxu2 %v12265_v24  ;;  %8339 = vmatpush.bf16.msra.mxu3 %v12585_v16  ;;  %v12106_v24 = vld [vmem:[%s22027_s8 + $0x4e8] sm:$0xf0]  ;;  %v12145_v16 = vor.u32 %v13895_v48, %v12144_v39  ;;  %v13264_v39 = vld [vmem:[%s22027_s8 + $0xdd0] sm:$0xf]  ;;  %v14175_v48 = vld [vmem:[%s22027_s8 + $0xdf4] sm:$0xf0]  ;;  %v12945_v36 = vor.u32 %v14095_v32, %v12944_v49  ;;  %v12865_v49 = vor.u32 %v14075_v22, %v12864_v37 }
 0x3c4   :  { %v12109_v27 = vor.u32 %v13880_v56, %v12106_v24  ;;  %v11669_v56 = vor.u32 %v13770_v10, %v11666_v18  ;;  %v11989_v24 = vor.u32 %v13850_v25, %v11986_v51  ;;  %v13830_v28 = vld [vmem:[%s22027_s8 + $0x334] sm:$0xf]  ;;  %v11906_v9 = vld [vmem:[%s22027_s8 + $0x358] sm:$0xf0]  ;;  %v13144_v10 = vld [vmem:[%s22027_s8 + $0xce0] sm:$0xf] }
 0x3c5   :  { %v14145_v18 = vld [vmem:[%s22027_s8 + $0xd04] sm:$0xf0]  ;;  %v13740_v25 = vld [vmem:[%s22027_s8 + $0x64] sm:$0xf]  ;;  %v11546_v51 = vld [vmem:[%s22027_s8 + $0x88] sm:$0xf0] }
 0x3c6   :  { %8301 = vmatpush.bf16.msra.mxu0 %v11585_v5  ;;  %8314 = vmatpush.bf16.msra.mxu1 %v11905_v3  ;;  %v13870_v5 = vld [vmem:[%s22027_s8 + $0x474] sm:$0xf]  ;;  %v12066_v3 = vld [vmem:[%s22027_s8 + $0x498] sm:$0xf0]  ;;  %v13960_v22 = vld [vmem:[%s22027_s8 + $0x744] sm:$0xf] }
 0x3c7   :  { %8327 = vmatpush.bf16.msra.mxu2 %v12225_v47  ;;  %8340 = vmatpush.bf16.msra.mxu3 %v12545_v44  ;;  %v12984_v47 = vld [vmem:[%s22027_s8 + $0xba0] sm:$0xf]  ;;  %v14105_v44 = vld [vmem:[%s22027_s8 + $0xbc4] sm:$0xf0]  ;;  %v12069_v29 = vor.u32 %v13870_v5, %v12066_v3  ;;  %v11949_v3 = vor.u32 %v13840_v55, %v11946_v45  ;;  %v11506_v45 = vld [vmem:[%s22027_s8 + $0x38] sm:$0xf0] }
 0x3c8   :  { %v11826_v37 = vld [vmem:[%s22027_s8 + $0x2b8] sm:$0xf0] }
 0x3ca   :  { %8302 = vmatpush.bf16.msra.mxu0 %v11545_v15  ;;  %8315 = vmatpush.bf16.msra.mxu1 %v11865_v40  ;;  %v12026_v15 = vld [vmem:[%s22027_s8 + $0x448] sm:$0xf0]  ;;  %v12985_v40 = vor.u32 %v14105_v44, %v12984_v47  ;;  %v13750_v47 = vld [vmem:[%s22027_s8 + $0xb4] sm:$0xf] }
 0x3cb   :  { %8328 = vmatpush.bf16.msra.mxu2 %v12185_v12  ;;  %8341 = vmatpush.bf16.msra.mxu3 %v12505_v13  ;;  %v11709_v12 = vor.u32 %v13780_v61, %v11706_v4  ;;  %v12029_v13 = vor.u32 %v13860_v57, %v12026_v15  ;;  %v8769_v57 = vperm.slane %v20468_v53, 1 }
 0x3ce   :  { %8303 = vmatpush.bf16.msra.mxu0 %v11505_v33  ;;  %8316 = vmatpush.bf16.msra.mxu1 %v11825_v41  ;;  %v8097_v6 = vpop.f32.mrf.mxu0  ;;  %v8110_v58 = vpop.f32.mrf.mxu1  ;;  %v13265_v33 = vor.u32 %v14175_v48, %v13264_v39  ;;  %v12904_v41 = vld [vmem:[%s22027_s8 + $0xb00] sm:$0xf]  ;;  %v11909_v48 = vor.u32 %v13830_v28, %v11906_v9  ;;  %v13066_v28 = vld [vmem:[%s22027_s8 + $0xc68] sm:$0xf0]  ;;  %v14200_v9 = vld [vmem:[%s22027_s8 + $0xec4] sm:$0xf] }
 0x3cf   :  { %8329 = vmatpush.bf16.msra.mxu2 %v12145_v16  ;;  %8342 = vmatpush.bf16.msra.mxu3 %v12465_v43  ;;  %v8098_v35 = vadd.f32 %v8097_v6, %v20321_v23  ;;  %v13224_v16 = vld [vmem:[%s22027_s8 + $0xd80] sm:$0xf]  ;;  %v14165_v23 = vld [vmem:[%s22027_s8 + $0xda4] sm:$0xf0]  ;;  %v13760_v43 = vld [vmem:[%s22027_s8 + $0x104] sm:$0xf]  ;;  %v12905_v1 = vor.u32 %v14085_v42, %v12904_v41 }
 0x3d0   :  { %v13225_v60 = vor.u32 %v14165_v23, %v13224_v16  ;;  %v13820_v6 = vld [vmem:[%s22027_s8 + $0x2e4] sm:$0xf]  ;;  %v12784_v41 = vld [vmem:[%s22027_s8 + $0xa10] sm:$0xf]  ;;  %v14055_v42 = vld [vmem:[%s22027_s8 + $0xa34] sm:$0xf0] }
 0x3d1   :  { %8304 = vmatmul.bf16.vlgmr.msra.gmra.mxu0 %v19193_v11  ;;  %8317 = vmatmul.bf16.vlgmr.msra.gmra.mxu1 %v19198_v7  ;;  %v13104_v16 = vld [vmem:[%s22027_s8 + $0xc90] sm:$0xf]  ;;  %v14135_v23 = vld [vmem:[%s22027_s8 + $0xcb4] sm:$0xf0] }
 0x3d2   :  { %8348 = vmatpush.bf16.msrb.mxu0 %v13065_v46  ;;  %8361 = vmatpush.bf16.msrb.mxu1 %v13385_v50  ;;  %v8111_v46 = vadd.f32 %v8110_v58, %v8098_v35  ;;  %v11626_v50 = vld [vmem:[%s22027_s8 + $0x128] sm:$0xf0] }
 0x3d3   :  { %8374 = vmatpush.bf16.msrb.mxu2 %v11789_v59  ;;  %8387 = vmatpush.bf16.msrb.mxu3 %v12109_v27  ;;  %v8768_v59 = vperm.slane %v20468_v53, 0  ;;  %v20499_v27 = vld [vmem:[%s22030_s11] sm:$0xff]  ;;  %v11629_v5 = vor.u32 %v13760_v43, %v11626_v50  ;;  %v11866_v58 = vld [vmem:[%s22027_s8 + $0x308] sm:$0xf0]  ;;  %v13730_v43 = vld [vmem:[%s22027_s8 + $0x14] sm:$0xf]  ;;  %v11549_v50 = vor.u32 %v13740_v25, %v11546_v51 }
 0x3d4   :  { %8330 = vmatmul.bf16.vlgmr.msra.gmra.mxu2 %v19203_v2  ;;  %8343 = vmatmul.bf16.vlgmr.msra.gmra.mxu3 %v19214_v14  ;;  %v11869_v55 = vor.u32 %v13820_v6, %v11866_v58  ;;  %v13346_v25 = vld [vmem:[%s22027_s8 + $0xe98] sm:$0xf0]  ;;  %v13940_v58 = vld [vmem:[%s22027_s8 + $0x6a4] sm:$0xf] }
 0x3d5   :  { %v8788_v61 = vadd.f32 %v8768_v59, %v20279_v34  ;;  %v13810_v59 = vld [vmem:[%s22027_s8 + $0x294] sm:$0xf] }
 0x3d6   :  { %8349 = vmatpush.bf16.msrb.mxu0 %v13025_v19  ;;  %8362 = vmatpush.bf16.msrb.mxu1 %v13345_v20  ;;  %v13184_v19 = vld [vmem:[%s22027_s8 + $0xd30] sm:$0xf]  ;;  %v14155_v20 = vld [vmem:[%s22027_s8 + $0xd54] sm:$0xf0]  ;;  %v8099_v15 = vpop.f32.mrf.mxu0 }
 0x3d7   :  { %8375 = vmatpush.bf16.msrb.mxu2 %v11749_v30  ;;  %8388 = vmatpush.bf16.msrb.mxu3 %v12069_v29  ;;  %v8123_v44 = vpop.f32.mrf.mxu2  ;;  %v8136_v30 = vpop.f32.mrf.mxu3  ;;  %v11586_v29 = vld [vmem:[%s22027_s8 + $0xd8] sm:$0xf0]  ;;  %v13185_v32 = vor.u32 %v14155_v20, %v13184_v19  ;;  %v8798_v35 = vmax.f32 %v8788_v61, 0.0  ;;  %v14040_v20 = vld [vmem:[%s22027_s8 + $0x9c4] sm:$0xf]  ;;  %v11829_v15 = vor.u32 %v13810_v59, %v11826_v37 }
 0x3d8   :  { %v8124_v4 = vadd.f32 %v8123_v44, %v8111_v46  ;;  %v11589_v39 = vor.u32 %v13750_v47, %v11586_v29  ;;  %v12746_v47 = vld [vmem:[%s22027_s8 + $0x9e8] sm:$0xf0]  ;;  %v14120_v44 = vld [vmem:[%s22027_s8 + $0xc44] sm:$0xf]  ;;  %v13105_v29 = vor.u32 %v14135_v23, %v13104_v16  ;;  %v14090_v37 = vld [vmem:[%s22027_s8 + $0xb54] sm:$0xf] }
 0x3d9   :  { %v13386_v61 = vld [vmem:[%s22027_s8 + $0xee8] sm:$0xf0]  ;;  %v14180_v16 = vld [vmem:[%s22027_s8 + $0xe24] sm:$0xf] }
 0x3da   :  { %8350 = vmatpush.bf16.msrb.mxu0 %v12985_v40  ;;  %8363 = vmatpush.bf16.msrb.mxu1 %v13305_v62  ;;  %v8112_v40 = vpop.f32.mrf.mxu1  ;;  %v8856_v62 = vperm.slane %v20499_v27, 0  ;;  %v8137_v34 = vadd.f32 %v8136_v30, %v8124_v4  ;;  %v12785_v30 = vor.u32 %v14055_v42, %v12784_v41  ;;  %v14020_v41 = vld [vmem:[%s22027_s8 + $0x924] sm:$0xf]  ;;  %v12666_v42 = vld [vmem:[%s22027_s8 + $0x948] sm:$0xf0] }
 0x3db   :  { %8376 = vmatpush.bf16.msrb.mxu2 %v11709_v12  ;;  %8389 = vmatpush.bf16.msrb.mxu3 %v12029_v13  ;;  %v12824_v12 = vld [vmem:[%s22027_s8 + $0xa60] sm:$0xf]  ;;  %v14065_v13 = vld [vmem:[%s22027_s8 + $0xa84] sm:$0xf0]  ;;  %v13306_v23 = vld [vmem:[%s22027_s8 + $0xe48] sm:$0xf0] }
 0x3dc   :  { %v13309_v59 = vor.u32 %v14180_v16, %v13306_v23  ;;  %v13900_v23 = vld [vmem:[%s22027_s8 + $0x564] sm:$0xf] }
 0x3de   :  { %8351 = vmatpush.bf16.msrb.mxu0 %v12945_v36  ;;  %8364 = vmatpush.bf16.msrb.mxu1 %v13265_v33  ;;  %v8789_v36 = vadd.f32 %v8769_v57, %v8137_v34  ;;  %v8857_v33 = vperm.slane %v20499_v27, 1  ;;  %v11509_v57 = vor.u32 %v13730_v43, %v11506_v45  ;;  %v14030_v34 = vld [vmem:[%s22027_s8 + $0x974] sm:$0xf] }
 0x3df   :  { %8377 = vmatpush.bf16.msrb.mxu2 %v11669_v56  ;;  %8390 = vmatpush.bf16.msrb.mxu3 %v11989_v24  ;;  %v12825_v56 = vor.u32 %v14065_v13, %v12824_v12  ;;  %v13145_v24 = vor.u32 %v14145_v18, %v13144_v10  ;;  %v13069_v12 = vor.u32 %v14120_v44, %v13066_v28  ;;  %v13026_v10 = vld [vmem:[%s22027_s8 + $0xc18] sm:$0xf0]  ;;  %v14190_v18 = vld [vmem:[%s22027_s8 + $0xe74] sm:$0xf]  ;;  %v12266_v28 = vld [vmem:[%s22027_s8 + $0x628] sm:$0xf0] }
 0x3e0   :  { %v8799_v46 = vmax.f32 %v8789_v36, 0.0  ;;  %v13389_v13 = vor.u32 %v14200_v9, %v13386_v61 }
 0x3e2   :  { %8352 = vmatpush.bf16.msrb.mxu0 %v12905_v1  ;;  %8365 = vmatpush.bf16.msrb.mxu1 %v13225_v60  ;;  %v8125_v1 = vpop.f32.mrf.mxu2  ;;  %v8138_v60 = vpop.f32.mrf.mxu3  ;;  %v8877_v19 = vmul.f32 %v8857_v33, %v8799_v46  ;;  %v13349_v33 = vor.u32 %v14190_v18, %v13346_v25  ;;  %v12669_v46 = vor.u32 %v14020_v41, %v12666_v42  ;;  %v13990_v18 = vld [vmem:[%s22027_s8 + $0x834] sm:$0xf]  ;;  %v12546_v25 = vld [vmem:[%s22027_s8 + $0x858] sm:$0xf0] }
 0x3e3   :  { %8378 = vmatpush.bf16.msrb.mxu2 %v11629_v5  ;;  %8391 = vmatpush.bf16.msrb.mxu3 %v11949_v3  ;;  %v12426_v5 = vld [vmem:[%s22027_s8 + $0x768] sm:$0xf0]  ;;  %v8876_v3 = vmul.f32 %v8856_v62, %v8798_v35  ;;  %v12749_v62 = vor.u32 %v14040_v20, %v12746_v47  ;;  %v14010_v1 = vld [vmem:[%s22027_s8 + $0x8d4] sm:$0xf]  ;;  %v12626_v60 = vld [vmem:[%s22027_s8 + $0x8f8] sm:$0xf0]  ;;  %v12549_v16 = vor.u32 %v13990_v18, %v12546_v25 }
 0x3e4   :  { %v12429_v40 = vor.u32 %v13960_v22, %v12426_v5  ;;  %v12346_v35 = vld [vmem:[%s22027_s8 + $0x6c8] sm:$0xf0]  ;;  %v12946_v22 = vld [vmem:[%s22027_s8 + $0xb78] sm:$0xf0]  ;;  %v14170_v5 = vld [vmem:[%s22027_s8 + $0xdd4] sm:$0xf] }
 0x3e5   :  { %v20601_v4 = vadd.f32 %v8877_v19, %v8876_v3  ;;  %v12349_v43 = vor.u32 %v13940_v58, %v12346_v35  ;;  %v13266_v3 = vld [vmem:[%s22027_s8 + $0xdf8] sm:$0xf0]  ;;  %v12949_v9 = vor.u32 %v14090_v37, %v12946_v22  ;;  %v14140_v37 = vld [vmem:[%s22027_s8 + $0xce4] sm:$0xf]  ;;  %v13146_v22 = vld [vmem:[%s22027_s8 + $0xd08] sm:$0xf0] }
 0x3e6   :  { %8353 = vmatpush.bf16.msrb.mxu0 %v12865_v49  ;;  %8366 = vmatpush.bf16.msrb.mxu1 %v13185_v32  ;;  %v13950_v49 = vld [vmem:[%s22027_s8 + $0x6f4] sm:$0xf]  ;;  %v12386_v32 = vld [vmem:[%s22027_s8 + $0x718] sm:$0xf0]  ;;  %v13269_v61 = vor.u32 %v14170_v5, %v13266_v3 }
 0x3e7   :  { %8379 = vmatpush.bf16.msrb.mxu2 %v11589_v39  ;;  %8392 = vmatpush.bf16.msrb.mxu3 %v11909_v48  ;;  %v12706_v39 = vld [vmem:[%s22027_s8 + $0x998] sm:$0xf0]  ;;  %v14110_v48 = vld [vmem:[%s22027_s8 + $0xbf4] sm:$0xf]  ;;  %v12389_v51 = vor.u32 %v13950_v49, %v12386_v32  ;;  %v14160_v49 = vld [vmem:[%s22027_s8 + $0xd84] sm:$0xf] }
 0x3e8   :  { %v12709_v6 = vor.u32 %v14030_v34, %v12706_v39  ;;  %v13029_v36 = vor.u32 %v14110_v48, %v13026_v10  ;;  %v13226_v32 = vld [vmem:[%s22027_s8 + $0xda8] sm:$0xf0]  ;;  %v13910_v34 = vld [vmem:[%s22027_s8 + $0x5b4] sm:$0xf]  ;;  %v12226_v39 = vld [vmem:[%s22027_s8 + $0x5d8] sm:$0xf0] }
 0x3e9   :  { %v13229_v10 = vor.u32 %v14160_v49, %v13226_v32  ;;  %v12866_v35 = vld [vmem:[%s22027_s8 + $0xad8] sm:$0xf0]  ;;  %v13890_v5 = vld [vmem:[%s22027_s8 + $0x514] sm:$0xf]  ;;  %v12112_v49 = vld [vmem:[%s22027_s8 + $0x4c8] sm:$0xf] }
 0x3ea   :  { %8354 = vmatpush.bf16.msrb.mxu0 %v12825_v56  ;;  %8367 = vmatpush.bf16.msrb.mxu1 %v13145_v24  ;;  %v14100_v56 = vld [vmem:[%s22027_s8 + $0xba4] sm:$0xf]  ;;  %v12986_v24 = vld [vmem:[%s22027_s8 + $0xbc8] sm:$0xf0]  ;;  %v13886_v32 = vld [vmem:[%s22027_s8 + $0x4ec] sm:$0xf0] }
 0x3eb   :  { %8380 = vmatpush.bf16.msrb.mxu2 %v11549_v50  ;;  %8393 = vmatpush.bf16.msrb.mxu3 %v11869_v55  ;;  %v13930_v50 = vld [vmem:[%s22027_s8 + $0x654] sm:$0xf]  ;;  %v12306_v55 = vld [vmem:[%s22027_s8 + $0x678] sm:$0xf0]  ;;  %v12989_v45 = vor.u32 %v14100_v56, %v12986_v24  ;;  %v12229_v24 = vor.u32 %v13910_v34, %v12226_v39  ;;  %v13966_v39 = vld [vmem:[%s22027_s8 + $0x76c] sm:$0xf0] }
 0x3ec   :  { %v12309_v44 = vor.u32 %v13930_v50, %v12306_v55 }
 0x3ee   :  { %8355 = vmatpush.bf16.msrb.mxu0 %v12785_v30  ;;  %8368 = vmatpush.bf16.msrb.mxu1 %v13105_v29  ;;  %v8149_v19 = vpop.f32.mrf.mxu0  ;;  %v8162_v20 = vpop.f32.mrf.mxu1  ;;  %v12629_v30 = vor.u32 %v14010_v1, %v12626_v60  ;;  %v13920_v29 = vld [vmem:[%s22027_s8 + $0x604] sm:$0xf]  ;;  %v12826_v60 = vld [vmem:[%s22027_s8 + $0xa88] sm:$0xf0] }
 0x3ef   :  { %8381 = vmatpush.bf16.msrb.mxu2 %v11509_v57  ;;  %8394 = vmatpush.bf16.msrb.mxu3 %v11829_v15  ;;  %v8150_v47 = vadd.f32 %v8149_v19, %v18504_v38  ;;  %v14000_v57 = vld [vmem:[%s22027_s8 + $0x884] sm:$0xf]  ;;  %v12586_v38 = vld [vmem:[%s22027_s8 + $0x8a8] sm:$0xf0] }
 0x3f0   :  { %v14080_v15 = vld [vmem:[%s22027_s8 + $0xb04] sm:$0xf] }
 0x3f1   :  { %8356 = vmatmul.bf16.vlgmr.msrb.gmra.mxu0 %v19411_v26  ;;  %8369 = vmatmul.bf16.vlgmr.msrb.gmra.mxu1 %v19416_v21  ;;  %v14060_v1 = vld [vmem:[%s22027_s8 + $0xa64] sm:$0xf] }
 0x3f2   :  { %8400 = vmatpush.bf16.msra.mxu0 %v12429_v40  ;;  %8413 = vmatpush.bf16.msra.mxu1 %v12749_v62  ;;  %v8163_v40 = vadd.f32 %v8162_v20, %v8150_v47  ;;  %v12906_v62 = vld [vmem:[%s22027_s8 + $0xb28] sm:$0xf0]  ;;  %v12146_v20 = vld [vmem:[%s22027_s8 + $0x538] sm:$0xf0]  ;;  %v13970_v47 = vld [vmem:[%s22027_s8 + $0x794] sm:$0xf] }
 0x3f3   :  { %8426 = vmatpush.bf16.msra.mxu2 %v13069_v12  ;;  %8439 = vmatpush.bf16.msra.mxu3 %v13389_v13  ;;  %v12269_v12 = vor.u32 %v13920_v29, %v12266_v28  ;;  %v12589_v13 = vor.u32 %v14000_v57, %v12586_v38  ;;  %v12909_v48 = vor.u32 %v14080_v15, %v12906_v62  ;;  %v14050_v28 = vld [vmem:[%s22027_s8 + $0xa14] sm:$0xf]  ;;  %v13106_v15 = vld [vmem:[%s22027_s8 + $0xcb8] sm:$0xf0]  ;;  %v13806_v62 = vld [vmem:[%s22027_s8 + $0x26c] sm:$0xf0] }
 0x3f4   :  { %8382 = vmatmul.bf16.vlgmr.msrb.gmra.mxu2 %v19193_v11  ;;  %8395 = vmatmul.bf16.vlgmr.msrb.gmra.mxu3 %v19198_v7  ;;  %v13149_v29 = vor.u32 %v14140_v37, %v13146_v22  ;;  %v13866_v37 = vld [vmem:[%s22027_s8 + $0x44c] sm:$0xf0]  ;;  %v12352_v22 = vld [vmem:[%s22027_s8 + $0x6a8] sm:$0xf] }
 0x3f6   :  { %8401 = vmatpush.bf16.msra.mxu0 %v12389_v51  ;;  %8414 = vmatpush.bf16.msra.mxu1 %v12709_v6  ;;  %v14070_v51 = vld [vmem:[%s22027_s8 + $0xab4] sm:$0xf]  ;;  %v8151_v42 = vpop.f32.mrf.mxu0  ;;  %v8164_v56 = vpop.f32.mrf.mxu1 }
 0x3f7   :  { %8427 = vmatpush.bf16.msra.mxu2 %v13029_v36  ;;  %8440 = vmatpush.bf16.msra.mxu3 %v13349_v33  ;;  %v8175_v6 = vpop.f32.mrf.mxu2  ;;  %v8188_v58 = vpop.f32.mrf.mxu3  ;;  %v14150_v36 = vld [vmem:[%s22027_s8 + $0xd34] sm:$0xf]  ;;  %v13186_v33 = vld [vmem:[%s22027_s8 + $0xd58] sm:$0xf0]  ;;  %v12869_v50 = vor.u32 %v14070_v51, %v12866_v35  ;;  %v13796_v35 = vld [vmem:[%s22027_s8 + $0x21c] sm:$0xf0] }
 0x3f8   :  { %v8176_v41 = vadd.f32 %v8175_v6, %v8163_v40  ;;  %v13189_v55 = vor.u32 %v14150_v36, %v13186_v33  ;;  %v11792_v40 = vld [vmem:[%s22027_s8 + $0x248] sm:$0xf]  ;;  %v12113_v6 = vor.u32 %v13886_v32, %v12112_v49  ;;  %v13876_v42 = vld [vmem:[%s22027_s8 + $0x49c] sm:$0xf0]  ;;  %v12392_v56 = vld [vmem:[%s22027_s8 + $0x6f8] sm:$0xf] }
 0x3f9   :  { %v11793_v51 = vor.u32 %v13806_v62, %v11792_v40  ;;  %v14016_v40 = vld [vmem:[%s22027_s8 + $0x8fc] sm:$0xf0] }
 0x3fa   :  { %8402 = vmatpush.bf16.msra.mxu0 %v12349_v43  ;;  %8415 = vmatpush.bf16.msra.mxu1 %v12669_v46  ;;  %v12186_v43 = vld [vmem:[%s22027_s8 + $0x588] sm:$0xf0]  ;;  %v20734_v46 = vadd.f32 %v8188_v58, %v8176_v41  ;;  %v11752_v58 = vld [vmem:[%s22027_s8 + $0x1f8] sm:$0xf] }
 0x3fb   :  { %8428 = vmatpush.bf16.msra.mxu2 %v12989_v45  ;;  %8441 = vmatpush.bf16.msra.mxu3 %v13309_v59  ;;  %v13980_v45 = vld [vmem:[%s22027_s8 + $0x7e4] sm:$0xf]  ;;  %v12506_v59 = vld [vmem:[%s22027_s8 + $0x808] sm:$0xf0]  ;;  %v12189_v3 = vor.u32 %v13900_v23, %v12186_v43  ;;  %v12072_v41 = vld [vmem:[%s22027_s8 + $0x478] sm:$0xf]  ;;  %v11753_v43 = vor.u32 %v13796_v35, %v11752_v58 }
 0x3fc   :  { %v12509_v19 = vor.u32 %v13980_v45, %v12506_v59  ;;  %v14036_v23 = vld [vmem:[%s22027_s8 + $0x99c] sm:$0xf0]  ;;  %v13786_v45 = vld [vmem:[%s22027_s8 + $0x1cc] sm:$0xf0]  ;;  %v12592_v35 = vld [vmem:[%s22027_s8 + $0x888] sm:$0xf] }
 0x3fd   :  { %v13926_v58 = vld [vmem:[%s22027_s8 + $0x62c] sm:$0xf0] }
 0x3fe   :  { %8403 = vmatpush.bf16.msra.mxu0 %v12309_v44  ;;  %8416 = vmatpush.bf16.msra.mxu1 %v12629_v30  ;;  %v12466_v44 = vld [vmem:[%s22027_s8 + $0x7b8] sm:$0xf0]  ;;  %v12829_v30 = vor.u32 %v14060_v1, %v12826_v60  ;;  %v12032_v60 = vld [vmem:[%s22027_s8 + $0x428] sm:$0xf] }
 0x3ff   :  { %8429 = vmatpush.bf16.msra.mxu2 %v12949_v9  ;;  %8442 = vmatpush.bf16.msra.mxu3 %v13269_v61  ;;  %v12786_v9 = vld [vmem:[%s22027_s8 + $0xa38] sm:$0xf0]  ;;  %v14130_v61 = vld [vmem:[%s22027_s8 + $0xc94] sm:$0xf]  ;;  %v8177_v57 = vpop.f32.mrf.mxu2  ;;  %v8190_v38 = vpop.f32.mrf.mxu3  ;;  %v12469_v34 = vor.u32 %v13970_v47, %v12466_v44  ;;  %v12033_v47 = vor.u32 %v13866_v37, %v12032_v60  ;;  %v11672_v44 = vld [vmem:[%s22027_s8 + $0x158] sm:$0xf] }
 0x400   :  { %v12789_v18 = vor.u32 %v14050_v28, %v12786_v9  ;;  %v13109_v25 = vor.u32 %v14130_v61, %v13106_v15  ;;  %v11992_v9 = vld [vmem:[%s22027_s8 + $0x3d8] sm:$0xf]  ;;  %v13856_v61 = vld [vmem:[%s22027_s8 + $0x3fc] sm:$0xf0] }
 0x401   :  { %v12312_v57 = vld [vmem:[%s22027_s8 + $0x658] sm:$0xf]  ;;  %v13936_v38 = vld [vmem:[%s22027_s8 + $0x67c] sm:$0xf0] }
 0x402   :  { %8404 = vmatpush.bf16.msra.mxu0 %v12269_v12  ;;  %8417 = vmatpush.bf16.msra.mxu1 %v12589_v13  ;;  %v12432_v12 = vld [vmem:[%s22027_s8 + $0x748] sm:$0xf]  ;;  %v12149_v13 = vor.u32 %v13890_v5, %v12146_v20  ;;  %v13946_v5 = vld [vmem:[%s22027_s8 + $0x6cc] sm:$0xf0]  ;;  %v12632_v15 = vld [vmem:[%s22027_s8 + $0x8d8] sm:$0xf] }
 0x403   :  { %8430 = vmatpush.bf16.msra.mxu2 %v12909_v48  ;;  %8443 = vmatpush.bf16.msra.mxu3 %v13229_v10  ;;  %v12752_v48 = vld [vmem:[%s22027_s8 + $0x9c8] sm:$0xf]  ;;  %v14046_v10 = vld [vmem:[%s22027_s8 + $0x9ec] sm:$0xf0]  ;;  %v12433_v36 = vor.u32 %v13966_v39, %v12432_v12  ;;  %v8770_v12 = vperm.slane %v20468_v53, 2 }
 0x404   :  { %v12753_v33 = vor.u32 %v14046_v10, %v12752_v48  ;;  %v11632_v39 = vld [vmem:[%s22027_s8 + $0x108] sm:$0xf]  ;;  %v13766_v48 = vld [vmem:[%s22027_s8 + $0x12c] sm:$0xf0]  ;;  %v12313_v10 = vor.u32 %v13936_v38, %v12312_v57 }
 0x405   :  { %v11872_v57 = vld [vmem:[%s22027_s8 + $0x2e8] sm:$0xf]  ;;  %v13826_v38 = vld [vmem:[%s22027_s8 + $0x30c] sm:$0xf0] }
 0x406   :  { %8405 = vmatpush.bf16.msra.mxu0 %v12229_v24  ;;  %8418 = vmatpush.bf16.msra.mxu1 %v12549_v16  ;;  %v13956_v24 = vld [vmem:[%s22027_s8 + $0x71c] sm:$0xf0]  ;;  %v12712_v16 = vld [vmem:[%s22027_s8 + $0x978] sm:$0xf] }
 0x407   :  { %8431 = vmatpush.bf16.msra.mxu2 %v12869_v50  ;;  %8444 = vmatpush.bf16.msra.mxu3 %v13189_v55  ;;  %v12073_v50 = vor.u32 %v13876_v42, %v12072_v41  ;;  %v11712_v55 = vld [vmem:[%s22027_s8 + $0x1a8] sm:$0xf]  ;;  %v12393_v59 = vor.u32 %v13956_v24, %v12392_v56  ;;  %v12713_v1 = vor.u32 %v14036_v23, %v12712_v16  ;;  %v11592_v24 = vld [vmem:[%s22027_s8 + $0xb8] sm:$0xf]  ;;  %v13756_v16 = vld [vmem:[%s22027_s8 + $0xdc] sm:$0xf0] }
 0x408   :  { %v11713_v20 = vor.u32 %v13786_v45, %v11712_v55  ;;  %v11633_v42 = vor.u32 %v13766_v48, %v11632_v39  ;;  %v11912_v23 = vld [vmem:[%s22027_s8 + $0x338] sm:$0xf]  ;;  %v13836_v55 = vld [vmem:[%s22027_s8 + $0x35c] sm:$0xf0] }
 0x409   :  { %v12232_v45 = vld [vmem:[%s22027_s8 + $0x5b8] sm:$0xf]  ;;  %v13816_v48 = vld [vmem:[%s22027_s8 + $0x2bc] sm:$0xf0] }
 0x40a   :  { %8406 = vmatpush.bf16.msra.mxu0 %v12189_v3  ;;  %8419 = vmatpush.bf16.msra.mxu1 %v12509_v19  ;;  %v12672_v3 = vld [vmem:[%s22027_s8 + $0x928] sm:$0xf]  ;;  %v14026_v19 = vld [vmem:[%s22027_s8 + $0x94c] sm:$0xf0]  ;;  %v11832_v39 = vld [vmem:[%s22027_s8 + $0x298] sm:$0xf] }
 0x40b   :  { %8432 = vmatpush.bf16.msra.mxu2 %v12829_v30  ;;  %8445 = vmatpush.bf16.msra.mxu3 %v13149_v29  ;;  %v13776_v30 = vld [vmem:[%s22027_s8 + $0x17c] sm:$0xf0]  ;;  %v12353_v29 = vor.u32 %v13946_v5, %v12352_v22  ;;  %v12673_v28 = vor.u32 %v14026_v19, %v12672_v3  ;;  %v12552_v22 = vld [vmem:[%s22027_s8 + $0x838] sm:$0xf] }
 0x40c   :  { %v13996_v5 = vld [vmem:[%s22027_s8 + $0x85c] sm:$0xf0] }
 0x40e   :  { %8407 = vmatpush.bf16.msra.mxu0 %v12149_v13  ;;  %8420 = vmatpush.bf16.msra.mxu1 %v12469_v34  ;;  %v8201_v62 = vpop.f32.mrf.mxu0  ;;  %v8214_v49 = vpop.f32.mrf.mxu1  ;;  %v11673_v13 = vor.u32 %v13776_v30, %v11672_v44  ;;  %v11993_v34 = vor.u32 %v13856_v61, %v11992_v9  ;;  %v11593_v44 = vor.u32 %v13756_v16, %v11592_v24 }
 0x40f   :  { %8433 = vmatpush.bf16.msra.mxu2 %v12789_v18  ;;  %8446 = vmatpush.bf16.msra.mxu3 %v13109_v25  ;;  %v8202_v32 = vadd.f32 %v8201_v62, %v20734_v46  ;;  %v12633_v18 = vor.u32 %v14016_v40, %v12632_v15  ;;  %v11952_v46 = vld [vmem:[%s22027_s8 + $0x388] sm:$0xf]  ;;  %v13846_v25 = vld [vmem:[%s22027_s8 + $0x3ac] sm:$0xf0]  ;;  %v11913_v30 = vor.u32 %v13836_v55, %v11912_v23  ;;  %v11794_v23 = vld [vmem:[%s22027_s8 + $0x270] sm:$0xf0] }
 0x410   :  { %v11953_v56 = vor.u32 %v13846_v25, %v11952_v46  ;;  %v12553_v61 = vor.u32 %v13996_v5, %v12552_v22  ;;  %v12192_v15 = vld [vmem:[%s22027_s8 + $0x568] sm:$0xf]  ;;  %v13906_v62 = vld [vmem:[%s22027_s8 + $0x58c] sm:$0xf0]  ;;  %v12152_v46 = vld [vmem:[%s22027_s8 + $0x518] sm:$0xf]  ;;  %v11833_v16 = vor.u32 %v13816_v48, %v11832_v39 }
 0x411   :  { %8408 = vmatmul.bf16.vlgmr.msra.gmra.mxu0 %v19203_v2  ;;  %8421 = vmatmul.bf16.vlgmr.msra.gmra.mxu1 %v19214_v14  ;;  %v13896_v25 = vld [vmem:[%s22027_s8 + $0x53c] sm:$0xf0]  ;;  %v12952_v39 = vld [vmem:[%s22027_s8 + $0xb58] sm:$0xf] }
 0x412   :  { %8452 = vmatpush.bf16.msrb.mxu0 %v11793_v51  ;;  %8465 = vmatpush.bf16.msrb.mxu1 %v12113_v6  ;;  %v12272_v51 = vld [vmem:[%s22027_s8 + $0x608] sm:$0xf]  ;;  %v8215_v6 = vadd.f32 %v8214_v49, %v8202_v32  ;;  %v13986_v32 = vld [vmem:[%s22027_s8 + $0x80c] sm:$0xf0]  ;;  %v12153_v55 = vor.u32 %v13896_v25, %v12152_v46  ;;  %v14096_v48 = vld [vmem:[%s22027_s8 + $0xb7c] sm:$0xf0] }
 0x413   :  { %8478 = vmatpush.bf16.msrb.mxu2 %v12433_v36  ;;  %8491 = vmatpush.bf16.msrb.mxu3 %v12753_v33  ;;  %v14006_v36 = vld [vmem:[%s22027_s8 + $0x8ac] sm:$0xf0]  ;;  %v8858_v33 = vperm.slane %v20499_v27, 2  ;;  %v12512_v49 = vld [vmem:[%s22027_s8 + $0x7e8] sm:$0xf] }
 0x414   :  { %8434 = vmatmul.bf16.vlgmr.msra.gmra.mxu2 %v19411_v26  ;;  %8447 = vmatmul.bf16.vlgmr.msra.gmra.mxu3 %v19416_v21  ;;  %v8790_v41 = vadd.f32 %v8770_v12, %v8215_v6  ;;  %v11512_v12 = vld [vmem:[%s22027_s8 + $0x18] sm:$0xf]  ;;  %v14176_v25 = vld [vmem:[%s22027_s8 + $0xdfc] sm:$0xf0] }
 0x415   :  { %v13272_v46 = vld [vmem:[%s22027_s8 + $0xdd8] sm:$0xf] }
 0x416   :  { %8453 = vmatpush.bf16.msrb.mxu0 %v11753_v43  ;;  %8466 = vmatpush.bf16.msrb.mxu1 %v12073_v50  ;;  %v12273_v43 = vor.u32 %v13926_v58, %v12272_v51  ;;  %v12593_v50 = vor.u32 %v14006_v36, %v12592_v35  ;;  %v8203_v19 = vpop.f32.mrf.mxu0  ;;  %v12472_v51 = vld [vmem:[%s22027_s8 + $0x798] sm:$0xf]  ;;  %v13976_v35 = vld [vmem:[%s22027_s8 + $0x7bc] sm:$0xf0]  ;;  %v13072_v36 = vld [vmem:[%s22027_s8 + $0xc48] sm:$0xf] }
 0x417   :  { %8479 = vmatpush.bf16.msrb.mxu2 %v12393_v59  ;;  %8492 = vmatpush.bf16.msrb.mxu3 %v12713_v1  ;;  %v13916_v59 = vld [vmem:[%s22027_s8 + $0x5dc] sm:$0xf0]  ;;  %v8800_v1 = vmax.f32 %v8790_v41, 0.0  ;;  %v8227_v60 = vpop.f32.mrf.mxu2  ;;  %v8240_v37 = vpop.f32.mrf.mxu3  ;;  %v13392_v41 = vld [vmem:[%s22027_s8 + $0xec8] sm:$0xf] }
 0x418   :  { %v8228_v3 = vadd.f32 %v8227_v60, %v18702_v8  ;;  %v12233_v8 = vor.u32 %v13916_v59, %v12232_v45  ;;  %v12473_v45 = vor.u32 %v13976_v35, %v12472_v51  ;;  %v13032_v60 = vld [vmem:[%s22027_s8 + $0xbf8] sm:$0xf]  ;;  %v14196_v19 = vld [vmem:[%s22027_s8 + $0xe9c] sm:$0xf0]  ;;  %v13771_v51 = vld [vmem:[%s22027_s8 + $0x15c] sm:$0xf] }
 0x419   :  { %v11994_v35 = vld [vmem:[%s22027_s8 + $0x400] sm:$0xf0] }
 0x41a   :  { %8454 = vmatpush.bf16.msrb.mxu0 %v11713_v20  ;;  %8467 = vmatpush.bf16.msrb.mxu1 %v12033_v47  ;;  %v8216_v20 = vpop.f32.mrf.mxu1  ;;  %v8878_v47 = vmul.f32 %v8858_v33, %v8800_v1  ;;  %v20936_v9 = vadd.f32 %v8240_v37, %v8228_v3  ;;  %v14126_v33 = vld [vmem:[%s22027_s8 + $0xc6c] sm:$0xf0]  ;;  %v14116_v37 = vld [vmem:[%s22027_s8 + $0xc1c] sm:$0xf0]  ;;  %v13352_v3 = vld [vmem:[%s22027_s8 + $0xe78] sm:$0xf] }
 0x41b   :  { %8480 = vmatpush.bf16.msrb.mxu2 %v12353_v29  ;;  %8493 = vmatpush.bf16.msrb.mxu3 %v12673_v28  ;;  %v11552_v29 = vld [vmem:[%s22027_s8 + $0x68] sm:$0xf]  ;;  %v13746_v28 = vld [vmem:[%s22027_s8 + $0x8c] sm:$0xf0]  ;;  %v13073_v59 = vor.u32 %v14126_v33, %v13072_v36  ;;  %v13791_v20 = vld [vmem:[%s22027_s8 + $0x1fc] sm:$0xf] }
 0x41c   :  { %v20948_v40 = vadd.f32 %v20601_v4, %v8878_v47  ;;  %v11553_v4 = vor.u32 %v13746_v28, %v11552_v29  ;;  %v11754_v47 = vld [vmem:[%s22027_s8 + $0x220] sm:$0xf0]  ;;  %v13033_v29 = vor.u32 %v14116_v37, %v13032_v60  ;;  %v13353_v28 = vor.u32 %v14196_v19, %v13352_v3  ;;  %v11954_v60 = vld [vmem:[%s22027_s8 + $0x3b0] sm:$0xf0]  ;;  %v14076_v3 = vld [vmem:[%s22027_s8 + $0xadc] sm:$0xf0] }
 0x41e   :  { %8455 = vmatpush.bf16.msrb.mxu0 %v11673_v13  ;;  %8468 = vmatpush.bf16.msrb.mxu1 %v11993_v34  ;;  %v11873_v13 = vor.u32 %v13826_v38, %v11872_v57  ;;  %v13736_v34 = vld [vmem:[%s22027_s8 + $0x3c] sm:$0xf0]  ;;  %v11757_v57 = vor.u32 %v13791_v20, %v11754_v47  ;;  %v13192_v47 = vld [vmem:[%s22027_s8 + $0xd38] sm:$0xf] }
 0x41f   :  { %8481 = vmatpush.bf16.msrb.mxu2 %v12313_v10  ;;  %8494 = vmatpush.bf16.msrb.mxu3 %v12633_v18  ;;  %v12193_v10 = vor.u32 %v13906_v62, %v12192_v15  ;;  %v12513_v18 = vor.u32 %v13986_v32, %v12512_v49  ;;  %v8229_v6 = vpop.f32.mrf.mxu2  ;;  %v8242_v58 = vpop.f32.mrf.mxu3  ;;  %v11513_v24 = vor.u32 %v13736_v34, %v11512_v12  ;;  %v13312_v15 = vld [vmem:[%s22027_s8 + $0xe28] sm:$0xf]  ;;  %v14186_v62 = vld [vmem:[%s22027_s8 + $0xe4c] sm:$0xf0]  ;;  %v13781_v49 = vld [vmem:[%s22027_s8 + $0x1ac] sm:$0xf] }
 0x420   :  { %v11714_v32 = vld [vmem:[%s22027_s8 + $0x1d0] sm:$0xf0]  ;;  %v13861_v12 = vld [vmem:[%s22027_s8 + $0x42c] sm:$0xf]  ;;  %v13313_v34 = vor.u32 %v14186_v62, %v13312_v15  ;;  %v11674_v6 = vld [vmem:[%s22027_s8 + $0x180] sm:$0xf0] }
 0x421   :  { %v13851_v58 = vld [vmem:[%s22027_s8 + $0x3dc] sm:$0xf]  ;;  %v8771_v15 = vperm.slane %v20468_v53, 3  ;;  %v13152_v53 = vld [vmem:[%s22027_s8 + $0xce8] sm:$0xf] }
 0x422   :  { %8456 = vmatpush.bf16.msrb.mxu0 %v11633_v42  ;;  %8469 = vmatpush.bf16.msrb.mxu1 %v11953_v56  ;;  %v14206_v42 = vld [vmem:[%s22027_s8 + $0xeec] sm:$0xf0]  ;;  %v13801_v56 = vld [vmem:[%s22027_s8 + $0x24c] sm:$0xf] }
 0x423   :  { %8482 = vmatpush.bf16.msrb.mxu2 %v12273_v43  ;;  %8495 = vmatpush.bf16.msrb.mxu3 %v12593_v50  ;;  %v13881_v43 = vld [vmem:[%s22027_s8 + $0x4cc] sm:$0xf]  ;;  %v12114_v50 = vld [vmem:[%s22027_s8 + $0x4f0] sm:$0xf0]  ;;  %v13393_v1 = vor.u32 %v14206_v42, %v13392_v41  ;;  %v11797_v22 = vor.u32 %v13801_v56, %v11794_v23  ;;  %v12953_v42 = vor.u32 %v14096_v48, %v12952_v39 }
 0x424   :  { %v12117_v5 = vor.u32 %v13881_v43, %v12114_v50  ;;  %v13273_v56 = vor.u32 %v14176_v25, %v13272_v46  ;;  %v11677_v23 = vor.u32 %v13771_v51, %v11674_v6  ;;  %v11997_v43 = vor.u32 %v13851_v58, %v11994_v35  ;;  %v13232_v50 = vld [vmem:[%s22027_s8 + $0xd88] sm:$0xf]  ;;  %v11554_v46 = vld [vmem:[%s22027_s8 + $0x90] sm:$0xf0]  ;;  %v13821_v25 = vld [vmem:[%s22027_s8 + $0x2ec] sm:$0xf] }
 0x425   :  { %v11874_v51 = vld [vmem:[%s22027_s8 + $0x310] sm:$0xf0]  ;;  %v8859_v58 = vperm.slane %v20499_v27, 3  ;;  %v12792_v35 = vld [vmem:[%s22027_s8 + $0xa18] sm:$0xf] }
 0x426   :  { %8457 = vmatpush.bf16.msrb.mxu0 %v11593_v44  ;;  %8470 = vmatpush.bf16.msrb.mxu1 %v11913_v30  ;;  %v13871_v44 = vld [vmem:[%s22027_s8 + $0x47c] sm:$0xf]  ;;  %v12074_v30 = vld [vmem:[%s22027_s8 + $0x4a0] sm:$0xf0]  ;;  %v14136_v27 = vld [vmem:[%s22027_s8 + $0xcbc] sm:$0xf0] }
 0x427   :  { %8483 = vmatpush.bf16.msrb.mxu2 %v12233_v8  ;;  %8496 = vmatpush.bf16.msrb.mxu3 %v12553_v61  ;;  %v12992_v8 = vld [vmem:[%s22027_s8 + $0xba8] sm:$0xf]  ;;  %v14106_v61 = vld [vmem:[%s22027_s8 + $0xbcc] sm:$0xf0]  ;;  %v12077_v38 = vor.u32 %v13871_v44, %v12074_v30  ;;  %v14156_v44 = vld [vmem:[%s22027_s8 + $0xd5c] sm:$0xf0] }
 0x428   :  { %v13751_v30 = vld [vmem:[%s22027_s8 + $0xbc] sm:$0xf] }
 0x42a   :  { %8458 = vmatpush.bf16.msrb.mxu0 %v11553_v4  ;;  %8471 = vmatpush.bf16.msrb.mxu1 %v11873_v13  ;;  %v12034_v4 = vld [vmem:[%s22027_s8 + $0x450] sm:$0xf0]  ;;  %v12993_v13 = vor.u32 %v14106_v61, %v12992_v8  ;;  %v11594_v8 = vld [vmem:[%s22027_s8 + $0xe0] sm:$0xf0]  ;;  %v13831_v61 = vld [vmem:[%s22027_s8 + $0x33c] sm:$0xf] }
 0x42b   :  { %8484 = vmatpush.bf16.msrb.mxu2 %v12193_v10  ;;  %8497 = vmatpush.bf16.msrb.mxu3 %v12513_v18  ;;  %v11717_v10 = vor.u32 %v13781_v49, %v11714_v32  ;;  %v12037_v18 = vor.u32 %v13861_v12, %v12034_v4  ;;  %v13193_v12 = vor.u32 %v14156_v44, %v13192_v47  ;;  %v12832_v4 = vld [vmem:[%s22027_s8 + $0xa68] sm:$0xf]  ;;  %v14201_v47 = vld [vmem:[%s22027_s8 + $0xecc] sm:$0xf]  ;;  %v13394_v44 = vld [vmem:[%s22027_s8 + $0xef0] sm:$0xf0] }
 0x42c   :  { %v11597_v39 = vor.u32 %v13751_v30, %v11594_v8 }
 0x42e   :  { %8459 = vmatpush.bf16.msrb.mxu0 %v11513_v24  ;;  %8472 = vmatpush.bf16.msrb.mxu1 %v11833_v16  ;;  %v8253_v36 = vpop.f32.mrf.mxu0  ;;  %v8266_v33 = vpop.f32.mrf.mxu1  ;;  %v12912_v24 = vld [vmem:[%s22027_s8 + $0xb08] sm:$0xf]  ;;  %v14086_v16 = vld [vmem:[%s22027_s8 + $0xb2c] sm:$0xf0] }
 0x42f   :  { %8485 = vmatpush.bf16.msrb.mxu2 %v12153_v55  ;;  %8498 = vmatpush.bf16.msrb.mxu3 %v12473_v45  ;;  %v8254_v41 = vadd.f32 %v8253_v36, %v20936_v9  ;;  %v14166_v9 = vld [vmem:[%s22027_s8 + $0xdac] sm:$0xf0]  ;;  %v13761_v55 = vld [vmem:[%s22027_s8 + $0x10c] sm:$0xf]  ;;  %v12913_v37 = vor.u32 %v14086_v16, %v12912_v24  ;;  %v14056_v36 = vld [vmem:[%s22027_s8 + $0xa3c] sm:$0xf0] }
 0x431   :  { %8460 = vmatmul.bf16.vlgmr.msrb.gmra.mxu0 %v19193_v11  ;;  %8473 = vmatmul.bf16.vlgmr.msrb.gmra.mxu1 %v19198_v7  ;;  %v8267_v45 = vadd.f32 %v8266_v33, %v8254_v41 }
 0x432   :  { %8504 = vmatpush.bf16.msra.mxu0 %v13073_v59  ;;  %8517 = vmatpush.bf16.msra.mxu1 %v13393_v1  ;;  %v11634_v59 = vld [vmem:[%s22027_s8 + $0x130] sm:$0xf0]  ;;  %v13841_v1 = vld [vmem:[%s22027_s8 + $0x38c] sm:$0xf] }
 0x433   :  { %8530 = vmatpush.bf16.msra.mxu2 %v11797_v22  ;;  %8543 = vmatpush.bf16.msra.mxu3 %v12117_v5  ;;  %v13233_v22 = vor.u32 %v14166_v9, %v13232_v50  ;;  %v12872_v5 = vld [vmem:[%s22027_s8 + $0xab8] sm:$0xf]  ;;  %v11637_v19 = vor.u32 %v13761_v55, %v11634_v59  ;;  %v11957_v20 = vor.u32 %v13841_v1, %v11954_v60  ;;  %v13811_v50 = vld [vmem:[%s22027_s8 + $0x29c] sm:$0xf]  ;;  %v13961_v59 = vld [vmem:[%s22027_s8 + $0x74c] sm:$0xf] }
 0x434   :  { %8486 = vmatmul.bf16.vlgmr.msrb.gmra.mxu2 %v19203_v2  ;;  %8499 = vmatmul.bf16.vlgmr.msrb.gmra.mxu3 %v19214_v14  ;;  %v12873_v32 = vor.u32 %v14076_v3, %v12872_v5  ;;  %v12434_v1 = vld [vmem:[%s22027_s8 + $0x770] sm:$0xf0]  ;;  %v14121_v5 = vld [vmem:[%s22027_s8 + $0xc4c] sm:$0xf]  ;;  %v12793_v3 = vor.u32 %v14056_v36, %v12792_v35 }
 0x435   :  { %v12437_v8 = vor.u32 %v13961_v59, %v12434_v1  ;;  %v13314_v35 = vld [vmem:[%s22027_s8 + $0xe50] sm:$0xf0] }
 0x436   :  { %8505 = vmatpush.bf16.msra.mxu0 %v13033_v29  ;;  %8518 = vmatpush.bf16.msra.mxu1 %v13353_v28  ;;  %v8255_v62 = vpop.f32.mrf.mxu0  ;;  %v8268_v49 = vpop.f32.mrf.mxu1 }
 0x437   :  { %8531 = vmatpush.bf16.msra.mxu2 %v11757_v57  ;;  %8544 = vmatpush.bf16.msra.mxu3 %v12077_v38  ;;  %v8279_v29 = vpop.f32.mrf.mxu2  ;;  %v8292_v28 = vpop.f32.mrf.mxu3  ;;  %v11914_v57 = vld [vmem:[%s22027_s8 + $0x360] sm:$0xf0]  ;;  %v13397_v62 = vor.u32 %v14201_v47, %v13394_v44  ;;  %v12914_v44 = vld [vmem:[%s22027_s8 + $0xb30] sm:$0xf0] }
 0x438   :  { %v8280_v38 = vadd.f32 %v8279_v29, %v8267_v45  ;;  %v11917_v48 = vor.u32 %v13831_v61, %v11914_v57  ;;  %v11834_v45 = vld [vmem:[%s22027_s8 + $0x2c0] sm:$0xf0]  ;;  %v13951_v57 = vld [vmem:[%s22027_s8 + $0x6fc] sm:$0xf] }
 0x439   :  { %v12714_v49 = vld [vmem:[%s22027_s8 + $0x9a0] sm:$0xf0] }
 0x43a   :  { %8506 = vmatpush.bf16.msra.mxu0 %v12993_v13  ;;  %8519 = vmatpush.bf16.msra.mxu1 %v13313_v34  ;;  %v14066_v13 = vld [vmem:[%s22027_s8 + $0xa8c] sm:$0xf0]  ;;  %v8293_v34 = vadd.f32 %v8292_v28, %v8280_v38  ;;  %v11837_v28 = vor.u32 %v13811_v50, %v11834_v45  ;;  %v12394_v38 = vld [vmem:[%s22027_s8 + $0x720] sm:$0xf0]  ;;  %v14171_v50 = vld [vmem:[%s22027_s8 + $0xddc] sm:$0xf] }
 0x43b   :  { %8532 = vmatpush.bf16.msra.mxu2 %v11717_v10  ;;  %8545 = vmatpush.bf16.msra.mxu3 %v12037_v18  ;;  %v14146_v10 = vld [vmem:[%s22027_s8 + $0xd0c] sm:$0xf0]  ;;  %v13741_v18 = vld [vmem:[%s22027_s8 + $0x6c] sm:$0xf]  ;;  %v12833_v33 = vor.u32 %v14066_v13, %v12832_v4  ;;  %v14191_v4 = vld [vmem:[%s22027_s8 + $0xe7c] sm:$0xf] }
 0x43c   :  { %v8791_v6 = vadd.f32 %v8771_v15, %v8293_v34  ;;  %v13153_v41 = vor.u32 %v14146_v10, %v13152_v53  ;;  %v11557_v16 = vor.u32 %v13741_v18, %v11554_v46  ;;  %v13354_v13 = vld [vmem:[%s22027_s8 + $0xea0] sm:$0xf0]  ;;  %v12397_v34 = vor.u32 %v13951_v57, %v12394_v38  ;;  %v12354_v53 = vld [vmem:[%s22027_s8 + $0x6d0] sm:$0xf0]  ;;  %v14021_v46 = vld [vmem:[%s22027_s8 + $0x92c] sm:$0xf] }
 0x43d   :  { %v13357_v18 = vor.u32 %v14191_v4, %v13354_v13  ;;  %v13911_v57 = vld [vmem:[%s22027_s8 + $0x5bc] sm:$0xf]  ;;  %v12234_v38 = vld [vmem:[%s22027_s8 + $0x5e0] sm:$0xf0] }
 0x43e   :  { %8507 = vmatpush.bf16.msra.mxu0 %v12953_v42  ;;  %8520 = vmatpush.bf16.msra.mxu1 %v13273_v56  ;;  %v13112_v42 = vld [vmem:[%s22027_s8 + $0xc98] sm:$0xf]  ;;  %v13731_v56 = vld [vmem:[%s22027_s8 + $0x1c] sm:$0xf]  ;;  %v8801_v24 = vmax.f32 %v8791_v6, 0.0 }
 0x43f   :  { %8533 = vmatpush.bf16.msra.mxu2 %v11677_v23  ;;  %8546 = vmatpush.bf16.msra.mxu3 %v11997_v43  ;;  %v11877_v23 = vor.u32 %v13821_v25, %v11874_v51  ;;  %v11514_v43 = vld [vmem:[%s22027_s8 + $0x40] sm:$0xf0]  ;;  %v8281_v9 = vpop.f32.mrf.mxu2  ;;  %v8294_v55 = vpop.f32.mrf.mxu3  ;;  %v12674_v25 = vld [vmem:[%s22027_s8 + $0x950] sm:$0xf0]  ;;  %v14101_v51 = vld [vmem:[%s22027_s8 + $0xbac] sm:$0xf] }
 0x440   :  { %v8879_v60 = vmul.f32 %v8859_v58, %v8801_v24  ;;  %v11517_v29 = vor.u32 %v13731_v56, %v11514_v43  ;;  %v12994_v6 = vld [vmem:[%s22027_s8 + $0xbd0] sm:$0xf0]  ;;  %v14181_v58 = vld [vmem:[%s22027_s8 + $0xe2c] sm:$0xf]  ;;  %v14011_v24 = vld [vmem:[%s22027_s8 + $0x8dc] sm:$0xf] }
 0x441   :  { %v13317_v56 = vor.u32 %v14181_v58, %v13314_v35  ;;  %v12954_v43 = vld [vmem:[%s22027_s8 + $0xb80] sm:$0xf0] }
 0x442   :  { %8508 = vmatpush.bf16.msra.mxu0 %v12913_v37  ;;  %8521 = vmatpush.bf16.msra.mxu1 %v13233_v22  ;;  %v14041_v37 = vld [vmem:[%s22027_s8 + $0x9cc] sm:$0xf]  ;;  %v12754_v22 = vld [vmem:[%s22027_s8 + $0x9f0] sm:$0xf0]  ;;  %v21207_v30 = vadd.f32 %v20948_v40, %v8879_v60  ;;  %v14031_v40 = vld [vmem:[%s22027_s8 + $0x97c] sm:$0xf] }
 0x443   :  { %8534 = vmatpush.bf16.msra.mxu2 %v11637_v19  ;;  %8547 = vmatpush.bf16.msra.mxu3 %v11957_v20  ;;  %v13113_v19 = vor.u32 %v14136_v27, %v13112_v42  ;;  %v13074_v20 = vld [vmem:[%s22027_s8 + $0xc70] sm:$0xf0]  ;;  %v12757_v61 = vor.u32 %v14041_v37, %v12754_v22  ;;  %v12314_v42 = vld [vmem:[%s22027_s8 + $0x680] sm:$0xf0]  ;;  %v12997_v27 = vor.u32 %v14101_v51, %v12994_v6  ;;  %v13921_v37 = vld [vmem:[%s22027_s8 + $0x60c] sm:$0xf] }
 0x444   :  { %v13077_v15 = vor.u32 %v14121_v5, %v13074_v20  ;;  %v13274_v9 = vld [vmem:[%s22027_s8 + $0xe00] sm:$0xf0]  ;;  %v12274_v22 = vld [vmem:[%s22027_s8 + $0x630] sm:$0xf0]  ;;  %v14081_v20 = vld [vmem:[%s22027_s8 + $0xb0c] sm:$0xf] }
 0x445   :  { %v12874_v13 = vld [vmem:[%s22027_s8 + $0xae0] sm:$0xf0]  ;;  %v12194_v51 = vld [vmem:[%s22027_s8 + $0x590] sm:$0xf0] }
 0x446   :  { %8509 = vmatpush.bf16.msra.mxu0 %v12873_v32  ;;  %8522 = vmatpush.bf16.msra.mxu1 %v13193_v12  ;;  %v14111_v32 = vld [vmem:[%s22027_s8 + $0xbfc] sm:$0xf]  ;;  %v13034_v12 = vld [vmem:[%s22027_s8 + $0xc20] sm:$0xf0] }
 0x447   :  { %8535 = vmatpush.bf16.msra.mxu2 %v11597_v39  ;;  %8548 = vmatpush.bf16.msra.mxu3 %v11917_v48  ;;  %v12717_v39 = vor.u32 %v14031_v40, %v12714_v49  ;;  %v13941_v48 = vld [vmem:[%s22027_s8 + $0x6ac] sm:$0xf]  ;;  %v13037_v10 = vor.u32 %v14111_v32, %v13034_v12  ;;  %v13991_v40 = vld [vmem:[%s22027_s8 + $0x83c] sm:$0xf]  ;;  %v12554_v49 = vld [vmem:[%s22027_s8 + $0x860] sm:$0xf0] }
 0x448   :  { %v12357_v36 = vor.u32 %v13941_v48, %v12354_v53  ;;  %v14071_v32 = vld [vmem:[%s22027_s8 + $0xabc] sm:$0xf] }
 0x449   :  { %v12877_v58 = vor.u32 %v14071_v32, %v12874_v13  ;;  %v13877_v13 = vld [vmem:[%s22027_s8 + $0x4a4] sm:$0xf0] }
 0x44a   :  { %8510 = vmatpush.bf16.msra.mxu0 %v12833_v33  ;;  %8523 = vmatpush.bf16.msra.mxu1 %v13153_v41  ;;  %v12677_v33 = vor.u32 %v14021_v46, %v12674_v25  ;;  %v13931_v41 = vld [vmem:[%s22027_s8 + $0x65c] sm:$0xf]  ;;  %v12557_v46 = vor.u32 %v13991_v40, %v12554_v49  ;;  %v13901_v25 = vld [vmem:[%s22027_s8 + $0x56c] sm:$0xf]  ;;  %v11760_v40 = vld [vmem:[%s22027_s8 + $0x200] sm:$0xf] }
 0x44b   :  { %8536 = vmatpush.bf16.msra.mxu2 %v11557_v16  ;;  %8549 = vmatpush.bf16.msra.mxu3 %v11877_v23  ;;  %v12634_v16 = vld [vmem:[%s22027_s8 + $0x900] sm:$0xf0]  ;;  %v14091_v23 = vld [vmem:[%s22027_s8 + $0xb5c] sm:$0xf]  ;;  %v12317_v1 = vor.u32 %v13931_v41, %v12314_v42  ;;  %v14061_v41 = vld [vmem:[%s22027_s8 + $0xa6c] sm:$0xf] }
 0x44c   :  { %v12637_v60 = vor.u32 %v14011_v24, %v12634_v16  ;;  %v12957_v5 = vor.u32 %v14091_v23, %v12954_v43  ;;  %v12834_v42 = vld [vmem:[%s22027_s8 + $0xa90] sm:$0xf0]  ;;  %v13891_v24 = vld [vmem:[%s22027_s8 + $0x51c] sm:$0xf]  ;;  %v12197_v16 = vor.u32 %v13901_v25, %v12194_v51  ;;  %v12154_v43 = vld [vmem:[%s22027_s8 + $0x540] sm:$0xf0] }
 0x44d   :  { %v13797_v49 = vld [vmem:[%s22027_s8 + $0x224] sm:$0xf0]  ;;  %v13787_v25 = vld [vmem:[%s22027_s8 + $0x1d4] sm:$0xf0] }
 0x44e   :  { %8511 = vmatpush.bf16.msra.mxu0 %v12793_v3  ;;  %8524 = vmatpush.bf16.msra.mxu1 %v13113_v19  ;;  %v8305_v55 = vpop.f32.mrf.mxu0  ;;  %v8318_v45 = vpop.f32.mrf.mxu1  ;;  %v13277_v3 = vor.u32 %v14171_v50, %v13274_v9  ;;  %v14001_v19 = vld [vmem:[%s22027_s8 + $0x88c] sm:$0xf]  ;;  %v13971_v50 = vld [vmem:[%s22027_s8 + $0x79c] sm:$0xf]  ;;  %v12474_v9 = vld [vmem:[%s22027_s8 + $0x7c0] sm:$0xf0] }
 0x44f   :  { %8537 = vmatpush.bf16.msra.mxu2 %v11517_v29  ;;  %8550 = vmatpush.bf16.msra.mxu3 %v11837_v28  ;;  %v8306_v59 = vadd.f32 %v8305_v55, %v18900_v31  ;;  %v12594_v31 = vld [vmem:[%s22027_s8 + $0x8b0] sm:$0xf0]  ;;  %v14161_v29 = vld [vmem:[%s22027_s8 + $0xd8c] sm:$0xf]  ;;  %v12837_v55 = vor.u32 %v14061_v41, %v12834_v42  ;;  %v13947_v41 = vld [vmem:[%s22027_s8 + $0x6d4] sm:$0xf0] }
 0x450   :  { %v13234_v28 = vld [vmem:[%s22027_s8 + $0xdb0] sm:$0xf0]  ;;  %v12680_v42 = vld [vmem:[%s22027_s8 + $0x930] sm:$0xf] }
 0x451   :  { %8512 = vmatmul.bf16.vlgmr.msra.gmra.mxu0 %v19411_v26  ;;  %8525 = vmatmul.bf16.vlgmr.msra.gmra.mxu1 %v19416_v21  ;;  %v8319_v47 = vadd.f32 %v8318_v45, %v8306_v59  ;;  %v14051_v59 = vld [vmem:[%s22027_s8 + $0xa1c] sm:$0xf] }
 0x452   :  { %8556 = vmatpush.bf16.msrb.mxu0 %v12437_v8  ;;  %8569 = vmatpush.bf16.msrb.mxu1 %v12757_v61  ;;  %v12277_v8 = vor.u32 %v13921_v37, %v12274_v22  ;;  %v12597_v61 = vor.u32 %v14001_v19, %v12594_v31  ;;  %v13807_v19 = vld [vmem:[%s22027_s8 + $0x274] sm:$0xf0]  ;;  %v12120_v31 = vld [vmem:[%s22027_s8 + $0x4d0] sm:$0xf] }
 0x453   :  { %8582 = vmatpush.bf16.msrb.mxu2 %v13077_v15  ;;  %8595 = vmatpush.bf16.msrb.mxu3 %v13397_v62  ;;  %v12917_v15 = vor.u32 %v14081_v20, %v12914_v44  ;;  %v13237_v62 = vor.u32 %v14161_v29, %v13234_v28  ;;  %v13887_v20 = vld [vmem:[%s22027_s8 + $0x4f4] sm:$0xf0]  ;;  %v12157_v44 = vor.u32 %v13891_v24, %v12154_v43 }
 0x454   :  { %8538 = vmatmul.bf16.vlgmr.msra.gmra.mxu2 %v19193_v11  ;;  %8551 = vmatmul.bf16.vlgmr.msra.gmra.mxu3 %v19198_v7  ;;  %v12477_v29 = vor.u32 %v13971_v50, %v12474_v9  ;;  %v13967_v28 = vld [vmem:[%s22027_s8 + $0x774] sm:$0xf0]  ;;  %v12000_v9 = vld [vmem:[%s22027_s8 + $0x3e0] sm:$0xf] }
 0x456   :  { %8557 = vmatpush.bf16.msrb.mxu0 %v12397_v34  ;;  %8570 = vmatpush.bf16.msrb.mxu1 %v12717_v39  ;;  %v14151_v34 = vld [vmem:[%s22027_s8 + $0xd3c] sm:$0xf]  ;;  %v13194_v39 = vld [vmem:[%s22027_s8 + $0xd60] sm:$0xf0]  ;;  %v8307_v53 = vpop.f32.mrf.mxu0 }
 0x457   :  { %8583 = vmatpush.bf16.msrb.mxu2 %v13037_v10  ;;  %8596 = vmatpush.bf16.msrb.mxu3 %v13357_v18  ;;  %v8331_v12 = vpop.f32.mrf.mxu2  ;;  %v8344_v4 = vpop.f32.mrf.mxu3  ;;  %v12237_v18 = vor.u32 %v13911_v57, %v12234_v38  ;;  %v13197_v35 = vor.u32 %v14151_v34, %v13194_v39  ;;  %v12400_v34 = vld [vmem:[%s22027_s8 + $0x700] sm:$0xf]  ;;  %v13957_v39 = vld [vmem:[%s22027_s8 + $0x724] sm:$0xf0] }
 0x458   :  { %v8332_v48 = vadd.f32 %v8331_v12, %v8319_v47  ;;  %v8320_v10 = vpop.f32.mrf.mxu1  ;;  %v12440_v47 = vld [vmem:[%s22027_s8 + $0x750] sm:$0xf]  ;;  %v14037_v53 = vld [vmem:[%s22027_s8 + $0x9a4] sm:$0xf0]  ;;  %v12401_v51 = vor.u32 %v13957_v39, %v12400_v34  ;;  %v11920_v39 = vld [vmem:[%s22027_s8 + $0x340] sm:$0xf] }
 0x459   :  { %v12441_v32 = vor.u32 %v13967_v28, %v12440_v47  ;;  %v11761_v10 = vor.u32 %v13797_v49, %v11760_v40  ;;  %v11640_v47 = vld [vmem:[%s22027_s8 + $0x110] sm:$0xf]  ;;  %v21518_v40 = vld [vmem:[%s22030_s11] sm:$0xff]  ;;  %v13757_v34 = vld [vmem:[%s22027_s8 + $0xe4] sm:$0xf0] }
 0x45a   :  { %8558 = vmatpush.bf16.msrb.mxu0 %v12357_v36  ;;  %8571 = vmatpush.bf16.msrb.mxu1 %v12677_v33  ;;  %v21340_v6 = vadd.f32 %v8344_v4, %v8332_v48  ;;  %v13981_v36 = vld [vmem:[%s22027_s8 + $0x7ec] sm:$0xf]  ;;  %v12514_v33 = vld [vmem:[%s22027_s8 + $0x810] sm:$0xf0]  ;;  %v12080_v4 = vld [vmem:[%s22027_s8 + $0x480] sm:$0xf] }
 0x45b   :  { %8584 = vmatpush.bf16.msrb.mxu2 %v12997_v27  ;;  %8597 = vmatpush.bf16.msrb.mxu3 %v13317_v56  ;;  %v14141_v27 = vld [vmem:[%s22027_s8 + $0xcec] sm:$0xf]  ;;  %v13154_v56 = vld [vmem:[%s22027_s8 + $0xd10] sm:$0xf0]  ;;  %v12517_v23 = vor.u32 %v13981_v36, %v12514_v33  ;;  %v12720_v48 = vld [vmem:[%s22027_s8 + $0x980] sm:$0xf] }
 0x45c   :  { %v13157_v45 = vor.u32 %v14141_v27, %v13154_v56  ;;  %v13867_v36 = vld [vmem:[%s22027_s8 + $0x454] sm:$0xf0]  ;;  %v12360_v33 = vld [vmem:[%s22027_s8 + $0x6b0] sm:$0xf]  ;;  %v8860_v49 = vperm.slane %v21518_v40, 4 }
 0x45d   :  { %v14027_v27 = vld [vmem:[%s22027_s8 + $0x954] sm:$0xf0]  ;;  %v12361_v43 = vor.u32 %v13947_v41, %v12360_v33  ;;  %v11960_v28 = vld [vmem:[%s22027_s8 + $0x390] sm:$0xf] }
 0x45e   :  { %8559 = vmatpush.bf16.msrb.mxu0 %v12317_v1  ;;  %8572 = vmatpush.bf16.msrb.mxu1 %v12637_v60  ;;  %v12794_v1 = vld [vmem:[%s22027_s8 + $0xa40] sm:$0xf0]  ;;  %v14131_v60 = vld [vmem:[%s22027_s8 + $0xc9c] sm:$0xf]  ;;  %v12681_v50 = vor.u32 %v14027_v27, %v12680_v42 }
 0x45f   :  { %8585 = vmatpush.bf16.msrb.mxu2 %v12957_v5  ;;  %8598 = vmatpush.bf16.msrb.mxu3 %v13277_v3  ;;  %v8333_v37 = vpop.f32.mrf.mxu2  ;;  %v8346_v22 = vpop.f32.mrf.mxu3  ;;  %v13114_v5 = vld [vmem:[%s22027_s8 + $0xcc0] sm:$0xf0]  ;;  %v11800_v3 = vld [vmem:[%s22027_s8 + $0x250] sm:$0xf]  ;;  %v12797_v57 = vor.u32 %v14051_v59, %v12794_v1  ;;  %v13937_v59 = vld [vmem:[%s22027_s8 + $0x684] sm:$0xf0] }
 0x460   :  { %v13117_v38 = vor.u32 %v14131_v60, %v13114_v5  ;;  %v12640_v1 = vld [vmem:[%s22027_s8 + $0x8e0] sm:$0xf]  ;;  %v14017_v60 = vld [vmem:[%s22027_s8 + $0x904] sm:$0xf0] }
 0x462   :  { %8560 = vmatpush.bf16.msrb.mxu0 %v12277_v8  ;;  %8573 = vmatpush.bf16.msrb.mxu1 %v12597_v61  ;;  %v12760_v8 = vld [vmem:[%s22027_s8 + $0x9d0] sm:$0xf]  ;;  %v14047_v61 = vld [vmem:[%s22027_s8 + $0x9f4] sm:$0xf0] }
 0x463   :  { %8586 = vmatpush.bf16.msrb.mxu2 %v12917_v15  ;;  %8599 = vmatpush.bf16.msrb.mxu3 %v13237_v62  ;;  %v11801_v15 = vor.u32 %v13807_v19, %v11800_v3  ;;  %v12121_v62 = vor.u32 %v13887_v20, %v12120_v31  ;;  %v12761_v12 = vor.u32 %v14047_v61, %v12760_v8  ;;  %v21488_v3 = vld [vmem:[%s22029_s10] sm:$0xff]  ;;  %v13847_v8 = vld [vmem:[%s22027_s8 + $0x3b4] sm:$0xf0]  ;;  %v12280_v61 = vld [vmem:[%s22027_s8 + $0x610] sm:$0xf] }
 0x464   :  { %v8772_v19 = vperm.slane %v21488_v3, 4 }
 0x466   :  { %8561 = vmatpush.bf16.msrb.mxu0 %v12237_v18  ;;  %8574 = vmatpush.bf16.msrb.mxu1 %v12557_v46  ;;  %v12081_v18 = vor.u32 %v13877_v13, %v12080_v4  ;;  %v11720_v46 = vld [vmem:[%s22027_s8 + $0x1b0] sm:$0xf]  ;;  %v11961_v4 = vor.u32 %v13847_v8, %v11960_v28  ;;  %v11600_v13 = vld [vmem:[%s22027_s8 + $0xc0] sm:$0xf] }
 0x467   :  { %8587 = vmatpush.bf16.msrb.mxu2 %v12877_v58  ;;  %8600 = vmatpush.bf16.msrb.mxu3 %v13197_v35  ;;  %v12721_v58 = vor.u32 %v14037_v53, %v12720_v48  ;;  %v12040_v35 = vld [vmem:[%s22027_s8 + $0x430] sm:$0xf]  ;;  %v11721_v56 = vor.u32 %v13787_v25, %v11720_v46  ;;  %v13917_v46 = vld [vmem:[%s22027_s8 + $0x5e4] sm:$0xf0]  ;;  %v12480_v28 = vld [vmem:[%s22027_s8 + $0x7a0] sm:$0xf] }
 0x468   :  { %v12041_v24 = vor.u32 %v13867_v36, %v12040_v35  ;;  %v12560_v35 = vld [vmem:[%s22027_s8 + $0x840] sm:$0xf]  ;;  %v13997_v36 = vld [vmem:[%s22027_s8 + $0x864] sm:$0xf0] }
 0x46a   :  { %8562 = vmatpush.bf16.msrb.mxu0 %v12197_v16  ;;  %8575 = vmatpush.bf16.msrb.mxu1 %v12517_v23  ;;  %v11680_v16 = vld [vmem:[%s22027_s8 + $0x160] sm:$0xf]  ;;  %v13777_v23 = vld [vmem:[%s22027_s8 + $0x184] sm:$0xf0] }
 0x46b   :  { %8588 = vmatpush.bf16.msrb.mxu2 %v12837_v55  ;;  %8601 = vmatpush.bf16.msrb.mxu3 %v13157_v45  ;;  %v13857_v55 = vld [vmem:[%s22027_s8 + $0x404] sm:$0xf0]  ;;  %v12320_v45 = vld [vmem:[%s22027_s8 + $0x660] sm:$0xf]  ;;  %v11681_v31 = vor.u32 %v13777_v23, %v11680_v16  ;;  %v11560_v16 = vld [vmem:[%s22027_s8 + $0x70] sm:$0xf] }
 0x46c   :  { %v12001_v20 = vor.u32 %v13857_v55, %v12000_v9  ;;  %v13747_v23 = vld [vmem:[%s22027_s8 + $0x94] sm:$0xf0]  ;;  %v11880_v9 = vld [vmem:[%s22027_s8 + $0x2f0] sm:$0xf] }
 0x46d   :  { %v13827_v55 = vld [vmem:[%s22027_s8 + $0x314] sm:$0xf0] }
 0x46e   :  { %8563 = vmatpush.bf16.msrb.mxu0 %v12157_v44  ;;  %8576 = vmatpush.bf16.msrb.mxu1 %v12477_v29  ;;  %v8357_v37 = vpop.f32.mrf.mxu0  ;;  %v8370_v22 = vpop.f32.mrf.mxu1  ;;  %v13767_v44 = vld [vmem:[%s22027_s8 + $0x134] sm:$0xf0]  ;;  %v12641_v29 = vor.u32 %v14017_v60, %v12640_v1  ;;  %v12520_v60 = vld [vmem:[%s22027_s8 + $0x7f0] sm:$0xf] }
 0x46f   :  { %8589 = vmatpush.bf16.msrb.mxu2 %v12797_v57  ;;  %8602 = vmatpush.bf16.msrb.mxu3 %v13117_v38  ;;  %v8358_v5 = vadd.f32 %v8357_v37, %v21340_v6  ;;  %v12321_v6 = vor.u32 %v13937_v59, %v12320_v45  ;;  %v13927_v38 = vld [vmem:[%s22027_s8 + $0x634] sm:$0xf0]  ;;  %v12200_v45 = vld [vmem:[%s22027_s8 + $0x570] sm:$0xf] }
 0x470   :  { %v12281_v48 = vor.u32 %v13927_v38, %v12280_v61  ;;  %v13907_v1 = vld [vmem:[%s22027_s8 + $0x594] sm:$0xf0]  ;;  %v13080_v38 = vld [vmem:[%s22027_s8 + $0xc50] sm:$0xf] }
 0x471   :  { %8564 = vmatmul.bf16.vlgmr.msrb.gmra.mxu0 %v19203_v2  ;;  %8577 = vmatmul.bf16.vlgmr.msrb.gmra.mxu1 %v19214_v14  ;;  %v8371_v57 = vadd.f32 %v8370_v22, %v8358_v5  ;;  %v13987_v37 = vld [vmem:[%s22027_s8 + $0x814] sm:$0xf0]  ;;  %v11520_v22 = vld [vmem:[%s22027_s8 + $0x20] sm:$0xf]  ;;  %v11881_v5 = vor.u32 %v13827_v55, %v11880_v9  ;;  %v13320_v9 = vld [vmem:[%s22027_s8 + $0xe30] sm:$0xf] }
 0x472   :  { %8608 = vmatpush.bf16.msra.mxu0 %v11801_v15  ;;  %8621 = vmatpush.bf16.msra.mxu1 %v12121_v62  ;;  %v12600_v15 = vld [vmem:[%s22027_s8 + $0x890] sm:$0xf]  ;;  %v14007_v62 = vld [vmem:[%s22027_s8 + $0x8b4] sm:$0xf0] }
 0x473   :  { %8634 = vmatpush.bf16.msra.mxu2 %v12441_v32  ;;  %8647 = vmatpush.bf16.msra.mxu3 %v12761_v12  ;;  %v8792_v32 = vadd.f32 %v8772_v19, %v8371_v57  ;;  %v11641_v12 = vor.u32 %v13767_v44, %v11640_v47  ;;  %v12601_v53 = vor.u32 %v14007_v62, %v12600_v15  ;;  %v13737_v19 = vld [vmem:[%s22027_s8 + $0x44] sm:$0xf0]  ;;  %v14127_v15 = vld [vmem:[%s22027_s8 + $0xc74] sm:$0xf0]  ;;  %v13400_v62 = vld [vmem:[%s22027_s8 + $0xed0] sm:$0xf] }
 0x474   :  { %8590 = vmatmul.bf16.vlgmr.msrb.gmra.mxu2 %v19411_v26  ;;  %8603 = vmatmul.bf16.vlgmr.msrb.gmra.mxu3 %v19416_v21  ;;  %v12201_v47 = vor.u32 %v13907_v1, %v12200_v45  ;;  %v12521_v44 = vor.u32 %v13987_v37, %v12520_v60  ;;  %v13977_v57 = vld [vmem:[%s22027_s8 + $0x7c4] sm:$0xf0]  ;;  %v14187_v55 = vld [vmem:[%s22027_s8 + $0xe54] sm:$0xf0]  ;;  %v13782_v45 = vld [vmem:[%s22027_s8 + $0x1b4] sm:$0xf] }
 0x475   :  { %v8802_v25 = vmax.f32 %v8792_v32, 0.0  ;;  %v13802_v32 = vld [vmem:[%s22027_s8 + $0x254] sm:$0xf]  ;;  %v11722_v1 = vld [vmem:[%s22027_s8 + $0x1d8] sm:$0xf0] }
 0x476   :  { %8609 = vmatpush.bf16.msra.mxu0 %v11761_v10  ;;  %8622 = vmatpush.bf16.msra.mxu1 %v12081_v18  ;;  %v13837_v10 = vld [vmem:[%s22027_s8 + $0x364] sm:$0xf0]  ;;  %v12240_v18 = vld [vmem:[%s22027_s8 + $0x5c0] sm:$0xf]  ;;  %v8359_v41 = vpop.f32.mrf.mxu0  ;;  %v8372_v42 = vpop.f32.mrf.mxu1  ;;  %v13862_v60 = vld [vmem:[%s22027_s8 + $0x434] sm:$0xf] }
 0x477   :  { %8635 = vmatpush.bf16.msra.mxu2 %v12401_v51  ;;  %8648 = vmatpush.bf16.msra.mxu3 %v12721_v58  ;;  %v8383_v51 = vpop.f32.mrf.mxu2  ;;  %v8396_v58 = vpop.f32.mrf.mxu3  ;;  %v8880_v27 = vmul.f32 %v8860_v49, %v8802_v25  ;;  %v14207_v49 = vld [vmem:[%s22027_s8 + $0xef4] sm:$0xf0]  ;;  %v14117_v25 = vld [vmem:[%s22027_s8 + $0xc24] sm:$0xf0]  ;;  %v11762_v41 = vld [vmem:[%s22027_s8 + $0x228] sm:$0xf0] }
 0x478   :  { %v8384_v33 = vadd.f32 %v8383_v51, %v19098_v17  ;;  %v12241_v17 = vor.u32 %v13917_v46, %v12240_v18  ;;  %v13401_v18 = vor.u32 %v14207_v49, %v13400_v62  ;;  %v13040_v46 = vld [vmem:[%s22027_s8 + $0xc00] sm:$0xf]  ;;  %v13872_v42 = vld [vmem:[%s22027_s8 + $0x484] sm:$0xf]  ;;  %v12042_v37 = vld [vmem:[%s22027_s8 + $0x458] sm:$0xf0] }
 0x479   :  { %v21564_v59 = vadd.f32 %v21207_v30, %v8880_v27  ;;  %v11561_v30 = vor.u32 %v13747_v23, %v11560_v16  ;;  %v12082_v27 = vld [vmem:[%s22027_s8 + $0x4a8] sm:$0xf0]  ;;  %v13000_v16 = vld [vmem:[%s22027_s8 + $0xbb0] sm:$0xf]  ;;  %v14107_v23 = vld [vmem:[%s22027_s8 + $0xbd4] sm:$0xf0] }
 0x47a   :  { %8610 = vmatpush.bf16.msra.mxu0 %v11721_v56  ;;  %8623 = vmatpush.bf16.msra.mxu1 %v12041_v24  ;;  %v11601_v56 = vor.u32 %v13757_v34, %v11600_v13  ;;  %v11921_v24 = vor.u32 %v13837_v10, %v11920_v39  ;;  %v11802_v13 = vld [vmem:[%s22027_s8 + $0x278] sm:$0xf0]  ;;  %v13882_v34 = vld [vmem:[%s22027_s8 + $0x4d4] sm:$0xf]  ;;  %v13081_v10 = vor.u32 %v14127_v15, %v13080_v38  ;;  %v12920_v49 = vld [vmem:[%s22027_s8 + $0xb10] sm:$0xf] }
 0x47b   :  { %8636 = vmatpush.bf16.msra.mxu2 %v12361_v43  ;;  %8649 = vmatpush.bf16.msra.mxu3 %v12681_v50  ;;  %v21552_v43 = vadd.f32 %v8396_v58, %v8384_v33  ;;  %v12561_v50 = vor.u32 %v13997_v36, %v12560_v35  ;;  %v12122_v39 = vld [vmem:[%s22027_s8 + $0x4f8] sm:$0xf0]  ;;  %v11805_v51 = vor.u32 %v13802_v32, %v11802_v13  ;;  %v13360_v35 = vld [vmem:[%s22027_s8 + $0xe80] sm:$0xf]  ;;  %v14197_v36 = vld [vmem:[%s22027_s8 + $0xea4] sm:$0xf0] }
 0x47c   :  { %v12125_v58 = vor.u32 %v13882_v34, %v12122_v39  ;;  %v13792_v33 = vld [vmem:[%s22027_s8 + $0x204] sm:$0xf]  ;;  %v14087_v32 = vld [vmem:[%s22027_s8 + $0xb34] sm:$0xf0]  ;;  %v13240_v13 = vld [vmem:[%s22027_s8 + $0xd90] sm:$0xf] }
 0x47d   :  { %v13762_v34 = vld [vmem:[%s22027_s8 + $0x114] sm:$0xf] }
 0x47e   :  { %8611 = vmatpush.bf16.msra.mxu0 %v11681_v31  ;;  %8624 = vmatpush.bf16.msra.mxu1 %v12001_v20  ;;  %v11840_v31 = vld [vmem:[%s22027_s8 + $0x2a0] sm:$0xf]  ;;  %v13817_v20 = vld [vmem:[%s22027_s8 + $0x2c4] sm:$0xf0] }
 0x47f   :  { %8637 = vmatpush.bf16.msra.mxu2 %v12321_v6  ;;  %8650 = vmatpush.bf16.msra.mxu3 %v12641_v29  ;;  %v12160_v6 = vld [vmem:[%s22027_s8 + $0x520] sm:$0xf]  ;;  %v13897_v29 = vld [vmem:[%s22027_s8 + $0x544] sm:$0xf0]  ;;  %v8385_v8 = vpop.f32.mrf.mxu2  ;;  %v8398_v61 = vpop.f32.mrf.mxu3 }
 0x480   :  { %v12002_v8 = vld [vmem:[%s22027_s8 + $0x408] sm:$0xf0] }
 0x482   :  { %8612 = vmatpush.bf16.msra.mxu0 %v11641_v12  ;;  %8625 = vmatpush.bf16.msra.mxu1 %v11961_v4  ;;  %v11521_v12 = vor.u32 %v13737_v19, %v11520_v22  ;;  %v11841_v4 = vor.u32 %v13817_v20, %v11840_v31  ;;  %v13001_v22 = vor.u32 %v14107_v23, %v13000_v16  ;;  %v14097_v19 = vld [vmem:[%s22027_s8 + $0xb84] sm:$0xf0]  ;;  %v11922_v16 = vld [vmem:[%s22027_s8 + $0x368] sm:$0xf0] }
 0x483   :  { %8638 = vmatpush.bf16.msra.mxu2 %v12281_v48  ;;  %8651 = vmatpush.bf16.msra.mxu3 %v12601_v53  ;;  %v12161_v48 = vor.u32 %v13897_v29, %v12160_v6  ;;  %v12481_v53 = vor.u32 %v13977_v57, %v12480_v28  ;;  %v11725_v31 = vor.u32 %v13782_v45, %v11722_v1  ;;  %v13772_v6 = vld [vmem:[%s22027_s8 + $0x164] sm:$0xf]  ;;  %v11682_v29 = vld [vmem:[%s22027_s8 + $0x188] sm:$0xf0]  ;;  %v12840_v1 = vld [vmem:[%s22027_s8 + $0xa70] sm:$0xf] }
 0x484   :  { %v12045_v20 = vor.u32 %v13862_v60, %v12042_v37  ;;  %v13852_v28 = vld [vmem:[%s22027_s8 + $0x3e4] sm:$0xf]  ;;  %v14067_v60 = vld [vmem:[%s22027_s8 + $0xa94] sm:$0xf0] }
 0x486   :  { %8613 = vmatpush.bf16.msra.mxu0 %v11601_v56  ;;  %8626 = vmatpush.bf16.msra.mxu1 %v11921_v24  ;;  %v13041_v56 = vor.u32 %v14117_v25, %v13040_v46  ;;  %v13361_v24 = vor.u32 %v14197_v36, %v13360_v35  ;;  %v12880_v25 = vld [vmem:[%s22027_s8 + $0xac0] sm:$0xf] }
 0x487   :  { %8639 = vmatpush.bf16.msra.mxu2 %v12241_v17  ;;  %8652 = vmatpush.bf16.msra.mxu3 %v12561_v50  ;;  %v11765_v17 = vor.u32 %v13792_v33, %v11762_v41  ;;  %v12085_v50 = vor.u32 %v13872_v42, %v12082_v27  ;;  %v13200_v36 = vld [vmem:[%s22027_s8 + $0xd40] sm:$0xf]  ;;  %v14157_v33 = vld [vmem:[%s22027_s8 + $0xd64] sm:$0xf0]  ;;  %v13752_v41 = vld [vmem:[%s22027_s8 + $0xc4] sm:$0xf] }
 0x488   :  { %v13201_v45 = vor.u32 %v14157_v33, %v13200_v36  ;;  %v14202_v36 = vld [vmem:[%s22027_s8 + $0xed4] sm:$0xf]  ;;  %v13402_v33 = vld [vmem:[%s22027_s8 + $0xef8] sm:$0xf0] }
 0x48a   :  { %8614 = vmatpush.bf16.msra.mxu0 %v11561_v30  ;;  %8627 = vmatpush.bf16.msra.mxu1 %v11881_v5  ;;  %v13321_v30 = vor.u32 %v14187_v55, %v13320_v9  ;;  %v12960_v5 = vld [vmem:[%s22027_s8 + $0xb60] sm:$0xf] }
 0x48b   :  { %8640 = vmatpush.bf16.msra.mxu2 %v12201_v47  ;;  %8653 = vmatpush.bf16.msra.mxu3 %v12521_v44  ;;  %v13280_v47 = vld [vmem:[%s22027_s8 + $0xde0] sm:$0xf]  ;;  %v14177_v44 = vld [vmem:[%s22027_s8 + $0xe04] sm:$0xf0]  ;;  %v12961_v15 = vor.u32 %v14097_v19, %v12960_v5  ;;  %v13160_v5 = vld [vmem:[%s22027_s8 + $0xcf0] sm:$0xf] }
 0x48c   :  { %v13281_v62 = vor.u32 %v14177_v44, %v13280_v47  ;;  %v14147_v19 = vld [vmem:[%s22027_s8 + $0xd14] sm:$0xf0]  ;;  %v13822_v47 = vld [vmem:[%s22027_s8 + $0x2f4] sm:$0xf]  ;;  %v11882_v44 = vld [vmem:[%s22027_s8 + $0x318] sm:$0xf0] }
 0x48e   :  { %8615 = vmatpush.bf16.msra.mxu0 %v11521_v12  ;;  %8628 = vmatpush.bf16.msra.mxu1 %v11841_v4  ;;  %v8409_v61 = vpop.f32.mrf.mxu0  ;;  %v8422_v57 = vpop.f32.mrf.mxu1  ;;  %v11685_v12 = vor.u32 %v13772_v6, %v11682_v29  ;;  %v12005_v4 = vor.u32 %v13852_v28, %v12002_v8  ;;  %v8861_v29 = vperm.slane %v21518_v40, 5  ;;  %v12800_v28 = vld [vmem:[%s22027_s8 + $0xa20] sm:$0xf]  ;;  %v14057_v8 = vld [vmem:[%s22027_s8 + $0xa44] sm:$0xf0] }
 0x48f   :  { %8641 = vmatpush.bf16.msra.mxu2 %v12161_v48  ;;  %8654 = vmatpush.bf16.msra.mxu3 %v12481_v53  ;;  %v8410_v38 = vadd.f32 %v8409_v61, %v21552_v43  ;;  %v14167_v43 = vld [vmem:[%s22027_s8 + $0xdb4] sm:$0xf0]  ;;  %v11642_v48 = vld [vmem:[%s22027_s8 + $0x138] sm:$0xf0]  ;;  %v13842_v53 = vld [vmem:[%s22027_s8 + $0x394] sm:$0xf]  ;;  %v12841_v61 = vor.u32 %v14067_v60, %v12840_v1 }
 0x490   :  { %v13241_v46 = vor.u32 %v14167_v43, %v13240_v13  ;;  %v13812_v13 = vld [vmem:[%s22027_s8 + $0x2a4] sm:$0xf]  ;;  %v13362_v60 = vld [vmem:[%s22027_s8 + $0xea8] sm:$0xf0] }
 0x491   :  { %8616 = vmatmul.bf16.vlgmr.msra.gmra.mxu0 %v19193_v11  ;;  %8629 = vmatmul.bf16.vlgmr.msra.gmra.mxu1 %v19198_v7  ;;  %v8423_v39 = vadd.f32 %v8422_v57, %v8410_v38  ;;  %v13161_v57 = vor.u32 %v14147_v19, %v13160_v5  ;;  %v13120_v38 = vld [vmem:[%s22027_s8 + $0xca0] sm:$0xf]  ;;  %v14192_v1 = vld [vmem:[%s22027_s8 + $0xe84] sm:$0xf]  ;;  %v12362_v5 = vld [vmem:[%s22027_s8 + $0x6d8] sm:$0xf0] }
 0x492   :  { %8660 = vmatpush.bf16.msrb.mxu0 %v13081_v10  ;;  %8673 = vmatpush.bf16.msrb.mxu1 %v13401_v18  ;;  %v11962_v10 = vld [vmem:[%s22027_s8 + $0x3b8] sm:$0xf0]  ;;  %v12921_v18 = vor.u32 %v14087_v32, %v12920_v49 }
 0x493   :  { %8686 = vmatpush.bf16.msrb.mxu2 %v11805_v51  ;;  %8699 = vmatpush.bf16.msrb.mxu3 %v12125_v58  ;;  %v14077_v51 = vld [vmem:[%s22027_s8 + $0xae4] sm:$0xf0]  ;;  %v11645_v58 = vor.u32 %v13762_v34, %v11642_v48  ;;  %v11965_v35 = vor.u32 %v13842_v53, %v11962_v10  ;;  %v13962_v48 = vld [vmem:[%s22027_s8 + $0x754] sm:$0xf]  ;;  %v12442_v53 = vld [vmem:[%s22027_s8 + $0x778] sm:$0xf0] }
 0x494   :  { %8642 = vmatmul.bf16.vlgmr.msra.gmra.mxu2 %v19203_v2  ;;  %8655 = vmatmul.bf16.vlgmr.msra.gmra.mxu3 %v19214_v14  ;;  %v12881_v55 = vor.u32 %v14077_v51, %v12880_v25  ;;  %v14122_v25 = vld [vmem:[%s22027_s8 + $0xc54] sm:$0xf]  ;;  %v12801_v51 = vor.u32 %v14057_v8, %v12800_v28  ;;  %v13322_v28 = vld [vmem:[%s22027_s8 + $0xe58] sm:$0xf0] }
 0x496   :  { %8661 = vmatpush.bf16.msrb.mxu0 %v13041_v56  ;;  %8674 = vmatpush.bf16.msrb.mxu1 %v13361_v24  ;;  %v11602_v56 = vld [vmem:[%s22027_s8 + $0xe8] sm:$0xf0]  ;;  %v13832_v24 = vld [vmem:[%s22027_s8 + $0x344] sm:$0xf]  ;;  %v8424_v9 = vpop.f32.mrf.mxu1 }
 0x497   :  { %8687 = vmatpush.bf16.msrb.mxu2 %v11765_v17  ;;  %8700 = vmatpush.bf16.msrb.mxu3 %v12085_v50  ;;  %v8435_v42 = vpop.f32.mrf.mxu2  ;;  %v8448_v27 = vpop.f32.mrf.mxu3  ;;  %v8773_v17 = vperm.slane %v21488_v3, 5  ;;  %v12722_v9 = vld [vmem:[%s22027_s8 + $0x9a8] sm:$0xf0] }
 0x498   :  { %v8436_v23 = vadd.f32 %v8435_v42, %v8423_v39  ;;  %v8411_v50 = vpop.f32.mrf.mxu0  ;;  %v11842_v39 = vld [vmem:[%s22027_s8 + $0x2c8] sm:$0xf0] }
 0x499   :  { %v13405_v50 = vor.u32 %v14202_v36, %v13402_v33  ;;  %v14162_v36 = vld [vmem:[%s22027_s8 + $0xd94] sm:$0xf]  ;;  %v13242_v33 = vld [vmem:[%s22027_s8 + $0xdb8] sm:$0xf0] }
 0x49a   :  { %8662 = vmatpush.bf16.msrb.mxu0 %v13001_v22  ;;  %8675 = vmatpush.bf16.msrb.mxu1 %v13321_v30  ;;  %v8449_v37 = vadd.f32 %v8448_v27, %v8436_v23  ;;  %v11605_v22 = vor.u32 %v13752_v41, %v11602_v56  ;;  %v11925_v30 = vor.u32 %v13832_v24, %v11922_v16  ;;  %v13952_v16 = vld [vmem:[%s22027_s8 + $0x704] sm:$0xf]  ;;  %v12402_v23 = vld [vmem:[%s22027_s8 + $0x728] sm:$0xf0] }
 0x49b   :  { %8688 = vmatpush.bf16.msrb.mxu2 %v11725_v31  ;;  %8701 = vmatpush.bf16.msrb.mxu3 %v12045_v20  ;;  %v13742_v31 = vld [vmem:[%s22027_s8 + $0x74] sm:$0xf]  ;;  %v11562_v20 = vld [vmem:[%s22027_s8 + $0x98] sm:$0xf0]  ;;  %v11845_v27 = vor.u32 %v13812_v13, %v11842_v39  ;;  %v12445_v56 = vor.u32 %v13962_v48, %v12442_v53 }
 0x49c   :  { %v8793_v6 = vadd.f32 %v8773_v17, %v8449_v37  ;;  %v11565_v32 = vor.u32 %v13742_v31, %v11562_v20  ;;  %v12405_v37 = vor.u32 %v13952_v16, %v12402_v23  ;;  %v13365_v31 = vor.u32 %v14192_v1, %v13362_v60  ;;  %v14022_v20 = vld [vmem:[%s22027_s8 + $0x934] sm:$0xf]  ;;  %v14152_v1 = vld [vmem:[%s22027_s8 + $0xd44] sm:$0xf]  ;;  %v13202_v60 = vld [vmem:[%s22027_s8 + $0xd68] sm:$0xf0] }
 0x49d   :  { %v13922_v53 = vld [vmem:[%s22027_s8 + $0x614] sm:$0xf]  ;;  %v13245_v23 = vor.u32 %v14162_v36, %v13242_v33 }
 0x49e   :  { %8663 = vmatpush.bf16.msrb.mxu0 %v12961_v15  ;;  %8676 = vmatpush.bf16.msrb.mxu1 %v13281_v62  ;;  %v14137_v15 = vld [vmem:[%s22027_s8 + $0xcc4] sm:$0xf0]  ;;  %v13732_v62 = vld [vmem:[%s22027_s8 + $0x24] sm:$0xf]  ;;  %v8803_v49 = vmax.f32 %v8793_v6, 0.0 }
 0x49f   :  { %8689 = vmatpush.bf16.msrb.mxu2 %v11685_v12  ;;  %8702 = vmatpush.bf16.msrb.mxu3 %v12005_v4  ;;  %v11885_v12 = vor.u32 %v13822_v47, %v11882_v44  ;;  %v11522_v4 = vld [vmem:[%s22027_s8 + $0x48] sm:$0xf0]  ;;  %v8437_v43 = vpop.f32.mrf.mxu2  ;;  %v8450_v34 = vpop.f32.mrf.mxu3  ;;  %v12682_v47 = vld [vmem:[%s22027_s8 + $0x958] sm:$0xf0]  ;;  %v14102_v44 = vld [vmem:[%s22027_s8 + $0xbb4] sm:$0xf] }
 0x4a0   :  { %v8881_v10 = vmul.f32 %v8861_v29, %v8803_v49  ;;  %v11525_v42 = vor.u32 %v13732_v62, %v11522_v4  ;;  %v13002_v6 = vld [vmem:[%s22027_s8 + $0xbd8] sm:$0xf0]  ;;  %v14182_v29 = vld [vmem:[%s22027_s8 + $0xe34] sm:$0xf]  ;;  %v14092_v49 = vld [vmem:[%s22027_s8 + $0xb64] sm:$0xf] }
 0x4a1   :  { %v13325_v62 = vor.u32 %v14182_v29, %v13322_v28  ;;  %v13282_v4 = vld [vmem:[%s22027_s8 + $0xe08] sm:$0xf0]  ;;  %v13982_v29 = vld [vmem:[%s22027_s8 + $0x7f4] sm:$0xf]  ;;  %v12522_v28 = vld [vmem:[%s22027_s8 + $0x818] sm:$0xf0] }
 0x4a2   :  { %8664 = vmatpush.bf16.msrb.mxu0 %v12921_v18  ;;  %8677 = vmatpush.bf16.msrb.mxu1 %v13241_v46  ;;  %v14042_v18 = vld [vmem:[%s22027_s8 + $0x9d4] sm:$0xf]  ;;  %v12762_v46 = vld [vmem:[%s22027_s8 + $0x9f8] sm:$0xf0]  ;;  %v21823_v41 = vadd.f32 %v21564_v59, %v8881_v10  ;;  %v14032_v59 = vld [vmem:[%s22027_s8 + $0x984] sm:$0xf] }
 0x4a3   :  { %8690 = vmatpush.bf16.msrb.mxu2 %v11645_v58  ;;  %8703 = vmatpush.bf16.msrb.mxu3 %v11965_v35  ;;  %v13121_v58 = vor.u32 %v14137_v15, %v13120_v38  ;;  %v13082_v35 = vld [vmem:[%s22027_s8 + $0xc78] sm:$0xf0]  ;;  %v12765_v24 = vor.u32 %v14042_v18, %v12762_v46  ;;  %v12322_v38 = vld [vmem:[%s22027_s8 + $0x688] sm:$0xf0]  ;;  %v13005_v15 = vor.u32 %v14102_v44, %v13002_v6 }
 0x4a4   :  { %v13085_v17 = vor.u32 %v14122_v25, %v13082_v35  ;;  %v12282_v10 = vld [vmem:[%s22027_s8 + $0x638] sm:$0xf0]  ;;  %v14002_v25 = vld [vmem:[%s22027_s8 + $0x894] sm:$0xf]  ;;  %v13205_v6 = vor.u32 %v14152_v1, %v13202_v60 }
 0x4a5   :  { %v12922_v35 = vld [vmem:[%s22027_s8 + $0xb38] sm:$0xf0] }
 0x4a6   :  { %8665 = vmatpush.bf16.msrb.mxu0 %v12881_v55  ;;  %8678 = vmatpush.bf16.msrb.mxu1 %v13201_v45  ;;  %v14112_v55 = vld [vmem:[%s22027_s8 + $0xc04] sm:$0xf]  ;;  %v13042_v45 = vld [vmem:[%s22027_s8 + $0xc28] sm:$0xf0] }
 0x4a7   :  { %8691 = vmatpush.bf16.msrb.mxu2 %v11605_v22  ;;  %8704 = vmatpush.bf16.msrb.mxu3 %v11925_v30  ;;  %v12725_v22 = vor.u32 %v14032_v59, %v12722_v9  ;;  %v13942_v30 = vld [vmem:[%s22027_s8 + $0x6b4] sm:$0xf]  ;;  %v13045_v19 = vor.u32 %v14112_v55, %v13042_v45  ;;  %v14072_v59 = vld [vmem:[%s22027_s8 + $0xac4] sm:$0xf]  ;;  %v12882_v45 = vld [vmem:[%s22027_s8 + $0xae8] sm:$0xf0] }
 0x4a8   :  { %v12365_v8 = vor.u32 %v13942_v30, %v12362_v5  ;;  %v12885_v44 = vor.u32 %v14072_v59, %v12882_v45 }
 0x4aa   :  { %8666 = vmatpush.bf16.msrb.mxu0 %v12841_v61  ;;  %8679 = vmatpush.bf16.msrb.mxu1 %v13161_v57  ;;  %v12685_v61 = vor.u32 %v14022_v20, %v12682_v47  ;;  %v13932_v57 = vld [vmem:[%s22027_s8 + $0x664] sm:$0xf]  ;;  %v12202_v20 = vld [vmem:[%s22027_s8 + $0x598] sm:$0xf0] }
 0x4ab   :  { %8692 = vmatpush.bf16.msrb.mxu2 %v11565_v32  ;;  %8705 = vmatpush.bf16.msrb.mxu3 %v11885_v12  ;;  %v12962_v32 = vld [vmem:[%s22027_s8 + $0xb88] sm:$0xf0]  ;;  %v14172_v12 = vld [vmem:[%s22027_s8 + $0xde4] sm:$0xf]  ;;  %v12325_v39 = vor.u32 %v13932_v57, %v12322_v38  ;;  %v14142_v57 = vld [vmem:[%s22027_s8 + $0xcf4] sm:$0xf] }
 0x4ac   :  { %v12965_v18 = vor.u32 %v14092_v49, %v12962_v32  ;;  %v13285_v46 = vor.u32 %v14172_v12, %v13282_v4  ;;  %v13162_v38 = vld [vmem:[%s22027_s8 + $0xd18] sm:$0xf0]  ;;  %v13972_v12 = vld [vmem:[%s22027_s8 + $0x7a4] sm:$0xf]  ;;  %v12482_v4 = vld [vmem:[%s22027_s8 + $0x7c8] sm:$0xf0] }
 0x4ad   :  { %v13165_v32 = vor.u32 %v14142_v57, %v13162_v38 }
 0x4ae   :  { %8667 = vmatpush.bf16.msrb.mxu0 %v12801_v51  ;;  %8680 = vmatpush.bf16.msrb.mxu1 %v13121_v58  ;;  %v8461_v13 = vpop.f32.mrf.mxu0  ;;  %v8474_v43 = vpop.f32.mrf.mxu1  ;;  %v14082_v51 = vld [vmem:[%s22027_s8 + $0xb14] sm:$0xf] }
 0x4af   :  { %8693 = vmatpush.bf16.msrb.mxu2 %v11525_v42  ;;  %8706 = vmatpush.bf16.msrb.mxu3 %v11845_v27  ;;  %v8462_v34 = vadd.f32 %v8461_v13, %v19316_v54  ;;  %v12602_v54 = vld [vmem:[%s22027_s8 + $0x8b8] sm:$0xf0]  ;;  %v12285_v42 = vor.u32 %v13922_v53, %v12282_v10  ;;  %v12925_v16 = vor.u32 %v14082_v51, %v12922_v35  ;;  %v14052_v13 = vld [vmem:[%s22027_s8 + $0xa24] sm:$0xf]  ;;  %v13122_v53 = vld [vmem:[%s22027_s8 + $0xcc8] sm:$0xf0] }
 0x4b0   :  { %v12605_v27 = vor.u32 %v14002_v25, %v12602_v54  ;;  %v8774_v35 = vperm.slane %v21488_v3, 6 }
 0x4b1   :  { %8668 = vmatmul.bf16.vlgmr.msrb.gmra.mxu0 %v19411_v26  ;;  %8681 = vmatmul.bf16.vlgmr.msrb.gmra.mxu1 %v19416_v21  ;;  %v8475_v58 = vadd.f32 %v8474_v43, %v8462_v34 }
 0x4b2   :  { %8712 = vmatpush.bf16.msra.mxu0 %v12445_v56  ;;  %8725 = vmatpush.bf16.msra.mxu1 %v12765_v24  ;;  %v13912_v56 = vld [vmem:[%s22027_s8 + $0x5c4] sm:$0xf]  ;;  %v12242_v24 = vld [vmem:[%s22027_s8 + $0x5e8] sm:$0xf0] }
 0x4b3   :  { %8738 = vmatpush.bf16.msra.mxu2 %v13085_v17  ;;  %8751 = vmatpush.bf16.msra.mxu3 %v13405_v50  ;;  %v13992_v17 = vld [vmem:[%s22027_s8 + $0x844] sm:$0xf]  ;;  %v12562_v50 = vld [vmem:[%s22027_s8 + $0x868] sm:$0xf0]  ;;  %v12245_v5 = vor.u32 %v13912_v56, %v12242_v24 }
 0x4b4   :  { %8694 = vmatmul.bf16.vlgmr.msrb.gmra.mxu2 %v19193_v11  ;;  %8707 = vmatmul.bf16.vlgmr.msrb.gmra.mxu3 %v19198_v7  ;;  %v14012_v11 = vld [vmem:[%s22027_s8 + $0x8e4] sm:$0xf]  ;;  %v12642_v7 = vld [vmem:[%s22027_s8 + $0x908] sm:$0xf0] }
 0x4b5   :  { %v12645_v48 = vor.u32 %v14012_v11, %v12642_v7  ;;  %v13892_v11 = vld [vmem:[%s22027_s8 + $0x524] sm:$0xf]  ;;  %v12162_v7 = vld [vmem:[%s22027_s8 + $0x548] sm:$0xf0] }
 0x4b6   :  { %8713 = vmatpush.bf16.msra.mxu0 %v12405_v37  ;;  %8726 = vmatpush.bf16.msra.mxu1 %v12725_v22  ;;  %v8463_v22 = vpop.f32.mrf.mxu0  ;;  %v8476_v30 = vpop.f32.mrf.mxu1  ;;  %v12165_v10 = vor.u32 %v13892_v11, %v12162_v7 }
 0x4b7   :  { %8739 = vmatpush.bf16.msra.mxu2 %v13045_v19  ;;  %8752 = vmatpush.bf16.msra.mxu3 %v13365_v31  ;;  %v8487_v9 = vpop.f32.mrf.mxu2  ;;  %v8500_v55 = vpop.f32.mrf.mxu3  ;;  %v12565_v19 = vor.u32 %v13992_v17, %v12562_v50  ;;  %v13902_v31 = vld [vmem:[%s22027_s8 + $0x574] sm:$0xf]  ;;  %v8775_v22 = vperm.slane %v21488_v3, 7 }
 0x4b8   :  { %v8488_v37 = vadd.f32 %v8487_v9, %v8475_v58 }
 0x4ba   :  { %8714 = vmatpush.bf16.msra.mxu0 %v12365_v8  ;;  %8727 = vmatpush.bf16.msra.mxu1 %v12685_v61  ;;  %v8501_v47 = vadd.f32 %v8500_v55, %v8488_v37  ;;  %v14062_v8 = vld [vmem:[%s22027_s8 + $0xa74] sm:$0xf]  ;;  %v12842_v61 = vld [vmem:[%s22027_s8 + $0xa98] sm:$0xf0] }
 0x4bb   :  { %8740 = vmatpush.bf16.msra.mxu2 %v13005_v15  ;;  %8753 = vmatpush.bf16.msra.mxu3 %v13325_v62  ;;  %v12205_v15 = vor.u32 %v13902_v31, %v12202_v20  ;;  %v12525_v62 = vor.u32 %v13982_v29, %v12522_v28  ;;  %v12845_v49 = vor.u32 %v14062_v8, %v12842_v61  ;;  %v8863_v31 = vperm.slane %v21518_v40, 7 }
 0x4be   :  { %8715 = vmatpush.bf16.msra.mxu0 %v12325_v39  ;;  %8728 = vmatpush.bf16.msra.mxu1 %v12645_v48  ;;  %v12802_v39 = vld [vmem:[%s22027_s8 + $0xa48] sm:$0xf0]  ;;  %v14132_v48 = vld [vmem:[%s22027_s8 + $0xca4] sm:$0xf] }
 0x4bf   :  { %8741 = vmatpush.bf16.msra.mxu2 %v12965_v18  ;;  %8754 = vmatpush.bf16.msra.mxu3 %v13285_v46  ;;  %v8489_v43 = vpop.f32.mrf.mxu2  ;;  %v8502_v34 = vpop.f32.mrf.mxu3  ;;  %v12485_v18 = vor.u32 %v13972_v12, %v12482_v4  ;;  %v12805_v46 = vor.u32 %v14052_v13, %v12802_v39  ;;  %v13125_v25 = vor.u32 %v14132_v48, %v13122_v53 }
 0x4c0   :  { %v8853_v43 = vld [vmem:[%s22030_s11 + $0x8] sm:$0x3]  ;;  %s13406_s11 = sld [smem:[#allocation2 + $0x1]] }
 0x4c1   :  { %v8864_v48 = vperm.slane %v8853_v43, 0 }
 0x4c2   :  { %8716 = vmatpush.bf16.msra.mxu0 %v12285_v42  ;;  %8729 = vmatpush.bf16.msra.mxu1 %v12605_v27  ;;  %v8862_v42 = vperm.slane %v21518_v40, 6  ;;  %v8765_v40 = vld [vmem:[%s22029_s10 + $0x8] sm:$0x3]  ;;  %s8827_s10 = sld [smem:[#allocation2]] }
 0x4c3   :  { %8742 = vmatpush.bf16.msra.mxu2 %v12925_v16  ;;  %8755 = vmatpush.bf16.msra.mxu3 %v13245_v23  ;;  %v8776_v13 = vperm.slane %v8765_v40, 0 }
 0x4c6   :  { %8717 = vmatpush.bf16.msra.mxu0 %v12245_v5  ;;  %8730 = vmatpush.bf16.msra.mxu1 %v12565_v19 }
 0x4c7   :  { %8743 = vmatpush.bf16.msra.mxu2 %v12885_v44  ;;  %8756 = vmatpush.bf16.msra.mxu3 %v13205_v6 }
 0x4ca   :  { %8718 = vmatpush.bf16.msra.mxu0 %v12205_v15  ;;  %8731 = vmatpush.bf16.msra.mxu1 %v12525_v62 }
 0x4cb   :  { %8744 = vmatpush.bf16.msra.mxu2 %v12845_v49  ;;  %8757 = vmatpush.bf16.msra.mxu3 %v13165_v32 }
 0x4ce   :  { %8719 = vmatpush.bf16.msra.mxu0 %v12165_v10  ;;  %8732 = vmatpush.bf16.msra.mxu1 %v12485_v18  ;;  %v8513_v54 = vpop.f32.mrf.mxu0  ;;  %v8526_v51 = vpop.f32.mrf.mxu1 }
 0x4cf   :  { %8745 = vmatpush.bf16.msra.mxu2 %v12805_v46  ;;  %8758 = vmatpush.bf16.msra.mxu3 %v13125_v25  ;;  %v8514_v58 = vadd.f32 %v8513_v54, %v8501_v47 }
 0x4d1   :  { %8720 = vmatmul.bf16.vlgmr.msra.gmra.mxu0 %v19203_v2  ;;  %8733 = vmatmul.bf16.vlgmr.msra.gmra.mxu1 %v19214_v14  ;;  %v8527_v36 = vadd.f32 %v8526_v51, %v8514_v58 }
 0x4d2   :  { %8746 = vmatmul.bf16.vlgmr.msra.gmra.mxu2 %v19411_v26  ;;  %8759 = vmatmul.bf16.vlgmr.msra.gmra.mxu3 %v19416_v21 }
 0x4d3   :  { %v8794_v33 = vadd.f32 %v8774_v35, %v8527_v36 }
 0x4d5   :  { %v8804_v27 = vmax.f32 %v8794_v33, 0.0 }
 0x4d6   :  { %v8515_v16 = vpop.f32.mrf.mxu0  ;;  %v8528_v14 = vpop.f32.mrf.mxu1 }
 0x4d7   :  { %v8539_v56 = vpop.f32.mrf.mxu2  ;;  %v8552_v24 = vpop.f32.mrf.mxu3  ;;  %v8882_v23 = vmul.f32 %v8862_v42, %v8804_v27  ;;  %v8777_v14 = vperm.slane %v8765_v40, 1 }
 0x4d8   :  { %v8540_v2 = vadd.f32 %v8539_v56, %v19524_v52 }
 0x4d9   :  { %v8891_v21 = vadd.f32 %v21823_v41, %v8882_v23 }
 0x4da   :  { %v8553_v26 = vadd.f32 %v8552_v24, %v8540_v2 }
 0x4df   :  { %v8541_v17 = vpop.f32.mrf.mxu2  ;;  %v8554_v50 = vpop.f32.mrf.mxu3 }
 0x4e0   :  { %v8865_v50 = vperm.slane %v8853_v43, 1 }
 0x4ee   :  { %v8565_v59 = vpop.f32.mrf.mxu0  ;;  %v8578_v9 = vpop.f32.mrf.mxu1 }
 0x4ef   :  { %v8566_v55 = vadd.f32 %v8565_v59, %v8553_v26 }
 0x4f1   :  { %v8579_v45 = vadd.f32 %v8578_v9, %v8566_v55 }
 0x4f6   :  { %v8567_v30 = vpop.f32.mrf.mxu0  ;;  %v8580_v5 = vpop.f32.mrf.mxu1 }
 0x4f7   :  { %v8591_v1 = vpop.f32.mrf.mxu2  ;;  %v8604_v60 = vpop.f32.mrf.mxu3  ;;  %v8850_v30 = vstv %s13406_s11 }
 0x4f8   :  { %v8592_v37 = vadd.f32 %v8591_v1, %v8579_v45 }
 0x4fa   :  { %v8605_v52 = vadd.f32 %v8604_v60, %v8592_v37  ;;  %v8900_v60 = vlaneseq  ;;  %v8828_v37 = vstv %s8827_s10 }
 0x4fc   :  { %v8795_v19 = vadd.f32 %v8775_v22, %v8605_v52  ;;  %v8901_v22 = vand.u32 127, %v8900_v60 }
 0x4fe   :  { %v8805_v20 = vmax.f32 %v8795_v19, 0.0  ;;  %vm8902_vm6 = vcmp.eq.s32.totalorder %v8901_v22, 0  ;;  %vm8904_vm7 = vcmp.eq.s32.totalorder %v8901_v22, 1  ;;  %vm8906_vm8 = vcmp.eq.s32.totalorder %v8901_v22, 2 }
 0x4ff   :  { %v8593_v47 = vpop.f32.mrf.mxu2  ;;  %v8606_v41 = vpop.f32.mrf.mxu3 }
 0x500   :  { %v8883_v44 = vmul.f32 %v8863_v31, %v8805_v20  ;;  %v8898_v31 = vstv %s13407_s9 }
 0x502   :  { %v8892_v6 = vadd.f32 %v8891_v21, %v8883_v44 }
 0x50e   :  { %v8617_v29 = vpop.f32.mrf.mxu0  ;;  %v8630_v28 = vpop.f32.mrf.mxu1 }
 0x50f   :  { %v8618_v3 = vadd.f32 %v8617_v29, %v19722_v63 }
 0x511   :  { %v8631_v11 = vadd.f32 %v8630_v28, %v8618_v3 }
 0x516   :  { %v8619_v57 = vpop.f32.mrf.mxu0  ;;  %v8632_v38 = vpop.f32.mrf.mxu1 }
 0x517   :  { %v8643_v8 = vpop.f32.mrf.mxu2  ;;  %v8656_v61 = vpop.f32.mrf.mxu3 }
 0x518   :  { %v8644_v7 = vadd.f32 %v8643_v8, %v8631_v11 }
 0x51a   :  { %v8657_v49 = vadd.f32 %v8656_v61, %v8644_v7 }
 0x51f   :  { %v8645_v15 = vpop.f32.mrf.mxu2  ;;  %v8658_v62 = vpop.f32.mrf.mxu3 }
 0x52e   :  { %v8669_v32 = vpop.f32.mrf.mxu0  ;;  %v8682_v12 = vpop.f32.mrf.mxu1 }
 0x52f   :  { %v8670_v4 = vadd.f32 %v8669_v32, %v8657_v49 }
 0x531   :  { %v8683_v34 = vadd.f32 %v8682_v12, %v8670_v4 }
 0x533   :  { %v8796_v39 = vadd.f32 %v8776_v13, %v8683_v34 }
 0x535   :  { %v8806_v53 = vmax.f32 %v8796_v39, 0.0 }
 0x536   :  { %v8671_v18 = vpop.f32.mrf.mxu0  ;;  %v8684_v46 = vpop.f32.mrf.mxu1 }
 0x537   :  { %v8695_v63 = vpop.f32.mrf.mxu2  ;;  %v8708_v10 = vpop.f32.mrf.mxu3  ;;  %v8884_v25 = vmul.f32 %v8864_v48, %v8806_v53 }
 0x538   :  { %v8696_v35 = vadd.f32 %v8695_v63, %v19920_v0  ;;  %v8826_v0 = vpop.xlane.xlu1 %8825 }
 0x539   :  { %v8893_v54 = vadd.f32 %v8892_v6, %v8884_v25  ;;  %v8829_v52 = vadd.f32 %v8828_v37, %v8826_v0 }
 0x53a   :  { %v8709_v36 = vadd.f32 %v8708_v10, %v8696_v35 }
 0x53b   :  { %v8903_v47 = vsel %vm8902_vm6, %v8829_v52, 0.0 }
 0x53f   :  { %v8697_v51 = vpop.f32.mrf.mxu2  ;;  %v8710_v58 = vpop.f32.mrf.mxu3 }
 0x540   :  { %v8848_v5 = vpop.xlane.xlu1 %8847 }
 0x541   :  { %v8851_v19 = vadd.f32 %v8850_v30, %v8848_v5 }
 0x543   :  { %v8905_v44 = vsel %vm8904_vm7, %v8851_v19, %v8903_v47 }
 0x54e   :  { %v8721_v33 = vpop.f32.mrf.mxu0  ;;  %v8734_v42 = vpop.f32.mrf.mxu1 }
 0x54f   :  { %v8722_v27 = vadd.f32 %v8721_v33, %v8709_v36 }
 0x551   :  { %v8735_v56 = vadd.f32 %v8734_v42, %v8722_v27 }
 0x555   :  { %v8747_v24 = vpop.f32.mrf.mxu2  ;;  %v8760_v2 = vpop.f32.mrf.mxu3 }
 0x556   :  { %v8748_v16 = vadd.f32 %v8747_v24, %v8735_v56  ;;  %v8723_v23 = vpop.f32.mrf.mxu0  ;;  %v8736_v26 = vpop.f32.mrf.mxu1 }
 0x558   :  { %v8761_v21 = vadd.f32 %v8760_v2, %v8748_v16 }
 0x55a   :  { %v8797_v17 = vadd.f32 %v8777_v14, %v8761_v21 }
 0x55c   :  { %v8807_v59 = vmax.f32 %v8797_v17, 0.0 }
 0x55d   :  { %v8749_v9 = vpop.f32.mrf.mxu2  ;;  %v8762_v55 = vpop.f32.mrf.mxu3 }
 0x55e   :  { %v8885_v45 = vmul.f32 %v8865_v50, %v8807_v59 }
 0x560   :  { %v8894_v1 = vadd.f32 %v8893_v54, %v8885_v45 }
 0x562   :  { %8895 = vadd.xlane.f32.xlu2 %v8894_v1 }
 0x5d5   :  { %v8896_v20 = vpop.xlane.xlu2 %8895 }
 0x5d6   :  { %v8899_v41 = vadd.f32 %v8898_v31, %v8896_v20 }
 0x5d8   :  { %v8907_v6 = vsel %vm8906_vm8, %v8899_v41, %v8905_v44 }
 0x5d9   :  { %8908 = vst [vmem:[%s22035_s16] sm:$0xff] %v8907_v6 }
 0x5da   :  { %8925 = vsyncpa [#allocation3], 1 }

</bundles_post_ra>
